<compile_context>
chip_gen: v6e
topology: v6e:2x2x1
jax: 0.10.0
libtpu: 0.0.40
codegen_flags: <defaults>
</compile_context>

<pallas_src>
import math

import jax
import jax.numpy as jnp
import numpy as np
from jax import lax
from jax.experimental import pallas as pl
from jax.experimental.pallas import tpu as pltpu

VMEM_LIMIT = 32 * 1024 * 1024  # explicit scoped-VMEM budget (fits v5e/v6e/v7x)


# --------------------------- small helpers ---------------------------------

def _pick_tile(total, candidates):
    for c in candidates:
        if total % c == 0:
            return c
    return total


def _ksilu(v):
    # SiLU; sigmoid via exp (EUP) + divide.  (pl.reciprocal(approx=True) is the
    # EUP-only variant if the small accuracy loss is acceptable.)
    return v * (1.0 / (1.0 + jnp.exp(-v)))


def _ksoftplus(v):
    # overflow-safe softplus: max(v, 0) + log(1 + exp(-|v|))
    return jnp.maximum(v, 0.0) + jnp.log(1.0 + jnp.exp(-jnp.abs(v)))


# --------------------------- Pallas kernels --------------------------------

def _norm_inproj_kernel(xp_ref, g_ref, w9_ref, xz_ref, xn_s):
    # xp_ref : (1, 1, H+2, W+2, C) raw input, channels-last, 1-ring zero halo on H/W
    # g_ref  : (1, C) RMSNorm weight;  w9_ref: (9, C, 2E) conv taps as matmul weights
    # xz_ref : (1, 1, HW, 2E) output;  xn_s  : (H+2, W+2, C) VMEM scratch
    Hp, Wp, C = xn_s.shape
    H, W = Hp - 2, Wp - 2
    E2 = xz_ref.shape[-1]
    xp = xp_ref[0, 0]                                        # (Hp, Wp, C)
    # RMSNorm over W (halo columns are zero, so sum over padded W == sum over W).
    ssq = jnp.sum(xp * xp, axis=1, keepdims=True)            # (Hp, 1, C)
    xn_s[...] = xp * lax.rsqrt(ssq * (1.0 / W) + 1e-5) * g_ref[0][None, None, :]
    # 3x3 conv == 9 shifted matmuls accumulated in f32 (im2col never hits HBM).
    acc = jnp.zeros((H * W, E2), jnp.float32)
    for t in range(9):
        dh, dw = divmod(t, 3)
        slab = xn_s[dh:dh + H, dw:dw + W, :].reshape(H * W, C)
        acc = acc + jnp.dot(slab, w9_ref[t], preferred_element_type=jnp.float32)
    xz_ref[0, 0] = acc


def _dwconv_xproj_kernel(xc_ref, wdw_ref, bdw_ref, wf_ref, bf_ref, xs_ref, dbc_ref):
    # xc_ref : (1, L, HWc, E);  wdw_ref: (K, E);  bdw_ref: (1, E)
    # wf_ref : (E, DW) fused [dt_proj(xp) | B | C | 0-pad];  bf_ref: (1, DW)
    # xs_ref : (1, L, HWc, E) SiLU(conv) output;  dbc_ref: (1, L, HWc, DW)
    _, L, HWc, E = xc_ref.shape
    K = wdw_ref.shape[0]
    DW = wf_ref.shape[1]
    xc = xc_ref[0]                                           # (L, HWc, E)
    # causal left-pad over L, built in-kernel (no extra HBM round trip)
    xpad = jnp.concatenate(
        [jnp.zeros((K - 1, HWc, E), jnp.float32), xc], axis=0)
    acc = jnp.zeros((L, HWc, E), jnp.float32) + bdw_ref[0][None, None, :]
    for k in range(K):
        acc = acc + wdw_ref[k][None, None, :] * xpad[k:k + L]
    xs = _ksilu(acc)
    xs_ref[0] = xs
    dbc = jnp.dot(xs.reshape(L * HWc, E), wf_ref[...],
                  preferred_element_type=jnp.float32) + bf_ref[...]
    dbc_ref[0] = dbc.reshape(L, HWc, DW)


def _ssm_scan_kernel(dbc_ref, xs_ref, at_ref, d_ref, y_ref, da_s, hx_s):
    # Selective scan: h_t = exp(delta_t*A) * h_{t-1} + delta_t*B_t*x_t,
    #                 y_t = sum_s h_t[..., s]*C_t[..., s] + D*x_t
    # TODO(synk): the original `selective_scan` calls an undefined `pscan` and its
    # `hs @ C` / `D * x` broadcasts are shape-inconsistent as written; this kernel keeps
    # the intended Mamba semantics (selective_scan_seq recurrence, no msconv kernel),
    # with the pure-JAX reference below as the contract.
    # dbc_ref : (1, L, HWc, DW) packed [delta_pre | B | C | pad]
    # xs_ref  : (1, L, HWc, E);  at_ref: (S, E) = -exp(A_log).T;  d_ref: (1, E)
    # y_ref   : (1, L, HWc, E);  da_s / hx_s: (L, HWc, S, E) VMEM scratch
    L, HWc, S, E = da_s.shape
    dbc = dbc_ref[0]                                         # (L, HWc, DW)
    delta = _ksoftplus(dbc[..., :E])                         # (L, HWc, E)
    Bm = dbc[..., E:E + S]                                   # (L, HWc, S)
    Cm = dbc[..., E + S:E + 2 * S]                           # (L, HWc, S)
    x = xs_ref[0]                                            # (L, HWc, E)
    # Hoist all EUP / broadcast work out of the serial recurrence.
    da_s[...] = jnp.exp(delta[:, :, None, :] * at_ref[...][None, None, :, :])
    hx_s[...] = (delta * x)[:, :, None, :] * Bm[..., None]   # holds bx, then hs

    def step(l, h):
        h = da_s[l] * h + hx_s[l]
        hx_s[l] = h                                          # store h_t in place
        return h

    lax.fori_loop(0, L, step, jnp.zeros((HWc, S, E), jnp.float32))
    y = jnp.sum(hx_s[...] * Cm[..., None], axis=2) + d_ref[0][None, None, :] * x
    y_ref[0] = y


def _gate_out_kernel(y_ref, z_ref, w_ref, r_ref, o_ref):
    # output = (y * silu(z)) @ W_out + residual   (residual aliased with output)
    g = y_ref[...] * _ksilu(z_ref[...])
    o_ref[...] = jnp.dot(g, w_ref[...],
                         preferred_element_type=jnp.float32) + r_ref[...]


# ------------------------------ wrappers ------------------------------------

def norm_inproj(x_pad, g, w9):
    N, L, Hp, Wp, C = x_pad.shape
    H, W = Hp - 2, Wp - 2
    HW = H * W
    E2 = w9.shape[-1]
    return pl.pallas_call(
        _norm_inproj_kernel,
        out_shape=jax.ShapeDtypeStruct((N, L, HW, E2), jnp.float32),
        grid=(N, L),
        in_specs=[
            pl.BlockSpec((1, 1, Hp, Wp, C), lambda n, l: (n, l, 0, 0, 0)),
            pl.BlockSpec((1, C), lambda n, l: (0, 0)),
            pl.BlockSpec((9, C, E2), lambda n, l: (0, 0, 0)),
        ],
        out_specs=pl.BlockSpec((1, 1, HW, E2), lambda n, l: (n, l, 0, 0)),
        scratch_shapes=[pltpu.VMEM((Hp, Wp, C), jnp.float32)],
        compiler_params=pltpu.CompilerParams(
            dimension_semantics=("parallel", "parallel"),
            vmem_limit_bytes=VMEM_LIMIT),
    )(x_pad, g, w9)


def dwconv_xproj(xc, w_dw, b_dw, w_f, b_f):
    N, L, HW, E = xc.shape
    K = w_dw.shape[0]
    DW = w_f.shape[1]
    hwc = _pick_tile(HW, (32, 16, 8))
    return pl.pallas_call(
        _dwconv_xproj_kernel,
        out_shape=(jax.ShapeDtypeStruct((N, L, HW, E), jnp.float32),
                   jax.ShapeDtypeStruct((N, L, HW, DW), jnp.float32)),
        grid=(N, HW // hwc),
        in_specs=[
            pl.BlockSpec((1, L, hwc, E), lambda n, j: (n, 0, j, 0)),
            pl.BlockSpec((K, E), lambda n, j: (0, 0)),
            pl.BlockSpec((1, E), lambda n, j: (0, 0)),
            pl.BlockSpec((E, DW), lambda n, j: (0, 0)),
            pl.BlockSpec((1, DW), lambda n, j: (0, 0)),
        ],
        out_specs=(pl.BlockSpec((1, L, hwc, E), lambda n, j: (n, 0, j, 0)),
                   pl.BlockSpec((1, L, hwc, DW), lambda n, j: (n, 0, j, 0))),
        compiler_params=pltpu.CompilerParams(
            dimension_semantics=("parallel", "parallel"),
            vmem_limit_bytes=VMEM_LIMIT),
    )(xc, w_dw, b_dw, w_f, b_f)


def ssm_scan(dbc, xs, neg_A_T, d):
    N, L, HW, DW = dbc.shape
    E = xs.shape[-1]
    S = neg_A_T.shape[0]
    hwc = _pick_tile(HW, (8, 16, 32))      # keep carried state ~16 vregs
    return pl.pallas_call(
        _ssm_scan_kernel,
        out_shape=jax.ShapeDtypeStruct((N, L, HW, E), jnp.float32),
        grid=(N, HW // hwc),
        in_specs=[
            pl.BlockSpec((1, L, hwc, DW), lambda n, j: (n, 0, j, 0)),
            pl.BlockSpec((1, L, hwc, E), lambda n, j: (n, 0, j, 0)),
            pl.BlockSpec((S, E), lambda n, j: (0, 0)),
            pl.BlockSpec((1, E), lambda n, j: (0, 0)),
        ],
        out_specs=pl.BlockSpec((1, L, hwc, E), lambda n, j: (n, 0, j, 0)),
        scratch_shapes=[pltpu.VMEM((L, hwc, S, E), jnp.float32),
                        pltpu.VMEM((L, hwc, S, E), jnp.float32)],
        compiler_params=pltpu.CompilerParams(
            dimension_semantics=("parallel", "parallel"),
            vmem_limit_bytes=VMEM_LIMIT),
    )(dbc, xs, neg_A_T, d)


def gate_out(y, z, w_out, xres):
    M, E = y.shape
    C = w_out.shape[1]
    tm = _pick_tile(M, (1024, 512, 256, 128, 64, 32, 16, 8))
    return pl.pallas_call(
        _gate_out_kernel,
        out_shape=jax.ShapeDtypeStruct((M, C), jnp.float32),
        grid=(M // tm,),
        in_specs=[
            pl.BlockSpec((tm, E), lambda i: (i, 0)),
            pl.BlockSpec((tm, E), lambda i: (i, 0)),
            pl.BlockSpec((E, C), lambda i: (0, 0)),
            pl.BlockSpec((tm, C), lambda i: (i, 0)),
        ],
        out_specs=pl.BlockSpec((tm, C), lambda i: (i, 0)),
        input_output_aliases={3: 0},       # residual buffer reused for the output
        compiler_params=pltpu.CompilerParams(
            dimension_semantics=("parallel",),
            vmem_limit_bytes=VMEM_LIMIT),
    )(y, z, w_out, xres)


# ----------------------------- full forward ---------------------------------

def residual_block_forward(x, p):
    N, C, L, H, W = x.shape
    E, S = p['A_log'].shape
    R = p['w_dt'].shape[0]
    HW = H * W
    M = N * L * HW
    f32 = jnp.float32

    # ---- parameter prep (tiny, XLA side) ----
    w9 = p['w_in'].reshape(C, 9, 2 * E).transpose(1, 0, 2)           # (9, C, 2E)
    DW = ((E + 2 * S + 127) // 128) * 128                            # lane-pad to 128
    parts = [p['w_xp'][:, :R] @ p['w_dt'],                           # fold dt_proj (exact)
             p['w_xp'][:, R:R + 2 * S]]
    if DW - (E + 2 * S) > 0:
        parts.append(jnp.zeros((E, DW - (E + 2 * S)), f32))
    w_fused = jnp.concatenate(parts, axis=1)                         # (E, DW)
    b_fused = jnp.concatenate([p['b_dt'],
                               jnp.zeros((DW - E,), f32)]).reshape(1, DW)
    neg_A_T = -jnp.exp(p['A_log']).T                                 # (S, E)

    # ---- activations: channels-last + 1-ring spatial halo (not 9x im2col) ----
    x_cl = jnp.transpose(x, (0, 2, 3, 4, 1))                         # (N, L, H, W, C)
    x_pad = jnp.pad(x_cl, ((0, 0), (0, 0), (1, 1), (1, 1), (0, 0)))

    # K1: RMSNorm + in_proj (3x3 conv) fused
    xz = norm_inproj(x_pad, p['norm_w'].reshape(1, C), w9)           # (N, L, HW, 2E)
    xc = xz[..., :E]                                                 # (N, L, HW, E)
    zg = xz[..., E:]                                                 # (N, L, HW, E)

    # K2: causal depthwise conv over L + SiLU + fused x_proj/dt_proj
    xs, dbc = dwconv_xproj(xc, p['w_dw'], p['b_dw'].reshape(1, E), w_fused, b_fused)

    # K3: selective scan over L (HW-chunked, state (HWc, S, E))
    y = ssm_scan(dbc, xs, neg_A_T, p['D'].reshape(1, E))             # (N, L, HW, E)

    # K4: y * silu(z), out_proj, residual add — fused, row-tiled
    xres = x_cl.reshape(M, C)
    out = gate_out(y.reshape(M, E), zg.reshape(M, E), p['w_out'], xres)   # (M, C)
    return jnp.transpose(out.reshape(N, L, H, W, C), (0, 4, 1, 2, 3))


# --------------------------- pure-JAX reference ------------------------------

def _sigmoid(v):
    return 1.0 / (1.0 + jnp.exp(-v))


def _softplus(v):
    return jnp.log(1.0 + jnp.exp(v))


def reference_forward(x, p):
    N, C, L, H, W = x.shape
    E, S = p['A_log'].shape
    R = p['w_dt'].shape[0]
    hp = jax.lax.Precision.HIGHEST
    xn = x * jax.lax.rsqrt(jnp.mean(x * x, axis=-1, keepdims=True) + 1e-5) \
         * p['norm_w'][None, :, None, None, None]
    w_conv = p['w_in'].T.reshape(2 * E, C, 3, 3)
    xn2 = xn.transpose(0, 2, 1, 3, 4).reshape(N * L, C, H, W)
    xz = jax.lax.conv_general_dilated(xn2, w_conv, (1, 1), ((1, 1), (1, 1)),
                                      dimension_numbers=('NCHW', 'OIHW', 'NCHW'),
                                      precision=hp)
    xz = xz.reshape(N, L, 2 * E, H, W)
    xcp, z = xz[:, :, :E], xz[:, :, E:]
    K = p['w_dw'].shape[0]
    xpadL = jnp.pad(xcp, ((0, 0), (K - 1, 0), (0, 0), (0, 0), (0, 0)))
    xcv = sum(p['w_dw'][k][None, None, :, None, None] * xpadL[:, k:k + L]
              for k in range(K)) + p['b_dw'][None, None, :, None, None]
    xsl = xcv * _sigmoid(xcv)
    dbc = jnp.einsum('nlehw,ed->nldhw', xsl, p['w_xp'], precision=hp)
    delta_r, Bm, Cm = dbc[:, :, :R], dbc[:, :, R:R + S], dbc[:, :, R + S:]
    dpre = jnp.einsum('nlrhw,re->nlehw', delta_r, p['w_dt'], precision=hp) \
           + p['b_dt'][None, None, :, None, None]
    delta = _softplus(dpre)
    A = -jnp.exp(p['A_log'])
    dA = jnp.exp(delta[..., None] * A[None, None, :, None, None, :])
    Bperm = jnp.transpose(Bm, (0, 1, 3, 4, 2))
    bx = (delta * xsl)[..., None] * Bperm[:, :, None, :, :, :]

    def step(h, inp):
        dA_l, bx_l = inp
        h = dA_l * h + bx_l
        return h, h

    h0 = jnp.zeros((N, E, H, W, S), jnp.float32)
    _, hs = jax.lax.scan(step, h0, (jnp.moveaxis(dA, 1, 0), jnp.moveaxis(bx, 1, 0)))
    hs = jnp.moveaxis(hs, 0, 1)
    y = jnp.einsum('nlehws,nlshw->nlehw', hs, Cm, precision=hp) \
        + p['D'][None, None, :, None, None] * xsl
    g = y * (z * _sigmoid(z))
    out = jnp.einsum('nlehw,ec->nlchw', g, p['w_out'], precision=hp)
    return out.transpose(0, 2, 1, 3, 4) + x


# ----------------------------------- main ------------------------------------

if __name__ == "__main__":
    # MambaConfig(d_model=32): d_inner=64, d_state=16, dt_rank=ceil(32/16)=2, d_conv=4
    d_model, expand, d_state, d_conv = 32, 2, 16, 4
    d_inner = expand * d_model
    dt_rank = math.ceil(d_model / 16)
    N, L, H, W = 2, 6, 8, 8

    key = jax.random.PRNGKey(0)
    ks = jax.random.split(key, 10)
    x = jax.random.normal(ks[0], (N, d_model, L, H, W), jnp.float32)

    dt_std = dt_rank ** -0.5
    dt = jnp.exp(jax.random.uniform(ks[6], (d_inner,), jnp.float32)
                 * (math.log(0.1) - math.log(0.001)) + math.log(0.001))
    dt = jnp.clip(dt, 1e-4)
    params = {
        'norm_w': jnp.ones((d_model,), jnp.float32),
        'w_in': 0.1 * jax.random.normal(ks[1], (d_model * 9, 2 * d_inner), jnp.float32),
        'w_dw': 0.3 * jax.random.normal(ks[2], (d_conv, d_inner), jnp.float32),
        'b_dw': 0.1 * jax.random.normal(ks[3], (d_inner,), jnp.float32),
        'w_xp': 0.1 * jax.random.normal(ks[4], (d_inner, dt_rank + 2 * d_state), jnp.float32),
        'w_dt': jax.random.uniform(ks[5], (dt_rank, d_inner), jnp.float32, -dt_std, dt_std),
        'b_dt': dt + jnp.log(-jnp.expm1(-dt)),
        'A_log': jnp.log(jnp.tile(jnp.arange(1, d_state + 1, dtype=jnp.float32)[None],
                                  (d_inner, 1))),
        'D': jnp.ones((d_inner,), jnp.float32),
        'w_out': 0.1 * jax.random.normal(ks[7], (d_inner, d_model), jnp.float32),
    }

    fwd = jax.jit(residual_block_forward)
    out = jax.block_until_ready(fwd(x, params))

    ref = jax.block_until_ready(reference_forward(x, params))
    assert out.shape == (N, d_model, L, H, W)
    np.testing.assert_allclose(np.asarray(out), np.asarray(ref), rtol=1e-2, atol=1e-2)
    print("KERNEL_OK")
</pallas_src>

<mosaic_0001>
module attributes {stable_mosaic.version = 11 : i64} {
  func.func @_norm_inproj_kernel(%arg0: i32, %arg1: i32, %arg2: memref<1x1x10x10x32xf32, #tpu.memory_space<vmem>>, %arg3: memref<1x32xf32, #tpu.memory_space<vmem>>, %arg4: memref<9x32x128xf32, #tpu.memory_space<vmem>>, %arg5: memref<1x1x64x128xf32, #tpu.memory_space<vmem>>, %arg6: memref<10x10x32xf32, #tpu.memory_space<vmem>>) attributes {dimension_semantics = [#tpu.dimension_semantics<parallel>, #tpu.dimension_semantics<parallel>], iteration_bounds = array<i64: 2, 6>, scalar_prefetch = 0 : i64, scratch_operands = 1 : i64, tpu.core_type = #tpu.core_type<tc>, window_params = [{transform_indices = @transform_0, window_bounds = array<i64: 1, 1, 10, 10, 32>}, {pipeline_mode = #tpu.pipeline_mode<synchronous>, transform_indices = @transform_1, window_bounds = array<i64: 1, 32>}, {pipeline_mode = #tpu.pipeline_mode<synchronous>, transform_indices = @transform_2, window_bounds = array<i64: 9, 32, 128>}, {transform_indices = @transform_3, window_bounds = array<i64: 1, 1, 64, 128>}]} {
    %c0 = arith.constant 0 : index
    %c0_0 = arith.constant 0 : index
    %c0_1 = arith.constant 0 : index
    %c0_2 = arith.constant 0 : index
    %c0_3 = arith.constant 0 : index
    %0 = vector.load %arg2[%c0, %c0_0, %c0_1, %c0_2, %c0_3] : memref<1x1x10x10x32xf32, #tpu.memory_space<vmem>>, vector<1x1x10x10x32xf32>
    %1 = vector.shape_cast %0 : vector<1x1x10x10x32xf32> to vector<10x10x32xf32>
    %2 = arith.mulf %1, %1 : vector<10x10x32xf32>
    %cst = arith.constant dense<0.000000e+00> : vector<10x32xf32>
    %3 = vector.multi_reduction <add>, %2, %cst [1] : vector<10x10x32xf32> to vector<10x32xf32>
    %4 = vector.shape_cast %3 : vector<10x32xf32> to vector<10x1x32xf32>
    %cst_4 = arith.constant 1.250000e-01 : f32
    %5 = vector.broadcast %cst_4 : f32 to vector<10x1x32xf32>
    %6 = arith.mulf %4, %5 : vector<10x1x32xf32>
    %cst_5 = arith.constant 9.99999974E-6 : f32
    %7 = vector.broadcast %cst_5 : f32 to vector<10x1x32xf32>
    %8 = arith.addf %6, %7 : vector<10x1x32xf32>
    %9 = math.rsqrt %8 : vector<10x1x32xf32>
    %10 = vector.broadcast %9 : vector<10x1x32xf32> to vector<10x10x32xf32>
    %11 = arith.mulf %1, %10 : vector<10x10x32xf32>
    %c0_6 = arith.constant 0 : index
    %c0_7 = arith.constant 0 : index
    %12 = vector.load %arg3[%c0_6, %c0_7] : memref<1x32xf32, #tpu.memory_space<vmem>>, vector<1x32xf32>
    %13 = vector.shape_cast %12 : vector<1x32xf32> to vector<32xf32>
    %14 = vector.shape_cast %13 : vector<32xf32> to vector<1x1x32xf32>
    %15 = vector.broadcast %14 : vector<1x1x32xf32> to vector<10x10x32xf32>
    %16 = arith.mulf %11, %15 : vector<10x10x32xf32>
    %c0_8 = arith.constant 0 : index
    %c0_9 = arith.constant 0 : index
    %c0_10 = arith.constant 0 : index
    %17 = vector.load %arg6[%c0_8, %c0_9, %c0_10] : memref<10x10x32xf32, #tpu.memory_space<vmem>>, vector<10x10x32xf32>
    tpu.vector_store %arg6[%c0_8, %c0_9, %c0_10], %16 {strides = array<i32>} : memref<10x10x32xf32, #tpu.memory_space<vmem>>, vector<10x10x32xf32>,
    %cst_11 = arith.constant 0.000000e+00 : f32
    %18 = vector.broadcast %cst_11 : f32 to vector<64x128xf32>
    %c0_12 = arith.constant 0 : index
    %c0_13 = arith.constant 0 : index
    %c0_14 = arith.constant 0 : index
    %19 = vector.load %arg6[%c0_12, %c0_13, %c0_14] : memref<10x10x32xf32, #tpu.memory_space<vmem>>, vector<8x8x32xf32>
    %20 = vector.shape_cast %19 : vector<8x8x32xf32> to vector<64x32xf32>
    %c0_15 = arith.constant 0 : index
    %c0_16 = arith.constant 0 : index
    %c0_17 = arith.constant 0 : index
    %21 = vector.load %arg4[%c0_15, %c0_16, %c0_17] : memref<9x32x128xf32, #tpu.memory_space<vmem>>, vector<1x32x128xf32>
    %22 = vector.shape_cast %21 : vector<1x32x128xf32> to vector<32x128xf32>
    %cst_18 = arith.constant dense<0.000000e+00> : vector<64x128xf32>
    %23 = tpu.matmul %20, %22, %cst_18 {dimension_numbers = #tpu.dot_dimension_numbers<[1], [0], [0], [1], [0, 0, 1, 1], [], []>} : vector<64x32xf32>, vector<32x128xf32>, vector<64x128xf32> -> vector<64x128xf32>
    %24 = arith.addf %18, %23 : vector<64x128xf32>
    %c0_19 = arith.constant 0 : index
    %c1 = arith.constant 1 : index
    %c0_20 = arith.constant 0 : index
    %25 = vector.load %arg6[%c0_19, %c1, %c0_20] : memref<10x10x32xf32, #tpu.memory_space<vmem>>, vector<8x8x32xf32>
    %26 = vector.shape_cast %25 : vector<8x8x32xf32> to vector<64x32xf32>
    %c1_21 = arith.constant 1 : index
    %c0_22 = arith.constant 0 : index
    %c0_23 = arith.constant 0 : index
    %27 = vector.load %arg4[%c1_21, %c0_22, %c0_23] : memref<9x32x128xf32, #tpu.memory_space<vmem>>, vector<1x32x128xf32>
    %28 = vector.shape_cast %27 : vector<1x32x128xf32> to vector<32x128xf32>
    %cst_24 = arith.constant dense<0.000000e+00> : vector<64x128xf32>
    %29 = tpu.matmul %26, %28, %cst_24 {dimension_numbers = #tpu.dot_dimension_numbers<[1], [0], [0], [1], [0, 0, 1, 1], [], []>} : vector<64x32xf32>, vector<32x128xf32>, vector<64x128xf32> -> vector<64x128xf32>
    %30 = arith.addf %24, %29 : vector<64x128xf32>
    %c0_25 = arith.constant 0 : index
    %c2 = arith.constant 2 : index
    %c0_26 = arith.constant 0 : index
    %31 = vector.load %arg6[%c0_25, %c2, %c0_26] : memref<10x10x32xf32, #tpu.memory_space<vmem>>, vector<8x8x32xf32>
    %32 = vector.shape_cast %31 : vector<8x8x32xf32> to vector<64x32xf32>
    %c2_27 = arith.constant 2 : index
    %c0_28 = arith.constant 0 : index
    %c0_29 = arith.constant 0 : index
    %33 = vector.load %arg4[%c2_27, %c0_28, %c0_29] : memref<9x32x128xf32, #tpu.memory_space<vmem>>, vector<1x32x128xf32>
    %34 = vector.shape_cast %33 : vector<1x32x128xf32> to vector<32x128xf32>
    %cst_30 = arith.constant dense<0.000000e+00> : vector<64x128xf32>
    %35 = tpu.matmul %32, %34, %cst_30 {dimension_numbers = #tpu.dot_dimension_numbers<[1], [0], [0], [1], [0, 0, 1, 1], [], []>} : vector<64x32xf32>, vector<32x128xf32>, vector<64x128xf32> -> vector<64x128xf32>
    %36 = arith.addf %30, %35 : vector<64x128xf32>
    %c1_31 = arith.constant 1 : index
    %c0_32 = arith.constant 0 : index
    %c0_33 = arith.constant 0 : index
    %37 = vector.load %arg6[%c1_31, %c0_32, %c0_33] : memref<10x10x32xf32, #tpu.memory_space<vmem>>, vector<8x8x32xf32>
    %38 = vector.shape_cast %37 : vector<8x8x32xf32> to vector<64x32xf32>
    %c3 = arith.constant 3 : index
    %c0_34 = arith.constant 0 : index
    %c0_35 = arith.constant 0 : index
    %39 = vector.load %arg4[%c3, %c0_34, %c0_35] : memref<9x32x128xf32, #tpu.memory_space<vmem>>, vector<1x32x128xf32>
    %40 = vector.shape_cast %39 : vector<1x32x128xf32> to vector<32x128xf32>
    %cst_36 = arith.constant dense<0.000000e+00> : vector<64x128xf32>
    %41 = tpu.matmul %38, %40, %cst_36 {dimension_numbers = #tpu.dot_dimension_numbers<[1], [0], [0], [1], [0, 0, 1, 1], [], []>} : vector<64x32xf32>, vector<32x128xf32>, vector<64x128xf32> -> vector<64x128xf32>
    %42 = arith.addf %36, %41 : vector<64x128xf32>
    %c1_37 = arith.constant 1 : index
    %c1_38 = arith.constant 1 : index
    %c0_39 = arith.constant 0 : index
    %43 = vector.load %arg6[%c1_37, %c1_38, %c0_39] : memref<10x10x32xf32, #tpu.memory_space<vmem>>, vector<8x8x32xf32>
    %44 = vector.shape_cast %43 : vector<8x8x32xf32> to vector<64x32xf32>
    %c4 = arith.constant 4 : index
    %c0_40 = arith.constant 0 : index
    %c0_41 = arith.constant 0 : index
    %45 = vector.load %arg4[%c4, %c0_40, %c0_41] : memref<9x32x128xf32, #tpu.memory_space<vmem>>, vector<1x32x128xf32>
    %46 = vector.shape_cast %45 : vector<1x32x128xf32> to vector<32x128xf32>
    %cst_42 = arith.constant dense<0.000000e+00> : vector<64x128xf32>
    %47 = tpu.matmul %44, %46, %cst_42 {dimension_numbers = #tpu.dot_dimension_numbers<[1], [0], [0], [1], [0, 0, 1, 1], [], []>} : vector<64x32xf32>, vector<32x128xf32>, vector<64x128xf32> -> vector<64x128xf32>
    %48 = arith.addf %42, %47 : vector<64x128xf32>
    %c1_43 = arith.constant 1 : index
    %c2_44 = arith.constant 2 : index
    %c0_45 = arith.constant 0 : index
    %49 = vector.load %arg6[%c1_43, %c2_44, %c0_45] : memref<10x10x32xf32, #tpu.memory_space<vmem>>, vector<8x8x32xf32>
    %50 = vector.shape_cast %49 : vector<8x8x32xf32> to vector<64x32xf32>
    %c5 = arith.constant 5 : index
    %c0_46 = arith.constant 0 : index
    %c0_47 = arith.constant 0 : index
    %51 = vector.load %arg4[%c5, %c0_46, %c0_47] : memref<9x32x128xf32, #tpu.memory_space<vmem>>, vector<1x32x128xf32>
    %52 = vector.shape_cast %51 : vector<1x32x128xf32> to vector<32x128xf32>
    %cst_48 = arith.constant dense<0.000000e+00> : vector<64x128xf32>
    %53 = tpu.matmul %50, %52, %cst_48 {dimension_numbers = #tpu.dot_dimension_numbers<[1], [0], [0], [1], [0, 0, 1, 1], [], []>} : vector<64x32xf32>, vector<32x128xf32>, vector<64x128xf32> -> vector<64x128xf32>
    %54 = arith.addf %48, %53 : vector<64x128xf32>
    %c2_49 = arith.constant 2 : index
    %c0_50 = arith.constant 0 : index
    %c0_51 = arith.constant 0 : index
    %55 = vector.load %arg6[%c2_49, %c0_50, %c0_51] : memref<10x10x32xf32, #tpu.memory_space<vmem>>, vector<8x8x32xf32>
    %56 = vector.shape_cast %55 : vector<8x8x32xf32> to vector<64x32xf32>
    %c6 = arith.constant 6 : index
    %c0_52 = arith.constant 0 : index
    %c0_53 = arith.constant 0 : index
    %57 = vector.load %arg4[%c6, %c0_52, %c0_53] : memref<9x32x128xf32, #tpu.memory_space<vmem>>, vector<1x32x128xf32>
    %58 = vector.shape_cast %57 : vector<1x32x128xf32> to vector<32x128xf32>
    %cst_54 = arith.constant dense<0.000000e+00> : vector<64x128xf32>
    %59 = tpu.matmul %56, %58, %cst_54 {dimension_numbers = #tpu.dot_dimension_numbers<[1], [0], [0], [1], [0, 0, 1, 1], [], []>} : vector<64x32xf32>, vector<32x128xf32>, vector<64x128xf32> -> vector<64x128xf32>
    %60 = arith.addf %54, %59 : vector<64x128xf32>
    %c2_55 = arith.constant 2 : index
    %c1_56 = arith.constant 1 : index
    %c0_57 = arith.constant 0 : index
    %61 = vector.load %arg6[%c2_55, %c1_56, %c0_57] : memref<10x10x32xf32, #tpu.memory_space<vmem>>, vector<8x8x32xf32>
    %62 = vector.shape_cast %61 : vector<8x8x32xf32> to vector<64x32xf32>
    %c7 = arith.constant 7 : index
    %c0_58 = arith.constant 0 : index
    %c0_59 = arith.constant 0 : index
    %63 = vector.load %arg4[%c7, %c0_58, %c0_59] : memref<9x32x128xf32, #tpu.memory_space<vmem>>, vector<1x32x128xf32>
    %64 = vector.shape_cast %63 : vector<1x32x128xf32> to vector<32x128xf32>
    %cst_60 = arith.constant dense<0.000000e+00> : vector<64x128xf32>
    %65 = tpu.matmul %62, %64, %cst_60 {dimension_numbers = #tpu.dot_dimension_numbers<[1], [0], [0], [1], [0, 0, 1, 1], [], []>} : vector<64x32xf32>, vector<32x128xf32>, vector<64x128xf32> -> vector<64x128xf32>
    %66 = arith.addf %60, %65 : vector<64x128xf32>
    %c2_61 = arith.constant 2 : index
    %c2_62 = arith.constant 2 : index
    %c0_63 = arith.constant 0 : index
    %67 = vector.load %arg6[%c2_61, %c2_62, %c0_63] : memref<10x10x32xf32, #tpu.memory_space<vmem>>, vector<8x8x32xf32>
    %68 = vector.shape_cast %67 : vector<8x8x32xf32> to vector<64x32xf32>
    %c8 = arith.constant 8 : index
    %c0_64 = arith.constant 0 : index
    %c0_65 = arith.constant 0 : index
    %69 = vector.load %arg4[%c8, %c0_64, %c0_65] : memref<9x32x128xf32, #tpu.memory_space<vmem>>, vector<1x32x128xf32>
    %70 = vector.shape_cast %69 : vector<1x32x128xf32> to vector<32x128xf32>
    %cst_66 = arith.constant dense<0.000000e+00> : vector<64x128xf32>
    %71 = tpu.matmul %68, %70, %cst_66 {dimension_numbers = #tpu.dot_dimension_numbers<[1], [0], [0], [1], [0, 0, 1, 1], [], []>} : vector<64x32xf32>, vector<32x128xf32>, vector<64x128xf32> -> vector<64x128xf32>
    %72 = arith.addf %66, %71 : vector<64x128xf32>
    %c0_67 = arith.constant 0 : index
    %c0_68 = arith.constant 0 : index
    %c0_69 = arith.constant 0 : index
    %c0_70 = arith.constant 0 : index
    %73 = vector.load %arg5[%c0_67, %c0_68, %c0_69, %c0_70] : memref<1x1x64x128xf32, #tpu.memory_space<vmem>>, vector<1x1x64x128xf32>
    %74 = vector.shape_cast %73 : vector<1x1x64x128xf32> to vector<64x128xf32>
    %75 = vector.shape_cast %72 : vector<64x128xf32> to vector<1x1x64x128xf32>
    tpu.vector_store %arg5[%c0_67, %c0_68, %c0_69, %c0_70], %75 {strides = array<i32>} : memref<1x1x64x128xf32, #tpu.memory_space<vmem>>, vector<1x1x64x128xf32>,
    return
  }
  func.func @transform_0(%arg0: i32, %arg1: i32) -> (i32, i32, i32, i32, i32) {
    %c0_i32 = arith.constant 0 : i32
    %c0_i32_0 = arith.constant 0 : i32
    %c0_i32_1 = arith.constant 0 : i32
    %c0_i32_2 = arith.constant 0 : i32
    return %arg0, %arg1, %c0_i32, %c0_i32_0, %c0_i32_1 : i32, i32, i32, i32, i32
  }
  func.func @transform_1(%arg0: i32, %arg1: i32) -> (i32, i32) {
    %c0_i32 = arith.constant 0 : i32
    %c0_i32_0 = arith.constant 0 : i32
    %c0_i32_1 = arith.constant 0 : i32
    return %c0_i32, %c0_i32_0 : i32, i32
  }
  func.func @transform_2(%arg0: i32, %arg1: i32) -> (i32, i32, i32) {
    %c0_i32 = arith.constant 0 : i32
    %c0_i32_0 = arith.constant 0 : i32
    %c0_i32_1 = arith.constant 0 : i32
    %c0_i32_2 = arith.constant 0 : i32
    return %c0_i32, %c0_i32_0, %c0_i32_1 : i32, i32, i32
  }
  func.func @transform_3(%arg0: i32, %arg1: i32) -> (i32, i32, i32, i32) {
    %c0_i32 = arith.constant 0 : i32
    %c0_i32_0 = arith.constant 0 : i32
    %c0_i32_1 = arith.constant 0 : i32
    return %arg0, %arg1, %c0_i32, %c0_i32_0 : i32, i32, i32, i32
  }
}

module attributes {stable_mosaic.version = 11 : i64} {
  func.func @_ssm_scan_kernel(%arg0: i32, %arg1: i32, %arg2: memref<1x6x8x128xf32, #tpu.memory_space<vmem>>, %arg3: memref<1x6x8x64xf32, #tpu.memory_space<vmem>>, %arg4: memref<16x64xf32, #tpu.memory_space<vmem>>, %arg5: memref<1x64xf32, #tpu.memory_space<vmem>>, %arg6: memref<1x6x8x64xf32, #tpu.memory_space<vmem>>, %arg7: memref<6x8x16x64xf32, #tpu.memory_space<vmem>>, %arg8: memref<6x8x16x64xf32, #tpu.memory_space<vmem>>) attributes {dimension_semantics = [#tpu.dimension_semantics<parallel>, #tpu.dimension_semantics<parallel>], iteration_bounds = array<i64: 2, 8>, scalar_prefetch = 0 : i64, scratch_operands = 2 : i64, tpu.core_type = #tpu.core_type<tc>, window_params = [{transform_indices = @transform_0, window_bounds = array<i64: 1, 6, 8, 128>}, {transform_indices = @transform_1, window_bounds = array<i64: 1, 6, 8, 64>}, {pipeline_mode = #tpu.pipeline_mode<synchronous>, transform_indices = @transform_2, window_bounds = array<i64: 16, 64>}, {pipeline_mode = #tpu.pipeline_mode<synchronous>, transform_indices = @transform_3, window_bounds = array<i64: 1, 64>}, {transform_indices = @transform_4, window_bounds = array<i64: 1, 6, 8, 64>}]} {
    %c0 = arith.constant 0 : index
    %c0_0 = arith.constant 0 : index
    %c0_1 = arith.constant 0 : index
    %c0_2 = arith.constant 0 : index
    %0 = vector.load %arg2[%c0, %c0_0, %c0_1, %c0_2] : memref<1x6x8x128xf32, #tpu.memory_space<vmem>>, vector<1x6x8x128xf32>
    %1 = vector.shape_cast %0 : vector<1x6x8x128xf32> to vector<6x8x128xf32>
    %2 = vector.extract_strided_slice %1 {offsets = [0, 0, 0], sizes = [6, 8, 64], strides = [1, 1, 1]} : vector<6x8x128xf32> to vector<6x8x64xf32>
    %cst = arith.constant 0.000000e+00 : f32
    %3 = vector.broadcast %cst : f32 to vector<6x8x64xf32>
    %4 = arith.maximumf %2, %3 : vector<6x8x64xf32>
    %5 = math.absf %2 : vector<6x8x64xf32>
    %cst_3 = arith.constant 0.000000e+00 : f32
    %6 = vector.broadcast %cst_3 : f32 to vector<6x8x64xf32>
    %7 = arith.subf %6, %5 : vector<6x8x64xf32>
    %8 = math.exp %7 : vector<6x8x64xf32>
    %cst_4 = arith.constant 1.000000e+00 : f32
    %9 = vector.broadcast %cst_4 : f32 to vector<6x8x64xf32>
    %10 = arith.addf %9, %8 : vector<6x8x64xf32>
    %11 = math.log %10 : vector<6x8x64xf32>
    %12 = arith.addf %4, %11 : vector<6x8x64xf32>
    %13 = vector.extract_strided_slice %1 {offsets = [0, 0, 64], sizes = [6, 8, 16], strides = [1, 1, 1]} : vector<6x8x128xf32> to vector<6x8x16xf32>
    %14 = vector.extract_strided_slice %1 {offsets = [0, 0, 80], sizes = [6, 8, 16], strides = [1, 1, 1]} : vector<6x8x128xf32> to vector<6x8x16xf32>
    %c0_5 = arith.constant 0 : index
    %c0_6 = arith.constant 0 : index
    %c0_7 = arith.constant 0 : index
    %c0_8 = arith.constant 0 : index
    %15 = vector.load %arg3[%c0_5, %c0_6, %c0_7, %c0_8] : memref<1x6x8x64xf32, #tpu.memory_space<vmem>>, vector<1x6x8x64xf32>
    %16 = vector.shape_cast %15 : vector<1x6x8x64xf32> to vector<6x8x64xf32>
    %17 = vector.shape_cast %12 : vector<6x8x64xf32> to vector<6x8x1x64xf32>
    %c0_9 = arith.constant 0 : index
    %c0_10 = arith.constant 0 : index
    %18 = vector.load %arg4[%c0_9, %c0_10] : memref<16x64xf32, #tpu.memory_space<vmem>>, vector<16x64xf32>
    %19 = vector.shape_cast %18 : vector<16x64xf32> to vector<1x1x16x64xf32>
    %20 = vector.broadcast %17 : vector<6x8x1x64xf32> to vector<6x8x16x64xf32>
    %21 = vector.broadcast %19 : vector<1x1x16x64xf32> to vector<6x8x16x64xf32>
    %22 = arith.mulf %20, %21 : vector<6x8x16x64xf32>
    %23 = math.exp %22 : vector<6x8x16x64xf32>
    %c0_11 = arith.constant 0 : index
    %c0_12 = arith.constant 0 : index
    %c0_13 = arith.constant 0 : index
    %c0_14 = arith.constant 0 : index
    %24 = vector.load %arg7[%c0_11, %c0_12, %c0_13, %c0_14] : memref<6x8x16x64xf32, #tpu.memory_space<vmem>>, vector<6x8x16x64xf32>
    tpu.vector_store %arg7[%c0_11, %c0_12, %c0_13, %c0_14], %23 {strides = array<i32>} : memref<6x8x16x64xf32, #tpu.memory_space<vmem>>, vector<6x8x16x64xf32>,
    %25 = arith.mulf %12, %16 : vector<6x8x64xf32>
    %26 = vector.shape_cast %25 : vector<6x8x64xf32> to vector<6x8x1x64xf32>
    %27 = vector.shape_cast %13 : vector<6x8x16xf32> to vector<6x8x16x1xf32>
    %28 = vector.broadcast %26 : vector<6x8x1x64xf32> to vector<6x8x16x64xf32>
    %29 = vector.broadcast %27 : vector<6x8x16x1xf32> to vector<6x8x16x64xf32>
    %30 = arith.mulf %28, %29 : vector<6x8x16x64xf32>
    %c0_15 = arith.constant 0 : index
    %c0_16 = arith.constant 0 : index
    %c0_17 = arith.constant 0 : index
    %c0_18 = arith.constant 0 : index
    %31 = vector.load %arg8[%c0_15, %c0_16, %c0_17, %c0_18] : memref<6x8x16x64xf32, #tpu.memory_space<vmem>>, vector<6x8x16x64xf32>
    tpu.vector_store %arg8[%c0_15, %c0_16, %c0_17, %c0_18], %30 {strides = array<i32>} : memref<6x8x16x64xf32, #tpu.memory_space<vmem>>, vector<6x8x16x64xf32>,
    %cst_19 = arith.constant 0.000000e+00 : f32
    %32 = vector.broadcast %cst_19 : f32 to vector<8x16x64xf32>
    %c0_i32 = arith.constant 0 : i32
    %c6_i32 = arith.constant 6 : i32
    %33 = arith.addi %c0_i32, %c6_i32 : i32
    %c1_i32 = arith.constant 1 : i32
    %34 = scf.for %arg9 = %c0_i32 to %33 step %c1_i32 iter_args(%arg10 = %32) -> (vector<8x16x64xf32>)  : i32 {
      %49 = arith.index_cast %arg9 : i32 to index
      %c0_32 = arith.constant 0 : index
      %c0_33 = arith.constant 0 : index
      %c0_34 = arith.constant 0 : index
      %50 = vector.load %arg7[%49, %c0_32, %c0_33, %c0_34] : memref<6x8x16x64xf32, #tpu.memory_space<vmem>>, vector<1x8x16x64xf32>
      %51 = vector.shape_cast %50 : vector<1x8x16x64xf32> to vector<8x16x64xf32>
      %52 = arith.mulf %51, %arg10 : vector<8x16x64xf32>
      %53 = arith.index_cast %arg9 : i32 to index
      %c0_35 = arith.constant 0 : index
      %c0_36 = arith.constant 0 : index
      %c0_37 = arith.constant 0 : index
      %54 = vector.load %arg8[%53, %c0_35, %c0_36, %c0_37] : memref<6x8x16x64xf32, #tpu.memory_space<vmem>>, vector<1x8x16x64xf32>
      %55 = vector.shape_cast %54 : vector<1x8x16x64xf32> to vector<8x16x64xf32>
      %56 = arith.addf %52, %55 : vector<8x16x64xf32>
      %57 = arith.index_cast %arg9 : i32 to index
      %c0_38 = arith.constant 0 : index
      %c0_39 = arith.constant 0 : index
      %c0_40 = arith.constant 0 : index
      %58 = vector.load %arg8[%57, %c0_38, %c0_39, %c0_40] : memref<6x8x16x64xf32, #tpu.memory_space<vmem>>, vector<1x8x16x64xf32>
      %59 = vector.shape_cast %58 : vector<1x8x16x64xf32> to vector<8x16x64xf32>
      %60 = vector.shape_cast %56 : vector<8x16x64xf32> to vector<1x8x16x64xf32>
      tpu.vector_store %arg8[%57, %c0_38, %c0_39, %c0_40], %60 {strides = array<i32>} : memref<6x8x16x64xf32, #tpu.memory_space<vmem>>, vector<1x8x16x64xf32>,
      scf.yield %56 : vector<8x16x64xf32>
    }
    %c6_i32_20 = arith.constant 6 : i32
    %c0_21 = arith.constant 0 : index
    %c0_22 = arith.constant 0 : index
    %c0_23 = arith.constant 0 : index
    %c0_24 = arith.constant 0 : index
    %35 = vector.load %arg8[%c0_21, %c0_22, %c0_23, %c0_24] : memref<6x8x16x64xf32, #tpu.memory_space<vmem>>, vector<6x8x16x64xf32>
    %36 = vector.shape_cast %14 : vector<6x8x16xf32> to vector<6x8x16x1xf32>
    %37 = vector.broadcast %36 : vector<6x8x16x1xf32> to vector<6x8x16x64xf32>
    %38 = arith.mulf %35, %37 : vector<6x8x16x64xf32>
    %cst_25 = arith.constant dense<0.000000e+00> : vector<6x8x64xf32>
    %39 = vector.multi_reduction <add>, %38, %cst_25 [2] : vector<6x8x16x64xf32> to vector<6x8x64xf32>
    %c0_26 = arith.constant 0 : index
    %c0_27 = arith.constant 0 : index
    %40 = vector.load %arg5[%c0_26, %c0_27] : memref<1x64xf32, #tpu.memory_space<vmem>>, vector<1x64xf32>
    %41 = vector.shape_cast %40 : vector<1x64xf32> to vector<64xf32>
    %42 = vector.shape_cast %41 : vector<64xf32> to vector<1x1x64xf32>
    %43 = vector.broadcast %42 : vector<1x1x64xf32> to vector<6x8x64xf32>
    %44 = arith.mulf %43, %16 : vector<6x8x64xf32>
    %45 = arith.addf %39, %44 : vector<6x8x64xf32>
    %c0_28 = arith.constant 0 : index
    %c0_29 = arith.constant 0 : index
    %c0_30 = arith.constant 0 : index
    %c0_31 = arith.constant 0 : index
    %46 = vector.load %arg6[%c0_28, %c0_29, %c0_30, %c0_31] : memref<1x6x8x64xf32, #tpu.memory_space<vmem>>, vector<1x6x8x64xf32>
    %47 = vector.shape_cast %46 : vector<1x6x8x64xf32> to vector<6x8x64xf32>
    %48 = vector.shape_cast %45 : vector<6x8x64xf32> to vector<1x6x8x64xf32>
    tpu.vector_store %arg6[%c0_28, %c0_29, %c0_30, %c0_31], %48 {strides = array<i32>} : memref<1x6x8x64xf32, #tpu.memory_space<vmem>>, vector<1x6x8x64xf32>,
    return
  }
  func.func @transform_0(%arg0: i32, %arg1: i32) -> (i32, i32, i32, i32) {
    %c0_i32 = arith.constant 0 : i32
    %c0_i32_0 = arith.constant 0 : i32
    %c0_i32_1 = arith.constant 0 : i32
    return %arg0, %c0_i32, %arg1, %c0_i32_0 : i32, i32, i32, i32
  }
  func.func @transform_1(%arg0: i32, %arg1: i32) -> (i32, i32, i32, i32) {
    %c0_i32 = arith.constant 0 : i32
    %c0_i32_0 = arith.constant 0 : i32
    %c0_i32_1 = arith.constant 0 : i32
    return %arg0, %c0_i32, %arg1, %c0_i32_0 : i32, i32, i32, i32
  }
  func.func @transform_2(%arg0: i32, %arg1: i32) -> (i32, i32) {
    %c0_i32 = arith.constant 0 : i32
    %c0_i32_0 = arith.constant 0 : i32
    %c0_i32_1 = arith.constant 0 : i32
    return %c0_i32, %c0_i32_0 : i32, i32
  }
  func.func @transform_3(%arg0: i32, %arg1: i32) -> (i32, i32) {
    %c0_i32 = arith.constant 0 : i32
    %c0_i32_0 = arith.constant 0 : i32
    %c0_i32_1 = arith.constant 0 : i32
    return %c0_i32, %c0_i32_0 : i32, i32
  }
  func.func @transform_4(%arg0: i32, %arg1: i32) -> (i32, i32, i32, i32) {
    %c0_i32 = arith.constant 0 : i32
    %c0_i32_0 = arith.constant 0 : i32
    %c0_i32_1 = arith.constant 0 : i32
    return %arg0, %c0_i32, %arg1, %c0_i32_0 : i32, i32, i32, i32
  }
}

module attributes {stable_mosaic.version = 11 : i64} {
  func.func @_dwconv_xproj_kernel(%arg0: i32, %arg1: i32, %arg2: memref<1x6x32x64xf32, #tpu.memory_space<vmem>>, %arg3: memref<4x64xf32, #tpu.memory_space<vmem>>, %arg4: memref<1x64xf32, #tpu.memory_space<vmem>>, %arg5: memref<64x128xf32, #tpu.memory_space<vmem>>, %arg6: memref<1x128xf32, #tpu.memory_space<vmem>>, %arg7: memref<1x6x32x64xf32, #tpu.memory_space<vmem>>, %arg8: memref<1x6x32x128xf32, #tpu.memory_space<vmem>>) attributes {dimension_semantics = [#tpu.dimension_semantics<parallel>, #tpu.dimension_semantics<parallel>], iteration_bounds = array<i64: 2, 2>, scalar_prefetch = 0 : i64, scratch_operands = 0 : i64, tpu.core_type = #tpu.core_type<tc>, window_params = [{transform_indices = @transform_0, window_bounds = array<i64: 1, 6, 32, 64>}, {pipeline_mode = #tpu.pipeline_mode<synchronous>, transform_indices = @transform_1, window_bounds = array<i64: 4, 64>}, {pipeline_mode = #tpu.pipeline_mode<synchronous>, transform_indices = @transform_2, window_bounds = array<i64: 1, 64>}, {pipeline_mode = #tpu.pipeline_mode<synchronous>, transform_indices = @transform_3, window_bounds = array<i64: 64, 128>}, {pipeline_mode = #tpu.pipeline_mode<synchronous>, transform_indices = @transform_4, window_bounds = array<i64: 1, 128>}, {transform_indices = @transform_5, window_bounds = array<i64: 1, 6, 32, 64>}, {transform_indices = @transform_6, window_bounds = array<i64: 1, 6, 32, 128>}]} {
    %c0 = arith.constant 0 : index
    %c0_0 = arith.constant 0 : index
    %c0_1 = arith.constant 0 : index
    %c0_2 = arith.constant 0 : index
    %0 = vector.load %arg2[%c0, %c0_0, %c0_1, %c0_2] : memref<1x6x32x64xf32, #tpu.memory_space<vmem>>, vector<1x6x32x64xf32>
    %1 = vector.shape_cast %0 : vector<1x6x32x64xf32> to vector<6x32x64xf32>
    %cst = arith.constant 0.000000e+00 : f32
    %2 = vector.broadcast %cst : f32 to vector<3x32x64xf32>
    %3 = tpu.concatenate %2, %1 in 0 : vector<3x32x64xf32>, vector<6x32x64xf32> -> vector<9x32x64xf32>
    %cst_3 = arith.constant 0.000000e+00 : f32
    %4 = vector.broadcast %cst_3 : f32 to vector<6x32x64xf32>
    %c0_4 = arith.constant 0 : index
    %c0_5 = arith.constant 0 : index
    %5 = vector.load %arg4[%c0_4, %c0_5] : memref<1x64xf32, #tpu.memory_space<vmem>>, vector<1x64xf32>
    %6 = vector.shape_cast %5 : vector<1x64xf32> to vector<64xf32>
    %7 = vector.shape_cast %6 : vector<64xf32> to vector<1x1x64xf32>
    %8 = vector.broadcast %7 : vector<1x1x64xf32> to vector<6x32x64xf32>
    %9 = arith.addf %4, %8 : vector<6x32x64xf32>
    %c0_6 = arith.constant 0 : index
    %c0_7 = arith.constant 0 : index
    %10 = vector.load %arg3[%c0_6, %c0_7] : memref<4x64xf32, #tpu.memory_space<vmem>>, vector<1x64xf32>
    %11 = vector.shape_cast %10 : vector<1x64xf32> to vector<64xf32>
    %12 = vector.shape_cast %11 : vector<64xf32> to vector<1x1x64xf32>
    %13 = vector.extract_strided_slice %3 {offsets = [0, 0, 0], sizes = [6, 32, 64], strides = [1, 1, 1]} : vector<9x32x64xf32> to vector<6x32x64xf32>
    %14 = vector.broadcast %12 : vector<1x1x64xf32> to vector<6x32x64xf32>
    %15 = arith.mulf %14, %13 : vector<6x32x64xf32>
    %16 = arith.addf %9, %15 : vector<6x32x64xf32>
    %c1 = arith.constant 1 : index
    %c0_8 = arith.constant 0 : index
    %17 = vector.load %arg3[%c1, %c0_8] : memref<4x64xf32, #tpu.memory_space<vmem>>, vector<1x64xf32>
    %18 = vector.shape_cast %17 : vector<1x64xf32> to vector<64xf32>
    %19 = vector.shape_cast %18 : vector<64xf32> to vector<1x1x64xf32>
    %20 = vector.extract_strided_slice %3 {offsets = [1, 0, 0], sizes = [6, 32, 64], strides = [1, 1, 1]} : vector<9x32x64xf32> to vector<6x32x64xf32>
    %21 = vector.broadcast %19 : vector<1x1x64xf32> to vector<6x32x64xf32>
    %22 = arith.mulf %21, %20 : vector<6x32x64xf32>
    %23 = arith.addf %16, %22 : vector<6x32x64xf32>
    %c2 = arith.constant 2 : index
    %c0_9 = arith.constant 0 : index
    %24 = vector.load %arg3[%c2, %c0_9] : memref<4x64xf32, #tpu.memory_space<vmem>>, vector<1x64xf32>
    %25 = vector.shape_cast %24 : vector<1x64xf32> to vector<64xf32>
    %26 = vector.shape_cast %25 : vector<64xf32> to vector<1x1x64xf32>
    %27 = vector.extract_strided_slice %3 {offsets = [2, 0, 0], sizes = [6, 32, 64], strides = [1, 1, 1]} : vector<9x32x64xf32> to vector<6x32x64xf32>
    %28 = vector.broadcast %26 : vector<1x1x64xf32> to vector<6x32x64xf32>
    %29 = arith.mulf %28, %27 : vector<6x32x64xf32>
    %30 = arith.addf %23, %29 : vector<6x32x64xf32>
    %c3 = arith.constant 3 : index
    %c0_10 = arith.constant 0 : index
    %31 = vector.load %arg3[%c3, %c0_10] : memref<4x64xf32, #tpu.memory_space<vmem>>, vector<1x64xf32>
    %32 = vector.shape_cast %31 : vector<1x64xf32> to vector<64xf32>
    %33 = vector.shape_cast %32 : vector<64xf32> to vector<1x1x64xf32>
    %34 = vector.extract_strided_slice %3 {offsets = [3, 0, 0], sizes = [6, 32, 64], strides = [1, 1, 1]} : vector<9x32x64xf32> to vector<6x32x64xf32>
    %35 = vector.broadcast %33 : vector<1x1x64xf32> to vector<6x32x64xf32>
    %36 = arith.mulf %35, %34 : vector<6x32x64xf32>
    %37 = arith.addf %30, %36 : vector<6x32x64xf32>
    %cst_11 = arith.constant 0.000000e+00 : f32
    %38 = vector.broadcast %cst_11 : f32 to vector<6x32x64xf32>
    %39 = arith.subf %38, %37 : vector<6x32x64xf32>
    %40 = math.exp %39 : vector<6x32x64xf32>
    %cst_12 = arith.constant 1.000000e+00 : f32
    %41 = vector.broadcast %cst_12 : f32 to vector<6x32x64xf32>
    %42 = arith.addf %41, %40 : vector<6x32x64xf32>
    %cst_13 = arith.constant 1.000000e+00 : f32
    %43 = vector.broadcast %cst_13 : f32 to vector<6x32x64xf32>
    %44 = arith.divf %43, %42 : vector<6x32x64xf32>
    %45 = arith.mulf %37, %44 : vector<6x32x64xf32>
    %c0_14 = arith.constant 0 : index
    %c0_15 = arith.constant 0 : index
    %c0_16 = arith.constant 0 : index
    %c0_17 = arith.constant 0 : index
    %46 = vector.load %arg7[%c0_14, %c0_15, %c0_16, %c0_17] : memref<1x6x32x64xf32, #tpu.memory_space<vmem>>, vector<1x6x32x64xf32>
    %47 = vector.shape_cast %46 : vector<1x6x32x64xf32> to vector<6x32x64xf32>
    %48 = vector.shape_cast %45 : vector<6x32x64xf32> to vector<1x6x32x64xf32>
    tpu.vector_store %arg7[%c0_14, %c0_15, %c0_16, %c0_17], %48 {strides = array<i32>} : memref<1x6x32x64xf32, #tpu.memory_space<vmem>>, vector<1x6x32x64xf32>,
    %49 = vector.shape_cast %45 : vector<6x32x64xf32> to vector<192x64xf32>
    %c0_18 = arith.constant 0 : index
    %c0_19 = arith.constant 0 : index
    %50 = vector.load %arg5[%c0_18, %c0_19] : memref<64x128xf32, #tpu.memory_space<vmem>>, vector<64x128xf32>
    %cst_20 = arith.constant dense<0.000000e+00> : vector<192x128xf32>
    %51 = tpu.matmul %49, %50, %cst_20 {dimension_numbers = #tpu.dot_dimension_numbers<[1], [0], [0], [1], [0, 0, 1, 1], [], []>} : vector<192x64xf32>, vector<64x128xf32>, vector<192x128xf32> -> vector<192x128xf32>
    %c0_21 = arith.constant 0 : index
    %c0_22 = arith.constant 0 : index
    %52 = vector.load %arg6[%c0_21, %c0_22] : memref<1x128xf32, #tpu.memory_space<vmem>>, vector<1x128xf32>
    %53 = vector.broadcast %52 : vector<1x128xf32> to vector<192x128xf32>
    %54 = arith.addf %51, %53 : vector<192x128xf32>
    %55 = vector.shape_cast %54 : vector<192x128xf32> to vector<6x32x128xf32>
    %c0_23 = arith.constant 0 : index
    %c0_24 = arith.constant 0 : index
    %c0_25 = arith.constant 0 : index
    %c0_26 = arith.constant 0 : index
    %56 = vector.load %arg8[%c0_23, %c0_24, %c0_25, %c0_26] : memref<1x6x32x128xf32, #tpu.memory_space<vmem>>, vector<1x6x32x128xf32>
    %57 = vector.shape_cast %56 : vector<1x6x32x128xf32> to vector<6x32x128xf32>
    %58 = vector.shape_cast %55 : vector<6x32x128xf32> to vector<1x6x32x128xf32>
    tpu.vector_store %arg8[%c0_23, %c0_24, %c0_25, %c0_26], %58 {strides = array<i32>} : memref<1x6x32x128xf32, #tpu.memory_space<vmem>>, vector<1x6x32x128xf32>,
    return
  }
  func.func @transform_0(%arg0: i32, %arg1: i32) -> (i32, i32, i32, i32) {
    %c0_i32 = arith.constant 0 : i32
    %c0_i32_0 = arith.constant 0 : i32
    %c0_i32_1 = arith.constant 0 : i32
    return %arg0, %c0_i32, %arg1, %c0_i32_0 : i32, i32, i32, i32
  }
  func.func @transform_1(%arg0: i32, %arg1: i32) -> (i32, i32) {
    %c0_i32 = arith.constant 0 : i32
    %c0_i32_0 = arith.constant 0 : i32
    %c0_i32_1 = arith.constant 0 : i32
    return %c0_i32, %c0_i32_0 : i32, i32
  }
  func.func @transform_2(%arg0: i32, %arg1: i32) -> (i32, i32) {
    %c0_i32 = arith.constant 0 : i32
    %c0_i32_0 = arith.constant 0 : i32
    %c0_i32_1 = arith.constant 0 : i32
    return %c0_i32, %c0_i32_0 : i32, i32
  }
  func.func @transform_3(%arg0: i32, %arg1: i32) -> (i32, i32) {
    %c0_i32 = arith.constant 0 : i32
    %c0_i32_0 = arith.constant 0 : i32
    %c0_i32_1 = arith.constant 0 : i32
    return %c0_i32, %c0_i32_0 : i32, i32
  }
  func.func @transform_4(%arg0: i32, %arg1: i32) -> (i32, i32) {
    %c0_i32 = arith.constant 0 : i32
    %c0_i32_0 = arith.constant 0 : i32
    %c0_i32_1 = arith.constant 0 : i32
    return %c0_i32, %c0_i32_0 : i32, i32
  }
  func.func @transform_5(%arg0: i32, %arg1: i32) -> (i32, i32, i32, i32) {
    %c0_i32 = arith.constant 0 : i32
    %c0_i32_0 = arith.constant 0 : i32
    %c0_i32_1 = arith.constant 0 : i32
    return %arg0, %c0_i32, %arg1, %c0_i32_0 : i32, i32, i32, i32
  }
  func.func @transform_6(%arg0: i32, %arg1: i32) -> (i32, i32, i32, i32) {
    %c0_i32 = arith.constant 0 : i32
    %c0_i32_0 = arith.constant 0 : i32
    %c0_i32_1 = arith.constant 0 : i32
    return %arg0, %c0_i32, %arg1, %c0_i32_0 : i32, i32, i32, i32
  }
}

module attributes {stable_mosaic.version = 11 : i64} {
  func.func @_gate_out_kernel(%arg0: i32, %arg1: memref<256x64xf32, #tpu.memory_space<vmem>>, %arg2: memref<256x64xf32, #tpu.memory_space<vmem>>, %arg3: memref<64x32xf32, #tpu.memory_space<vmem>>, %arg4: memref<256x32xf32, #tpu.memory_space<vmem>>, %arg5: memref<256x32xf32, #tpu.memory_space<vmem>>) attributes {dimension_semantics = [#tpu.dimension_semantics<parallel>], iteration_bounds = array<i64: 3>, scalar_prefetch = 0 : i64, scratch_operands = 0 : i64, tpu.core_type = #tpu.core_type<tc>, window_params = [{transform_indices = @transform_0, window_bounds = array<i64: 256, 64>}, {transform_indices = @transform_1, window_bounds = array<i64: 256, 64>}, {pipeline_mode = #tpu.pipeline_mode<synchronous>, transform_indices = @transform_2, window_bounds = array<i64: 64, 32>}, {transform_indices = @transform_3, window_bounds = array<i64: 256, 32>}, {transform_indices = @transform_4, window_bounds = array<i64: 256, 32>}]} {
    %c0 = arith.constant 0 : index
    %c0_0 = arith.constant 0 : index
    %0 = vector.load %arg1[%c0, %c0_0] : memref<256x64xf32, #tpu.memory_space<vmem>>, vector<256x64xf32>
    %c0_1 = arith.constant 0 : index
    %c0_2 = arith.constant 0 : index
    %1 = vector.load %arg2[%c0_1, %c0_2] : memref<256x64xf32, #tpu.memory_space<vmem>>, vector<256x64xf32>
    %cst = arith.constant 0.000000e+00 : f32
    %2 = vector.broadcast %cst : f32 to vector<256x64xf32>
    %3 = arith.subf %2, %1 : vector<256x64xf32>
    %4 = math.exp %3 : vector<256x64xf32>
    %cst_3 = arith.constant 1.000000e+00 : f32
    %5 = vector.broadcast %cst_3 : f32 to vector<256x64xf32>
    %6 = arith.addf %5, %4 : vector<256x64xf32>
    %cst_4 = arith.constant 1.000000e+00 : f32
    %7 = vector.broadcast %cst_4 : f32 to vector<256x64xf32>
    %8 = arith.divf %7, %6 : vector<256x64xf32>
    %9 = arith.mulf %1, %8 : vector<256x64xf32>
    %10 = arith.mulf %0, %9 : vector<256x64xf32>
    %c0_5 = arith.constant 0 : index
    %c0_6 = arith.constant 0 : index
    %11 = vector.load %arg3[%c0_5, %c0_6] : memref<64x32xf32, #tpu.memory_space<vmem>>, vector<64x32xf32>
    %cst_7 = arith.constant dense<0.000000e+00> : vector<256x32xf32>
    %12 = tpu.matmul %10, %11, %cst_7 {dimension_numbers = #tpu.dot_dimension_numbers<[1], [0], [0], [1], [0, 0, 1, 1], [], []>} : vector<256x64xf32>, vector<64x32xf32>, vector<256x32xf32> -> vector<256x32xf32>
    %c0_8 = arith.constant 0 : index
    %c0_9 = arith.constant 0 : index
    %13 = vector.load %arg4[%c0_8, %c0_9] : memref<256x32xf32, #tpu.memory_space<vmem>>, vector<256x32xf32>
    %14 = arith.addf %12, %13 : vector<256x32xf32>
    %c0_10 = arith.constant 0 : index
    %c0_11 = arith.constant 0 : index
    %15 = vector.load %arg5[%c0_10, %c0_11] : memref<256x32xf32, #tpu.memory_space<vmem>>, vector<256x32xf32>
    tpu.vector_store %arg5[%c0_10, %c0_11], %14 {strides = array<i32>} : memref<256x32xf32, #tpu.memory_space<vmem>>, vector<256x32xf32>,
    return
  }
  func.func @transform_0(%arg0: i32) -> (i32, i32) {
    %c0_i32 = arith.constant 0 : i32
    %c0_i32_0 = arith.constant 0 : i32
    return %arg0, %c0_i32 : i32, i32
  }
  func.func @transform_1(%arg0: i32) -> (i32, i32) {
    %c0_i32 = arith.constant 0 : i32
    %c0_i32_0 = arith.constant 0 : i32
    return %arg0, %c0_i32 : i32, i32
  }
  func.func @transform_2(%arg0: i32) -> (i32, i32) {
    %c0_i32 = arith.constant 0 : i32
    %c0_i32_0 = arith.constant 0 : i32
    %c0_i32_1 = arith.constant 0 : i32
    return %c0_i32, %c0_i32_0 : i32, i32
  }
  func.func @transform_3(%arg0: i32) -> (i32, i32) {
    %c0_i32 = arith.constant 0 : i32
    %c0_i32_0 = arith.constant 0 : i32
    return %arg0, %c0_i32 : i32, i32
  }
  func.func @transform_4(%arg0: i32) -> (i32, i32) {
    %c0_i32 = arith.constant 0 : i32
    %c0_i32_0 = arith.constant 0 : i32
    return %arg0, %c0_i32 : i32, i32
  }
}

</mosaic_0001>

<bundles_post_ra>
// kernel: residual_block_forward.7
= control target key start
LH: loop header
LB: loop body
LE: loop exit
PB: predicated region body
PF: predicated region fallthrough
CT: control target
= control target key end

     0   :  { %s1376_s15 = smov 0   ;;  %s1811_s0 = inlined_call_operand.vmem [shape: f32[768,64], index: 0, kind: input, shape index: {}]   ;;  %s1812_s1 = inlined_call_operand.vmem [shape: f32[768,64], index: 1, kind: input, shape index: {}]   ;;  %s1813_s2 = inlined_call_operand.vmem [shape: f32[64,32], index: 2, kind: input, shape index: {}]   ;;  %s1814_s3 = inlined_call_operand.vmem [shape: f32[768,32], index: 3, kind: input, shape index: {}, may-alias: {3,4}]   ;;  %s1815_s4 = inlined_call_operand.vmem [shape: f32[768,32], index: 4, kind: output, shape index: {}, may-alias: {3,4}]  }
   0x1 LB: > { %s1040_s16 = sadd.s32 4294967295, %s1349_s15   ;;  %p1044_p0 = scmp.ge.s32.totalorder %s1349_s15, 1  ;;  %s1349_s15 = sphi %s1376_s15, %s14_s15  }
   0x2   : > { %p185_p1 = scmp.lt.s32.totalorder %s1349_s15, 4 }
   0x4   : > { %p186_p2 = pnand %p1044_p0, %p185_p1 }
   0x5   : > { %s1045_s21 = sshll.u32 (!%p186_p2), %s1040_s16, 5 }
   0x6   : > { %189 = sbr.rel (%p186_p2) target bundleno = 298 (0x12a), region = 36  ;;  %p222_p3 = scmp.lt.s32.totalorder (!%p186_p2), %s1045_s21, 95 }
   0xb   : > { %v572_v0 = vld [vmem:[%s1813_s2 + $0x38] sm:$0xff]  ;;  %v571_v1 = vld [vmem:[%s1813_s2 + $0x30] sm:$0xff]  ;;  %v570_v2 = vld [vmem:[%s1813_s2 + $0x28] sm:$0xff]  ;;  %s1817_s21 = smov (!%p222_p3, %s1045_s21), 95  ;;  %vm605_vm0 = vcmask 523264   ;;  %vm927_vm1 = vcmask 261120  }
   0xc   : > { %1127 = vmatprep.subr.mxu0 %v572_v0  ;;  %1191 = vmatprep.subr.mxu1 %v572_v0  ;;  %v569_v3 = vld [vmem:[%s1813_s2 + $0x20] sm:$0xff]  ;;  %s1396_s26 = sshll.u32 %s1817_s21, 3  ;;  %v568_v4 = vld [vmem:[%s1813_s2 + $0x18] sm:$0xff]  ;;  %v567_v6 = vld [vmem:[%s1813_s2 + $0x10] sm:$0xff] }
   0xd   : > { %1128 = vmatpush3.msra.mxu0 %v572_v0  ;;  %1199 = vmatpush3.msra.mxu1 %v572_v0  ;;  %s1405_s5 = scalar_lea.vmem %s1812_s1, %s1396_s26  ;;  %v566_v13 = vld [vmem:[%s1813_s2 + $0x8] sm:$0xff]  ;;  %v565_v22 = vld [vmem:[%s1813_s2] sm:$0xff]  ;;  %s1517_s14 = scalar_lea.vmem %s1811_s0, %s1396_s26 }
   0xe   : > { %1129 = vmatprep.subr.mxu0 %v571_v1  ;;  %1192 = vmatprep.subr.mxu1 %v571_v1  ;;  %v1408_v5 = vld [vmem:[%s1405_s5] sm:$0xff]  ;;  %v1418_v9 = vld [vmem:[%s1405_s5 + $0x8] sm:$0xff]  ;;  %v1430_v16 = vld [vmem:[%s1405_s5 + $0x10] sm:$0xff]  ;;  %s1653_s18 = scalar_lea.vmem %s1814_s3, %s1396_s26  ;;  %s1716_s21 = scalar_lea.vmem %s1815_s4, %s1396_s26 }
   0xf   : > { %1130 = vmatpush3.msra.mxu0 %v571_v1  ;;  %1200 = vmatpush3.msra.mxu1 %v571_v1  ;;  %v309_v7 = vsub.f32 0.0, %v1408_v5  ;;  %v1415_v8 = vld [vmem:[%s1405_s5 + $0x80] sm:$0xff]  ;;  %v310_v11 = vsub.f32 0.0, %v1418_v9  ;;  %v1423_v12 = vld [vmem:[%s1405_s5 + $0x88] sm:$0xff]  ;;  %v1433_v17 = vld [vmem:[%s1405_s5 + $0x90] sm:$0xff]  ;;  %v311_v20 = vsub.f32 0.0, %v1430_v16 }
  0x10   : > { %1131 = vmatprep.subr.mxu0 %v570_v2  ;;  %1193 = vmatprep.subr.mxu1 %v570_v2  ;;  %v325_v10 = vsub.f32 0.0, %v1415_v8  ;;  %v326_v15 = vsub.f32 0.0, %v1423_v12  ;;  %v327_v21 = vsub.f32 0.0, %v1433_v17  ;;  %v1441_v24 = vld [vmem:[%s1405_s5 + $0x18] sm:$0xff]  ;;  %v1449_v30 = vld [vmem:[%s1405_s5 + $0x20] sm:$0xff]  ;;  %v1456_v34 = vld [vmem:[%s1405_s5 + $0x28] sm:$0xff] }
  0x11   : > { %1132 = vmatpush3.msra.mxu0 %v570_v2  ;;  %1201 = vmatpush3.msra.mxu1 %v570_v2  ;;  %v341_v14 = vmul.f32 1.442695, %v309_v7  ;;  %v343_v19 = vmul.f32 1.442695, %v310_v11  ;;  %v345_v25 = vmul.f32 1.442695, %v311_v20 }
  0x12   : > { %1133 = vmatprep.subr.mxu0 %v569_v3  ;;  %1194 = vmatprep.subr.mxu1 %v569_v3  ;;  %v373_v18 = vmul.f32 1.442695, %v325_v10  ;;  %v375_v23 = vmul.f32 1.442695, %v326_v15  ;;  %v377_v26 = vmul.f32 1.442695, %v327_v21 }
  0x13   : > { %1134 = vmatpush3.msra.mxu0 %v569_v3  ;;  %1202 = vmatpush3.msra.mxu1 %v569_v3  ;;  %1215 = vpow2.f32 %v341_v14  ;;  %v312_v27 = vsub.f32 0.0, %v1441_v24  ;;  %v1445_v28 = vld [vmem:[%s1405_s5 + $0x98] sm:$0xff]  ;;  %v313_v32 = vsub.f32 0.0, %v1449_v30  ;;  %v1453_v33 = vld [vmem:[%s1405_s5 + $0xa0] sm:$0xff]  ;;  %v314_v37 = vsub.f32 0.0, %v1456_v34  ;;  %v1461_v38 = vld [vmem:[%s1405_s5 + $0xa8] sm:$0xff] }
  0x14   : > { %1135 = vmatprep.subr.mxu0 %v568_v4  ;;  %1195 = vmatprep.subr.mxu1 %v568_v4  ;;  %1217 = vpow2.f32 %v373_v18  ;;  %v328_v29 = vsub.f32 0.0, %v1445_v28  ;;  %v329_v36 = vsub.f32 0.0, %v1453_v33  ;;  %v330_v40 = vsub.f32 0.0, %v1461_v38  ;;  %v1465_v41 = vld [vmem:[%s1405_s5 + $0x30] sm:$0xff]  ;;  %v1473_v48 = vld [vmem:[%s1405_s5 + $0x38] sm:$0xff]  ;;  %v1481_v63 = vld [vmem:[%s1405_s5 + $0x40] sm:$0xff] }
  0x15   : > { %1136 = vmatpush3.msra.mxu0 %v568_v4  ;;  %1203 = vmatpush3.msra.mxu1 %v568_v4  ;;  %1219 = vpow2.f32 %v343_v19  ;;  %v347_v31 = vmul.f32 1.442695, %v312_v27  ;;  %v349_v39 = vmul.f32 1.442695, %v313_v32  ;;  %v351_v43 = vmul.f32 1.442695, %v314_v37 }
  0x16   : > { %1137 = vmatprep.subr.mxu0 %v567_v6  ;;  %1196 = vmatprep.subr.mxu1 %v567_v6  ;;  %1221 = vpow2.f32 %v375_v23  ;;  %v379_v35 = vmul.f32 1.442695, %v328_v29  ;;  %v381_v42 = vmul.f32 1.442695, %v329_v36  ;;  %v315_v44 = vsub.f32 0.0, %v1465_v41  ;;  %v1469_v45 = vld [vmem:[%s1405_s5 + $0xb0] sm:$0xff] }
  0x17   : > { %1138 = vmatpush3.msra.mxu0 %v567_v6  ;;  %1204 = vmatpush3.msra.mxu1 %v567_v6  ;;  %1223 = vpow2.f32 %v345_v25  ;;  %v383_v46 = vmul.f32 1.442695, %v330_v40  ;;  %v331_v47 = vsub.f32 0.0, %v1469_v45  ;;  %v316_v50 = vsub.f32 0.0, %v1473_v48  ;;  %v1477_v51 = vld [vmem:[%s1405_s5 + $0xb8] sm:$0xff]  ;;  %v1484_v4 = vld [vmem:[%s1405_s5 + $0xc0] sm:$0xff] }
  0x18   : > { %1139 = vmatprep.subr.mxu0 %v566_v13  ;;  %1197 = vmatprep.subr.mxu1 %v566_v13  ;;  %1225 = vpow2.f32 %v377_v26  ;;  %v353_v49 = vmul.f32 1.442695, %v315_v44  ;;  %v332_v53 = vsub.f32 0.0, %v1477_v51  ;;  %v317_v10 = vsub.f32 0.0, %v1481_v63  ;;  %v1488_v11 = vld [vmem:[%s1405_s5 + $0x48] sm:$0xff]  ;;  %v1495_v21 = vld [vmem:[%s1405_s5 + $0x50] sm:$0xff] }
  0x19   : > { %1140 = vmatpush3.msra.mxu0 %v566_v13  ;;  %1205 = vmatpush3.msra.mxu1 %v566_v13  ;;  %1227 = vpow2.f32 %v347_v31  ;;  %v385_v52 = vmul.f32 1.442695, %v331_v47  ;;  %v355_v54 = vmul.f32 1.442695, %v316_v50  ;;  %v333_v19 = vsub.f32 0.0, %v1484_v4  ;;  %v1492_v20 = vld [vmem:[%s1405_s5 + $0xc8] sm:$0xff] }
  0x1a   : > { %1141 = vmatprep.subr.mxu0 %v565_v22  ;;  %1198 = vmatprep.subr.mxu1 %v565_v22  ;;  %1229 = vpow2.f32 %v379_v35  ;;  %v387_v55 = vmul.f32 1.442695, %v332_v53  ;;  %v318_v25 = vsub.f32 0.0, %v1488_v11  ;;  %v1499_v26 = vld [vmem:[%s1405_s5 + $0xd0] sm:$0xff]  ;;  %v357_v31 = vmul.f32 1.442695, %v317_v10 }
  0x1b   : > { %1142 = vmatpush3.msra.mxu0 %v565_v22  ;;  %1206 = vmatpush3.msra.mxu1 %v565_v22  ;;  %1231 = vpow2.f32 %v349_v39  ;;  %v1502_v32 = vld [vmem:[%s1405_s5 + $0x58] sm:$0xff]  ;;  %v334_v37 = vsub.f32 0.0, %v1492_v20  ;;  %v319_v39 = vsub.f32 0.0, %v1495_v21  ;;  %v335_v47 = vsub.f32 0.0, %v1499_v26  ;;  %v1531_v10 = vld [vmem:[%s1405_s5 + $0xe8] sm:$0xff] }
  0x1c   : > { %1233 = vpow2.f32 %v381_v42  ;;  %v1507_v40 = vld [vmem:[%s1405_s5 + $0xd8] sm:$0xff]  ;;  %v1510_v42 = vld [vmem:[%s1405_s5 + $0x60] sm:$0xff]  ;;  %v320_v53 = vsub.f32 0.0, %v1502_v32 }
  0x1d   : > { %1235 = vpow2.f32 %v351_v43 }
  0x1e   : > { %1237 = vpow2.f32 %v383_v46  ;;  %v389_v46 = vmul.f32 1.442695, %v333_v19 }
  0x1f   : > { %1239 = vpow2.f32 %v353_v49 }
  0x20   : > { %v1216_v56 = vpop.eup %1215  ;;  %1241 = vpow2.f32 %v385_v52  ;;  %v359_v52 = vmul.f32 1.442695, %v318_v25  ;;  %v246_v25 = vld [vmem:[%s1517_s14 + $0x8] sm:$0xff] }
  0x21   : > { %v1218_v57 = vpop.eup %1217  ;;  %v405_v58 = vadd.f32 1.0, %v1216_v56  ;;  %1243 = vpow2.f32 %v355_v54  ;;  %v1521_v54 = vld [vmem:[%s1405_s5 + $0xe0] sm:$0xff] }
  0x22   : > { %v1220_v59 = vpop.eup %1219  ;;  %v421_v60 = vadd.f32 1.0, %v1218_v57  ;;  %1245 = vpow2.f32 %v387_v55  ;;  %v336_v57 = vsub.f32 0.0, %v1507_v40 }
  0x23   : > { %v1222_v61 = vpop.eup %1221  ;;  %1247 = vrcp.f32 %v405_v58  ;;  %v406_v62 = vadd.f32 1.0, %v1220_v59  ;;  %v321_v58 = vsub.f32 0.0, %v1510_v42  ;;  %v1526_v59 = vld [vmem:[%s1405_s5 + $0x68] sm:$0xff] }
  0x24   : > { %v1224_v0 = vpop.eup %1223  ;;  %1249 = vrcp.f32 %v421_v60  ;;  %v422_v1 = vadd.f32 1.0, %v1222_v61  ;;  %v322_v19 = vsub.f32 0.0, %v1526_v59 }
  0x25   : > { %v1226_v2 = vpop.eup %1225  ;;  %1251 = vrcp.f32 %v406_v62  ;;  %v407_v3 = vadd.f32 1.0, %v1224_v0  ;;  %v391_v62 = vmul.f32 1.442695, %v334_v37  ;;  %v361_v0 = vmul.f32 1.442695, %v319_v39  ;;  %v262_v37 = vld [vmem:[%s1517_s14 + $0x88] sm:$0xff] }
  0x26   : > { %v1228_v6 = vpop.eup %1227  ;;  %1253 = vrcp.f32 %v422_v1  ;;  %v423_v7 = vadd.f32 1.0, %v1226_v2  ;;  %v245_v2 = vld [vmem:[%s1517_s14] sm:$0xff]  ;;  %v338_v39 = vsub.f32 0.0, %v1531_v10 }
  0x27   : > { %v1230_v13 = vpop.eup %1229  ;;  %1255 = vrcp.f32 %v407_v3  ;;  %v408_v14 = vadd.f32 1.0, %v1228_v6  ;;  %v393_v6 = vmul.f32 1.442695, %v335_v47 }
  0x28   : > { %v1232_v15 = vpop.eup %1231  ;;  %1257 = vrcp.f32 %v423_v7  ;;  %v424_v18 = vadd.f32 1.0, %v1230_v13  ;;  %v337_v7 = vsub.f32 0.0, %v1521_v54 }
  0x29   : > { %v1234_v22 = vpop.eup %1233  ;;  %1259 = vrcp.f32 %v408_v14  ;;  %v409_v23 = vadd.f32 1.0, %v1232_v15  ;;  %v261_v15 = vld [vmem:[%s1517_s14 + $0x80] sm:$0xff] }
  0x2a   : > { %v1236_v27 = vpop.eup %1235  ;;  %1261 = vrcp.f32 %v424_v18  ;;  %v425_v29 = vadd.f32 1.0, %v1234_v22  ;;  %v363_v18 = vmul.f32 1.442695, %v320_v53 }
  0x2b   : > { %v1238_v35 = vpop.eup %1237  ;;  %1263 = vrcp.f32 %v409_v23  ;;  %v410_v36 = vadd.f32 1.0, %v1236_v27  ;;  %v395_v27 = vmul.f32 1.442695, %v336_v57  ;;  %v1552_v57 = vld [vmem:[%s1405_s5 + $0xf0] sm:$0xff] }
  0x2c   : > { %v1240_v43 = vpop.eup %1239  ;;  %1265 = vrcp.f32 %v425_v29  ;;  %v426_v44 = vadd.f32 1.0, %v1238_v35  ;;  %v1538_v29 = vmul.f32 1.442695, %v321_v58 }
  0x2d   : > { %v1242_v49 = vpop.eup %1241  ;;  %1267 = vrcp.f32 %v410_v36  ;;  %v411_v50 = vadd.f32 1.0, %v1240_v43  ;;  %v1544_v43 = vld [vmem:[%s1405_s5 + $0x70] sm:$0xff] }
  0x2e   : > { %v1244_v55 = vpop.eup %1243  ;;  %1269 = vrcp.f32 %v426_v44  ;;  %v427_v56 = vadd.f32 1.0, %v1242_v49  ;;  %v247_v49 = vld [vmem:[%s1517_s14 + $0x10] sm:$0xff] }
  0x2f   : > { %v1246_v60 = vpop.eup %1245  ;;  %1271 = vrcp.f32 %v411_v50  ;;  %v412_v61 = vadd.f32 1.0, %v1244_v55  ;;  %v397_v50 = vmul.f32 1.442695, %v337_v7  ;;  %v263_v55 = vld [vmem:[%s1517_s14 + $0x90] sm:$0xff]  ;;  %v399_v7 = vmul.f32 1.442695, %v338_v39 }
  0x30   : > { %v1248_v1 = vpop.eup %1247  ;;  %1273 = vrcp.f32 %v427_v56  ;;  %v428_v3 = vadd.f32 1.0, %v1246_v60  ;;  %v367_v56 = vmul.f32 1.442695, %v322_v19  ;;  %v248_v60 = vld [vmem:[%s1517_s14 + $0x18] sm:$0xff]  ;;  %v339_v19 = vsub.f32 0.0, %v1552_v57 }
  0x31   : > { %v1250_v13 = vpop.eup %1249  ;;  %v501_v14 = vmul.f32 %v1248_v1, %v1408_v5  ;;  %1275 = vrcp.f32 %v412_v61  ;;  %v323_v61 = vsub.f32 0.0, %v1544_v43  ;;  %v1559_v1 = vld [vmem:[%s1405_s5 + $0x78] sm:$0xff] }
  0x32   : > { %v1252_v22 = vpop.eup %1251  ;;  %v517_v23 = vmul.f32 %v1250_v13, %v1415_v8  ;;  %1277 = vrcp.f32 %v428_v3  ;;  %v264_v3 = vld [vmem:[%s1517_s14 + $0x98] sm:$0xff] }
  0x33   : > { %v1254_v35 = vpop.eup %1253  ;;  %v533_v36 = vmul.f32 %v501_v14, %v245_v2  ;;  %v502_v5 = vmul.f32 %v1252_v22, %v1418_v9  ;;  %1279 = vpow2.f32 %v357_v31  ;;  %v1565_v13 = vld [vmem:[%s1405_s5 + $0xf8] sm:$0xff] }
  0x34   : > { %v1256_v44 = vpop.eup %1255  ;;  %v549_v47 = vmul.f32 %v517_v23, %v261_v15  ;;  %v518_v8 = vmul.f32 %v1254_v35, %v1423_v12  ;;  %1281 = vpow2.f32 %v389_v46  ;;  %v249_v15 = vld [vmem:[%s1517_s14 + $0x20] sm:$0xff] }
  0x35   : > { %v1258_v53 = vpop.eup %1257  ;;  %1143 = vmatprep.mubr.msk.f32.mxu0 %vm605_vm0, %v533_v36  ;;  %v534_v9 = vmul.f32 %v502_v5, %v246_v25  ;;  %v503_v31 = vmul.f32 %v1256_v44, %v1430_v16  ;;  %1283 = vpow2.f32 %v359_v52  ;;  %v265_v23 = vld [vmem:[%s1517_s14 + $0xa0] sm:$0xff]  ;;  %v324_v25 = vsub.f32 0.0, %v1559_v1 }
  0x36   : > { %v1260_v58 = vpop.eup %1259  ;;  %1167 = vmatprep.mubr.msk.f32.mxu1 %vm605_vm0, %v549_v47  ;;  %v550_v12 = vmul.f32 %v518_v8, %v262_v37  ;;  %v519_v46 = vmul.f32 %v1258_v53, %v1433_v17  ;;  %1285 = vpow2.f32 %v391_v62  ;;  %v340_v5 = vsub.f32 0.0, %v1565_v13 }
  0x37   : > { %v1262_v16 = vpop.eup %1261  ;;  %1144 = vmatmul.mubr.msk.f32.vlgmr.msra.gmra.mxu0 %vm605_vm0, %v534_v9  ;;  %v535_v52 = vmul.f32 %v503_v31, %v247_v49  ;;  %v504_v2 = vmul.f32 %v1260_v58, %v1441_v24  ;;  %1287 = vpow2.f32 %v361_v0  ;;  %v369_v44 = vmul.f32 1.442695, %v323_v61  ;;  %v267_v31 = vld [vmem:[%s1517_s14 + $0xb0] sm:$0xff] }
  0x38   : > { %v1264_v17 = vpop.eup %1263  ;;  %1168 = vmatmul.mubr.msk.f32.vlgmr.msra.gmra.mxu1 %vm605_vm0, %v550_v12  ;;  %v551_v62 = vmul.f32 %v519_v46, %v263_v55  ;;  %v520_v14 = vmul.f32 %v1262_v16, %v1445_v28  ;;  %1289 = vpow2.f32 %v393_v6  ;;  %v250_v6 = vld [vmem:[%s1517_s14 + $0x28] sm:$0xff]  ;;  %v401_v49 = vmul.f32 1.442695, %v339_v19  ;;  %v268_v16 = vld [vmem:[%s1517_s14 + $0xb8] sm:$0xff] }
  0x39   : > { %v1266_v22 = vpop.eup %1265  ;;  %1146 = vmatprep.mubr.msk.f32.mxu0 %vm605_vm0, %v535_v52  ;;  %v536_v24 = vmul.f32 %v504_v2, %v248_v60  ;;  %v505_v0 = vmul.f32 %v1264_v17, %v1449_v30  ;;  %1291 = vpow2.f32 %v363_v18  ;;  %v266_v18 = vld [vmem:[%s1517_s14 + $0xa8] sm:$0xff] }
  0x3a   : > { %v1268_v35 = vpop.eup %1267  ;;  %1170 = vmatprep.mubr.msk.f32.mxu1 %vm605_vm0, %v551_v62  ;;  %v552_v36 = vmul.f32 %v520_v14, %v264_v3  ;;  %v521_v28 = vmul.f32 %v1266_v22, %v1453_v33  ;;  %1293 = vpow2.f32 %v395_v27  ;;  %v251_v27 = vld [vmem:[%s1517_s14 + $0x30] sm:$0xff] }
  0x3b   : > { %v1270_v37 = vpop.eup %1269  ;;  %1147 = vmatmul.mubr.msk.f32.gmra.mxu0 %vm605_vm0, %v536_v24  ;;  %v537_v39 = vmul.f32 %v505_v0, %v249_v15  ;;  %v506_v30 = vmul.f32 %v1268_v35, %v1456_v34  ;;  %1295 = vpow2.f32 %v1538_v29  ;;  %v371_v29 = vmul.f32 1.442695, %v324_v25 }
  0x3c   : > { %v1272_v47 = vpop.eup %1271  ;;  %1171 = vmatmul.mubr.msk.f32.gmra.mxu1 %vm605_vm0, %v552_v36  ;;  %v553_v8 = vmul.f32 %v521_v28, %v265_v23  ;;  %v522_v33 = vmul.f32 %v1270_v37, %v1461_v38  ;;  %1297 = vpow2.f32 %v397_v50  ;;  %v252_v38 = vld [vmem:[%s1517_s14 + $0x38] sm:$0xff]  ;;  %v403_v50 = vmul.f32 1.442695, %v340_v5 }
  0x3d   : > { %v1274_v53 = vpop.eup %1273  ;;  %1149 = vmatprep.mubr.msk.f32.mxu0 %vm605_vm0, %v537_v39  ;;  %v538_v9 = vmul.f32 %v506_v30, %v250_v6  ;;  %v507_v34 = vmul.f32 %v1272_v47, %v1465_v41  ;;  %1299 = vpow2.f32 %v367_v56 }
  0x3e   : > { %v1276_v55 = vpop.eup %1275  ;;  %1173 = vmatprep.mubr.msk.f32.mxu1 %vm605_vm0, %v553_v8  ;;  %v554_v58 = vmul.f32 %v522_v33, %v266_v18  ;;  %v523_v12 = vmul.f32 %v1274_v53, %v1469_v45  ;;  %1301 = vpow2.f32 %v399_v7 }
  0x3f   : > { %v1278_v46 = vpop.eup %1277  ;;  %1150 = vmatmul.mubr.msk.f32.gmra.mxu0 %vm605_vm0, %v538_v9  ;;  %v539_v60 = vmul.f32 %v507_v34, %v251_v27  ;;  %v508_v61 = vmul.f32 %v1276_v55, %v1473_v48  ;;  %1303 = vpow2.f32 %v369_v44  ;;  %v253_v34 = vld [vmem:[%s1517_s14 + $0x40] sm:$0xff] }
  0x40   : > { %v1280_v41 = vpop.eup %1279  ;;  %1174 = vmatmul.mubr.msk.f32.gmra.mxu1 %vm605_vm0, %v554_v58  ;;  %v555_v56 = vmul.f32 %v523_v12, %v267_v31  ;;  %v524_v52 = vmul.f32 %v1278_v46, %v1477_v51  ;;  %1305 = vpow2.f32 %v401_v49  ;;  %v269_v58 = vld [vmem:[%s1517_s14 + $0xc0] sm:$0xff] }
  0x41   : > { %v1282_v2 = vpop.eup %1281  ;;  %1152 = vmatprep.mubr.msk.f32.mxu0 %vm605_vm0, %v539_v60  ;;  %v540_v45 = vmul.f32 %v508_v61, %v252_v38  ;;  %v413_v3 = vadd.f32 1.0, %v1280_v41  ;;  %1307 = vpow2.f32 %v371_v29 }
  0x42   : > { %v1284_v7 = vpop.eup %1283  ;;  %1176 = vmatprep.mubr.msk.f32.mxu1 %vm605_vm0, %v555_v56  ;;  %v556_v17 = vmul.f32 %v524_v52, %v268_v16  ;;  %v429_v48 = vadd.f32 1.0, %v1282_v2  ;;  %1309 = vpow2.f32 %v403_v50  ;;  %v254_v50 = vld [vmem:[%s1517_s14 + $0x48] sm:$0xff] }
  0x43   : > { %v1286_v62 = vpop.eup %1285  ;;  %1153 = vmatmul.mubr.msk.f32.gmra.mxu0 %vm605_vm0, %v540_v45  ;;  %1311 = vrcp.f32 %v413_v3  ;;  %v414_v14 = vadd.f32 1.0, %v1284_v7  ;;  %v270_v16 = vld [vmem:[%s1517_s14 + $0xc8] sm:$0xff]  ;;  %v271_v3 = vld [vmem:[%s1517_s14 + $0xd0] sm:$0xff] }
  0x44   : > { %v1288_v15 = vpop.eup %1287  ;;  %1177 = vmatmul.mubr.msk.f32.gmra.mxu1 %vm605_vm0, %v556_v17  ;;  %1313 = vrcp.f32 %v429_v48  ;;  %v430_v51 = vadd.f32 1.0, %v1286_v62  ;;  %v256_v48 = vld [vmem:[%s1517_s14 + $0x58] sm:$0xff] }
  0x45   : > { %v1290_v19 = vpop.eup %1289  ;;  %1315 = vrcp.f32 %v414_v14  ;;  %v415_v22 = vadd.f32 1.0, %v1288_v15  ;;  %v272_v15 = vld [vmem:[%s1517_s14 + $0xd8] sm:$0xff] }
  0x46   : > { %v1292_v24 = vpop.eup %1291  ;;  %1317 = vrcp.f32 %v430_v51  ;;  %v431_v0 = vadd.f32 1.0, %v1290_v19 }
  0x47   : > { %v1294_v23 = vpop.eup %1293  ;;  %1319 = vrcp.f32 %v415_v22  ;;  %v416_v25 = vadd.f32 1.0, %v1292_v24  ;;  %v257_v22 = vld [vmem:[%s1517_s14 + $0x60] sm:$0xff] }
  0x48   : > { %v1296_v35 = vpop.eup %1295  ;;  %1321 = vrcp.f32 %v431_v0  ;;  %v432_v36 = vadd.f32 1.0, %v1294_v23  ;;  %v273_v23 = vld [vmem:[%s1517_s14 + $0xe0] sm:$0xff] }
  0x49   : > { %v1298_v28 = vpop.eup %1297  ;;  %1323 = vrcp.f32 %v416_v25  ;;  %v417_v6 = vadd.f32 1.0, %v1296_v35 }
  0x4a   : > { %v1300_v5 = vpop.eup %1299  ;;  %1325 = vrcp.f32 %v432_v36  ;;  %v433_v37 = vadd.f32 1.0, %v1298_v28  ;;  %v258_v36 = vld [vmem:[%s1517_s14 + $0x68] sm:$0xff] }
  0x4b   : > { %v1302_v39 = vpop.eup %1301  ;;  %1327 = vrcp.f32 %v417_v6  ;;  %v418_v30 = vadd.f32 1.0, %v1300_v5  ;;  %v274_v5 = vld [vmem:[%s1517_s14 + $0xe8] sm:$0xff] }
  0x4c   : > { %v1304_v18 = vpop.eup %1303  ;;  %1329 = vrcp.f32 %v433_v37  ;;  %v434_v44 = vadd.f32 1.0, %v1302_v39 }
  0x4d   : > { %v1306_v47 = vpop.eup %1305  ;;  %1331 = vrcp.f32 %v418_v30  ;;  %v419_v8 = vadd.f32 1.0, %v1304_v18  ;;  %v259_v30 = vld [vmem:[%s1517_s14 + $0x70] sm:$0xff] }
  0x4e   : > { %v1308_v33 = vpop.eup %1307  ;;  %1333 = vrcp.f32 %v434_v44  ;;  %v435_v27 = vadd.f32 1.0, %v1306_v47  ;;  %v275_v47 = vld [vmem:[%s1517_s14 + $0xf0] sm:$0xff] }
  0x4f   : > { %v1310_v49 = vpop.eup %1309  ;;  %1335 = vrcp.f32 %v419_v8  ;;  %v420_v53 = vadd.f32 1.0, %v1308_v33 }
  0x50   : > { %v1312_v9 = vpop.eup %1311  ;;  %1337 = vrcp.f32 %v435_v27  ;;  %v436_v31 = vadd.f32 1.0, %v1310_v49  ;;  %v260_v27 = vld [vmem:[%s1517_s14 + $0x78] sm:$0xff] }
  0x51   : > { %v1314_v29 = vpop.eup %1313  ;;  %v509_v55 = vmul.f32 %v1312_v9, %v1481_v63  ;;  %1339 = vrcp.f32 %v420_v53  ;;  %v255_v63 = vld [vmem:[%s1517_s14 + $0x50] sm:$0xff]  ;;  %v276_v9 = vld [vmem:[%s1517_s14 + $0xf8] sm:$0xff] }
  0x52   : > { %v1316_v12 = vpop.eup %1315  ;;  %v525_v38 = vmul.f32 %v1314_v29, %v1484_v4  ;;  %1341 = vrcp.f32 %v436_v31  ;;  %v573_v29 = vld [vmem:[%s1653_s18] sm:$0xff] }
  0x53   : > { %v1318_v46 = vpop.eup %1317  ;;  %v541_v60 = vmul.f32 %v509_v55, %v253_v34  ;;  %v510_v61 = vmul.f32 %v1316_v12, %v1488_v11  ;;  %v589_v55 = vld [vmem:[%s1653_s18 + $0x80] sm:$0xff]  ;;  %v592_v12 = vld [vmem:[%s1653_s18 + $0x98] sm:$0xff] }
  0x54   : > { %v1320_v41 = vpop.eup %1319  ;;  %v557_v56 = vmul.f32 %v525_v38, %v269_v58  ;;  %v526_v52 = vmul.f32 %v1318_v46, %v1492_v20  ;;  %v576_v58 = vld [vmem:[%s1653_s18 + $0x18] sm:$0xff]  ;;  %v575_v38 = vld [vmem:[%s1653_s18 + $0x10] sm:$0xff]  ;;  %v578_v46 = vld [vmem:[%s1653_s18 + $0x28] sm:$0xff] }
  0x55   : > { %v1322_v2 = vpop.eup %1321  ;;  %1155 = vmatprep.mubr.msk.f32.mxu0 %vm605_vm0, %v541_v60  ;;  %v542_v45 = vmul.f32 %v510_v61, %v254_v50  ;;  %v511_v4 = vmul.f32 %v1320_v41, %v1495_v21  ;;  %v591_v50 = vld [vmem:[%s1653_s18 + $0x90] sm:$0xff]  ;;  %v594_v60 = vld [vmem:[%s1653_s18 + $0xa8] sm:$0xff]  ;;  %v577_v61 = vld [vmem:[%s1653_s18 + $0x20] sm:$0xff] }
  0x56   : > { %v1324_v7 = vpop.eup %1323  ;;  %1179 = vmatprep.mubr.msk.f32.mxu1 %vm605_vm0, %v557_v56  ;;  %v558_v17 = vmul.f32 %v526_v52, %v270_v16  ;;  %v527_v11 = vmul.f32 %v1322_v2, %v1499_v26  ;;  %v593_v16 = vld [vmem:[%s1653_s18 + $0xa0] sm:$0xff]  ;;  %v580_v41 = vld [vmem:[%s1653_s18 + $0x38] sm:$0xff]  ;;  %v579_v52 = vld [vmem:[%s1653_s18 + $0x30] sm:$0xff] }
  0x57   : > { %v1326_v62 = vpop.eup %1325  ;;  %1156 = vmatmul.mubr.msk.f32.gmra.mxu0 %vm605_vm0, %v542_v45  ;;  %v543_v20 = vmul.f32 %v511_v4, %v255_v63  ;;  %v512_v14 = vmul.f32 %v1324_v7, %v1502_v32  ;;  %v596_v56 = vld [vmem:[%s1653_s18 + $0xb8] sm:$0xff]  ;;  %v1671_v63 = vld [vmem:[%s1653_s18 + $0xb0] sm:$0xff]  ;;  %v1674_v2 = vld [vmem:[%s1653_s18 + $0x48] sm:$0xff] }
  0x58   : > { %v1328_v51 = vpop.eup %1327  ;;  %1180 = vmatmul.mubr.msk.f32.gmra.mxu1 %vm605_vm0, %v558_v17  ;;  %v559_v21 = vmul.f32 %v527_v11, %v271_v3  ;;  %v528_v19 = vmul.f32 %v1326_v62, %v1507_v40  ;;  %v1677_v45 = vld [vmem:[%s1653_s18 + $0xc8] sm:$0xff]  ;;  %v1680_v4 = vld [vmem:[%s1653_s18 + $0x40] sm:$0xff]  ;;  %v1686_v7 = vld [vmem:[%s1653_s18 + $0x58] sm:$0xff] }
  0x59   : > { %v1330_v24 = vpop.eup %1329  ;;  %1158 = vmatprep.mubr.msk.f32.mxu0 %vm605_vm0, %v543_v20  ;;  %v544_v26 = vmul.f32 %v512_v14, %v256_v48  ;;  %v513_v0 = vmul.f32 %v1328_v51, %v1510_v42  ;;  %v1683_v3 = vld [vmem:[%s1653_s18 + $0xc0] sm:$0xff]  ;;  %v1689_v17 = vld [vmem:[%s1653_s18 + $0xd8] sm:$0xff]  ;;  %v1692_v11 = vld [vmem:[%s1653_s18 + $0x50] sm:$0xff] }
  0x5a   : > { %v1332_v25 = vpop.eup %1331  ;;  %1182 = vmatprep.mubr.msk.f32.mxu1 %vm605_vm0, %v559_v21  ;;  %v560_v32 = vmul.f32 %v528_v19, %v272_v15  ;;  %v529_v35 = vmul.f32 %v1330_v24, %v1521_v54  ;;  %v1695_v48 = vld [vmem:[%s1653_s18 + $0xd0] sm:$0xff]  ;;  %v1698_v62 = vld [vmem:[%s1653_s18 + $0x68] sm:$0xff]  ;;  %v1704_v14 = vld [vmem:[%s1653_s18 + $0x60] sm:$0xff] }
  0x5b   : > { %v1334_v28 = vpop.eup %1333  ;;  %1159 = vmatmul.mubr.msk.f32.gmra.mxu0 %vm605_vm0, %v544_v26  ;;  %v545_v40 = vmul.f32 %v513_v0, %v257_v22  ;;  %v514_v6 = vmul.f32 %v1332_v25, %v1526_v59  ;;  %v1701_v20 = vld [vmem:[%s1653_s18 + $0xe8] sm:$0xff]  ;;  %v1707_v15 = vld [vmem:[%s1653_s18 + $0xe0] sm:$0xff]  ;;  %v1710_v51 = vld [vmem:[%s1653_s18 + $0x78] sm:$0xff] }
  0x5c   : > { %v1336_v37 = vpop.eup %1335  ;;  %1183 = vmatmul.mubr.msk.f32.gmra.mxu1 %vm605_vm0, %v560_v32  ;;  %v561_v42 = vmul.f32 %v529_v35, %v273_v23  ;;  %v530_v39 = vmul.f32 %v1334_v28, %v1531_v10  ;;  %v1719_v19 = vld [vmem:[%s1653_s18 + $0xf8] sm:$0xff]  ;;  %v1722_v22 = vld [vmem:[%s1653_s18 + $0x70] sm:$0xff] }
  0x5d   : > { %v1338_v18 = vpop.eup %1337  ;;  %1161 = vmatprep.mubr.msk.f32.mxu0 %vm605_vm0, %v545_v40  ;;  %v546_v54 = vmul.f32 %v514_v6, %v258_v36  ;;  %v515_v44 = vmul.f32 %v1336_v37, %v1544_v43  ;;  %v1725_v24 = vld [vmem:[%s1653_s18 + $0xf0] sm:$0xff] }
  0x5e   : > { %v1340_v8 = vpop.eup %1339  ;;  %1185 = vmatprep.mubr.msk.f32.mxu1 %vm605_vm0, %v561_v42  ;;  %v562_v59 = vmul.f32 %v530_v39, %v274_v5  ;;  %v531_v33 = vmul.f32 %v1338_v18, %v1552_v57 }
  0x5f   : > { %v1342_v49 = vpop.eup %1341  ;;  %1162 = vmatmul.mubr.msk.f32.gmra.mxu0 %vm605_vm0, %v546_v54  ;;  %v547_v10 = vmul.f32 %v515_v44, %v259_v30  ;;  %v516_v53 = vmul.f32 %v1340_v8, %v1559_v1  ;;  %v574_v1 = vld [vmem:[%s1653_s18 + $0x8] sm:$0xff] }
  0x60   : > { %1186 = vmatmul.mubr.msk.f32.gmra.mxu1 %vm605_vm0, %v562_v59  ;;  %v563_v34 = vmul.f32 %v531_v33, %v275_v47  ;;  %v532_v43 = vmul.f32 %v1342_v49, %v1565_v13  ;;  %v590_v13 = vld [vmem:[%s1653_s18 + $0x88] sm:$0xff] }
  0x61   : > { %1164 = vmatprep.mubr.msk.f32.mxu0 %vm605_vm0, %v547_v10  ;;  %v548_v31 = vmul.f32 %v516_v53, %v260_v27 }
  0x62   : > { %1188 = vmatprep.mubr.msk.f32.mxu1 %vm605_vm0, %v563_v34  ;;  %v564_v57 = vmul.f32 %v532_v43, %v276_v9 }
  0x63   : > { %1165 = vmatmul.mubr.msk.f32.gmra.mxu0 %vm605_vm0, %v548_v31 }
  0x64   : > { %1189 = vmatmul.mubr.msk.f32.gmra.mxu1 %vm605_vm0, %v564_v57 }
  0xf7   : > { %v1145_v21 = vpop.f32.mrf.mxu0 }
  0xf8   : > { %v774_v26 = vadd.f32 %v1145_v21, %v574_v1  ;;  %v1169_v0 = vpop.f32.mrf.mxu1 }
  0xf9   : > { %v854_v23 = vadd.f32 %v1169_v0, %v590_v13  ;;  %v768_v25 = vpop.f32.mrf.mxu0 }
  0xfa   : > { %v769_v32 = vadd.f32 %v768_v25, %v573_v29  ;;  %v848_v35 = vpop.f32.mrf.mxu1  ;;  %929 = vst.msk [vmem:[%s1716_s21 + $0x8] sm:$0xff] %vm927_vm1, %v774_v26 }
  0xfb   : > { %v849_v36 = vadd.f32 %v848_v35, %v589_v55  ;;  %v1148_v28 = vpop.f32.mrf.mxu0  ;;  %945 = vst.msk [vmem:[%s1716_s21 + $0x88] sm:$0xff] %vm927_vm1, %v854_v23 }
  0xfc   : > { %v784_v40 = vadd.f32 %v1148_v28, %v576_v58  ;;  %v1172_v6 = vpop.f32.mrf.mxu1  ;;  %928 = vst.msk [vmem:[%s1716_s21] sm:$0xff] %vm927_vm1, %v769_v32 }
  0xfd   : > { %v864_v5 = vadd.f32 %v1172_v6, %v592_v12  ;;  %v778_v37 = vpop.f32.mrf.mxu0  ;;  %944 = vst.msk [vmem:[%s1716_s21 + $0x80] sm:$0xff] %vm927_vm1, %v849_v36 }
  0xfe   : > { %v779_v42 = vadd.f32 %v778_v37, %v575_v38  ;;  %v858_v39 = vpop.f32.mrf.mxu1  ;;  %931 = vst.msk [vmem:[%s1716_s21 + $0x18] sm:$0xff] %vm927_vm1, %v784_v40 }
  0xff   : > { %v859_v30 = vadd.f32 %v858_v39, %v591_v50  ;;  %v1151_v18 = vpop.f32.mrf.mxu0  ;;  %947 = vst.msk [vmem:[%s1716_s21 + $0x98] sm:$0xff] %vm927_vm1, %v864_v5 }
 0x100   : > { %v794_v54 = vadd.f32 %v1151_v18, %v578_v46  ;;  %v1175_v44 = vpop.f32.mrf.mxu1  ;;  %930 = vst.msk [vmem:[%s1716_s21 + $0x10] sm:$0xff] %vm927_vm1, %v779_v42 }
 0x101   : > { %v874_v47 = vadd.f32 %v1175_v44, %v594_v60  ;;  %v788_v8 = vpop.f32.mrf.mxu0  ;;  %946 = vst.msk [vmem:[%s1716_s21 + $0x90] sm:$0xff] %vm927_vm1, %v859_v30 }
 0x102   : > { %v789_v59 = vadd.f32 %v788_v8, %v577_v61  ;;  %v868_v33 = vpop.f32.mrf.mxu1  ;;  %933 = vst.msk [vmem:[%s1716_s21 + $0x28] sm:$0xff] %vm927_vm1, %v794_v54 }
 0x103   : > { %v869_v27 = vadd.f32 %v868_v33, %v593_v16  ;;  %v1154_v49 = vpop.f32.mrf.mxu0  ;;  %949 = vst.msk [vmem:[%s1716_s21 + $0xa8] sm:$0xff] %vm927_vm1, %v874_v47 }
 0x104   : > { %v804_v10 = vadd.f32 %v1154_v49, %v580_v41  ;;  %v1178_v53 = vpop.f32.mrf.mxu1  ;;  %932 = vst.msk [vmem:[%s1716_s21 + $0x20] sm:$0xff] %vm927_vm1, %v789_v59 }
 0x105   : > { %v884_v9 = vadd.f32 %v1178_v53, %v596_v56  ;;  %v798_v34 = vpop.f32.mrf.mxu0  ;;  %948 = vst.msk [vmem:[%s1716_s21 + $0xa0] sm:$0xff] %vm927_vm1, %v869_v27 }
 0x106   : > { %v799_v43 = vadd.f32 %v798_v34, %v579_v52  ;;  %v878_v31 = vpop.f32.mrf.mxu1  ;;  %935 = vst.msk [vmem:[%s1716_s21 + $0x38] sm:$0xff] %vm927_vm1, %v804_v10 }
 0x107   : > { %v879_v57 = vadd.f32 %v878_v31, %v1671_v63  ;;  %951 = vst.msk [vmem:[%s1716_s21 + $0xb8] sm:$0xff] %vm927_vm1, %v884_v9 }
 0x108   : > { %934 = vst.msk [vmem:[%s1716_s21 + $0x30] sm:$0xff] %vm927_vm1, %v799_v43 }
 0x109   : > { %950 = vst.msk [vmem:[%s1716_s21 + $0xb0] sm:$0xff] %vm927_vm1, %v879_v57 }
 0x117   : > { %v1157_v1 = vpop.f32.mrf.mxu0 }
 0x118   : > { %v814_v13 = vadd.f32 %v1157_v1, %v1674_v2  ;;  %v1181_v29 = vpop.f32.mrf.mxu1 }
 0x119   : > { %v894_v55 = vadd.f32 %v1181_v29, %v1677_v45  ;;  %v808_v58 = vpop.f32.mrf.mxu0 }
 0x11a   : > { %v809_v12 = vadd.f32 %v808_v58, %v1680_v4  ;;  %v888_v38 = vpop.f32.mrf.mxu1  ;;  %937 = vst.msk [vmem:[%s1716_s21 + $0x48] sm:$0xff] %vm927_vm1, %v814_v13 }
 0x11b   : > { %v889_v50 = vadd.f32 %v888_v38, %v1683_v3  ;;  %v1160_v46 = vpop.f32.mrf.mxu0  ;;  %953 = vst.msk [vmem:[%s1716_s21 + $0xc8] sm:$0xff] %vm927_vm1, %v894_v55 }
 0x11c   : > { %v824_v60 = vadd.f32 %v1160_v46, %v1686_v7  ;;  %v1184_v61 = vpop.f32.mrf.mxu1  ;;  %936 = vst.msk [vmem:[%s1716_s21 + $0x40] sm:$0xff] %vm927_vm1, %v809_v12 }
 0x11d   : > { %v904_v16 = vadd.f32 %v1184_v61, %v1689_v17  ;;  %v818_v41 = vpop.f32.mrf.mxu0  ;;  %952 = vst.msk [vmem:[%s1716_s21 + $0xc0] sm:$0xff] %vm927_vm1, %v889_v50 }
 0x11e   : > { %v819_v56 = vadd.f32 %v818_v41, %v1692_v11  ;;  %v898_v52 = vpop.f32.mrf.mxu1  ;;  %939 = vst.msk [vmem:[%s1716_s21 + $0x58] sm:$0xff] %vm927_vm1, %v824_v60 }
 0x11f   : > { %v899_v63 = vadd.f32 %v898_v52, %v1695_v48  ;;  %v1163_v2 = vpop.f32.mrf.mxu0  ;;  %955 = vst.msk [vmem:[%s1716_s21 + $0xd8] sm:$0xff] %vm927_vm1, %v904_v16 }
 0x120   : > { %v834_v45 = vadd.f32 %v1163_v2, %v1698_v62  ;;  %v1187_v4 = vpop.f32.mrf.mxu1  ;;  %938 = vst.msk [vmem:[%s1716_s21 + $0x50] sm:$0xff] %vm927_vm1, %v819_v56 }
 0x121   : > { %v914_v3 = vadd.f32 %v1187_v4, %v1701_v20  ;;  %v828_v7 = vpop.f32.mrf.mxu0  ;;  %954 = vst.msk [vmem:[%s1716_s21 + $0xd0] sm:$0xff] %vm927_vm1, %v899_v63 }
 0x122   : > { %v829_v17 = vadd.f32 %v828_v7, %v1704_v14  ;;  %v908_v11 = vpop.f32.mrf.mxu1  ;;  %941 = vst.msk [vmem:[%s1716_s21 + $0x68] sm:$0xff] %vm927_vm1, %v834_v45 }
 0x123   : > { %v909_v48 = vadd.f32 %v908_v11, %v1707_v15  ;;  %v1166_v62 = vpop.f32.mrf.mxu0  ;;  %957 = vst.msk [vmem:[%s1716_s21 + $0xe8] sm:$0xff] %vm927_vm1, %v914_v3 }
 0x124   : > { %v844_v21 = vadd.f32 %v1166_v62, %v1710_v51  ;;  %v1190_v20 = vpop.f32.mrf.mxu1  ;;  %940 = vst.msk [vmem:[%s1716_s21 + $0x60] sm:$0xff] %vm927_vm1, %v829_v17 }
 0x125   : > { %v924_v26 = vadd.f32 %v1190_v20, %v1719_v19  ;;  %v838_v0 = vpop.f32.mrf.mxu0  ;;  %956 = vst.msk [vmem:[%s1716_s21 + $0xe0] sm:$0xff] %vm927_vm1, %v909_v48 }
 0x126   : > { %v839_v14 = vadd.f32 %v838_v0, %v1722_v22  ;;  %v918_v23 = vpop.f32.mrf.mxu1  ;;  %943 = vst.msk [vmem:[%s1716_s21 + $0x78] sm:$0xff] %vm927_vm1, %v844_v21 }
 0x127   : > { %v919_v15 = vadd.f32 %v918_v23, %v1725_v24  ;;  %959 = vst.msk [vmem:[%s1716_s21 + $0xf8] sm:$0xff] %vm927_vm1, %v924_v26 }
 0x128   : > { %942 = vst.msk [vmem:[%s1716_s21 + $0x70] sm:$0xff] %vm927_vm1, %v839_v14 }
 0x129   : > { %958 = vst.msk [vmem:[%s1716_s21 + $0xf0] sm:$0xff] %vm927_vm1, %v919_v15 }
 0x12a PF: > { %s14_s15 = sadd.s32 1, %s1349_s15  }
 0x12b   : > { %p11_p4 = scmp.ge.s32.totalorder %s14_s15, 5  }
 0x12d   :  { %13 = sbr.rel (!%p11_p4) target bundleno = 1 (0x1), region = 72 }

// kernel: residual_block_forward.5
= control target key start
LH: loop header
LB: loop body
LE: loop exit
PB: predicated region body
PF: predicated region fallthrough
CT: control target
= control target key end

     0   :  { %s1865_s21 = smov 0   ;;  %s1867_s22 = smov 0   ;;  %s2639_s0 = inlined_call_operand.vmem [shape: f32[2,6,64,64], index: 0, kind: input, shape index: {}]   ;;  %s2640_s1 = inlined_call_operand.vmem [shape: f32[4,64], index: 1, kind: input, shape index: {}]   ;;  %s2641_s2 = inlined_call_operand.vmem [shape: f32[1,64], index: 2, kind: input, shape index: {}]   ;;  %s2642_s3 = inlined_call_operand.vmem [shape: f32[64,128], index: 3, kind: input, shape index: {}]   ;;  %s2643_s4 = inlined_call_operand.vmem [shape: f32[1,128], index: 4, kind: input, shape index: {}]   ;;  %s2644_s5 = inlined_call_operand.vmem [shape: f32[2,6,64,64], index: 5, kind: output, shape index: {0}]   ;;  %s2645_s6 = inlined_call_operand.vmem [shape: f32[2,6,64,128], index: 6, kind: output, shape index: {1}]  }
   0x1   :  { %s1869_s23 = smov 0   ;;  %s1871_s24 = smov 0  }
   0x2   :  { %s1873_s25 = smov 0   ;;  %s1875_s26 = smov 0  }
   0x3   :  { %s1877_s27 = smov 0  }
   0x4 LB: > { %s26_s28 = sadd.s32 1, %s1820_s25  ;;  %s29_s29 = sadd.s32 1, %s1824_s26  ;;  %s1828_s27 = sphi %s1877_s27, %s17_s27   ;;  %s1824_s26 = sphi %s1875_s26, %s2652_s26   ;;  %s1820_s25 = sphi %s1873_s25, %s2651_s25   ;;  %s1816_s24 = sphi %s1871_s24, %s2650_s24   ;;  %s1812_s23 = sphi %s1869_s23, %s2649_s23   ;;  %s1808_s22 = sphi %s1867_s22, %s2648_s22   ;;  %s1804_s21 = sphi %s1865_s21, %s2647_s21  }
   0x5   : > { %p27_p0 = scmp.ge.s32.totalorder %s26_s28, 2  ;;  %s1474_s30 = sadd.s32 4294967295, %s1828_s27  }
   0x6   : > { %p45_p1 = scmp.ne.s32.totalorder %s1808_s22, %s1804_s21  ;;  %p46_p2 = scmp.eq.s32.totalorder %s1828_s27, 0 }
   0x7   : > { %s2654_s28 = smov (%p27_p0, %s26_s28), 0  ;;  %s2656_s29 = smov (!%p27_p0, %s29_s29), %s1824_s26 }
   0x8   : > { %p31_p3 = scmp.ge.s32.totalorder %s2656_s29, 2  ;;  %p161_p4 = scmp.eq.s32.totalorder %s1474_s30, 3 }
   0x9   : > { %s34_s7 = ssub.s32 %s1820_s25, %s2654_s28  ;;  %p47_p5 = por %p46_p2, %p45_p1 }
   0xa   : > { %s2658_s29 = smov (%p31_p3, %s2656_s29), 0  ;;  %p1913_p6 = por %p161_p4, %p45_p1 }
   0xb   : > { %s33_s9 = ssub.s32 %s1824_s26, %s2658_s29  ;;  %s38_s11 = sadd.s32 1, %s1808_s22 }
   0xc   : > { %s35_s10 = sor.u32 %s34_s7, %s33_s9  ;;  %p1477_p8 = scmp.ge.s32.totalorder %s1828_s27, 4 }
   0xd   : > { %p36_p7 = scmp.eq.s32.totalorder %s35_s10, 0 }
   0xe   : > { %223 = sbr.rel (%p1477_p8) target bundleno = 39 (0x27), region = 32 }
   0xf   : > { %s1921_s12 = scalar_select %p36_p7, %s1808_s22, %s38_s11  }
  0x13   : > { %226 = sbr.rel (!%p47_p5) target bundleno = 39 (0x27), region = 36  ;;  %s228_s13 = sand.u32 (%p47_p5), 1, %s1808_s22  }
  0x14   : > { %s1617_s14 = smul.u32 (%p47_p5), 192, %s228_s13  ;;  %s1478_s15 = sshll.u32 (%p47_p5), %s1820_s25, 2 }
  0x15   : > { %s1618_s16 = smul.u32 (%p47_p5), 48, %s1824_s26 }
  0x16   : > { %s1935_s7 = scalar_lea.vmem (%p47_p5), [#allocation2], %s1617_s14 }
  0x17   : > { %s233_s17 = sadd.s32 (%p47_p5), %s1618_s16, %s1478_s15 }
  0x18   : > { %s1479_s18 = sshll.u32 %s233_s17, 3 }
  0x19   : > { %s1930_s30 = scalar_lea.vmem %s2639_s0, %s1479_s18 }
  0x1a   : > { %v310_v0 = vld [vmem:[%s1930_s30] sm:$0xff]  ;;  %v312_v1 = vld [vmem:[%s1930_s30 + $0x8] sm:$0xff]  ;;  %v314_v2 = vld [vmem:[%s1930_s30 + $0x10] sm:$0xff] }
  0x1b   : > { %311 = vst [vmem:[%s1935_s7] sm:$0xff] %v310_v0  ;;  %313 = vst [vmem:[%s1935_s7 + $0x8] sm:$0xff] %v312_v1  ;;  %v316_v3 = vld [vmem:[%s1930_s30 + $0x18] sm:$0xff]  ;;  %v318_v4 = vld [vmem:[%s1930_s30 + $0x40] sm:$0xff] }
  0x1c   : > { %315 = vst [vmem:[%s1935_s7 + $0x10] sm:$0xff] %v314_v2  ;;  %v320_v5 = vld [vmem:[%s1930_s30 + $0x48] sm:$0xff]  ;;  %317 = vst [vmem:[%s1935_s7 + $0x18] sm:$0xff] %v316_v3  ;;  %v322_v6 = vld [vmem:[%s1930_s30 + $0x50] sm:$0xff] }
  0x1d   : > { %319 = vst [vmem:[%s1935_s7 + $0x20] sm:$0xff] %v318_v4  ;;  %321 = vst [vmem:[%s1935_s7 + $0x28] sm:$0xff] %v320_v5  ;;  %v324_v7 = vld [vmem:[%s1930_s30 + $0x58] sm:$0xff]  ;;  %v326_v8 = vld [vmem:[%s1930_s30 + $0x80] sm:$0xff] }
  0x1e   : > { %323 = vst [vmem:[%s1935_s7 + $0x30] sm:$0xff] %v322_v6  ;;  %325 = vst [vmem:[%s1935_s7 + $0x38] sm:$0xff] %v324_v7  ;;  %v328_v9 = vld [vmem:[%s1930_s30 + $0x88] sm:$0xff]  ;;  %v330_v10 = vld [vmem:[%s1930_s30 + $0x90] sm:$0xff] }
  0x1f   : > { %327 = vst [vmem:[%s1935_s7 + $0x40] sm:$0xff] %v326_v8  ;;  %v332_v11 = vld [vmem:[%s1930_s30 + $0x98] sm:$0xff]  ;;  %329 = vst [vmem:[%s1935_s7 + $0x48] sm:$0xff] %v328_v9  ;;  %v334_v12 = vld [vmem:[%s1930_s30 + $0xc0] sm:$0xff] }
  0x20   : > { %331 = vst [vmem:[%s1935_s7 + $0x50] sm:$0xff] %v330_v10  ;;  %333 = vst [vmem:[%s1935_s7 + $0x58] sm:$0xff] %v332_v11  ;;  %v336_v13 = vld [vmem:[%s1930_s30 + $0xc8] sm:$0xff]  ;;  %v338_v14 = vld [vmem:[%s1930_s30 + $0xd0] sm:$0xff] }
  0x21   : > { %335 = vst [vmem:[%s1935_s7 + $0x60] sm:$0xff] %v334_v12  ;;  %337 = vst [vmem:[%s1935_s7 + $0x68] sm:$0xff] %v336_v13  ;;  %v340_v15 = vld [vmem:[%s1930_s30 + $0xd8] sm:$0xff]  ;;  %v342_v16 = vld [vmem:[%s1930_s30 + $0x100] sm:$0xff] }
  0x22   : > { %339 = vst [vmem:[%s1935_s7 + $0x70] sm:$0xff] %v338_v14  ;;  %v344_v17 = vld [vmem:[%s1930_s30 + $0x108] sm:$0xff]  ;;  %341 = vst [vmem:[%s1935_s7 + $0x78] sm:$0xff] %v340_v15  ;;  %v346_v18 = vld [vmem:[%s1930_s30 + $0x110] sm:$0xff] }
  0x23   : > { %343 = vst [vmem:[%s1935_s7 + $0x80] sm:$0xff] %v342_v16  ;;  %345 = vst [vmem:[%s1935_s7 + $0x88] sm:$0xff] %v344_v17  ;;  %v348_v19 = vld [vmem:[%s1930_s30 + $0x118] sm:$0xff]  ;;  %v350_v20 = vld [vmem:[%s1930_s30 + $0x140] sm:$0xff] }
  0x24   : > { %347 = vst [vmem:[%s1935_s7 + $0x90] sm:$0xff] %v346_v18  ;;  %349 = vst [vmem:[%s1935_s7 + $0x98] sm:$0xff] %v348_v19  ;;  %v352_v21 = vld [vmem:[%s1930_s30 + $0x148] sm:$0xff]  ;;  %v354_v22 = vld [vmem:[%s1930_s30 + $0x150] sm:$0xff] }
  0x25   : > { %351 = vst [vmem:[%s1935_s7 + $0xa0] sm:$0xff] %v350_v20  ;;  %v356_v23 = vld [vmem:[%s1930_s30 + $0x158] sm:$0xff]  ;;  %353 = vst [vmem:[%s1935_s7 + $0xa8] sm:$0xff] %v352_v21 }
  0x26   : > { %355 = vst [vmem:[%s1935_s7 + $0xb0] sm:$0xff] %v354_v22  ;;  %357 = vst [vmem:[%s1935_s7 + $0xb8] sm:$0xff] %v356_v23 }
  0x27 PF: > { %p1480_p9 = scmp.ge.s32.totalorder %s1828_s27, 1  ;;  %p362_p10 = scmp.lt.s32.totalorder %s1828_s27, 5 }
  0x29   : > { %p363_p11 = pnand %p1480_p9, %p362_p10 }
  0x2a   : > { %s369_s14 = sand.u32 (!%p363_p11), 1, %s1804_s21  }
  0x2b   : > { %366 = sbr.rel (%p363_p11) target bundleno = 376 (0x178), region = 74 }
  0x2c   : > { %s1991_s15 = smul.u32 (!%p363_p11), 192, %s369_s14 }
  0x2e   : > { %s2015_s11 = scalar_lea.vmem (!%p363_p11), [#allocation2], %s1991_s15  ;;  %s2286_s13 = scalar_lea.vmem (!%p363_p11), [#allocation3], %s1991_s15 }
  0x2f   : > { %s2455_s16 = scalar_lea.vmem (!%p363_p11), [#allocation4], %s1991_s15 }
  0x30   : > { %v806_v24 = vld [vmem:[%s2642_s3 + $0x38] sm:$0xff]  ;;  %v805_v25 = vld [vmem:[%s2642_s3 + $0x30] sm:$0xff]  ;;  %v804_v26 = vld [vmem:[%s2642_s3 + $0x28] sm:$0xff]  ;;  %vm774_vm0 = vcmask 523264   ;;  %s1511_s15 = sshll.u32 (%p1913_p6), %s1812_s23, 2  ;;  %s1620_s17 = smul.u32 (%p1913_p6), 48, %s1816_s24 }
  0x31   : > { %1549 = vmatprep.subr.mxu0 %v806_v24  ;;  %1601 = vmatprep.subr.mxu1 %v806_v24  ;;  %v1999_v27 = vld [vmem:[%s2641_s2] ss:$0 sm:$0xff]  ;;  %v2012_v30 = vld [vmem:[%s2640_s1 + $0x1] ss:$0 sm:$0xff]  ;;  %v2025_v34 = vld [vmem:[%s2640_s1 + $0x2] ss:$0 sm:$0xff] }
  0x32   : > { %1550 = vmatpush3.msra.mxu0 %v806_v24  ;;  %1609 = vmatpush3.msra.mxu1 %v806_v24  ;;  %v803_v28 = vld [vmem:[%s2642_s3 + $0x20] sm:$0xff]  ;;  %v472_v33 = vmul.f32 0.0, %v2012_v30  ;;  %v2028_v35 = vld [vmem:[%s2015_s11 + $0x8] sm:$0xff]  ;;  %v802_v42 = vld [vmem:[%s2642_s3 + $0x18] sm:$0xff]  ;;  %v511_v44 = vmul.f32 0.0, %v2025_v34  ;;  %s1108_s18 = sadd.s32 (%p1913_p6), %s1620_s17, %s1511_s15 }
  0x33   : > { %1551 = vmatprep.subr.mxu0 %v805_v25  ;;  %1602 = vmatprep.subr.mxu1 %v805_v25  ;;  %v2007_v29 = vld [vmem:[%s2640_s1] ss:$0 sm:$0xff]  ;;  %v2037_v37 = vld [vmem:[%s2640_s1 + $0x3] ss:$0 sm:$0xff]  ;;  %v801_v51 = vld [vmem:[%s2642_s3 + $0x10] sm:$0xff]  ;;  %s1512_s19 = sshll.u32 (%p1913_p6), %s1108_s18, 3 }
  0x34   : > { %1552 = vmatpush3.msra.mxu0 %v805_v25  ;;  %1610 = vmatpush3.msra.mxu1 %v805_v25  ;;  %v2018_v31 = vld [vmem:[%s2015_s11] sm:$0xff]  ;;  %v441_v32 = vmul.f32 0.0, %v2007_v29  ;;  %v443_v41 = vmul.f32 %v2007_v29, %v2028_v35  ;;  %v559_v46 = vmul.f32 %v2037_v37, %v2028_v35  ;;  %v2076_v55 = vld [vmem:[%s2015_s11 + $0x28] sm:$0xff]  ;;  %v2108_v8 = vld [vmem:[%s2015_s11 + $0x10] sm:$0xff]  ;;  %s2523_s30 = scalar_lea.vmem (%p1913_p6), %s2644_s5, %s1512_s19 }
  0x35   : > { %1553 = vmatprep.subr.mxu0 %v804_v26  ;;  %1603 = vmatprep.subr.mxu1 %v804_v26  ;;  %v2032_v36 = vmul.f32 %v2012_v30, %v2018_v31  ;;  %v2040_v38 = vld [vmem:[%s2015_s11 + $0x20] sm:$0xff]  ;;  %v442_v40 = vmul.f32 %v2007_v29, %v2018_v31  ;;  %v558_v45 = vmul.f32 %v2037_v37, %v2018_v31  ;;  %v2083_v59 = vld [vmem:[%s2015_s11 + $0x48] sm:$0xff]  ;;  %v2111_v9 = vld [vmem:[%s2015_s11 + $0x30] sm:$0xff] }
  0x36   : > { %v2043_v39 = vld [vmem:[%s2015_s11 + $0x40] sm:$0xff]  ;;  %1554 = vmatpush3.msra.mxu0 %v804_v26  ;;  %1611 = vmatpush3.msra.mxu1 %v804_v26  ;;  %v2053_v43 = vadd.f32 %v1999_v27, %v441_v32  ;;  %v477_v50 = vmul.f32 %v2012_v30, %v2040_v38  ;;  %v800_v60 = vld [vmem:[%s2642_s3 + $0x8] sm:$0xff]  ;;  %v456_v0 = vadd.f32 %v1999_v27, %v443_v41  ;;  %v2118_v13 = vld [vmem:[%s2015_s11 + $0x18] sm:$0xff] }
  0x37   : > { %1555 = vmatprep.subr.mxu0 %v803_v28  ;;  %1604 = vmatprep.subr.mxu1 %v803_v28  ;;  %v416_v47 = vld [vmem:[%s2015_s11 + $0x60] sm:$0xff]  ;;  %v450_v48 = vmul.f32 %v2007_v29, %v2043_v39  ;;  %v455_v49 = vadd.f32 %v1999_v27, %v442_v40  ;;  %v520_v54 = vmul.f32 %v2025_v34, %v2043_v39  ;;  %v2091_v63 = vld [vmem:[%s2015_s11 + $0x68] sm:$0xff]  ;;  %v2127_v18 = vld [vmem:[%s2015_s11 + $0x50] sm:$0xff] }
  0x38   : > { %1556 = vmatpush3.msra.mxu0 %v803_v28  ;;  %1612 = vmatpush3.msra.mxu1 %v803_v28  ;;  %v2070_v52 = vadd.f32 %v472_v33, %v2053_v43  ;;  %v485_v53 = vmul.f32 %v2012_v30, %v416_v47  ;;  %v2080_v58 = vmul.f32 %v2025_v34, %v416_v47  ;;  %v799_v4 = vld [vmem:[%s2642_s3] sm:$0xff]  ;;  %v2131_v21 = vld [vmem:[%s2015_s11 + $0x70] sm:$0xff] }
  0x39   : > { %1557 = vmatprep.subr.mxu0 %v802_v42  ;;  %1605 = vmatprep.subr.mxu1 %v802_v42  ;;  %v463_v56 = vadd.f32 %v1999_v27, %v450_v48  ;;  %v494_v57 = vadd.f32 %v477_v50, %v455_v49  ;;  %v570_v62 = vmul.f32 %v2037_v37, %v416_v47  ;;  %v2154_v47 = vld [vmem:[%s2015_s11 + $0x58] sm:$0xff] }
  0x3a   : > { %1558 = vmatpush3.msra.mxu0 %v802_v42  ;;  %1613 = vmatpush3.msra.mxu1 %v802_v42  ;;  %v532_v61 = vadd.f32 %v511_v44, %v2070_v52  ;;  %v478_v3 = vmul.f32 %v2012_v30, %v2076_v55  ;;  %v521_v7 = vmul.f32 %v2025_v34, %v2083_v59  ;;  %v2147_v42 = vld [vmem:[%s2015_s11 + $0x38] sm:$0xff] }
  0x3b   : > { %1559 = vmatprep.subr.mxu0 %v801_v51  ;;  %1606 = vmatprep.subr.mxu1 %v801_v51  ;;  %v2094_v1 = vadd.f32 %v485_v53, %v463_v56  ;;  %v541_v2 = vadd.f32 %v520_v54, %v494_v57  ;;  %v571_v12 = vmul.f32 %v2037_v37, %v2091_v63  ;;  %v2158_v50 = vld [vmem:[%s2015_s11 + $0x78] sm:$0xff] }
  0x3c   : > { %1560 = vmatpush3.msra.mxu0 %v801_v51  ;;  %1614 = vmatpush3.msra.mxu1 %v801_v51  ;;  %v2101_v5 = vadd.f32 %v558_v45, %v532_v61  ;;  %v2103_v6 = vadd.f32 %v559_v46, %v532_v61  ;;  %v495_v11 = vadd.f32 %v478_v3, %v456_v0 }
  0x3d   : > { %1561 = vmatprep.subr.mxu0 %v800_v60  ;;  %1607 = vmatprep.subr.mxu1 %v800_v60  ;;  %v2113_v10 = vadd.f32 %v570_v62, %v541_v2  ;;  %v560_v16 = vmul.f32 %v2037_v37, %v2108_v8  ;;  %v561_v17 = vmul.f32 %v2037_v37, %v2118_v13 }
  0x3e   : > { %1562 = vmatpush3.msra.mxu0 %v800_v60  ;;  %1615 = vmatpush3.msra.mxu1 %v800_v60  ;;  %v606_v14 = vsub.f32 0.0, %v2101_v5  ;;  %v607_v15 = vsub.f32 0.0, %v2103_v6  ;;  %v542_v20 = vadd.f32 %v521_v7, %v495_v11  ;;  %v444_v22 = vmul.f32 %v2007_v29, %v2108_v8 }
  0x3f   : > { %1563 = vmatprep.subr.mxu0 %v799_v4  ;;  %1608 = vmatprep.subr.mxu1 %v799_v4  ;;  %v618_v19 = vsub.f32 0.0, %v2113_v10  ;;  %v479_v23 = vmul.f32 %v2012_v30, %v2111_v9  ;;  %v2137_v26 = vadd.f32 %v560_v16, %v532_v61  ;;  %v2139_v28 = vadd.f32 %v561_v17, %v532_v61 }
  0x40   : > { %1564 = vmatpush3.msra.mxu0 %v799_v4  ;;  %v630_v24 = vmul.f32 1.442695, %v606_v14  ;;  %v632_v25 = vmul.f32 1.442695, %v607_v15  ;;  %1616 = vmatpush3.msra.mxu1 %v799_v4  ;;  %v2141_v33 = vadd.f32 %v571_v12, %v542_v20  ;;  %v457_v40 = vadd.f32 %v1999_v27, %v444_v22  ;;  %v2178_v12 = vld [vmem:[%s2015_s11 + $0x80] sm:$0xff] }
  0x41   : > { %v654_v32 = vmul.f32 1.442695, %v618_v19  ;;  %v522_v41 = vmul.f32 %v2025_v34, %v2127_v18  ;;  %v608_v44 = vsub.f32 0.0, %v2137_v26  ;;  %v609_v45 = vsub.f32 0.0, %v2139_v28 }
  0x42   : > { %1678 = vpow2.f32 %v630_v24  ;;  %v572_v46 = vmul.f32 %v2037_v37, %v2131_v21  ;;  %v619_v48 = vsub.f32 0.0, %v2141_v33  ;;  %v496_v49 = vadd.f32 %v479_v23, %v457_v40 }
  0x43   : > { %1680 = vpow2.f32 %v632_v25  ;;  %v445_v51 = vmul.f32 %v2007_v29, %v2118_v13  ;;  %v634_v53 = vmul.f32 1.442695, %v608_v44  ;;  %v636_v54 = vmul.f32 1.442695, %v609_v45  ;;  %v2195_v25 = vld [vmem:[%s2015_s11 + $0x88] sm:$0xff] }
  0x44   : > { %1682 = vpow2.f32 %v654_v32  ;;  %v480_v56 = vmul.f32 %v2012_v30, %v2147_v42  ;;  %v656_v57 = vmul.f32 1.442695, %v619_v48  ;;  %v543_v60 = vadd.f32 %v522_v41, %v496_v49 }
  0x45   : > { %v458_v61 = vadd.f32 %v1999_v27, %v445_v51  ;;  %v523_v62 = vmul.f32 %v2025_v34, %v2154_v47  ;;  %1684 = vpow2.f32 %v634_v53  ;;  %v573_v0 = vmul.f32 %v2037_v37, %v2158_v50 }
  0x46   : > { %v512_v2 = vmul.f32 %v2025_v34, %v2018_v31  ;;  %v562_v3 = vmul.f32 %v2037_v37, %v2040_v38  ;;  %1686 = vpow2.f32 %v656_v57  ;;  %v2173_v4 = vadd.f32 %v572_v46, %v543_v60 }
  0x47   : > { %v497_v7 = vadd.f32 %v480_v56, %v458_v61  ;;  %v513_v11 = vmul.f32 %v2025_v34, %v2028_v35  ;;  %1688 = vpow2.f32 %v636_v54  ;;  %v563_v15 = vmul.f32 %v2037_v37, %v2076_v55 }
  0x48   : > { %v533_v14 = vadd.f32 %v512_v2, %v2070_v52  ;;  %v446_v31 = vmul.f32 %v2007_v29, %v2040_v38  ;;  %v620_v16 = vsub.f32 0.0, %v2173_v4  ;;  %v481_v20 = vmul.f32 %v2012_v30, %v2043_v39 }
  0x49   : > { %v544_v17 = vadd.f32 %v523_v62, %v497_v7  ;;  %v534_v19 = vadd.f32 %v513_v11, %v2070_v52  ;;  %v574_v24 = vmul.f32 %v2037_v37, %v2178_v12  ;;  %v447_v32 = vmul.f32 %v2007_v29, %v2076_v55 }
  0x4a   : > { %v2189_v22 = vadd.f32 %v562_v3, %v533_v14  ;;  %v459_v23 = vadd.f32 %v1999_v27, %v446_v31  ;;  %v658_v40 = vmul.f32 1.442695, %v620_v16  ;;  %v482_v45 = vmul.f32 %v2012_v30, %v2083_v59 }
  0x4b   : > { %v2199_v41 = vadd.f32 %v573_v0, %v544_v17  ;;  %v2201_v44 = vadd.f32 %v563_v15, %v534_v19  ;;  %v460_v49 = vadd.f32 %v1999_v27, %v447_v32  ;;  %v525_v51 = vmul.f32 %v2025_v34, %v2091_v63 }
  0x4c   : > { %v610_v46 = vsub.f32 0.0, %v2189_v22  ;;  %v498_v48 = vadd.f32 %v481_v20, %v459_v23  ;;  %1690 = vpow2.f32 %v658_v40  ;;  %v575_v56 = vmul.f32 %v2037_v37, %v2195_v25 }
  0x4d   : > { %v621_v53 = vsub.f32 0.0, %v2199_v41  ;;  %v611_v54 = vsub.f32 0.0, %v2201_v44  ;;  %v499_v61 = vadd.f32 %v482_v45, %v460_v49  ;;  %v514_v62 = vmul.f32 %v2025_v34, %v2108_v8 }
  0x4e   : > { %v638_v57 = vmul.f32 1.442695, %v610_v46  ;;  %v545_v60 = vadd.f32 %v2080_v58, %v498_v48  ;;  %v564_v7 = vmul.f32 %v2037_v37, %v2111_v9  ;;  %v515_v11 = vmul.f32 %v2025_v34, %v2118_v13 }
  0x4f   : > { %v1679_v0 = vpop.eup %1678  ;;  %v660_v2 = vmul.f32 1.442695, %v621_v53  ;;  %v640_v3 = vmul.f32 1.442695, %v611_v54  ;;  %v546_v16 = vadd.f32 %v525_v51, %v499_v61  ;;  %v535_v19 = vadd.f32 %v514_v62, %v2070_v52  ;;  %v2238_v61 = vld [vmem:[%s2015_s11 + $0x90] sm:$0xff] }
  0x50   : > { %v1681_v14 = vpop.eup %1680  ;;  %v678_v15 = vadd.f32 1.0, %v1679_v0  ;;  %1692 = vpow2.f32 %v638_v57  ;;  %v2220_v31 = vadd.f32 %v574_v24, %v545_v60  ;;  %v536_v20 = vadd.f32 %v515_v11, %v2070_v52 }
  0x51   : > { %v1683_v58 = vpop.eup %1682  ;;  %v679_v17 = vadd.f32 1.0, %v1681_v14  ;;  %1694 = vpow2.f32 %v660_v2  ;;  %v2225_v40 = vadd.f32 %v575_v56, %v546_v16  ;;  %v2227_v46 = vadd.f32 %v564_v7, %v535_v19 }
  0x52   : > { %1696 = vrcp.f32 %v678_v15  ;;  %v690_v23 = vadd.f32 1.0, %v1683_v58  ;;  %v622_v32 = vsub.f32 0.0, %v2220_v31  ;;  %v1685_v45 = vpop.eup %1684  ;;  %v565_v24 = vmul.f32 %v2037_v37, %v2147_v42 }
  0x53   : > { %1698 = vrcp.f32 %v679_v17  ;;  %v448_v48 = vmul.f32 %v2007_v29, %v2111_v9  ;;  %v1687_v49 = vpop.eup %1686  ;;  %v680_v52 = vadd.f32 1.0, %v1685_v45  ;;  %v623_v53 = vsub.f32 0.0, %v2225_v40 }
  0x54   : > { %1700 = vrcp.f32 %v690_v23  ;;  %v662_v51 = vmul.f32 1.442695, %v622_v32  ;;  %v1689_v54 = vpop.eup %1688  ;;  %v691_v56 = vadd.f32 1.0, %v1687_v49  ;;  %v612_v57 = vsub.f32 0.0, %v2227_v46 }
  0x55   : > { %1702 = vpow2.f32 %v640_v3  ;;  %v2235_v60 = vadd.f32 %v565_v24, %v536_v20  ;;  %v681_v62 = vadd.f32 1.0, %v1689_v54  ;;  %v664_v0 = vmul.f32 1.442695, %v623_v53  ;;  %v2245_v3 = vld [vmem:[%s2015_s11 + $0x98] sm:$0xff] }
  0x56   : > { %1704 = vrcp.f32 %v680_v52  ;;  %v461_v2 = vadd.f32 %v1999_v27, %v448_v48  ;;  %v642_v7 = vmul.f32 1.442695, %v612_v57  ;;  %v483_v14 = vmul.f32 %v2012_v30, %v2127_v18 }
  0x57   : > { %1706 = vrcp.f32 %v691_v56  ;;  %v613_v11 = vsub.f32 0.0, %v2235_v60  ;;  %v526_v15 = vmul.f32 %v2025_v34, %v2131_v21  ;;  %v576_v16 = vmul.f32 %v2037_v37, %v2238_v61 }
  0x58   : > { %1708 = vrcp.f32 %v681_v62  ;;  %v449_v58 = vmul.f32 %v2007_v29, %v2147_v42  ;;  %v500_v19 = vadd.f32 %v483_v14, %v461_v2  ;;  %v484_v20 = vmul.f32 %v2012_v30, %v2154_v47 }
  0x59   : > { %1710 = vpow2.f32 %v662_v51  ;;  %v644_v17 = vmul.f32 1.442695, %v613_v11  ;;  %v1691_v23 = vpop.eup %1690  ;;  %v527_v45 = vmul.f32 %v2025_v34, %v2158_v50  ;;  %v577_v24 = vmul.f32 %v2037_v37, %v2245_v3 }
  0x5a   : > { %1712 = vpow2.f32 %v664_v0  ;;  %v462_v32 = vadd.f32 %v1999_v27, %v449_v58  ;;  %v692_v48 = vadd.f32 1.0, %v1691_v23  ;;  %v547_v49 = vadd.f32 %v526_v15, %v500_v19 }
  0x5b   : > { %1714 = vpow2.f32 %v642_v7  ;;  %v490_v52 = vadd.f32 %v2032_v36, %v2053_v43  ;;  %v516_v53 = vmul.f32 %v2025_v34, %v2040_v38  ;;  %v566_v54 = vmul.f32 %v2037_v37, %v2043_v39 }
  0x5c   : > { %1716 = vpow2.f32 %v644_v17  ;;  %v501_v51 = vadd.f32 %v484_v20, %v462_v32  ;;  %v2266_v57 = vadd.f32 %v576_v16, %v547_v49  ;;  %v474_v62 = vmul.f32 %v2012_v30, %v2028_v35  ;;  %v424_v20 = vld [vmem:[%s2015_s11 + $0xa0] sm:$0xff] }
  0x5d   : > { %v1693_v56 = vpop.eup %1692  ;;  %1718 = vrcp.f32 %v692_v48  ;;  %v517_v0 = vmul.f32 %v2025_v34, %v2076_v55  ;;  %v537_v11 = vadd.f32 %v516_v53, %v490_v52  ;;  %v567_v38 = vmul.f32 %v2037_v37, %v2083_v59 }
  0x5e   : > { %v1695_v36 = vpop.eup %1694  ;;  %v682_v2 = vadd.f32 1.0, %v1693_v56  ;;  %v548_v7 = vadd.f32 %v527_v45, %v501_v51  ;;  %v624_v15 = vsub.f32 0.0, %v2266_v57  ;;  %v491_v16 = vadd.f32 %v474_v62, %v2053_v43 }
  0x5f   : > { %v1697_v14 = vpop.eup %1696  ;;  %v693_v39 = vadd.f32 1.0, %v1695_v36  ;;  %v528_v35 = vmul.f32 %v2025_v34, %v2178_v12  ;;  %v2281_v19 = vadd.f32 %v566_v54, %v537_v11  ;;  %v578_v54 = vmul.f32 %v2037_v37, %v424_v20 }
  0x60   : > { %v1699_v58 = vpop.eup %1698  ;;  %v750_v55 = vmul.f32 %v1697_v14, %v2101_v5  ;;  %1720 = vrcp.f32 %v682_v2  ;;  %v2279_v17 = vadd.f32 %v577_v24, %v548_v7  ;;  %v666_v45 = vmul.f32 1.442695, %v624_v15 }
  0x61   : > { %v1701_v23 = vpop.eup %1700  ;;  %v751_v32 = vmul.f32 %v1699_v58, %v2103_v6  ;;  %1722 = vrcp.f32 %v693_v39  ;;  %v538_v48 = vadd.f32 %v517_v0, %v491_v16  ;;  %v614_v24 = vsub.f32 0.0, %v2281_v19 }
  0x62   : > { %v1703_v49 = vpop.eup %1702  ;;  %775 = vst.msk [vmem:[%s2286_s13] sm:$0xff] %vm774_vm0, %v750_v55  ;;  %1565 = vmatprep.mubr.msk.f32.mxu0 %vm774_vm0, %v750_v55  ;;  %v762_v5 = vmul.f32 %v1701_v23, %v2113_v10  ;;  %v625_v12 = vsub.f32 0.0, %v2279_v17  ;;  %v549_v6 = vadd.f32 %v528_v35, %v2094_v1  ;;  %1724 = vpow2.f32 %v666_v45 }
  0x63   : > { %v1705_v52 = vpop.eup %1704  ;;  %776 = vst.msk [vmem:[%s2286_s13 + $0x8] sm:$0xff] %vm774_vm0, %v751_v32  ;;  %1566 = vmatmul.mubr.msk.f32.vlgmr.msra.gmra.mxu0 %vm774_vm0, %v751_v32  ;;  %v683_v51 = vadd.f32 1.0, %v1703_v49  ;;  %v2298_v53 = vadd.f32 %v567_v38, %v538_v48  ;;  %v646_v62 = vmul.f32 1.442695, %v614_v24  ;;  %v451_v0 = vmul.f32 %v2007_v29, %v2083_v59  ;;  %v425_v38 = vld [vmem:[%s2015_s11 + $0xa8] sm:$0xff] }
  0x64   : > { %v1707_v10 = vpop.eup %1706  ;;  %787 = vst.msk [vmem:[%s2286_s13 + $0x60] sm:$0xff] %vm774_vm0, %v762_v5  ;;  %1583 = vmatprep.mubr.msk.f32.mxu1 %vm774_vm0, %v762_v5  ;;  %v752_v1 = vmul.f32 %v1705_v52, %v2137_v26  ;;  %v668_v56 = vmul.f32 1.442695, %v625_v12  ;;  %v2309_v11 = vadd.f32 %v578_v54, %v549_v6  ;;  %v579_v20 = vmul.f32 %v2037_v37, %v425_v38 }
  0x65   : > { %v1709_v36 = vpop.eup %1708  ;;  %v763_v2 = vmul.f32 %v1707_v10, %v2141_v33  ;;  %1726 = vrcp.f32 %v683_v51  ;;  %v615_v7 = vsub.f32 0.0, %v2298_v53  ;;  %v464_v59 = vadd.f32 %v1999_v27, %v451_v0 }
  0x66   : > { %v1711_v14 = vpop.eup %1710  ;;  %777 = vst.msk [vmem:[%s2286_s13 + $0x10] sm:$0xff] %vm774_vm0, %v752_v1  ;;  %1568 = vmatprep.mubr.msk.f32.mxu0 %vm774_vm0, %v752_v1  ;;  %v753_v26 = vmul.f32 %v1709_v36, %v2139_v28  ;;  %1728 = vpow2.f32 %v668_v56  ;;  %v486_v33 = vmul.f32 %v2012_v30, %v2091_v63  ;;  %v626_v35 = vsub.f32 0.0, %v2309_v11  ;;  %v426_v1 = vld [vmem:[%s2015_s11 + $0xb0] sm:$0xff] }
  0x67   : > { %v1713_v39 = vpop.eup %1712  ;;  %788 = vst.msk [vmem:[%s2286_s13 + $0x68] sm:$0xff] %vm774_vm0, %v763_v2  ;;  %1584 = vmatmul.mubr.msk.f32.vlgmr.msra.gmra.mxu1 %vm774_vm0, %v763_v2  ;;  %v694_v15 = vadd.f32 1.0, %v1711_v14  ;;  %1730 = vpow2.f32 %v646_v62  ;;  %v648_v16 = vmul.f32 1.442695, %v615_v7  ;;  %v529_v63 = vmul.f32 %v2025_v34, %v2195_v25 }
  0x68   : > { %v1715_v58 = vpop.eup %1714  ;;  %778 = vst.msk [vmem:[%s2286_s13 + $0x18] sm:$0xff] %vm774_vm0, %v753_v26  ;;  %1569 = vmatmul.mubr.msk.f32.gmra.mxu0 %vm774_vm0, %v753_v26  ;;  %v695_v28 = vadd.f32 1.0, %v1713_v39  ;;  %v503_v55 = vadd.f32 %v486_v33, %v464_v59  ;;  %v670_v45 = vmul.f32 1.442695, %v626_v35  ;;  %v475_v48 = vmul.f32 %v2012_v30, %v2108_v8 }
  0x69   : > { %v1717_v23 = vpop.eup %1716  ;;  %1732 = vrcp.f32 %v694_v15  ;;  %v684_v32 = vadd.f32 1.0, %v1715_v58  ;;  %v518_v24 = vmul.f32 %v2025_v34, %v2111_v9  ;;  %v568_v52 = vmul.f32 %v2037_v37, %v2127_v18 }
  0x6a   : > { %v1719_v49 = vpop.eup %1718  ;;  %1734 = vrcp.f32 %v695_v28  ;;  %v685_v5 = vadd.f32 1.0, %v1717_v23  ;;  %v550_v12 = vadd.f32 %v529_v63, %v503_v55  ;;  %v492_v6 = vadd.f32 %v475_v48, %v2053_v43  ;;  %v427_v55 = vld [vmem:[%s2015_s11 + $0xb8] sm:$0xff] }
  0x6b   : > { %v764_v25 = vmul.f32 %v1719_v49, %v2173_v4  ;;  %1736 = vrcp.f32 %v684_v32  ;;  %v476_v8 = vmul.f32 %v2012_v30, %v2118_v13  ;;  %v519_v54 = vmul.f32 %v2025_v34, %v2147_v42 }
  0x6c   : > { %1738 = vrcp.f32 %v685_v5  ;;  %v2337_v51 = vadd.f32 %v579_v20, %v550_v12  ;;  %v539_v9 = vadd.f32 %v518_v24, %v492_v6  ;;  %v569_v4 = vmul.f32 %v2037_v37, %v2154_v47 }
  0x6d   : > { %v1721_v10 = vpop.eup %1720  ;;  %789 = vst.msk [vmem:[%s2286_s13 + $0x70] sm:$0xff] %vm774_vm0, %v764_v25  ;;  %1586 = vmatprep.mubr.msk.f32.mxu1 %vm774_vm0, %v764_v25  ;;  %1740 = vpow2.f32 %v648_v16  ;;  %v452_v56 = vmul.f32 %v2007_v29, %v2127_v18  ;;  %v493_v0 = vadd.f32 %v476_v8, %v2053_v43  ;;  %v487_v38 = vmul.f32 %v2012_v30, %v2131_v21 }
  0x6e   : > { %v1723_v62 = vpop.eup %1722  ;;  %v754_v13 = vmul.f32 %v1721_v10, %v2189_v22  ;;  %1742 = vpow2.f32 %v670_v45  ;;  %v627_v42 = vsub.f32 0.0, %v2337_v51  ;;  %v2355_v2 = vadd.f32 %v568_v52, %v539_v9 }
  0x6f   : > { %v765_v36 = vmul.f32 %v1723_v62, %v2199_v41  ;;  %v465_v7 = vadd.f32 %v1999_v27, %v452_v56  ;;  %v1725_v14 = vpop.eup %1724  ;;  %v540_v22 = vadd.f32 %v519_v54, %v493_v0  ;;  %v530_v26 = vmul.f32 %v2025_v34, %v2238_v61 }
  0x70   : > { %779 = vst.msk [vmem:[%s2286_s13 + $0x20] sm:$0xff] %vm774_vm0, %v754_v13  ;;  %1571 = vmatprep.mubr.msk.f32.mxu0 %vm774_vm0, %v754_v13  ;;  %v672_v18 = vmul.f32 1.442695, %v627_v42  ;;  %v580_v43 = vmul.f32 %v2037_v37, %v426_v1  ;;  %v696_v41 = vadd.f32 1.0, %v1725_v14  ;;  %v616_v21 = vsub.f32 0.0, %v2355_v2 }
  0x71   : > { %790 = vst.msk [vmem:[%s2286_s13 + $0x78] sm:$0xff] %vm774_vm0, %v765_v36  ;;  %1587 = vmatmul.mubr.msk.f32.gmra.mxu1 %vm774_vm0, %v765_v36  ;;  %v504_v59 = vadd.f32 %v487_v38, %v465_v7  ;;  %v453_v33 = vmul.f32 %v2007_v29, %v2154_v47  ;;  %v2372_v15 = vadd.f32 %v569_v4, %v540_v22 }
  0x72   : > { %v1727_v39 = vpop.eup %1726  ;;  %1744 = vpow2.f32 %v672_v18  ;;  %v488_v61 = vmul.f32 %v2012_v30, %v2158_v50  ;;  %v650_v58 = vmul.f32 1.442695, %v616_v21  ;;  %v531_v47 = vmul.f32 %v2025_v34, %v2245_v3 }
  0x73   : > { %v1729_v16 = vpop.eup %1728  ;;  %v755_v35 = vmul.f32 %v1727_v39, %v2201_v44  ;;  %1746 = vrcp.f32 %v696_v41  ;;  %v551_v28 = vadd.f32 %v530_v26, %v504_v59  ;;  %v617_v23 = vsub.f32 0.0, %v2372_v15 }
  0x74   : > { %v1731_v63 = vpop.eup %1730  ;;  %v697_v20 = vadd.f32 1.0, %v1729_v16  ;;  %v466_v29 = vadd.f32 %v1999_v27, %v453_v33  ;;  %1748 = vpow2.f32 %v650_v58  ;;  %v581_v48 = vmul.f32 %v2037_v37, %v427_v55 }
  0x75   : > { %780 = vst.msk [vmem:[%s2286_s13 + $0x28] sm:$0xff] %vm774_vm0, %v755_v35  ;;  %1572 = vmatmul.mubr.msk.f32.gmra.mxu0 %vm774_vm0, %v755_v35  ;;  %v686_v30 = vadd.f32 1.0, %v1731_v63  ;;  %v2385_v50 = vadd.f32 %v580_v43, %v551_v28  ;;  %v652_v32 = vmul.f32 1.442695, %v617_v23 }
  0x76   : > { %v1733_v44 = vpop.eup %1732  ;;  %1750 = vrcp.f32 %v697_v20  ;;  %v505_v45 = vadd.f32 %v488_v61, %v466_v29 }
  0x77   : > { %v1735_v27 = vpop.eup %1734  ;;  %v766_v49 = vmul.f32 %v1733_v44, %v2220_v31  ;;  %1752 = vrcp.f32 %v686_v30  ;;  %v628_v34 = vsub.f32 0.0, %v2385_v50 }
  0x78   : > { %v1737_v3 = vpop.eup %1736  ;;  %v767_v5 = vmul.f32 %v1735_v27, %v2225_v40  ;;  %1754 = vpow2.f32 %v652_v32  ;;  %v552_v12 = vadd.f32 %v531_v47, %v505_v45 }
  0x79   : > { %v1739_v24 = vpop.eup %1738  ;;  %791 = vst.msk [vmem:[%s2286_s13 + $0x80] sm:$0xff] %vm774_vm0, %v766_v49  ;;  %1589 = vmatprep.mubr.msk.f32.mxu1 %vm774_vm0, %v766_v49  ;;  %v756_v37 = vmul.f32 %v1737_v3, %v2227_v46  ;;  %v674_v25 = vmul.f32 1.442695, %v628_v34 }
  0x7a   : > { %v1741_v6 = vpop.eup %1740  ;;  %792 = vst.msk [vmem:[%s2286_s13 + $0x88] sm:$0xff] %vm774_vm0, %v767_v5  ;;  %1590 = vmatmul.mubr.msk.f32.gmra.mxu1 %vm774_vm0, %v767_v5  ;;  %v757_v31 = vmul.f32 %v1739_v24, %v2235_v60  ;;  %v2399_v52 = vadd.f32 %v581_v48, %v552_v12 }
  0x7b   : > { %v1743_v40 = vpop.eup %1742  ;;  %781 = vst.msk [vmem:[%s2286_s13 + $0x30] sm:$0xff] %vm774_vm0, %v756_v37  ;;  %1574 = vmatprep.mubr.msk.f32.mxu0 %vm774_vm0, %v756_v37  ;;  %v687_v8 = vadd.f32 1.0, %v1741_v6  ;;  %1756 = vpow2.f32 %v674_v25 }
  0x7c   : > { %782 = vst.msk [vmem:[%s2286_s13 + $0x38] sm:$0xff] %vm774_vm0, %v757_v31  ;;  %1575 = vmatmul.mubr.msk.f32.gmra.mxu0 %vm774_vm0, %v757_v31  ;;  %v698_v46 = vadd.f32 1.0, %v1743_v40  ;;  %v629_v54 = vsub.f32 0.0, %v2399_v52 }
  0x7d   : > { %1758 = vrcp.f32 %v687_v8 }
  0x7e   : > { %1760 = vrcp.f32 %v698_v46  ;;  %v676_v60 = vmul.f32 1.442695, %v629_v54 }
  0x7f   : > { %v1745_v10 = vpop.eup %1744 }
  0x80   : > { %v1747_v9 = vpop.eup %1746  ;;  %v699_v4 = vadd.f32 1.0, %v1745_v10  ;;  %1762 = vpow2.f32 %v676_v60 }
  0x81   : > { %v768_v1 = vmul.f32 %v1747_v9, %v2266_v57  ;;  %v1749_v56 = vpop.eup %1748 }
  0x82   : > { %1764 = vrcp.f32 %v699_v4  ;;  %v688_v13 = vadd.f32 1.0, %v1749_v56 }
  0x83   : > { %v1751_v62 = vpop.eup %1750  ;;  %793 = vst.msk [vmem:[%s2286_s13 + $0x90] sm:$0xff] %vm774_vm0, %v768_v1  ;;  %1592 = vmatprep.mubr.msk.f32.mxu1 %vm774_vm0, %v768_v1 }
  0x84   : > { %v1753_v42 = vpop.eup %1752  ;;  %v769_v0 = vmul.f32 %v1751_v62, %v2279_v17  ;;  %1766 = vrcp.f32 %v688_v13 }
  0x85   : > { %v1755_v36 = vpop.eup %1754  ;;  %v758_v7 = vmul.f32 %v1753_v42, %v2281_v19 }
  0x86   : > { %794 = vst.msk [vmem:[%s2286_s13 + $0x98] sm:$0xff] %vm774_vm0, %v769_v0  ;;  %1593 = vmatmul.mubr.msk.f32.gmra.mxu1 %vm774_vm0, %v769_v0  ;;  %v689_v57 = vadd.f32 1.0, %v1755_v36 }
  0x87   : > { %783 = vst.msk [vmem:[%s2286_s13 + $0x40] sm:$0xff] %vm774_vm0, %v758_v7  ;;  %1577 = vmatprep.mubr.msk.f32.mxu0 %vm774_vm0, %v758_v7 }
  0x88   : > { %v1757_v38 = vpop.eup %1756  ;;  %1768 = vrcp.f32 %v689_v57 }
  0x89   : > { %v700_v14 = vadd.f32 1.0, %v1757_v38 }
  0x8a   : > { %v1759_v17 = vpop.eup %1758 }
  0x8b   : > { %v1761_v18 = vpop.eup %1760  ;;  %v759_v19 = vmul.f32 %v1759_v17, %v2298_v53  ;;  %1770 = vrcp.f32 %v700_v14 }
  0x8c   : > { %v770_v22 = vmul.f32 %v1761_v18, %v2309_v11  ;;  %v1185_v18 = vld [vmem:[%s2286_s13] sm:$0xff] (%p1913_p6) }
  0x8d   : > { %v1763_v26 = vpop.eup %1762  ;;  %784 = vst.msk [vmem:[%s2286_s13 + $0x48] sm:$0xff] %vm774_vm0, %v759_v19  ;;  %1578 = vmatmul.mubr.msk.f32.gmra.mxu0 %vm774_vm0, %v759_v19  ;;  %v1187_v19 = vld [vmem:[%s2286_s13 + $0x8] sm:$0xff] (%p1913_p6)  ;;  %1186 = vst [vmem:[%s2523_s30] sm:$0xff] (%p1913_p6), %v1185_v18 }
  0x8e   : > { %795 = vst.msk [vmem:[%s2286_s13 + $0xa0] sm:$0xff] %vm774_vm0, %v770_v22  ;;  %1595 = vmatprep.mubr.msk.f32.mxu1 %vm774_vm0, %v770_v22  ;;  %v701_v43 = vadd.f32 1.0, %v1763_v26  ;;  %v1189_v22 = vld [vmem:[%s2286_s13 + $0x10] sm:$0xff] (%p1913_p6)  ;;  %v1191_v26 = vld [vmem:[%s2286_s13 + $0x18] sm:$0xff] (%p1913_p6)  ;;  %1188 = vst [vmem:[%s2523_s30 + $0x8] sm:$0xff] (%p1913_p6), %v1187_v19 }
  0x8f   : > { %v1765_v41 = vpop.eup %1764  ;;  %1190 = vst [vmem:[%s2523_s30 + $0x10] sm:$0xff] (%p1913_p6), %v1189_v22  ;;  %1192 = vst [vmem:[%s2523_s30 + $0x18] sm:$0xff] (%p1913_p6), %v1191_v26 }
  0x90   : > { %v771_v21 = vmul.f32 %v1765_v41, %v2337_v51  ;;  %1772 = vrcp.f32 %v701_v43  ;;  %v1193_v43 = vld [vmem:[%s2286_s13 + $0x20] sm:$0xff] (%p1913_p6)  ;;  %v1195_v41 = vld [vmem:[%s2286_s13 + $0x28] sm:$0xff] (%p1913_p6) }
  0x91   : > { %v1767_v53 = vpop.eup %1766  ;;  %1194 = vst [vmem:[%s2523_s30 + $0x40] sm:$0xff] (%p1913_p6), %v1193_v43  ;;  %1196 = vst [vmem:[%s2523_s30 + $0x48] sm:$0xff] (%p1913_p6), %v1195_v41 }
  0x92   : > { %796 = vst.msk [vmem:[%s2286_s13 + $0xa8] sm:$0xff] %vm774_vm0, %v771_v21  ;;  %1596 = vmatmul.mubr.msk.f32.gmra.mxu1 %vm774_vm0, %v771_v21  ;;  %v760_v11 = vmul.f32 %v1767_v53, %v2355_v2  ;;  %v1197_v21 = vld [vmem:[%s2286_s13 + $0x30] sm:$0xff] (%p1913_p6)  ;;  %v1199_v53 = vld [vmem:[%s2286_s13 + $0x38] sm:$0xff] (%p1913_p6) }
  0x93   : > { %1198 = vst [vmem:[%s2523_s30 + $0x50] sm:$0xff] (%p1913_p6), %v1197_v21  ;;  %1200 = vst [vmem:[%s2523_s30 + $0x58] sm:$0xff] (%p1913_p6), %v1199_v53 }
  0x94   : > { %785 = vst.msk [vmem:[%s2286_s13 + $0x50] sm:$0xff] %vm774_vm0, %v760_v11  ;;  %1580 = vmatprep.mubr.msk.f32.mxu0 %vm774_vm0, %v760_v11  ;;  %v1201_v11 = vld [vmem:[%s2286_s13 + $0x40] sm:$0xff] (%p1913_p6) }
  0x95   : > { %v1769_v59 = vpop.eup %1768  ;;  %1202 = vst [vmem:[%s2523_s30 + $0x80] sm:$0xff] (%p1913_p6), %v1201_v11 }
  0x96   : > { %v761_v33 = vmul.f32 %v1769_v59, %v2372_v15  ;;  %v2451_v15 = vld [vmem:[%s2643_s4] ss:$0 sm:$0xff]  ;;  %v1203_v59 = vld [vmem:[%s2286_s13 + $0x48] sm:$0xff] (%p1913_p6) }
  0x97   : > { %1204 = vst [vmem:[%s2523_s30 + $0x88] sm:$0xff] (%p1913_p6), %v1203_v59 }
  0x98   : > { %v1771_v39 = vpop.eup %1770  ;;  %786 = vst.msk [vmem:[%s2286_s13 + $0x58] sm:$0xff] %vm774_vm0, %v761_v33  ;;  %1581 = vmatmul.mubr.msk.f32.gmra.mxu0 %vm774_vm0, %v761_v33 }
  0x99   : > { %v772_v51 = vmul.f32 %v1771_v39, %v2385_v50 }
  0x9b   : > { %797 = vst.msk [vmem:[%s2286_s13 + $0xb0] sm:$0xff] %vm774_vm0, %v772_v51  ;;  %1598 = vmatprep.mubr.msk.f32.mxu1 %vm774_vm0, %v772_v51  ;;  %v1205_v33 = vld [vmem:[%s2286_s13 + $0x50] sm:$0xff] (%p1913_p6)  ;;  %v1209_v51 = vld [vmem:[%s2286_s13 + $0x60] sm:$0xff] (%p1913_p6) }
  0x9c   : > { %1206 = vst [vmem:[%s2523_s30 + $0x90] sm:$0xff] (%p1913_p6), %v1205_v33  ;;  %1210 = vst [vmem:[%s2523_s30 + $0xc0] sm:$0xff] (%p1913_p6), %v1209_v51 }
  0x9d   : > { %v1773_v2 = vpop.eup %1772 }
  0x9e   : > { %v773_v61 = vmul.f32 %v1773_v2, %v2399_v52  ;;  %v1211_v2 = vld [vmem:[%s2286_s13 + $0x68] sm:$0xff] (%p1913_p6) }
  0x9f   : > { %v1207_v39 = vld [vmem:[%s2286_s13 + $0x58] sm:$0xff] (%p1913_p6)  ;;  %1212 = vst [vmem:[%s2523_s30 + $0xc8] sm:$0xff] (%p1913_p6), %v1211_v2 }
  0xa0   : > { %798 = vst.msk [vmem:[%s2286_s13 + $0xb8] sm:$0xff] %vm774_vm0, %v773_v61  ;;  %1599 = vmatmul.mubr.msk.f32.gmra.mxu1 %vm774_vm0, %v773_v61  ;;  %v1213_v61 = vld [vmem:[%s2286_s13 + $0x70] sm:$0xff] (%p1913_p6)  ;;  %1208 = vst [vmem:[%s2523_s30 + $0x98] sm:$0xff] (%p1913_p6), %v1207_v39 }
  0xa1   : > { %1214 = vst [vmem:[%s2523_s30 + $0xd0] sm:$0xff] (%p1913_p6), %v1213_v61 }
 0x123   : > { %v1567_v16 = vpop.f32.mrf.mxu0 }
 0x124   : > { %v958_v35 = vadd.f32 %v1567_v16, %v2451_v15  ;;  %v1217_v16 = vld [vmem:[%s2286_s13 + $0x80] sm:$0xff] (%p1913_p6) }
 0x125   : > { %v952_v58 = vpop.f32.mrf.mxu0  ;;  %1218 = vst [vmem:[%s2523_s30 + $0x100] sm:$0xff] (%p1913_p6), %v1217_v16 }
 0x126   : > { %1072 = vst [vmem:[%s2455_s16 + $0x8] sm:$0xff] %v958_v35  ;;  %v953_v28 = vadd.f32 %v2451_v15, %v952_v58  ;;  %v1219_v35 = vld [vmem:[%s2286_s13 + $0x88] sm:$0xff] (%p1913_p6)  ;;  %v1221_v58 = vld [vmem:[%s2286_s13 + $0x90] sm:$0xff] (%p1913_p6) }
 0x127   : > { %v1585_v55 = vpop.f32.mrf.mxu1  ;;  %1220 = vst [vmem:[%s2523_s30 + $0x108] sm:$0xff] (%p1913_p6), %v1219_v35  ;;  %1222 = vst [vmem:[%s2523_s30 + $0x110] sm:$0xff] (%p1913_p6), %v1221_v58 }
 0x128   : > { %1071 = vst [vmem:[%s2455_s16] sm:$0xff] %v953_v28  ;;  %v1018_v63 = vadd.f32 %v1585_v55, %v2451_v15  ;;  %v1570_v20 = vpop.f32.mrf.mxu0  ;;  %v1223_v28 = vld [vmem:[%s2286_s13 + $0x98] sm:$0xff] (%p1913_p6)  ;;  %v1225_v55 = vld [vmem:[%s2286_s13 + $0xa0] sm:$0xff] (%p1913_p6) }
 0x129   : > { %v968_v23 = vadd.f32 %v1570_v20, %v2451_v15  ;;  %v1012_v29 = vpop.f32.mrf.mxu1  ;;  %1224 = vst [vmem:[%s2523_s30 + $0x118] sm:$0xff] (%p1913_p6), %v1223_v28  ;;  %1226 = vst [vmem:[%s2523_s30 + $0x140] sm:$0xff] (%p1913_p6), %v1225_v55  ;;  %v1229_v20 = vld [vmem:[%s2286_s13 + $0xb0] sm:$0xff] (%p1913_p6) }
 0x12a   : > { %1084 = vst [vmem:[%s2455_s16 + $0x68] sm:$0xff] %v1018_v63  ;;  %v1013_v47 = vadd.f32 %v2451_v15, %v1012_v29  ;;  %v962_v30 = vpop.f32.mrf.mxu0  ;;  %v1227_v63 = vld [vmem:[%s2286_s13 + $0xa8] sm:$0xff] (%p1913_p6)  ;;  %1230 = vst [vmem:[%s2523_s30 + $0x150] sm:$0xff] (%p1913_p6), %v1229_v20 }
 0x12b   : > { %1074 = vst [vmem:[%s2455_s16 + $0x18] sm:$0xff] %v968_v23  ;;  %v963_v50 = vadd.f32 %v2451_v15, %v962_v30  ;;  %v1231_v23 = vld [vmem:[%s2286_s13 + $0xb8] sm:$0xff] (%p1913_p6)  ;;  %1228 = vst [vmem:[%s2523_s30 + $0x148] sm:$0xff] (%p1913_p6), %v1227_v63 }
 0x12c   : > { %1083 = vst [vmem:[%s2455_s16 + $0x60] sm:$0xff] %v1013_v47  ;;  %1232 = vst [vmem:[%s2523_s30 + $0x158] sm:$0xff] (%p1913_p6), %v1231_v23 }
 0x12d   : > { %1073 = vst [vmem:[%s2455_s16 + $0x10] sm:$0xff] %v963_v50 }
 0x131   : > { %v1588_v44 = vpop.f32.mrf.mxu1 }
 0x132   : > { %v1028_v32 = vadd.f32 %v1588_v44, %v2451_v15 }
 0x133   : > { %v1022_v45 = vpop.f32.mrf.mxu1 }
 0x134   : > { %1086 = vst [vmem:[%s2455_s16 + $0x78] sm:$0xff] %v1028_v32  ;;  %v1023_v48 = vadd.f32 %v2451_v15, %v1022_v45 }
 0x135   : > { %v1573_v27 = vpop.f32.mrf.mxu0 }
 0x136   : > { %v978_v49 = vadd.f32 %v1573_v27, %v2451_v15  ;;  %1085 = vst [vmem:[%s2455_s16 + $0x70] sm:$0xff] %v1023_v48 }
 0x137   : > { %v972_v34 = vpop.f32.mrf.mxu0 }
 0x138   : > { %1076 = vst [vmem:[%s2455_s16 + $0x28] sm:$0xff] %v978_v49  ;;  %v973_v3 = vadd.f32 %v2451_v15, %v972_v34 }
 0x13a   : > { %1075 = vst [vmem:[%s2455_s16 + $0x20] sm:$0xff] %v973_v3  ;;  %v1591_v5 = vpop.f32.mrf.mxu1 }
 0x13b   : > { %v1038_v12 = vadd.f32 %v1591_v5, %v2451_v15 }
 0x13c   : > { %v1576_v24 = vpop.f32.mrf.mxu0  ;;  %v1032_v37 = vpop.f32.mrf.mxu1 }
 0x13d   : > { %1088 = vst [vmem:[%s2455_s16 + $0x88] sm:$0xff] %v1038_v12  ;;  %v988_v25 = vadd.f32 %v1576_v24, %v2451_v15  ;;  %v1033_v6 = vadd.f32 %v2451_v15, %v1032_v37 }
 0x13e   : > { %v982_v31 = vpop.f32.mrf.mxu0 }
 0x13f   : > { %1078 = vst [vmem:[%s2455_s16 + $0x38] sm:$0xff] %v988_v25  ;;  %1087 = vst [vmem:[%s2455_s16 + $0x80] sm:$0xff] %v1033_v6  ;;  %v983_v52 = vadd.f32 %v2451_v15, %v982_v31 }
 0x141   : > { %1077 = vst [vmem:[%s2455_s16 + $0x30] sm:$0xff] %v983_v52 }
 0x146   : > { %v1594_v40 = vpop.f32.mrf.mxu1 }
 0x147   : > { %v1048_v8 = vadd.f32 %v1594_v40, %v2451_v15 }
 0x148   : > { %v1042_v46 = vpop.f32.mrf.mxu1 }
 0x149   : > { %1090 = vst [vmem:[%s2455_s16 + $0x98] sm:$0xff] %v1048_v8  ;;  %v1043_v54 = vadd.f32 %v2451_v15, %v1042_v46 }
 0x14b   : > { %1089 = vst [vmem:[%s2455_s16 + $0x90] sm:$0xff] %v1043_v54 }
 0x14d   : > { %v1579_v60 = vpop.f32.mrf.mxu0 }
 0x14e   : > { %v998_v10 = vadd.f32 %v1579_v60, %v2451_v15 }
 0x14f   : > { %v992_v9 = vpop.f32.mrf.mxu0 }
 0x150   : > { %1080 = vst [vmem:[%s2455_s16 + $0x48] sm:$0xff] %v998_v10  ;;  %v993_v4 = vadd.f32 %v2451_v15, %v992_v9 }
 0x152   : > { %1079 = vst [vmem:[%s2455_s16 + $0x40] sm:$0xff] %v993_v4  ;;  %v1597_v1 = vpop.f32.mrf.mxu1 }
 0x153   : > { %v1058_v56 = vadd.f32 %v1597_v1, %v2451_v15 }
 0x154   : > { %v1052_v62 = vpop.f32.mrf.mxu1 }
 0x155   : > { %1092 = vst [vmem:[%s2455_s16 + $0xa8] sm:$0xff] %v1058_v56  ;;  %v1053_v13 = vadd.f32 %v2451_v15, %v1052_v62 }
 0x157   : > { %1091 = vst [vmem:[%s2455_s16 + $0xa0] sm:$0xff] %v1053_v13 }
 0x158   : > { %v1582_v42 = vpop.f32.mrf.mxu0 }
 0x159   : > { %v1008_v0 = vadd.f32 %v1582_v42, %v2451_v15 }
 0x15a   : > { %v1002_v36 = vpop.f32.mrf.mxu0 }
 0x15b   : > { %1082 = vst [vmem:[%s2455_s16 + $0x58] sm:$0xff] %v1008_v0  ;;  %v1003_v7 = vadd.f32 %v2451_v15, %v1002_v36 }
 0x15d   : > { %1081 = vst [vmem:[%s2455_s16 + $0x50] sm:$0xff] %v1003_v7 }
 0x160   : > { %v1600_v57 = vpop.f32.mrf.mxu1 }
 0x161   : > { %v1068_v38 = vadd.f32 %v1600_v57, %v2451_v15  ;;  %1105 = sbr.rel (!%p1913_p6) target bundleno = 358 (0x166), region = 82 }
 0x162   : > { %v1062_v14 = vpop.f32.mrf.mxu1 }
 0x163   : > { %1094 = vst [vmem:[%s2455_s16 + $0xb8] sm:$0xff] %v1068_v38  ;;  %v1063_v17 = vadd.f32 %v2451_v15, %v1062_v14  ;;  %v1215_v15 = vld [vmem:[%s2286_s13 + $0x78] sm:$0xff] (%p1913_p6) }
 0x164   : > { %1216 = vst [vmem:[%s2523_s30 + $0xd8] sm:$0xff] (%p1913_p6), %v1215_v15 }
 0x165   : > { %1093 = vst [vmem:[%s2455_s16 + $0xb0] sm:$0xff] %v1063_v17 }
 0x166 PF: > { %1238 = sbr.rel (!%p1913_p6) target bundleno = 376 (0x178), region = 120  ;;  %s1513_s7 = sshll.u32 (%p1913_p6), %s1812_s23, 2  ;;  %v1318_v29 = vld [vmem:[%s2455_s16] sm:$0xff] (%p1913_p6)  ;;  %v1320_v47 = vld [vmem:[%s2455_s16 + $0x8] sm:$0xff] (%p1913_p6)  ;;  %v1322_v30 = vld [vmem:[%s2455_s16 + $0x10] sm:$0xff] (%p1913_p6) }
 0x167   : > { %s1621_s9 = smul.u32 (%p1913_p6), 48, %s1816_s24  ;;  %v1324_v50 = vld [vmem:[%s2455_s16 + $0x18] sm:$0xff] (%p1913_p6)  ;;  %v1326_v44 = vld [vmem:[%s2455_s16 + $0x20] sm:$0xff] (%p1913_p6)  ;;  %v1328_v32 = vld [vmem:[%s2455_s16 + $0x28] sm:$0xff] (%p1913_p6) }
 0x168   : > { %v1330_v45 = vld [vmem:[%s2455_s16 + $0x30] sm:$0xff] (%p1913_p6)  ;;  %v1332_v48 = vld [vmem:[%s2455_s16 + $0x38] sm:$0xff] (%p1913_p6)  ;;  %v1334_v27 = vld [vmem:[%s2455_s16 + $0x40] sm:$0xff] (%p1913_p6) }
 0x169   : > { %s1241_s8 = sadd.s32 (%p1913_p6), %s1621_s9, %s1513_s7  ;;  %v1336_v49 = vld [vmem:[%s2455_s16 + $0x48] sm:$0xff] (%p1913_p6)  ;;  %v1338_v34 = vld [vmem:[%s2455_s16 + $0x50] sm:$0xff] (%p1913_p6)  ;;  %v1340_v3 = vld [vmem:[%s2455_s16 + $0x58] sm:$0xff] (%p1913_p6) }
 0x16a   : > { %s1514_s10 = sshll.u32 (%p1913_p6), %s1241_s8, 3  ;;  %v1342_v5 = vld [vmem:[%s2455_s16 + $0x60] sm:$0xff] (%p1913_p6)  ;;  %v1344_v12 = vld [vmem:[%s2455_s16 + $0x68] sm:$0xff] (%p1913_p6)  ;;  %v1346_v24 = vld [vmem:[%s2455_s16 + $0x70] sm:$0xff] (%p1913_p6) }
 0x16b   : > { %s2580_s24 = scalar_lea.vmem %s2645_s6, %s1514_s10  ;;  %v1348_v37 = vld [vmem:[%s2455_s16 + $0x78] sm:$0xff]  ;;  %v1350_v25 = vld [vmem:[%s2455_s16 + $0x80] sm:$0xff]  ;;  %v1352_v6 = vld [vmem:[%s2455_s16 + $0x88] sm:$0xff] }
 0x16c   : > { %1319 = vst [vmem:[%s2580_s24] sm:$0xff] %v1318_v29  ;;  %1321 = vst [vmem:[%s2580_s24 + $0x8] sm:$0xff] %v1320_v47  ;;  %v1354_v31 = vld [vmem:[%s2455_s16 + $0x90] sm:$0xff]  ;;  %v1356_v52 = vld [vmem:[%s2455_s16 + $0x98] sm:$0xff] }
 0x16d   : > { %1323 = vst [vmem:[%s2580_s24 + $0x10] sm:$0xff] %v1322_v30  ;;  %1325 = vst [vmem:[%s2580_s24 + $0x18] sm:$0xff] %v1324_v50  ;;  %v1358_v40 = vld [vmem:[%s2455_s16 + $0xa0] sm:$0xff]  ;;  %v1360_v8 = vld [vmem:[%s2455_s16 + $0xa8] sm:$0xff] }
 0x16e   : > { %1327 = vst [vmem:[%s2580_s24 + $0x40] sm:$0xff] %v1326_v44  ;;  %1329 = vst [vmem:[%s2580_s24 + $0x48] sm:$0xff] %v1328_v32  ;;  %v1362_v46 = vld [vmem:[%s2455_s16 + $0xb0] sm:$0xff]  ;;  %v1364_v54 = vld [vmem:[%s2455_s16 + $0xb8] sm:$0xff] }
 0x16f   : > { %1331 = vst [vmem:[%s2580_s24 + $0x50] sm:$0xff] %v1330_v45  ;;  %1333 = vst [vmem:[%s2580_s24 + $0x58] sm:$0xff] %v1332_v48 }
 0x170   : > { %1335 = vst [vmem:[%s2580_s24 + $0x80] sm:$0xff] %v1334_v27  ;;  %1337 = vst [vmem:[%s2580_s24 + $0x88] sm:$0xff] %v1336_v49 }
 0x171   : > { %1339 = vst [vmem:[%s2580_s24 + $0x90] sm:$0xff] %v1338_v34  ;;  %1341 = vst [vmem:[%s2580_s24 + $0x98] sm:$0xff] %v1340_v3 }
 0x172   : > { %1343 = vst [vmem:[%s2580_s24 + $0xc0] sm:$0xff] %v1342_v5  ;;  %1345 = vst [vmem:[%s2580_s24 + $0xc8] sm:$0xff] %v1344_v12 }
 0x173   : > { %1347 = vst [vmem:[%s2580_s24 + $0xd0] sm:$0xff] %v1346_v24  ;;  %1349 = vst [vmem:[%s2580_s24 + $0xd8] sm:$0xff] %v1348_v37 }
 0x174   : > { %1351 = vst [vmem:[%s2580_s24 + $0x100] sm:$0xff] %v1350_v25  ;;  %1353 = vst [vmem:[%s2580_s24 + $0x108] sm:$0xff] %v1352_v6 }
 0x175   : > { %1355 = vst [vmem:[%s2580_s24 + $0x110] sm:$0xff] %v1354_v31  ;;  %1357 = vst [vmem:[%s2580_s24 + $0x118] sm:$0xff] %v1356_v52 }
 0x176   : > { %1359 = vst [vmem:[%s2580_s24 + $0x140] sm:$0xff] %v1358_v40  ;;  %1361 = vst [vmem:[%s2580_s24 + $0x148] sm:$0xff] %v1360_v8 }
 0x177   : > { %1363 = vst [vmem:[%s2580_s24 + $0x150] sm:$0xff] %v1362_v46  ;;  %1365 = vst [vmem:[%s2580_s24 + $0x158] sm:$0xff] %v1364_v54 }
 0x178 PF: > { %s17_s27 = sadd.s32 1, %s1828_s27   ;;  %s2647_s21 = smov %s1808_s22 }
 0x179   : > { %p14_p12 = scmp.ge.s32.totalorder %s17_s27, 6   ;;  %s2648_s22 = smov %s1921_s12 }
 0x17a   : > { %s2649_s23 = smov %s1820_s25  ;;  %s2650_s24 = smov %s1824_s26 }
 0x17b   : > { %s2651_s25 = smov %s2654_s28  ;;  %s2652_s26 = smov %s2658_s29 }
 0x17c   :  { %16 = sbr.rel (!%p14_p12) target bundleno = 4 (0x4), region = 201 }

// kernel: residual_block_forward.4
= control target key start
LH: loop header
LB: loop body
LE: loop exit
PB: predicated region body
PF: predicated region fallthrough
CT: control target
= control target key end

     0   :  { %s2408_s12 = smov 0   ;;  %s2410_s13 = smov 0   ;;  %s2990_s0 = inlined_call_operand.vmem [shape: f32[2,6,10,10,32], index: 0, kind: input, shape index: {}]   ;;  %s2991_s1 = inlined_call_operand.vmem [shape: f32[1,32], index: 1, kind: input, shape index: {}]   ;;  %s2992_s2 = inlined_call_operand.vmem [shape: f32[9,32,128], index: 2, kind: input, shape index: {}]   ;;  %s2993_s3 = inlined_call_operand.vmem [shape: f32[2,6,64,128], index: 3, kind: output, shape index: {}]  }
   0x1   :  { %s2412_s14 = smov 0   ;;  %s2414_s15 = smov 0  }
   0x2   :  { %s2416_s16 = smov 0  }
   0x3 LB: > { %s22_s17 = sadd.s32 1, %s2378_s14  ;;  %s25_s18 = sadd.s32 1, %s2382_s15  ;;  %s2386_s16 = sphi %s2416_s16, %s13_s16   ;;  %s2382_s15 = sphi %s2414_s15, %s2997_s15   ;;  %s2378_s14 = sphi %s2412_s14, %s2996_s14   ;;  %s2374_s13 = sphi %s2410_s13, %s2995_s13   ;;  %s2370_s12 = sphi %s2408_s12, %s2994_s12  }
   0x4   : > { %p23_p0 = scmp.ge.s32.totalorder %s22_s17, 6  ;;  %p1878_p1 = scmp.ge.s32.totalorder %s2386_s16, 1 }
   0x5   : > { %p157_p2 = scmp.lt.s32.totalorder %s2386_s16, 13 }
   0x6   : > { %s2999_s17 = smov (%p23_p0, %s22_s17), 0  ;;  %s3001_s18 = smov (!%p23_p0, %s25_s18), %s2382_s15 }
   0x7   : > { %p158_p3 = pnand %p1878_p1, %p157_p2  ;;  %p27_p4 = scmp.ge.s32.totalorder %s3001_s18, 2 }
   0x8   : > { %p189_p5 = scmp.lt.s32.totalorder (!%p158_p3), %s2374_s13, 1  ;;  %p191_p6 = scmp.lt.s32.totalorder (!%p158_p3), %s2370_s12, 5 }
   0x9   : > { %s3003_s18 = smov (%p27_p4, %s3001_s18), 0  ;;  %161 = sbr.rel (%p158_p3) target bundleno = 353 (0x161), region = 32 }
   0xe   : > { %v1886_v0 = vld [vmem:[%s2992_s2 + $0x38] sm:$0xff]  ;;  %v1885_v1 = vld [vmem:[%s2992_s2 + $0x30] sm:$0xff]  ;;  %v1884_v2 = vld [vmem:[%s2992_s2 + $0x28] sm:$0xff]  ;;  %s3005_s13 = smov (!%p189_p5, %s2374_s13), 1  ;;  %s3007_s12 = smov (!%p191_p6, %s2370_s12), 5  ;;  %vm247_vm0 = vcmask 261120  }
   0xf   : > { %2277 = vmatprep.subr.mxu1 %v1886_v0  ;;  %2097 = vmatprep.subr.mxu0 %v1886_v0  ;;  %v1883_v3 = vld [vmem:[%s2992_s2 + $0x20] sm:$0xff]  ;;  %s2286_s27 = smul.u32 120, %s3005_s13  ;;  %v2459_v4 = vld [vmem:[%s2992_s2 + $0x18] sm:$0xff]  ;;  %vm249_vm1 = vcmask 254976   ;;  %s1880_s21 = sshll.u32 %s3007_s12, 3 }
  0x10   : > { %2281 = vmatpush3.msra.mxu1 %v1886_v0  ;;  %2098 = vmatpush3.msra.mxu0 %v1886_v0  ;;  %s2285_s28 = smul.u32 20, %s3007_s12  ;;  %v2464_v5 = vld [vmem:[%s2992_s2 + $0x58] sm:$0xff] }
  0x11   : > { %2278 = vmatprep.subr.mxu1 %v1885_v1  ;;  %2099 = vmatprep.subr.mxu0 %v1885_v1  ;;  %s2287_s20 = smul.u32 48, %s3005_s13 }
  0x12   : > { %2282 = vmatpush3.msra.mxu1 %v1885_v1  ;;  %2100 = vmatpush3.msra.mxu0 %v1885_v1  ;;  %s195_s6 = sadd.s32 %s2286_s27, %s2285_s28 }
  0x13   : > { %2279 = vmatprep.subr.mxu1 %v1884_v2  ;;  %2101 = vmatprep.subr.mxu0 %v1884_v2  ;;  %s1879_s7 = sshll.u32 %s195_s6, 3  ;;  %s204_s22 = sadd.s32 %s2287_s20, %s1880_s21 }
  0x14   : > { %2283 = vmatpush3.msra.mxu1 %v1884_v2  ;;  %2102 = vmatpush3.msra.mxu0 %v1884_v2  ;;  %s2469_s10 = scalar_lea.vmem %s2990_s0, %s1879_s7  ;;  %s1881_s12 = sshll.u32 %s204_s22, 3 }
  0x15   : > { %2280 = vmatprep.subr.mxu1 %v1883_v3  ;;  %2103 = vmatprep.subr.mxu0 %v1883_v3  ;;  %v2474_v6 = vld [vmem:[%s2469_s10] sm:$0xff]  ;;  %v2477_v7 = vld [vmem:[%s2469_s10 + $0x8] sm:$0x3]  ;;  %v2492_v13 = vld [vmem:[%s2469_s10 + $0x10] sm:$0xff]  ;;  %s2958_s24 = scalar_lea.vmem %s2993_s3, %s1881_s12 }
  0x16   : > { %2284 = vmatpush3.msra.mxu1 %v1883_v3  ;;  %2104 = vmatpush3.msra.mxu0 %v1883_v3  ;;  %v2480_v8 = vld [vmem:[%s2469_s10 + $0x40] sm:$0xff]  ;;  %v227_v9 = vmul.f32 %v2474_v6, %v2474_v6  ;;  %v228_v10 = vmul.f32 %v2477_v7, %v2477_v7  ;;  %v2487_v11 = vld [vmem:[%s2469_s10 + $0x48] sm:$0x3]  ;;  %v2495_v14 = vld [vmem:[%s2469_s10 + $0x18] sm:$0x3]  ;;  %v229_v16 = vmul.f32 %v2492_v13, %v2492_v13 }
  0x17   : > { %2117 = vmatprep.subr.mxu1 %v2459_v4  ;;  %2137 = vmatprep.subr.mxu0 %v2464_v5  ;;  %v235_v12 = vmul.f32 %v2480_v8, %v2480_v8  ;;  %v236_v15 = vmul.f32 %v2487_v11, %v2487_v11  ;;  %v230_v17 = vmul.f32 %v2495_v14, %v2495_v14  ;;  %v2504_v18 = vld [vmem:[%s2469_s10 + $0x50] sm:$0xff]  ;;  %v2507_v19 = vld [vmem:[%s2469_s10 + $0x58] sm:$0x3]  ;;  %v2510_v20 = vld [vmem:[%s2469_s10 + $0x20] sm:$0xff] }
  0x18   : > { %v248_v21 = vsel %vm247_vm0, %v227_v9, 0.0  ;;  %v250_v22 = vsel %vm249_vm1, %v228_v10, 0.0  ;;  %v237_v24 = vmul.f32 %v2504_v18, %v2504_v18  ;;  %v2518_v25 = vld [vmem:[%s2469_s10 + $0x28] sm:$0x3]  ;;  %v2521_v26 = vld [vmem:[%s2469_s10 + $0x60] sm:$0xff]  ;;  %v258_v29 = vsel %vm247_vm0, %v229_v16, 0.0 }
  0x19   : > { %v285_v23 = vsel %vm247_vm0, %v235_v12, 0.0  ;;  %v251_v27 = vadd.f32 %v250_v22, %v248_v21  ;;  %v286_v28 = vsel %vm249_vm1, %v236_v15, 0.0  ;;  %v259_v30 = vsel %vm249_vm1, %v230_v17, 0.0  ;;  %v2527_v31 = vld [vmem:[%s2469_s10 + $0x68] sm:$0x3]  ;;  %v2542_v44 = vld [vmem:[%s2469_s10 + $0x30] sm:$0xff] }
  0x1a   : > { %v287_v32 = vadd.f32 %v286_v28, %v285_v23  ;;  %v260_v33 = vadd.f32 %v259_v30, %v258_v29  ;;  %v238_v34 = vmul.f32 %v2507_v19, %v2507_v19  ;;  %v294_v35 = vsel %vm247_vm0, %v237_v24, 0.0  ;;  %v2548_v53 = vld [vmem:[%s2469_s10 + $0x38] sm:$0x3]  ;;  %v2554_v62 = vld [vmem:[%s2469_s10 + $0x70] sm:$0xff] }
  0x1b   : > { %v252_v36 = vrot.slane %v251_v27, 4  ;;  %v231_v37 = vmul.f32 %v2510_v20, %v2510_v20  ;;  %v232_v38 = vmul.f32 %v2518_v25, %v2518_v25  ;;  %v239_v39 = vmul.f32 %v2521_v26, %v2521_v26  ;;  %v2560_v15 = vld [vmem:[%s2469_s10 + $0x78] sm:$0x3] }
  0x1c   : > { %v288_v40 = vrot.slane %v287_v32, 4  ;;  %v261_v41 = vrot.slane %v260_v33, 4  ;;  %v295_v42 = vsel %vm249_vm1, %v238_v34, 0.0  ;;  %v240_v43 = vmul.f32 %v2527_v31, %v2527_v31 }
  0x1d   : > { %v253_v45 = vadd.f32 %v252_v36, %v251_v27  ;;  %v296_v46 = vadd.f32 %v295_v42, %v294_v35  ;;  %v267_v47 = vsel %vm247_vm0, %v231_v37, 0.0  ;;  %v268_v48 = vsel %vm249_vm1, %v232_v38, 0.0 }
  0x1e   : > { %v289_v49 = vadd.f32 %v288_v40, %v287_v32  ;;  %v262_v50 = vadd.f32 %v261_v41, %v260_v33  ;;  %v269_v51 = vadd.f32 %v268_v48, %v267_v47  ;;  %v303_v52 = vsel %vm247_vm0, %v239_v39, 0.0 }
  0x1f   : > { %v254_v54 = vrot.slane %v253_v45, 2  ;;  %v297_v55 = vrot.slane %v296_v46, 4  ;;  %v304_v56 = vsel %vm249_vm1, %v240_v43, 0.0  ;;  %v233_v57 = vmul.f32 %v2542_v44, %v2542_v44 }
  0x20   : > { %v290_v58 = vrot.slane %v289_v49, 2  ;;  %v263_v59 = vrot.slane %v262_v50, 2  ;;  %v270_v60 = vrot.slane %v269_v51, 4  ;;  %v305_v61 = vadd.f32 %v304_v56, %v303_v52 }
  0x21   : > { %v255_v63 = vadd.f32 %v254_v54, %v253_v45  ;;  %v298_v0 = vadd.f32 %v297_v55, %v296_v46  ;;  %v234_v1 = vmul.f32 %v2548_v53, %v2548_v53  ;;  %v276_v2 = vsel %vm247_vm0, %v233_v57, 0.0 }
  0x22   : > { %v291_v3 = vadd.f32 %v290_v58, %v289_v49  ;;  %v264_v9 = vadd.f32 %v263_v59, %v262_v50  ;;  %v271_v10 = vadd.f32 %v270_v60, %v269_v51  ;;  %v306_v12 = vrot.slane %v305_v61, 4  ;;  %v2570_v51 = vld [vmem:[%s2469_s10 + $0x80] sm:$0xff]  ;;  %v2573_v60 = vld [vmem:[%s2469_s10 + $0x88] sm:$0x3] }
  0x23   : > { %v256_v16 = vrot.slane %v255_v63, 1  ;;  %v299_v17 = vrot.slane %v298_v0, 2  ;;  %v277_v21 = vsel %vm249_vm1, %v234_v1, 0.0  ;;  %v241_v22 = vmul.f32 %v2554_v62, %v2554_v62  ;;  %v2578_v1 = vld [vmem:[%s2469_s10 + $0x90] sm:$0xff] }
  0x24   : > { %v292_v23 = vrot.slane %v291_v3, 1  ;;  %v265_v24 = vrot.slane %v264_v9, 1  ;;  %v272_v27 = vrot.slane %v271_v10, 2  ;;  %v307_v28 = vadd.f32 %v306_v12, %v305_v61 }
  0x25   : > { %v257_v29 = vadd.f32 %v256_v16, %v255_v63  ;;  %v300_v30 = vadd.f32 %v299_v17, %v298_v0  ;;  %v278_v32 = vadd.f32 %v277_v21, %v276_v2  ;;  %v242_v33 = vmul.f32 %v2560_v15, %v2560_v15 }
  0x26   : > { %v293_v34 = vadd.f32 %v292_v23, %v291_v3  ;;  %v266_v35 = vadd.f32 %v265_v24, %v264_v9  ;;  %v273_v36 = vadd.f32 %v272_v27, %v271_v10  ;;  %v308_v37 = vrot.slane %v307_v28, 2  ;;  %v2581_v10 = vld [vmem:[%s2469_s10 + $0x98] sm:$0x3] }
  0x27   : > { %v339_v38 = vmul.f32 0.125, %v257_v29  ;;  %v301_v39 = vrot.slane %v300_v30, 1  ;;  %v279_v40 = vrot.slane %v278_v32, 4  ;;  %v312_v41 = vsel %vm247_vm0, %v241_v22, 0.0 }
  0x28   : > { %v343_v42 = vmul.f32 0.125, %v293_v34  ;;  %v340_v43 = vmul.f32 0.125, %v266_v35  ;;  %v274_v45 = vrot.slane %v273_v36, 1  ;;  %v309_v46 = vadd.f32 %v308_v37, %v307_v28 }
  0x29   : > { %v349_v47 = vadd.f32 1e-05, %v339_v38  ;;  %v302_v48 = vadd.f32 %v301_v39, %v300_v30  ;;  %v280_v49 = vadd.f32 %v279_v40, %v278_v32  ;;  %v313_v50 = vsel %vm249_vm1, %v242_v33, 0.0 }
  0x2a   : > { %v353_v52 = vadd.f32 1e-05, %v343_v42  ;;  %v350_v54 = vadd.f32 1e-05, %v340_v43  ;;  %v275_v55 = vadd.f32 %v274_v45, %v273_v36  ;;  %v310_v56 = vrot.slane %v309_v46, 1 }
  0x2b   : > { %2328 = vrsqrt.f32 %v349_v47  ;;  %v344_v57 = vmul.f32 0.125, %v302_v48  ;;  %v281_v58 = vrot.slane %v280_v49, 2  ;;  %v314_v59 = vadd.f32 %v313_v50, %v312_v41 }
  0x2c   : > { %2330 = vrsqrt.f32 %v353_v52  ;;  %v341_v61 = vmul.f32 0.125, %v275_v55  ;;  %v311_v63 = vadd.f32 %v310_v56, %v309_v46  ;;  %v243_v0 = vmul.f32 %v2570_v51, %v2570_v51 }
  0x2d   : > { %2332 = vrsqrt.f32 %v350_v54  ;;  %v354_v2 = vadd.f32 1e-05, %v344_v57  ;;  %v282_v3 = vadd.f32 %v281_v58, %v280_v49  ;;  %v315_v9 = vrot.slane %v314_v59, 4  ;;  %v2596_v49 = vld [vmem:[%s2991_s1] ss:$0 sm:$0xff] }
  0x2e   : > { %v351_v12 = vadd.f32 1e-05, %v341_v61  ;;  %v345_v16 = vmul.f32 0.125, %v311_v63  ;;  %v244_v17 = vmul.f32 %v2573_v60, %v2573_v60  ;;  %v321_v21 = vsel %vm247_vm0, %v243_v0, 0.0 }
  0x2f   : > { %2334 = vrsqrt.f32 %v354_v2  ;;  %v283_v22 = vrot.slane %v282_v3, 1  ;;  %v316_v23 = vadd.f32 %v315_v9, %v314_v59  ;;  %v245_v24 = vmul.f32 %v2578_v1, %v2578_v1 }
  0x30   : > { %2336 = vrsqrt.f32 %v351_v12  ;;  %v355_v27 = vadd.f32 1e-05, %v345_v16  ;;  %v322_v28 = vsel %vm249_vm1, %v244_v17, 0.0  ;;  %v246_v29 = vmul.f32 %v2581_v10, %v2581_v10 }
  0x31   : > { %v284_v30 = vadd.f32 %v283_v22, %v282_v3  ;;  %v317_v32 = vrot.slane %v316_v23, 2  ;;  %v323_v33 = vadd.f32 %v322_v28, %v321_v21  ;;  %v330_v34 = vsel %vm247_vm0, %v245_v24, 0.0 }
  0x32   : > { %2338 = vrsqrt.f32 %v355_v27  ;;  %v331_v35 = vsel %vm249_vm1, %v246_v29, 0.0 }
  0x33   : > { %v342_v36 = vmul.f32 0.125, %v284_v30  ;;  %v318_v37 = vadd.f32 %v317_v32, %v316_v23  ;;  %v324_v38 = vrot.slane %v323_v33, 4  ;;  %v332_v39 = vadd.f32 %v331_v35, %v330_v34 }
  0x35   : > { %v352_v40 = vadd.f32 1e-05, %v342_v36  ;;  %v319_v41 = vrot.slane %v318_v37, 1  ;;  %v325_v42 = vadd.f32 %v324_v38, %v323_v33  ;;  %v333_v43 = vrot.slane %v332_v39, 4 }
  0x37   : > { %2340 = vrsqrt.f32 %v352_v40  ;;  %v320_v45 = vadd.f32 %v319_v41, %v318_v37  ;;  %v326_v46 = vrot.slane %v325_v42, 2  ;;  %v334_v47 = vadd.f32 %v333_v43, %v332_v39 }
  0x38   : > { %v2329_v48 = vpop.eup %2328 }
  0x39   : > { %v2331_v50 = vpop.eup %2330  ;;  %v369_v52 = vmul.f32 %v2329_v48, %v2474_v6  ;;  %v370_v54 = vmul.f32 %v2329_v48, %v2477_v7  ;;  %v346_v55 = vmul.f32 0.125, %v320_v45  ;;  %v327_v56 = vadd.f32 %v326_v46, %v325_v42  ;;  %v1905_v42 = vld [vmem:[%s2992_s2 + $0x50] sm:$0xff]  ;;  %v1904_v48 = vld [vmem:[%s2992_s2 + $0x48] sm:$0xff] }
  0x3a   : > { %v2333_v57 = vpop.eup %2332  ;;  %v377_v58 = vmul.f32 %v2331_v50, %v2480_v8  ;;  %v378_v59 = vmul.f32 %v2331_v50, %v2487_v11  ;;  %v335_v61 = vrot.slane %v334_v47, 2  ;;  %v446_v46 = vld [vmem:[%s2992_s2 + $0x10] sm:$0xff] }
  0x3b   : > { %v396_v63 = vmul.f32 %v2596_v49, %v369_v52  ;;  %v397_v0 = vmul.f32 %v2596_v49, %v370_v54  ;;  %v371_v2 = vmul.f32 %v2333_v57, %v2492_v13  ;;  %v372_v3 = vmul.f32 %v2333_v57, %v2495_v14 }
  0x3c   : > { %v2335_v9 = vpop.eup %2334  ;;  %v404_v6 = vmul.f32 %v2596_v49, %v377_v58  ;;  %v405_v7 = vmul.f32 %v2596_v49, %v378_v59  ;;  %v356_v12 = vadd.f32 1e-05, %v346_v55  ;;  %v328_v16 = vrot.slane %v327_v56, 1  ;;  %v444_v55 = vld [vmem:[%s2992_s2] sm:$0xff]  ;;  %v1930_v59 = vld [vmem:[%s2992_s2 + $0x98] sm:$0xff] }
  0x3d   : > { %v2337_v17 = vpop.eup %2336  ;;  %416 = vst.msk [vmem:[#allocation2] sm:$0xff] %vm247_vm0, %v396_v63  ;;  %v398_v8 = vmul.f32 %v2596_v49, %v371_v2  ;;  %v399_v11 = vmul.f32 %v2596_v49, %v372_v3  ;;  %v379_v13 = vmul.f32 %v2335_v9, %v2504_v18  ;;  %v380_v14 = vmul.f32 %v2335_v9, %v2507_v19 }
  0x3e   : > { %417 = vst.msk [vmem:[#allocation2 + $0x8] sm:$0x3] %vm249_vm1, %v397_v0  ;;  %425 = vst.msk [vmem:[#allocation2 + $0x48] sm:$0x3] %vm249_vm1, %v405_v7  ;;  %v373_v21 = vmul.f32 %v2337_v17, %v2510_v20  ;;  %v374_v22 = vmul.f32 %v2337_v17, %v2518_v25  ;;  %2342 = vrsqrt.f32 %v356_v12  ;;  %v329_v23 = vadd.f32 %v328_v16, %v327_v56  ;;  %v1903_v56 = vld [vmem:[%s2992_s2 + $0x40] sm:$0xff] }
  0x3f   : > { %424 = vst.msk [vmem:[#allocation2 + $0x40] sm:$0xff] %vm247_vm0, %v404_v6  ;;  %v2339_v24 = vpop.eup %2338  ;;  %418 = vst.msk [vmem:[#allocation2 + $0x10] sm:$0xff] %vm247_vm0, %v398_v8  ;;  %v406_v27 = vmul.f32 %v2596_v49, %v379_v13  ;;  %v407_v18 = vmul.f32 %v2596_v49, %v380_v14  ;;  %v336_v19 = vadd.f32 %v335_v61, %v334_v47  ;;  %v1929_v6 = vld [vmem:[%s2992_s2 + $0x90] sm:$0xff] }
  0x40   : > { %419 = vst.msk [vmem:[#allocation2 + $0x18] sm:$0x3] %vm249_vm1, %v399_v11  ;;  %v400_v28 = vmul.f32 %v2596_v49, %v373_v21  ;;  %v401_v29 = vmul.f32 %v2596_v49, %v374_v22  ;;  %v381_v20 = vmul.f32 %v2339_v24, %v2521_v26  ;;  %v382_v25 = vmul.f32 %v2339_v24, %v2527_v31  ;;  %v1928_v11 = vld [vmem:[%s2992_s2 + $0x88] sm:$0xff]  ;;  %v1927_v22 = vld [vmem:[%s2992_s2 + $0x80] sm:$0xff] }
  0x41   : > { %426 = vst.msk [vmem:[#allocation2 + $0x50] sm:$0xff] %vm247_vm0, %v406_v27  ;;  %v347_v30 = vmul.f32 0.125, %v329_v23  ;;  %v337_v32 = vrot.slane %v336_v19, 1 }
  0x42   : > { %427 = vst.msk [vmem:[#allocation2 + $0x58] sm:$0x3] %vm249_vm1, %v407_v18  ;;  %421 = vst.msk [vmem:[#allocation2 + $0x28] sm:$0x3] %vm249_vm1, %v401_v29  ;;  %v408_v33 = vmul.f32 %v2596_v49, %v381_v20  ;;  %v409_v34 = vmul.f32 %v2596_v49, %v382_v25  ;;  %v1915_v29 = vld [vmem:[%s2992_s2 + $0x60] sm:$0xff] }
  0x43   : > { %420 = vst.msk [vmem:[#allocation2 + $0x20] sm:$0xff] %vm247_vm0, %v400_v28  ;;  %v357_v35 = vadd.f32 1e-05, %v347_v30  ;;  %v338_v36 = vadd.f32 %v337_v32, %v336_v19  ;;  %v1916_v19 = vld [vmem:[%s2992_s2 + $0x68] sm:$0xff]  ;;  %v1942_v32 = vld [vmem:[%s2992_s2 + $0xb8] sm:$0xff] }
  0x44   : > { %v2341_v37 = vpop.eup %2340  ;;  %428 = vst.msk [vmem:[#allocation2 + $0x60] sm:$0xff] %vm247_vm0, %v408_v33  ;;  %v436_v17 = vld [vmem:[#allocation2] sm:$0xff]  ;;  %v1954_v33 = vld [vmem:[%s2992_s2 + $0xd8] sm:$0xff] }
  0x45   : > { %v448_v26 = vld [vmem:[#allocation2 + $0x1] sm:$0xff]  ;;  %429 = vst.msk [vmem:[#allocation2 + $0x68] sm:$0x3] %vm249_vm1, %v409_v34  ;;  %v375_v38 = vmul.f32 %v2341_v37, %v2542_v44  ;;  %v376_v39 = vmul.f32 %v2341_v37, %v2548_v53  ;;  %2344 = vrsqrt.f32 %v357_v35  ;;  %v348_v40 = vmul.f32 0.125, %v338_v36  ;;  %v1953_v35 = vld [vmem:[%s2992_s2 + $0xd0] sm:$0xff] }
  0x46   : > { %2105 = vmatprep.mubr.msk.f32.mxu0 %vm247_vm0, %v448_v26  ;;  %v2635_v31 = vld [vmem:[#allocation2 + $0x41] sm:$0xff]  ;;  %v437_v21 = vld [vmem:[#allocation2 + $0x10] sm:$0xff] }
  0x47   : > { %2111 = vmatprep.mubr.msk.f32.mxu1 %vm247_vm0, %v2635_v31  ;;  %v2641_v41 = vld [vmem:[#allocation2 + $0x11] sm:$0xff]  ;;  %v402_v43 = vmul.f32 %v2596_v49, %v375_v38  ;;  %v403_v44 = vmul.f32 %v2596_v49, %v376_v39  ;;  %v358_v45 = vadd.f32 1e-05, %v348_v40  ;;  %v2717_v8 = vld [vmem:[#allocation2 + $0x42] sm:$0xff] }
  0x48   : > { %2106 = vmatmul.mubr.msk.f32.vlgmr.msra.gmra.mxu0 %vm247_vm0, %v2641_v41  ;;  %v2698_v0 = vld [vmem:[#allocation2 + $0x12] sm:$0xff]  ;;  %v2757_v28 = vld [vmem:[#allocation2 + $0x40] sm:$0xff]  ;;  %v1952_v36 = vld [vmem:[%s2992_s2 + $0xc8] sm:$0xff] }
  0x49   : > { %v2650_v53 = vld [vmem:[#allocation2 + $0x51] sm:$0xff]  ;;  %2138 = vmatpush3.msra.mxu0 %v2464_v5  ;;  %422 = vst.msk [vmem:[#allocation2 + $0x30] sm:$0xff] %vm247_vm0, %v402_v43  ;;  %2346 = vrsqrt.f32 %v358_v45  ;;  %v445_v5 = vld [vmem:[%s2992_s2 + $0x8] sm:$0xff]  ;;  %v1951_v37 = vld [vmem:[%s2992_s2 + $0xc0] sm:$0xff] }
  0x4a   : > { %2112 = vmatmul.mubr.msk.f32.vlgmr.msra.gmra.mxu1 %vm247_vm0, %v2650_v53  ;;  %2139 = vmatprep.subr.mxu0 %v1905_v42  ;;  %v2658_v47 = vld [vmem:[#allocation2 + $0x21] sm:$0xff]  ;;  %423 = vst.msk [vmem:[#allocation2 + $0x38] sm:$0x3] %vm249_vm1, %v403_v44  ;;  %v2743_v27 = vld [vmem:[#allocation2 + $0x52] sm:$0xff] }
  0x4b   : > { %2118 = vmatpush3.msra.mxu1 %v2459_v4  ;;  %2108 = vmatprep.mubr.msk.f32.mxu0 %vm247_vm0, %v2658_v47  ;;  %v2343_v50 = vpop.eup %2342  ;;  %v2700_v2 = vld [vmem:[#allocation2 + $0x22] sm:$0xff]  ;;  %v2772_v25 = vld [vmem:[#allocation2 + $0x50] sm:$0xff] }
  0x4c   : > { %2119 = vmatprep.subr.mxu1 %v446_v46  ;;  %v2671_v52 = vld [vmem:[#allocation2 + $0x61] sm:$0xff]  ;;  %2140 = vmatpush3.msra.mxu0 %v1905_v42  ;;  %v383_v4 = vmul.f32 %v2343_v50, %v2554_v62  ;;  %v384_v54 = vmul.f32 %v2343_v50, %v2560_v15  ;;  %v1918_v62 = vld [vmem:[%s2992_s2 + $0x78] sm:$0xff]  ;;  %v1941_v26 = vld [vmem:[%s2992_s2 + $0xb0] sm:$0xff] }
  0x4d   : > { %2120 = vmatpush3.msra.mxu1 %v446_v46  ;;  %2114 = vmatprep.mubr.msk.f32.mxu1 %vm247_vm0, %v2671_v52  ;;  %v719_v15 = vld [vmem:[#allocation2 + $0x2] sm:$0xff]  ;;  %v1978_v42 = vld [vmem:[%s2992_s2 + $0x118] sm:$0xff]  ;;  %v1977_v44 = vld [vmem:[%s2992_s2 + $0x110] sm:$0xff] }
  0x4e   : > { %2121 = vmatprep.subr.mxu1 %v445_v5  ;;  %2141 = vmatprep.subr.mxu0 %v1904_v48  ;;  %v410_v57 = vmul.f32 %v2596_v49, %v383_v4  ;;  %v411_v58 = vmul.f32 %v2596_v49, %v384_v54  ;;  %v2736_v24 = vld [vmem:[#allocation2 + $0x20] sm:$0xff]  ;;  %v1940_v38 = vld [vmem:[%s2992_s2 + $0xa8] sm:$0xff] }
  0x4f   : > { %2122 = vmatpush3.msra.mxu1 %v445_v5  ;;  %2142 = vmatpush3.msra.mxu0 %v1904_v48  ;;  %v2774_v30 = vld [vmem:[#allocation2 + $0x60] sm:$0xff]  ;;  %v1976_v45 = vld [vmem:[%s2992_s2 + $0x108] sm:$0xff]  ;;  %v1965_v5 = vld [vmem:[%s2992_s2 + $0xf0] sm:$0xff] }
  0x50   : > { %2123 = vmatprep.subr.mxu1 %v444_v55  ;;  %2143 = vmatprep.subr.mxu0 %v1903_v56  ;;  %430 = vst.msk [vmem:[#allocation2 + $0x70] sm:$0xff] %vm247_vm0, %v410_v57  ;;  %v2752_v18 = vld [vmem:[#allocation2 + $0x30] sm:$0xff]  ;;  %v1939_v39 = vld [vmem:[%s2992_s2 + $0xa0] sm:$0xff]  ;;  %v1964_v48 = vld [vmem:[%s2992_s2 + $0xe8] sm:$0xff] }
  0x51   : > { %v2691_v61 = vld [vmem:[#allocation2 + $0x31] sm:$0xff]  ;;  %431 = vst.msk [vmem:[#allocation2 + $0x78] sm:$0x3] %vm249_vm1, %v411_v58  ;;  %2124 = vmatpush3.msra.mxu1 %v444_v55  ;;  %2144 = vmatpush3.msra.mxu0 %v1903_v56  ;;  %v1975_v46 = vld [vmem:[%s2992_s2 + $0x100] sm:$0xff] }
  0x52   : > { %2109 = vmatmul.mubr.msk.f32.gmra.mxu0 %vm247_vm0, %v2691_v61  ;;  %2157 = vmatprep.subr.mxu1 %v1918_v62  ;;  %v2345_v63 = vpop.eup %2344  ;;  %v1963_v50 = vld [vmem:[%s2992_s2 + $0xe0] sm:$0xff] }
  0x53   : > { %2145 = vmatprep.mubr.msk.f32.mxu0 %vm247_vm0, %v719_v15  ;;  %2177 = vmatprep.subr.mxu0 %v1930_v59  ;;  %v385_v3 = vmul.f32 %v2345_v63, %v2570_v51  ;;  %v386_v9 = vmul.f32 %v2345_v63, %v2573_v60  ;;  %v2713_v51 = vld [vmem:[#allocation2 + $0x32] sm:$0xff] }
  0x55   : > { %v412_v7 = vmul.f32 %v2596_v49, %v385_v3  ;;  %v413_v12 = vmul.f32 %v2596_v49, %v386_v9 }
  0x56   : > { %2146 = vmatmul.mubr.msk.f32.vlgmr.msra.gmra.mxu0 %vm247_vm0, %v2698_v0  ;;  %v2347_v16 = vpop.eup %2346 }
  0x57   : > { %2178 = vmatpush3.msra.mxu0 %v1930_v59  ;;  %2148 = vmatprep.mubr.msk.f32.mxu0 %vm247_vm0, %v2700_v2  ;;  %432 = vst.msk [vmem:[#allocation2 + $0x80] sm:$0xff] %vm247_vm0, %v412_v7  ;;  %v387_v13 = vmul.f32 %v2347_v16, %v2578_v1  ;;  %v388_v14 = vmul.f32 %v2347_v16, %v2581_v10  ;;  %v1917_v10 = vld [vmem:[%s2992_s2 + $0x70] sm:$0xff] }
  0x58   : > { %v2715_v60 = vld [vmem:[#allocation2 + $0x71] sm:$0xff]  ;;  %2179 = vmatprep.subr.mxu0 %v1929_v6  ;;  %433 = vst.msk [vmem:[#allocation2 + $0x88] sm:$0x3] %vm249_vm1, %v413_v12 }
  0x59   : > { %2115 = vmatmul.mubr.msk.f32.gmra.mxu1 %vm247_vm0, %v2715_v60  ;;  %2180 = vmatpush3.msra.mxu0 %v1929_v6  ;;  %v414_v23 = vmul.f32 %v2596_v49, %v387_v13  ;;  %v415_v1 = vmul.f32 %v2596_v49, %v388_v14  ;;  %v2748_v49 = vld [vmem:[#allocation2 + $0x62] sm:$0xff]  ;;  %v2766_v20 = vld [vmem:[#allocation2 + $0x72] sm:$0xff] }
  0x5a   : > { %2125 = vmatprep.mubr.msk.f32.mxu1 %vm247_vm0, %v436_v17  ;;  %2149 = vmatmul.mubr.msk.f32.gmra.mxu0 %vm247_vm0, %v2713_v51  ;;  %v2790_v34 = vld [vmem:[#allocation2 + $0x70] sm:$0xff] }
  0x5b   : > { %2151 = vmatprep.mubr.msk.f32.mxu0 %vm247_vm0, %v2717_v8  ;;  %2181 = vmatprep.subr.mxu0 %v1928_v11  ;;  %434 = vst.msk [vmem:[#allocation2 + $0x90] sm:$0xff] %vm247_vm0, %v414_v23 }
  0x5c   : > { %2182 = vmatpush3.msra.mxu0 %v1928_v11  ;;  %435 = vst.msk [vmem:[#allocation2 + $0x98] sm:$0x3] %vm249_vm1, %v415_v1 }
  0x5d   : > { %2126 = vmatmul.mubr.msk.f32.vlgmr.msra.gmra.mxu1 %vm247_vm0, %v437_v21  ;;  %2183 = vmatprep.subr.mxu0 %v1927_v22 }
  0x5e   : > { %2158 = vmatpush3.msra.mxu1 %v1918_v62  ;;  %2128 = vmatprep.mubr.msk.f32.mxu1 %vm247_vm0, %v2736_v24  ;;  %v877_v43 = vld [vmem:[#allocation2 + $0x80] sm:$0xff] }
  0x5f   : > { %2159 = vmatprep.subr.mxu1 %v1917_v10  ;;  %2152 = vmatmul.mubr.msk.f32.gmra.mxu0 %vm247_vm0, %v2743_v27  ;;  %v2829_v40 = vld [vmem:[#allocation2 + $0x81] sm:$0xff] }
  0x60   : > { %2160 = vmatpush3.msra.mxu1 %v1917_v10  ;;  %2154 = vmatprep.mubr.msk.f32.mxu0 %vm247_vm0, %v2748_v49  ;;  %v1177_v54 = vld [vmem:[#allocation2 + $0x82] sm:$0xff] }
  0x61   : > { %2129 = vmatmul.mubr.msk.f32.gmra.mxu1 %vm247_vm0, %v2752_v18  ;;  %2161 = vmatprep.subr.mxu1 %v1916_v19 }
  0x62   : > { %2131 = vmatprep.mubr.msk.f32.mxu1 %vm247_vm0, %v2757_v28  ;;  %2162 = vmatpush3.msra.mxu1 %v1916_v19  ;;  %v1328_v4 = vld [vmem:[#allocation2 + $0x90] sm:$0xff] }
  0x63   : > { %2163 = vmatprep.subr.mxu1 %v1915_v29  ;;  %2155 = vmatmul.mubr.msk.f32.gmra.mxu0 %vm247_vm0, %v2766_v20  ;;  %v1628_v55 = vld [vmem:[#allocation2 + $0x92] sm:$0xff] }
  0x64   : > { %2164 = vmatpush3.msra.mxu1 %v1915_v29  ;;  %2184 = vmatpush3.msra.mxu0 %v1927_v22 }
  0x65   : > { %2132 = vmatmul.mubr.msk.f32.gmra.mxu1 %vm247_vm0, %v2772_v25  ;;  %2185 = vmatprep.mubr.msk.f32.mxu0 %vm247_vm0, %v2641_v41  ;;  %v1966_v41 = vld [vmem:[%s2992_s2 + $0xf8] sm:$0xff] }
  0x66   : > { %2134 = vmatprep.mubr.msk.f32.mxu1 %vm247_vm0, %v2774_v30  ;;  %2197 = vmatprep.subr.mxu1 %v1942_v32 }
  0x67   : > { %2186 = vmatmul.mubr.msk.f32.vlgmr.msra.gmra.mxu0 %vm247_vm0, %v2658_v47  ;;  %2217 = vmatprep.subr.mxu0 %v1954_v33 }
  0x68   : > { %2218 = vmatpush3.msra.mxu0 %v1954_v33  ;;  %2188 = vmatprep.mubr.msk.f32.mxu0 %vm247_vm0, %v2691_v61 }
  0x69   : > { %2135 = vmatmul.mubr.msk.f32.gmra.mxu1 %vm247_vm0, %v2790_v34  ;;  %2219 = vmatprep.subr.mxu0 %v1953_v35 }
  0x6a   : > { %2165 = vmatprep.mubr.msk.f32.mxu1 %vm247_vm0, %v437_v21  ;;  %2220 = vmatpush3.msra.mxu0 %v1953_v35 }
  0x6b   : > { %2189 = vmatmul.mubr.msk.f32.gmra.mxu0 %vm247_vm0, %v2635_v31  ;;  %2221 = vmatprep.subr.mxu0 %v1952_v36 }
  0x6c   : > { %2191 = vmatprep.mubr.msk.f32.mxu0 %vm247_vm0, %v2650_v53  ;;  %2222 = vmatpush3.msra.mxu0 %v1952_v36 }
  0x6d   : > { %2166 = vmatmul.mubr.msk.f32.vlgmr.msra.gmra.mxu1 %vm247_vm0, %v2736_v24  ;;  %2223 = vmatprep.subr.mxu0 %v1951_v37 }
  0x6e   : > { %2198 = vmatpush3.msra.mxu1 %v1942_v32  ;;  %2168 = vmatprep.mubr.msk.f32.mxu1 %vm247_vm0, %v2752_v18 }
  0x6f   : > { %2199 = vmatprep.subr.mxu1 %v1941_v26  ;;  %2192 = vmatmul.mubr.msk.f32.gmra.mxu0 %vm247_vm0, %v2671_v52 }
  0x70   : > { %2200 = vmatpush3.msra.mxu1 %v1941_v26  ;;  %2194 = vmatprep.mubr.msk.f32.mxu0 %vm247_vm0, %v2715_v60 }
  0x71   : > { %2169 = vmatmul.mubr.msk.f32.gmra.mxu1 %vm247_vm0, %v2757_v28  ;;  %2201 = vmatprep.subr.mxu1 %v1940_v38 }
  0x72   : > { %2171 = vmatprep.mubr.msk.f32.mxu1 %vm247_vm0, %v2772_v25  ;;  %2202 = vmatpush3.msra.mxu1 %v1940_v38 }
  0x73   : > { %2203 = vmatprep.subr.mxu1 %v1939_v39  ;;  %2195 = vmatmul.mubr.msk.f32.gmra.mxu0 %vm247_vm0, %v2829_v40 }
  0x74   : > { %2204 = vmatpush3.msra.mxu1 %v1939_v39  ;;  %2224 = vmatpush3.msra.mxu0 %v1951_v37 }
  0x75   : > { %2172 = vmatmul.mubr.msk.f32.gmra.mxu1 %vm247_vm0, %v2774_v30  ;;  %2225 = vmatprep.mubr.msk.f32.mxu0 %vm247_vm0, %v2736_v24 }
  0x76   : > { %2174 = vmatprep.mubr.msk.f32.mxu1 %vm247_vm0, %v2790_v34  ;;  %2237 = vmatprep.subr.mxu1 %v1966_v41 }
  0x77   : > { %2226 = vmatmul.mubr.msk.f32.vlgmr.msra.gmra.mxu0 %vm247_vm0, %v2752_v18  ;;  %2257 = vmatprep.subr.mxu0 %v1978_v42 }
  0x78   : > { %2258 = vmatpush3.msra.mxu0 %v1978_v42  ;;  %2228 = vmatprep.mubr.msk.f32.mxu0 %vm247_vm0, %v2757_v28 }
  0x79   : > { %2175 = vmatmul.mubr.msk.f32.gmra.mxu1 %vm247_vm0, %v877_v43  ;;  %2259 = vmatprep.subr.mxu0 %v1977_v44 }
  0x7a   : > { %2205 = vmatprep.mubr.msk.f32.mxu1 %vm247_vm0, %v2698_v0  ;;  %2260 = vmatpush3.msra.mxu0 %v1977_v44 }
  0x7b   : > { %2229 = vmatmul.mubr.msk.f32.gmra.mxu0 %vm247_vm0, %v2772_v25  ;;  %2261 = vmatprep.subr.mxu0 %v1976_v45 }
  0x7c   : > { %2231 = vmatprep.mubr.msk.f32.mxu0 %vm247_vm0, %v2774_v30  ;;  %2262 = vmatpush3.msra.mxu0 %v1976_v45 }
  0x7d   : > { %2206 = vmatmul.mubr.msk.f32.vlgmr.msra.gmra.mxu1 %vm247_vm0, %v2700_v2  ;;  %2263 = vmatprep.subr.mxu0 %v1975_v46 }
  0x7e   : > { %2238 = vmatpush3.msra.mxu1 %v1966_v41  ;;  %2208 = vmatprep.mubr.msk.f32.mxu1 %vm247_vm0, %v2713_v51 }
  0x7f   : > { %2239 = vmatprep.subr.mxu1 %v1965_v5  ;;  %2232 = vmatmul.mubr.msk.f32.gmra.mxu0 %vm247_vm0, %v2790_v34 }
  0x80   : > { %2240 = vmatpush3.msra.mxu1 %v1965_v5  ;;  %2234 = vmatprep.mubr.msk.f32.mxu0 %vm247_vm0, %v877_v43 }
  0x81   : > { %2209 = vmatmul.mubr.msk.f32.gmra.mxu1 %vm247_vm0, %v2717_v8  ;;  %2241 = vmatprep.subr.mxu1 %v1964_v48 }
  0x82   : > { %2211 = vmatprep.mubr.msk.f32.mxu1 %vm247_vm0, %v2743_v27  ;;  %2242 = vmatpush3.msra.mxu1 %v1964_v48 }
  0x83   : > { %2243 = vmatprep.subr.mxu1 %v1963_v50  ;;  %2235 = vmatmul.mubr.msk.f32.gmra.mxu0 %vm247_vm0, %v1328_v4 }
  0x84   : > { %2244 = vmatpush3.msra.mxu1 %v1963_v50  ;;  %2264 = vmatpush3.msra.mxu0 %v1975_v46 }
  0x85   : > { %2212 = vmatmul.mubr.msk.f32.gmra.mxu1 %vm247_vm0, %v2748_v49  ;;  %2265 = vmatprep.mubr.msk.f32.mxu0 %vm247_vm0, %v2700_v2 }
  0x86   : > { %2214 = vmatprep.mubr.msk.f32.mxu1 %vm247_vm0, %v2766_v20 }
  0x87   : > { %2266 = vmatmul.mubr.msk.f32.vlgmr.msra.gmra.mxu0 %vm247_vm0, %v2713_v51 }
  0x88   : > { %2268 = vmatprep.mubr.msk.f32.mxu0 %vm247_vm0, %v2717_v8 }
  0x89   : > { %2215 = vmatmul.mubr.msk.f32.gmra.mxu1 %vm247_vm0, %v1177_v54 }
  0x8a   : > { %2245 = vmatprep.mubr.msk.f32.mxu1 %vm247_vm0, %v2658_v47 }
  0x8b   : > { %2269 = vmatmul.mubr.msk.f32.gmra.mxu0 %vm247_vm0, %v2743_v27 }
  0x8c   : > { %2271 = vmatprep.mubr.msk.f32.mxu0 %vm247_vm0, %v2748_v49 }
  0x8d   : > { %2246 = vmatmul.mubr.msk.f32.vlgmr.msra.gmra.mxu1 %vm247_vm0, %v2691_v61 }
  0x8e   : > { %2248 = vmatprep.mubr.msk.f32.mxu1 %vm247_vm0, %v2635_v31  ;;  %v1478_v31 = vld [vmem:[#allocation2 + $0x91] sm:$0xff] }
  0x8f   : > { %2272 = vmatmul.mubr.msk.f32.gmra.mxu0 %vm247_vm0, %v2766_v20 }
  0x90   : > { %2274 = vmatprep.mubr.msk.f32.mxu0 %vm247_vm0, %v1177_v54 }
  0x91   : > { %2249 = vmatmul.mubr.msk.f32.gmra.mxu1 %vm247_vm0, %v2650_v53 }
  0x92   : > { %2251 = vmatprep.mubr.msk.f32.mxu1 %vm247_vm0, %v2671_v52 }
  0x93   : > { %2275 = vmatmul.mubr.msk.f32.gmra.mxu0 %vm247_vm0, %v1628_v55 }
  0x95   : > { %2252 = vmatmul.mubr.msk.f32.gmra.mxu1 %vm247_vm0, %v2715_v60 }
  0x96   : > { %2254 = vmatprep.mubr.msk.f32.mxu1 %vm247_vm0, %v2829_v40 }
  0x99   : > { %2255 = vmatmul.mubr.msk.f32.gmra.mxu1 %vm247_vm0, %v1478_v31 }
 0x108   : > { %v2107_v47 = vpop.f32.mrf.mxu0 }
 0x10a   : > { %v551_v56 = vpop.f32.mrf.mxu0  ;;  %v2113_v57 = vpop.f32.mrf.mxu1 }
 0x10c   : > { %v571_v53 = vpop.f32.mrf.mxu1 }
 0x112   : > { %v2110_v58 = vpop.f32.mrf.mxu0 }
 0x114   : > { %v561_v62 = vpop.f32.mrf.mxu0 }
 0x116   : > { %v2147_v15 = vpop.f32.mrf.mxu0 }
 0x118   : > { %v822_v59 = vpop.f32.mrf.mxu0 }
 0x119   : > { %v2116_v52 = vpop.f32.mrf.mxu1 }
 0x11a   : > { %v2150_v61 = vpop.f32.mrf.mxu0 }
 0x11b   : > { %v2924_v63 = vpop.f32.mrf.mxu1 }
 0x11c   : > { %v832_v0 = vpop.f32.mrf.mxu0 }
 0x11d   : > { %v2127_v2 = vpop.f32.mrf.mxu1 }
 0x11e   : > { %v686_v34 = vadd.f32 %v2127_v2, %v2107_v47 }
 0x11f   : > { %v680_v3 = vpop.f32.mrf.mxu1  ;;  %v2153_v9 = vpop.f32.mrf.mxu0 }
 0x120   : > { %v681_v37 = vadd.f32 %v680_v3, %v551_v56  ;;  %v862_v39 = vadd.f32 %v2147_v15, %v686_v34 }
 0x121   : > { %v2130_v6 = vpop.f32.mrf.mxu1  ;;  %v842_v7 = vpop.f32.mrf.mxu0 }
 0x122   : > { %v696_v40 = vadd.f32 %v2130_v6, %v2110_v58  ;;  %v861_v43 = vadd.f32 %v822_v59, %v681_v37 }
 0x123   : > { %v690_v12 = vpop.f32.mrf.mxu1  ;;  %v2926_v16 = vpop.f32.mrf.mxu0 }
 0x124   : > { %v691_v44 = vadd.f32 %v690_v12, %v561_v62  ;;  %v864_v48 = vadd.f32 %v2150_v61, %v696_v40 }
 0x125   : > { %v2133_v17 = vpop.f32.mrf.mxu1  ;;  %v2928_v51 = vpop.f32.mrf.mxu0 }
 0x126   : > { %v706_v50 = vadd.f32 %v2133_v17, %v2113_v57  ;;  %v863_v47 = vadd.f32 %v832_v0, %v691_v44 }
 0x127   : > { %v700_v60 = vpop.f32.mrf.mxu1  ;;  %v2187_v8 = vpop.f32.mrf.mxu0 }
 0x128   : > { %v701_v54 = vadd.f32 %v700_v60, %v571_v53  ;;  %v866_v62 = vadd.f32 %v2153_v9, %v706_v50 }
 0x129   : > { %v2136_v11 = vpop.f32.mrf.mxu1  ;;  %v1123_v13 = vpop.f32.mrf.mxu0 }
 0x12a   : > { %v716_v15 = vadd.f32 %v2136_v11, %v2116_v52 }
 0x12b   : > { %v710_v14 = vpop.f32.mrf.mxu1  ;;  %v2190_v21 = vpop.f32.mrf.mxu0 }
 0x12c   : > { %v711_v57 = vadd.f32 %v710_v14, %v2924_v63  ;;  %v868_v0 = vadd.f32 %v2926_v16, %v716_v15 }
 0x12d   : > { %v2167_v22 = vpop.f32.mrf.mxu1  ;;  %v1133_v23 = vpop.f32.mrf.mxu0 }
 0x12e   : > { %v1013_v45 = vadd.f32 %v2167_v22, %v862_v39  ;;  %v865_v22 = vadd.f32 %v842_v7, %v701_v54 }
 0x12f   : > { %v973_v1 = vpop.f32.mrf.mxu1  ;;  %v2930_v24 = vpop.f32.mrf.mxu0 }
 0x130   : > { %v1012_v4 = vadd.f32 %v973_v1, %v861_v43  ;;  %v1163_v56 = vadd.f32 %v2187_v8, %v1013_v45 }
 0x131   : > { %v2170_v10 = vpop.f32.mrf.mxu1  ;;  %v2932_v27 = vpop.f32.mrf.mxu0 }
 0x132   : > { %v1015_v58 = vadd.f32 %v2170_v10, %v864_v48  ;;  %v1162_v3 = vadd.f32 %v1123_v13, %v1012_v4  ;;  %v867_v13 = vadd.f32 %v2928_v51, %v711_v57 }
 0x133   : > { %v983_v49 = vpop.f32.mrf.mxu1  ;;  %v2934_v18 = vpop.f32.mrf.mxu0 }
 0x134   : > { %v1014_v6 = vadd.f32 %v983_v49, %v863_v47  ;;  %v1165_v17 = vadd.f32 %v2190_v21, %v1015_v58 }
 0x135   : > { %v2173_v19 = vpop.f32.mrf.mxu1  ;;  %v2936_v28 = vpop.f32.mrf.mxu0 }
 0x136   : > { %v1017_v60 = vadd.f32 %v2173_v19, %v866_v62  ;;  %v1164_v11 = vadd.f32 %v1133_v23, %v1014_v6 }
 0x137   : > { %v993_v29 = vpop.f32.mrf.mxu1  ;;  %v2227_v20 = vpop.f32.mrf.mxu0 }
 0x138   : > { %v1016_v8 = vadd.f32 %v993_v29, %v865_v22  ;;  %v1167_v14 = vadd.f32 %v2930_v24, %v1017_v60 }
 0x139   : > { %v2176_v25 = vpop.f32.mrf.mxu1  ;;  %v1424_v30 = vpop.f32.mrf.mxu0 }
 0x13a   : > { %v1019_v7 = vadd.f32 %v2176_v25, %v868_v0  ;;  %v1166_v37 = vadd.f32 %v2932_v27, %v1016_v8 }
 0x13b   : > { %v1003_v32 = vpop.f32.mrf.mxu1  ;;  %v2230_v33 = vpop.f32.mrf.mxu0 }
 0x13c   : > { %v1018_v16 = vadd.f32 %v1003_v32, %v867_v13  ;;  %v1169_v24 = vadd.f32 %v2934_v18, %v1019_v7 }
 0x13d   : > { %v2207_v35 = vpop.f32.mrf.mxu1  ;;  %v2938_v36 = vpop.f32.mrf.mxu0 }
 0x13e   : > { %v1313_v12 = vadd.f32 %v2207_v35, %v1163_v56 }
 0x13f   : > { %v1273_v26 = vpop.f32.mrf.mxu1  ;;  %v2940_v38 = vpop.f32.mrf.mxu0 }
 0x140   : > { %v1312_v1 = vadd.f32 %v1273_v26, %v1162_v3  ;;  %v1464_v34 = vadd.f32 %v2227_v20, %v1313_v12 }
 0x141   : > { %v2210_v41 = vpop.f32.mrf.mxu1  ;;  %v2942_v42 = vpop.f32.mrf.mxu0 }
 0x142   : > { %v1315_v9 = vadd.f32 %v2210_v41, %v1165_v17  ;;  %v1463_v35 = vadd.f32 %v1424_v30, %v1312_v1  ;;  %v1168_v41 = vadd.f32 %v2936_v28, %v1018_v16 }
 0x143   : > { %v1283_v46 = vpop.f32.mrf.mxu1  ;;  %v2944_v5 = vpop.f32.mrf.mxu0 }
 0x144   : > { %v1314_v21 = vadd.f32 %v1283_v46, %v1164_v11  ;;  %v1466_v29 = vadd.f32 %v2230_v33, %v1315_v9 }
 0x145   : > { %v2213_v55 = vpop.f32.mrf.mxu1  ;;  %v2946_v31 = vpop.f32.mrf.mxu0 }
 0x146   : > { %v1317_v51 = vadd.f32 %v2213_v55, %v1167_v14  ;;  %v1465_v39 = vadd.f32 %v2938_v36, %v1314_v21 }
 0x147   : > { %v1293_v2 = vpop.f32.mrf.mxu1  ;;  %v2267_v59 = vpop.f32.mrf.mxu0 }
 0x148   : > { %v1316_v27 = vadd.f32 %v1293_v2, %v1166_v37  ;;  %v1468_v33 = vadd.f32 %v2940_v38, %v1317_v51 }
 0x149   : > { %v2216_v61 = vpop.f32.mrf.mxu1  ;;  %v1724_v53 = vpop.f32.mrf.mxu0 }
 0x14a   : > { %v1319_v44 = vadd.f32 %v2216_v61, %v1169_v24  ;;  %v1467_v36 = vadd.f32 %v2942_v42, %v1316_v27 }
 0x14b   : > { %v1303_v10 = vpop.f32.mrf.mxu1  ;;  %v2270_v52 = vpop.f32.mrf.mxu0 }
 0x14c   : > { %v1318_v50 = vadd.f32 %v1303_v10, %v1168_v41  ;;  %v1470_v28 = vadd.f32 %v2944_v5, %v1319_v44 }
 0x14d   : > { %v2247_v49 = vpop.f32.mrf.mxu1  ;;  %v1734_v63 = vpop.f32.mrf.mxu0 }
 0x14e   : > { %v1614_v19 = vadd.f32 %v2247_v49, %v1464_v34  ;;  %v1469_v15 = vadd.f32 %v2946_v31, %v1318_v50 }
 0x14f   : > { %v1574_v23 = vpop.f32.mrf.mxu1  ;;  %v2273_v26 = vpop.f32.mrf.mxu0 }
 0x150   : > { %v1764_v20 = vadd.f32 %v2267_v59, %v1614_v19  ;;  %v1613_v25 = vadd.f32 %v1574_v23, %v1463_v35 }
 0x151   : > { %v2250_v30 = vpop.f32.mrf.mxu1  ;;  %v1744_v48 = vpop.f32.mrf.mxu0 }
 0x152   : > { %1772 = vst [vmem:[%s2958_s24 + $0x8] sm:$0xff] %v1764_v20  ;;  %v1763_v32 = vadd.f32 %v1724_v53, %v1613_v25  ;;  %v1616_v40 = vadd.f32 %v2250_v30, %v1466_v29 }
 0x153   : > { %v1584_v43 = vpop.f32.mrf.mxu1  ;;  %v2276_v58 = vpop.f32.mrf.mxu0 }
 0x154   : > { %1771 = vst [vmem:[%s2958_s24] sm:$0xff] %v1763_v32  ;;  %v1766_v45 = vadd.f32 %v2270_v52, %v1616_v40  ;;  %v1615_v46 = vadd.f32 %v1584_v43, %v1465_v39 }
 0x155   : > { %v2253_v18 = vpop.f32.mrf.mxu1  ;;  %v1754_v6 = vpop.f32.mrf.mxu0 }
 0x156   : > { %1774 = vst [vmem:[%s2958_s24 + $0x18] sm:$0xff] %v1766_v45  ;;  %v1765_v4 = vadd.f32 %v1734_v63, %v1615_v46  ;;  %v1618_v54 = vadd.f32 %v2253_v18, %v1468_v33 }
 0x157   : > { %v1594_v55 = vpop.f32.mrf.mxu1 }
 0x158   : > { %1773 = vst [vmem:[%s2958_s24 + $0x10] sm:$0xff] %v1765_v4  ;;  %v1768_v38 = vadd.f32 %v2273_v26, %v1618_v54  ;;  %v1617_v47 = vadd.f32 %v1594_v55, %v1467_v36 }
 0x159   : > { %v2256_v56 = vpop.f32.mrf.mxu1 }
 0x15a   : > { %1776 = vst [vmem:[%s2958_s24 + $0x28] sm:$0xff] %v1768_v38  ;;  %v1767_v2 = vadd.f32 %v1744_v48, %v1617_v47  ;;  %v1620_v42 = vadd.f32 %v2256_v56, %v1470_v28 }
 0x15b   : > { %v1604_v59 = vpop.f32.mrf.mxu1 }
 0x15c   : > { %1775 = vst [vmem:[%s2958_s24 + $0x20] sm:$0xff] %v1767_v2  ;;  %v1770_v62 = vadd.f32 %v2276_v58, %v1620_v42  ;;  %v1619_v3 = vadd.f32 %v1604_v59, %v1469_v15 }
 0x15e   : > { %1778 = vst [vmem:[%s2958_s24 + $0x38] sm:$0xff] %v1770_v62  ;;  %v1769_v12 = vadd.f32 %v1754_v6, %v1619_v3 }
 0x160   : > { %1777 = vst [vmem:[%s2958_s24 + $0x30] sm:$0xff] %v1769_v12 }
 0x161 PF: > { %s13_s16 = sadd.s32 1, %s2386_s16   ;;  %s2994_s12 = smov %s2378_s14 }
 0x162   : > { %p10_p7 = scmp.ge.s32.totalorder %s13_s16, 14   ;;  %s2995_s13 = smov %s2382_s15 }
 0x163   : > { %s2996_s14 = smov %s2999_s17  ;;  %s2997_s15 = smov %s3003_s18 }
 0x164   :  { %12 = sbr.rel (!%p10_p7) target bundleno = 3 (0x3), region = 72 }

// kernel: residual_block_forward.6
= control target key start
LH: loop header
LB: loop body
LE: loop exit
PB: predicated region body
PF: predicated region fallthrough
CT: control target
= control target key end

     0   :  { %s4936_s15 = smov 0   ;;  %s4938_s16 = smov 0   ;;  %s6647_s0 = inlined_call_operand.vmem [shape: f32[2,6,64,128], index: 0, kind: input, shape index: {}]   ;;  %s6648_s1 = inlined_call_operand.vmem [shape: f32[2,6,64,64], index: 1, kind: input, shape index: {}]   ;;  %s6649_s2 = inlined_call_operand.vmem [shape: f32[16,64], index: 2, kind: input, shape index: {}]   ;;  %s6650_s3 = inlined_call_operand.vmem [shape: f32[1,64], index: 3, kind: input, shape index: {}]   ;;  %s6651_s4 = inlined_call_operand.vmem [shape: f32[2,6,64,64], index: 4, kind: output, shape index: {}]  }
   0x1   :  { %s4940_s17 = smov 0   ;;  %s4942_s18 = smov 0  }
   0x2   :  { %s4944_s19 = smov 0   ;;  %s4946_s20 = smov 0  }
   0x3   :  { %s4948_s21 = smov 0  }
   0x4 LB: > { %s23_s22 = sadd.s32 1, %s4832_s19  ;;  %s26_s23 = sadd.s32 1, %s4836_s20  ;;  %s4840_s21 = sphi %s4948_s21, %s14_s21   ;;  %s4836_s20 = sphi %s4946_s20, %s6766_s20   ;;  %s4832_s19 = sphi %s4944_s19, %s6765_s19   ;;  %s4828_s18 = sphi %s4942_s18, %s6764_s18   ;;  %s4824_s17 = sphi %s4940_s17, %s6763_s17   ;;  %s4820_s16 = sphi %s4938_s16, %s6762_s16   ;;  %s4816_s15 = sphi %s4936_s15, %s6761_s15  }
   0x5   : > { %p24_p0 = scmp.ge.s32.totalorder %s23_s22, 8  ;;  %s4285_s24 = sadd.s32 4294967295, %s4840_s21  }
   0x6   : > { %p42_p1 = scmp.ne.s32.totalorder %s4820_s16, %s4816_s15  ;;  %p43_p2 = scmp.eq.s32.totalorder %s4840_s21, 0 }
   0x7   : > { %s6768_s22 = smov (%p24_p0, %s23_s22), 0  ;;  %s6770_s23 = smov (!%p24_p0, %s26_s23), %s4836_s20 }
   0x8   : > { %p28_p3 = scmp.ge.s32.totalorder %s6770_s23, 2  ;;  %p144_p4 = scmp.eq.s32.totalorder %s4285_s24, 15 }
   0x9   : > { %s31_s25 = ssub.s32 %s4832_s19, %s6768_s22  ;;  %p4982_p5 = por %p43_p2, %p42_p1 }
   0xa   : > { %s6772_s23 = smov (%p28_p3, %s6770_s23), 0  ;;  %p4988_p6 = por %p144_p4, %p42_p1 }
   0xb   : > { %s30_s28 = ssub.s32 %s4836_s20, %s6772_s23  ;;  %s35_s30 = sadd.s32 1, %s4820_s16 }
   0xc   : > { %s32_s29 = sor.u32 %s31_s25, %s30_s28  ;;  %p4288_p8 = scmp.ge.s32.totalorder %s4840_s21, 16 }
   0xd   : > { %p33_p7 = scmp.eq.s32.totalorder %s32_s29, 0 }
   0xe   : > { %172 = sbr.rel (%p4288_p8) target bundleno = 45 (0x2d), region = 24 }
   0xf   : > { %s4996_s5 = scalar_select %p33_p7, %s4820_s16, %s35_s30  }
  0x13   : > { %175 = sbr.rel (!%p4982_p5) target bundleno = 32 (0x20), region = 28  ;;  %s177_s6 = sand.u32 (%p4982_p5), 1, %s4820_s16  }
  0x14   : > { %s4298_s7 = smul.u32 (%p4982_p5), 48, %s4836_s20 }
  0x15   : > { %s4297_s8 = smul.u32 (%p4982_p5), 48, %s177_s6 }
  0x16   : > { %s181_s9 = sadd.s32 (%p4982_p5), %s4832_s19, %s4298_s7 }
  0x17   : > { %s4289_s10 = sshll.u32 (%p4982_p5), %s181_s9, 3  ;;  %s179_s14 = scalar_lea.vmem (%p4982_p5), [#allocation4], %s4297_s8 }
  0x18   : > { %s183_s13 = scalar_lea.vmem %s6647_s0, %s4289_s10 }
  0x19   : > { %v222_v0 = vld [vmem:[%s183_s13] sm:$0xff] }
  0x1a   : > { %v224_v1 = vld [vmem:[%s183_s13 + $0x40] sm:$0xff]  ;;  %223 = vst [vmem:[%s179_s14] sm:$0xff] %v222_v0 }
  0x1b   : > { %v226_v2 = vld [vmem:[%s183_s13 + $0x80] sm:$0xff]  ;;  %225 = vst [vmem:[%s179_s14 + $0x8] sm:$0xff] %v224_v1 }
  0x1c   : > { %227 = vst [vmem:[%s179_s14 + $0x10] sm:$0xff] %v226_v2  ;;  %v228_v3 = vld [vmem:[%s183_s13 + $0xc0] sm:$0xff] }
  0x1d   : > { %v230_v4 = vld [vmem:[%s183_s13 + $0x100] sm:$0xff]  ;;  %229 = vst [vmem:[%s179_s14 + $0x18] sm:$0xff] %v228_v3 }
  0x1e   : > { %v232_v5 = vld [vmem:[%s183_s13 + $0x140] sm:$0xff]  ;;  %231 = vst [vmem:[%s179_s14 + $0x20] sm:$0xff] %v230_v4 }
  0x1f   : > { %233 = vst [vmem:[%s179_s14 + $0x28] sm:$0xff] %v232_v5 }
  0x20 PF: > { %239 = sbr.rel (!%p4982_p5) target bundleno = 45 (0x2d), region = 66  ;;  %s241_s24 = sand.u32 (%p4982_p5), 1, %s4820_s16  }
  0x21   : > { %s4300_s25 = smul.u32 (%p4982_p5), 48, %s4836_s20 }
  0x22   : > { %s4299_s28 = smul.u32 (%p4982_p5), 48, %s241_s24 }
  0x23   : > { %s245_s29 = sadd.s32 (%p4982_p5), %s4832_s19, %s4300_s25 }
  0x24   : > { %s4290_s30 = sshll.u32 (%p4982_p5), %s245_s29, 3  ;;  %s243_s9 = scalar_lea.vmem (%p4982_p5), [#allocation5], %s4299_s28 }
  0x25   : > { %s247_s8 = scalar_lea.vmem %s6648_s1, %s4290_s30 }
  0x26   : > { %v286_v6 = vld [vmem:[%s247_s8] sm:$0xff] }
  0x27   : > { %v288_v7 = vld [vmem:[%s247_s8 + $0x40] sm:$0xff]  ;;  %287 = vst [vmem:[%s243_s9] sm:$0xff] %v286_v6 }
  0x28   : > { %v290_v8 = vld [vmem:[%s247_s8 + $0x80] sm:$0xff]  ;;  %289 = vst [vmem:[%s243_s9 + $0x8] sm:$0xff] %v288_v7 }
  0x29   : > { %291 = vst [vmem:[%s243_s9 + $0x10] sm:$0xff] %v290_v8  ;;  %v292_v9 = vld [vmem:[%s247_s8 + $0xc0] sm:$0xff] }
  0x2a   : > { %v294_v10 = vld [vmem:[%s247_s8 + $0x100] sm:$0xff]  ;;  %293 = vst [vmem:[%s243_s9 + $0x18] sm:$0xff] %v292_v9 }
  0x2b   : > { %v296_v11 = vld [vmem:[%s247_s8 + $0x140] sm:$0xff]  ;;  %295 = vst [vmem:[%s243_s9 + $0x20] sm:$0xff] %v294_v10 }
  0x2c   : > { %297 = vst [vmem:[%s243_s9 + $0x28] sm:$0xff] %v296_v11 }
  0x2d PF: > { %p4291_p9 = scmp.ge.s32.totalorder %s4840_s21, 1  ;;  %p302_p10 = scmp.lt.s32.totalorder %s4840_s21, 17 }
  0x2f   : > { %p303_p11 = pnand %p4291_p9, %p302_p10 }
  0x31   : > { %306 = sbr.rel (%p303_p11) target bundleno = 707 (0x2c3), region = 104 }
  0x36   : > { %s309_s26 = sand.u32 1, %s4816_s15   ;;  %v420_v12 = vlaneseq  ;;  %v4910_v58 = vmov 1966171168   ;;  %vm1240_vm0 = vcmask 523264   ;;  %s6060_s7 = smov 0  }
  0x37   : > { %s5018_s10 = smul.u32 48, %s309_s26  ;;  %v418_v59 = vunpack.c.l.s4 %v4910_v58 }
  0x38   : > { %v5020_v13 = vshrl.u32 %v420_v12, 7 }
  0x39   : > { %s5023_s11 = scalar_lea.vmem [#allocation4], %s5018_s10  ;;  %v419_v63 = vunpack.c.0.s8 %v418_v59  ;;  %s5371_s24 = scalar_lea.vmem [#allocation5], %s5018_s10 }
  0x3a   : > { %v5026_v14 = vld [vmem:[%s5023_s11] sm:$0xff]  ;;  %v5029_v15 = vsub.s32 0, %v5020_v13  ;;  %v5032_v16 = vsub.s32 1, %v5020_v13  ;;  %v5045_v19 = vsub.s32 2, %v5020_v13  ;;  %v5048_v20 = vsub.s32 3, %v5020_v13  ;;  %v5060_v23 = vld [vmem:[%s5023_s11 + $0x18] sm:$0xff] }
  0x3b   : > { %v5051_v21 = vsub.s32 4, %v5020_v13  ;;  %v356_v24 = vand.u32 2147483647, %v5026_v14  ;;  %v5080_v30 = vld [vmem:[%s5023_s11 + $0x20] sm:$0xff]  ;;  %v5083_v31 = vld [vmem:[%s5023_s11 + $0x8] sm:$0xff]  ;;  %v5111_v39 = vsub.s32 5, %v5020_v13  ;;  %v5182_v5 = vsub.s32 %v419_v63, %v5020_v13 }
  0x3c   : > { %v5036_v17 = vrot.slane %v5026_v14, %v5032_v16  ;;  %v5040_v18 = vrot.slane %v5026_v14, %v5029_v15  ;;  %v5057_v22 = vrot.slane %v5026_v14, %v5045_v19  ;;  %v5065_v25 = vrot.slane %v5060_v23, %v5032_v16  ;;  %v5136_v47 = vld [vmem:[%s5023_s11 + $0x10] sm:$0xff]  ;;  %v5158_v57 = vld [vmem:[%s5023_s11 + $0x28] sm:$0xff]  ;;  %s6026_s6 = scalar_lea.vmem [#allocation6], %s5018_s10 }
  0x3d   : > { %v5069_v26 = vrot.slane %v5060_v23, %v5045_v19  ;;  %v5073_v27 = vrot.slane %v5060_v23, %v5048_v20  ;;  %v5077_v28 = vrot.slane %v5060_v23, %v5051_v21  ;;  %v362_v29 = vsub.f32 0.0, %v356_v24 }
  0x3e   : > { %1661 = vbcast.lane.b32.xlu1 %v5036_v17, 320  ;;  %1649 = vbcast.lane.b32.xlu0 %v5040_v18, 320  ;;  %6702 = vst [vmem:[#allocation7_spill] sm:$0xff] %v5065_v25  ;;  %v5087_v32 = vrot.slane %v5080_v30, %v5032_v16  ;;  %v5091_v33 = vrot.slane %v5080_v30, %v5045_v19  ;;  %v357_v36 = vand.u32 2147483647, %v5083_v31  ;;  %v5124_v43 = vsub.s32 6, %v5020_v13 }
  0x3f   : > { %6703 = vst [vmem:[#allocation8_spill] sm:$0xff] %v5073_v27  ;;  %6704 = vst [vmem:[#allocation9_spill] sm:$0xff] %v5077_v28  ;;  %v5097_v34 = vrot.slane %v5026_v14, %v5048_v20  ;;  %v368_v35 = vmul.f32 1.442695, %v362_v29  ;;  %v5102_v37 = vrot.slane %v5080_v30, %v5048_v20  ;;  %v5108_v38 = vrot.slane %v5026_v14, %v5051_v21 }
  0x40   : > { %v363_v40 = vsub.f32 0.0, %v357_v36  ;;  %v5115_v41 = vrot.slane %v5080_v30, %v5051_v21  ;;  %v5121_v42 = vrot.slane %v5026_v14, %v5111_v39  ;;  %v5130_v45 = vrot.slane %v5026_v14, %v5124_v43 }
  0x41   : > { %4496 = vpow2.f32 %v368_v35  ;;  %6705 = vst [vmem:[#allocation10_spill] sm:$0xff] %v5102_v37  ;;  %v5133_v46 = vsub.s32 7, %v5020_v13  ;;  %v358_v49 = vand.u32 2147483647, %v5136_v47  ;;  %v5149_v53 = vrot.slane %v5083_v31, %v5029_v15 }
  0x42   : > { %1665 = vbcast.lane.b32.xlu1 %v5036_v17, 328  ;;  %1653 = vbcast.lane.b32.xlu0 %v5040_v18, 328  ;;  %6706 = vst [vmem:[#allocation11_spill] sm:$0xff] %v5115_v41  ;;  %v370_v44 = vmul.f32 1.442695, %v363_v40  ;;  %v5155_v55 = vrot.slane %v5083_v31, %v5032_v16  ;;  %v5162_v60 = vrot.slane %v5158_v57, %v5032_v16  ;;  %v350_v0 = vmax.f32 %v5026_v14, 0.0 }
  0x43   : > { %v5143_v50 = vrot.slane %v5026_v14, %v5133_v46  ;;  %v364_v52 = vsub.f32 0.0, %v358_v49  ;;  %v5168_v61 = vrot.slane %v5083_v31, %v5045_v19  ;;  %v5173_v1 = vrot.slane %v5158_v57, %v5045_v19  ;;  %v5216_v40 = vld [vmem:[%s6649_s2] sm:$0xff]  ;;  %v5222_v49 = vld [vmem:[%s6649_s2 + $0x8] sm:$0xff] }
  0x44   : > { %4498 = vpow2.f32 %v370_v44  ;;  %6707 = vst [vmem:[#allocation12_spill] sm:$0xff] %v5155_v55  ;;  %v5179_v3 = vrot.slane %v5083_v31, %v5048_v20  ;;  %v5188_v7 = vrot.slane %v5158_v57, %v5048_v20  ;;  %v5194_v8 = vrot.slane %v5083_v31, %v5051_v21 }
  0x45   : > { %v372_v54 = vmul.f32 1.442695, %v364_v52  ;;  %6708 = vst [vmem:[#allocation13_spill] sm:$0xff] %v5168_v61  ;;  %v5204_v14 = vrot.slane %v5158_v57, %v5051_v21  ;;  %v5210_v29 = vrot.slane %v5083_v31, %v5111_v39 }
  0x46   : > { %1677 = vbcast.lane.b32.xlu1 %v5057_v22, 328  ;;  %1673 = vbcast.lane.b32.xlu0 %v5057_v22, 320  ;;  %6709 = vst [vmem:[#allocation14_spill] sm:$0xff] %v5179_v3  ;;  %6710 = vst [vmem:[#allocation15_spill] sm:$0xff] %v5194_v8 }
  0x47   : > { %6711 = vst [vmem:[#allocation16_spill] sm:$0xff] %v5210_v29 }
  0x4a   : > { %1689 = vbcast.lane.b32.xlu1 %v5097_v34, 328  ;;  %1685 = vbcast.lane.b32.xlu0 %v5097_v34, 320 }
  0x4e   : > { %1701 = vbcast.lane.b32.xlu1 %v5108_v38, 328  ;;  %1697 = vbcast.lane.b32.xlu0 %v5108_v38, 320  ;;  %v4497_v48 = vpop.eup %4496 }
  0x4f   : > { %v380_v51 = vadd.f32 1.0, %v4497_v48 }
  0x51   : > { %4500 = vlog2.f32 %v380_v51  ;;  %v4499_v56 = vpop.eup %4498 }
  0x52   : > { %1713 = vbcast.lane.b32.xlu1 %v5121_v42, 328  ;;  %1709 = vbcast.lane.b32.xlu0 %v5121_v42, 320  ;;  %4502 = vpow2.f32 %v372_v54  ;;  %v381_v62 = vadd.f32 1.0, %v4499_v56 }
  0x54   : > { %4504 = vlog2.f32 %v381_v62  ;;  %v5232_v62 = vrot.slane %v5083_v31, %v5124_v43 }
  0x56   : > { %1725 = vbcast.lane.b32.xlu1 %v5130_v45, 328  ;;  %1721 = vbcast.lane.b32.xlu0 %v5130_v45, 320  ;;  %6712 = vst [vmem:[#allocation17_spill] sm:$0xff] %v5232_v62 }
  0x5a   : > { %1737 = vbcast.lane.b32.xlu1 %v5143_v50, 328  ;;  %1733 = vbcast.lane.b32.xlu0 %v5143_v50, 320 }
  0x5e   : > { %1749 = vbcast.lane.b32.xlu1 %v5149_v53, 328  ;;  %1745 = vbcast.lane.b32.xlu0 %v5149_v53, 320  ;;  %v4501_v2 = vpop.eup %4500 }
  0x5f   : > { %v387_v4 = vmul.f32 0.6931472, %v4501_v2  ;;  %v4503_v24 = vpop.eup %4502 }
  0x60   : > { %v382_v59 = vadd.f32 1.0, %v4503_v24 }
  0x61   : > { %v5184_v6 = vadd.f32 %v387_v4, %v350_v0  ;;  %v4505_v2 = vpop.eup %4504 }
  0x62   : > { %1761 = vbcast.lane.b32.xlu1 %v5155_v55, 328  ;;  %1757 = vbcast.lane.b32.xlu0 %v5155_v55, 320  ;;  %4506 = vlog2.f32 %v382_v59 }
  0x63   : > { %v416_v9 = vcombine.high %v5184_v6, %v5184_v6  ;;  %v423_v10 = vrot.slane %v5184_v6, %v5182_v5 }
  0x65   : > { %v430_v11 = vrot.slane %v416_v9, %v5182_v5  ;;  %v431_v12 = vcombine.high %v423_v10, %v423_v10  ;;  %v439_v13 = vrot.slane %v423_v10, %v5182_v5 }
  0x66   : > { %1773 = vbcast.lane.b32.xlu1 %v5168_v61, 328  ;;  %1769 = vbcast.lane.b32.xlu0 %v5168_v61, 320 }
  0x67   : > { %v432_v35 = vcombine.high %v430_v11, %v430_v11  ;;  %v453_v36 = vrot.slane %v431_v12, %v5182_v5  ;;  %v461_v44 = vcombine.high %v439_v13, %v439_v13  ;;  %v715_v48 = vrot.slane %v439_v13, %v5029_v15 }
  0x68   : > { %v446_v51 = vrot.slane %v430_v11, %v5182_v5  ;;  %v5241_v11 = vrot.slane %v5083_v31, %v5133_v46 }
  0x69   : > { %v463_v52 = vcombine.high %v453_v36, %v453_v36  ;;  %v719_v54 = vrot.slane %v453_v36, %v5029_v15  ;;  %v460_v56 = vrot.slane %v432_v35, %v5182_v5  ;;  %v723_v58 = vrot.slane %v461_v44, %v5029_v15 }
  0x6a   : > { %1785 = vbcast.lane.b32.xlu1 %v5179_v3, 328  ;;  %1781 = vbcast.lane.b32.xlu0 %v5179_v3, 320  ;;  %v952_v0 = vmul.f32 %v715_v48, %v5216_v40  ;;  %v953_v4 = vmul.f32 %v715_v48, %v5222_v49  ;;  %v462_v12 = vcombine.high %v446_v51, %v446_v51  ;;  %v351_v44 = vmax.f32 %v5083_v31, 0.0 }
  0x6b   : > { %v727_v63 = vrot.slane %v463_v52, %v5029_v15  ;;  %v954_v9 = vmul.f32 %v719_v54, %v5216_v40  ;;  %v955_v10 = vmul.f32 %v719_v54, %v5222_v49  ;;  %v731_v13 = vrot.slane %v446_v51, %v5029_v15 }
  0x6c   : > { %v956_v24 = vmul.f32 %v723_v58, %v5216_v40  ;;  %v464_v35 = vcombine.high %v460_v56, %v460_v56  ;;  %v957_v36 = vmul.f32 %v723_v58, %v5222_v49  ;;  %v735_v48 = vrot.slane %v460_v56, %v5029_v15 }
  0x6d   : > { %v958_v52 = vmul.f32 %v727_v63, %v5216_v40  ;;  %v1048_v54 = vmul.f32 1.442695, %v952_v0  ;;  %v959_v51 = vmul.f32 %v727_v63, %v5222_v49  ;;  %v1052_v3 = vmul.f32 1.442695, %v954_v9 }
  0x6e   : > { %1797 = vbcast.lane.b32.xlu1 %v5194_v8, 328  ;;  %1793 = vbcast.lane.b32.xlu0 %v5194_v8, 320  ;;  %v1050_v8 = vmul.f32 1.442695, %v953_v4  ;;  %v1054_v61 = vmul.f32 1.442695, %v955_v10  ;;  %v739_v58 = vrot.slane %v462_v12, %v5029_v15  ;;  %v960_v31 = vmul.f32 %v731_v13, %v5216_v40 }
  0x6f   : > { %4508 = vpow2.f32 %v1048_v54  ;;  %v1056_v59 = vmul.f32 1.442695, %v956_v24  ;;  %v743_v55 = vrot.slane %v464_v35, %v5029_v15  ;;  %v1058_v56 = vmul.f32 1.442695, %v957_v36 }
  0x70   : > { %4510 = vpow2.f32 %v1050_v8  ;;  %v5260_v63 = vrot.slane %v5136_v47, %v5029_v15  ;;  %v962_v0 = vmul.f32 %v735_v48, %v5216_v40  ;;  %v5265_v4 = vrot.slane %v5136_v47, %v5032_v16 }
  0x71   : > { %4512 = vpow2.f32 %v1052_v3  ;;  %v963_v9 = vmul.f32 %v735_v48, %v5222_v49  ;;  %v1062_v8 = vmul.f32 1.442695, %v959_v51  ;;  %v964_v10 = vmul.f32 %v739_v58, %v5216_v40 }
  0x72   : > { %1809 = vbcast.lane.b32.xlu1 %v5210_v29, 328  ;;  %1805 = vbcast.lane.b32.xlu0 %v5210_v29, 320  ;;  %v389_v29 = vmul.f32 0.6931472, %v4505_v2  ;;  %v1060_v2 = vmul.f32 1.442695, %v958_v52  ;;  %4514 = vpow2.f32 %v1054_v61  ;;  %v965_v24 = vmul.f32 %v739_v58, %v5222_v49  ;;  %v4507_v58 = vpop.eup %4506 }
  0x73   : > { %4516 = vpow2.f32 %v1056_v59  ;;  %v1064_v12 = vmul.f32 1.442695, %v960_v31  ;;  %v966_v35 = vmul.f32 %v743_v55, %v5216_v40  ;;  %v1068_v16 = vmul.f32 1.442695, %v962_v0 }
  0x74   : > { %4518 = vpow2.f32 %v1058_v56  ;;  %v1072_v48 = vmul.f32 1.442695, %v964_v10  ;;  %v1074_v54 = vmul.f32 1.442695, %v965_v24  ;;  %v5286_v31 = vrot.slane %v5136_v47, %v5045_v19 }
  0x75   : > { %4520 = vpow2.f32 %v1060_v2  ;;  %v5294_v19 = vrot.slane %v5136_v47, %v5048_v20 }
  0x76   : > { %1821 = vbcast.lane.b32.xlu1 %v5232_v62, 328  ;;  %1817 = vbcast.lane.b32.xlu0 %v5232_v62, 320  ;;  %v961_v62 = vmul.f32 %v731_v13, %v5222_v49  ;;  %v5269_v13 = vadd.f32 %v389_v29, %v351_v44  ;;  %v967_v29 = vmul.f32 %v743_v55, %v5222_v49  ;;  %4522 = vpow2.f32 %v1062_v8 }
  0x77   : > { %v1070_v44 = vmul.f32 1.442695, %v963_v9  ;;  %4524 = vpow2.f32 %v1064_v12  ;;  %6713 = vst [vmem:[#allocation18_spill] sm:$0xff] %v5286_v31  ;;  %v1076_v55 = vmul.f32 1.442695, %v966_v35  ;;  %6714 = vst [vmem:[#allocation19_spill] sm:$0xff] %v5294_v19 }
  0x78   : > { %v1066_v3 = vmul.f32 1.442695, %v961_v62  ;;  %v465_v61 = vcombine.high %v5269_v13, %v5269_v13  ;;  %v472_v36 = vrot.slane %v5269_v13, %v5182_v5  ;;  %v1078_v59 = vmul.f32 1.442695, %v967_v29 }
  0x7a   : > { %1833 = vbcast.lane.b32.xlu1 %v5241_v11, 328  ;;  %1829 = vbcast.lane.b32.xlu0 %v5241_v11, 320  ;;  %v479_v62 = vrot.slane %v465_v61, %v5182_v5  ;;  %v480_v52 = vcombine.high %v472_v36, %v472_v36  ;;  %4526 = vpow2.f32 %v1066_v3  ;;  %v488_v51 = vrot.slane %v472_v36, %v5182_v5 }
  0x7b   : > { %4528 = vpow2.f32 %v1068_v16 }
  0x7c   : > { %4530 = vpow2.f32 %v1070_v44  ;;  %v502_v56 = vrot.slane %v480_v52, %v5182_v5  ;;  %v510_v0 = vcombine.high %v488_v51, %v488_v51  ;;  %v481_v2 = vcombine.high %v479_v62, %v479_v62  ;;  %v4509_v9 = vpop.eup %4508 }
  0x7d   : > { %4532 = vpow2.f32 %v1072_v48  ;;  %v747_v10 = vrot.slane %v488_v51, %v5029_v15  ;;  %v4511_v12 = vpop.eup %4510  ;;  %1241 = vst.msk [vmem:[#allocation2] sm:$0xff] %vm1240_vm0, %v4509_v9  ;;  %v495_v24 = vrot.slane %v479_v62, %v5182_v5  ;;  %v5307_v48 = vrot.slane %v5136_v47, %v5051_v21 }
  0x7e   : > { %1845 = vbcast.lane.b32.xlu1 %v5260_v63, 328  ;;  %1841 = vbcast.lane.b32.xlu0 %v5260_v63, 320  ;;  %4534 = vpow2.f32 %v1074_v54  ;;  %v512_v8 = vcombine.high %v502_v56, %v502_v56  ;;  %v751_v35 = vrot.slane %v502_v56, %v5029_v15  ;;  %v4513_v3 = vpop.eup %4512  ;;  %1242 = vst.msk [vmem:[#allocation2 + $0x8] sm:$0xff] %vm1240_vm0, %v4511_v12  ;;  %v352_v9 = vmax.f32 %v5136_v47, 0.0 }
  0x7f   : > { %4536 = vpow2.f32 %v1076_v55  ;;  %v755_v16 = vrot.slane %v510_v0, %v5029_v15  ;;  %v4515_v61 = vpop.eup %4514  ;;  %1243 = vst.msk [vmem:[#allocation2 + $0x10] sm:$0xff] %vm1240_vm0, %v4513_v3  ;;  %v509_v36 = vrot.slane %v481_v2, %v5182_v5  ;;  %v968_v29 = vmul.f32 %v747_v10, %v5216_v40  ;;  %6715 = vst [vmem:[#allocation20_spill] sm:$0xff] %v5307_v48 }
  0x80   : > { %4538 = vpow2.f32 %v1078_v59  ;;  %v759_v20 = vrot.slane %v512_v8, %v5029_v15  ;;  %v4517_v44 = vpop.eup %4516  ;;  %1244 = vst.msk [vmem:[#allocation2 + $0x18] sm:$0xff] %vm1240_vm0, %v4515_v61  ;;  %v969_v62 = vmul.f32 %v747_v10, %v5222_v49  ;;  %v970_v52 = vmul.f32 %v751_v35, %v5216_v40 }
  0x81   : > { %v971_v54 = vmul.f32 %v751_v35, %v5222_v49  ;;  %v4519_v51 = vpop.eup %4518  ;;  %1245 = vst.msk [vmem:[#allocation2 + $0x20] sm:$0xff] %vm1240_vm0, %v4517_v44  ;;  %v511_v55 = vcombine.high %v495_v24, %v495_v24  ;;  %v763_v59 = vrot.slane %v495_v24, %v5029_v15  ;;  %v972_v21 = vmul.f32 %v755_v16, %v5216_v40 }
  0x82   : > { %1857 = vbcast.lane.b32.xlu1 %v5265_v4, 328  ;;  %1853 = vbcast.lane.b32.xlu0 %v5265_v4, 320  ;;  %v1080_v56 = vmul.f32 1.442695, %v968_v29  ;;  %v4521_v0 = vpop.eup %4520  ;;  %1246 = vst.msk [vmem:[#allocation2 + $0x28] sm:$0xff] %vm1240_vm0, %v4519_v51  ;;  %v973_v2 = vmul.f32 %v755_v16, %v5222_v49  ;;  %v513_v12 = vcombine.high %v509_v36, %v509_v36 }
  0x83   : > { %v391_v8 = vmul.f32 0.6931472, %v4507_v58  ;;  %v4523_v10 = vpop.eup %4522  ;;  %1247 = vst.msk [vmem:[#allocation2 + $0x30] sm:$0xff] %vm1240_vm0, %v4521_v0  ;;  %v767_v35 = vrot.slane %v509_v36, %v5029_v15  ;;  %v974_v3 = vmul.f32 %v759_v20, %v5216_v40  ;;  %v975_v24 = vmul.f32 %v759_v20, %v5222_v49 }
  0x84   : > { %v4525_v61 = vpop.eup %4524  ;;  %1248 = vst.msk [vmem:[#allocation2 + $0x38] sm:$0xff] %vm1240_vm0, %v4523_v10  ;;  %4540 = vpow2.f32 %v1080_v56  ;;  %v1082_v29 = vmul.f32 1.442695, %v969_v62  ;;  %v1084_v44 = vmul.f32 1.442695, %v970_v52  ;;  %v5330_v58 = vrot.slane %v5136_v47, %v5111_v39 }
  0x85   : > { %v1086_v16 = vmul.f32 1.442695, %v971_v54  ;;  %1249 = vst.msk [vmem:[#allocation2 + $0x40] sm:$0xff] %vm1240_vm0, %v4525_v61  ;;  %v771_v36 = vrot.slane %v511_v55, %v5029_v15  ;;  %v976_v20 = vmul.f32 %v763_v59, %v5216_v40  ;;  %v1088_v0 = vmul.f32 1.442695, %v972_v21 }
  0x86   : > { %1869 = vbcast.lane.b32.xlu1 %v5286_v31, 328  ;;  %1865 = vbcast.lane.b32.xlu0 %v5286_v31, 320  ;;  %v5337_v62 = vrot.slane %v5136_v47, %v5124_v43  ;;  %v977_v52 = vmul.f32 %v763_v59, %v5222_v49  ;;  %4542 = vpow2.f32 %v1082_v29  ;;  %v1090_v54 = vmul.f32 1.442695, %v973_v2 }
  0x87   : > { %v4527_v51 = vpop.eup %4526  ;;  %v775_v61 = vrot.slane %v513_v12, %v5029_v15  ;;  %v978_v55 = vmul.f32 %v767_v35, %v5216_v40  ;;  %4544 = vpow2.f32 %v1084_v44  ;;  %v1092_v21 = vmul.f32 1.442695, %v974_v3 }
  0x88   : > { %v4529_v56 = vpop.eup %4528  ;;  %1250 = vst.msk [vmem:[#allocation2 + $0x48] sm:$0xff] %vm1240_vm0, %v4527_v51  ;;  %4546 = vpow2.f32 %v1086_v16  ;;  %v1094_v51 = vmul.f32 1.442695, %v975_v24  ;;  %v5346_v31 = vadd.f32 %v391_v8, %v352_v9  ;;  %v980_v2 = vmul.f32 %v771_v36, %v5216_v40 }
  0x89   : > { %v4531_v10 = vpop.eup %4530  ;;  %1251 = vst.msk [vmem:[#allocation2 + $0x50] sm:$0xff] %vm1240_vm0, %v4529_v56  ;;  %4548 = vpow2.f32 %v1088_v0  ;;  %v1096_v12 = vmul.f32 1.442695, %v976_v20  ;;  %v359_v3 = vand.u32 2147483647, %v5060_v23  ;;  %v5367_v0 = vrot.slane %v5136_v47, %v5133_v46 }
  0x8a   : > { %1881 = vbcast.lane.b32.xlu1 %v5294_v19, 328  ;;  %1877 = vbcast.lane.b32.xlu0 %v5294_v19, 320  ;;  %1252 = vst.msk [vmem:[#allocation2 + $0x58] sm:$0xff] %vm1240_vm0, %v4531_v10  ;;  %v979_v19 = vmul.f32 %v767_v35, %v5222_v49  ;;  %v981_v35 = vmul.f32 %v771_v36, %v5222_v49  ;;  %4550 = vpow2.f32 %v1090_v54  ;;  %v1098_v9 = vmul.f32 1.442695, %v977_v52 }
  0x8b   : > { %v514_v8 = vcombine.high %v5346_v31, %v5346_v31  ;;  %4552 = vpow2.f32 %v1092_v21  ;;  %v1100_v44 = vmul.f32 1.442695, %v978_v55  ;;  %v521_v16 = vrot.slane %v5346_v31, %v5182_v5 }
  0x8c   : > { %v983_v36 = vmul.f32 %v775_v61, %v5222_v49  ;;  %4554 = vpow2.f32 %v1094_v51  ;;  %v1102_v20 = vmul.f32 1.442695, %v979_v19  ;;  %v1104_v56 = vmul.f32 1.442695, %v980_v2  ;;  %v5374_v19 = vld [vmem:[%s5371_s24] sm:$0xff] }
  0x8d   : > { %4556 = vpow2.f32 %v1096_v12  ;;  %v1106_v52 = vmul.f32 1.442695, %v981_v35  ;;  %v528_v54 = vrot.slane %v514_v8, %v5182_v5  ;;  %v365_v10 = vsub.f32 0.0, %v359_v3  ;;  %6716 = vst [vmem:[#allocation21_spill] sm:$0xff] %v5374_v19 }
  0x8e   : > { %1893 = vbcast.lane.b32.xlu1 %v5307_v48, 328  ;;  %1889 = vbcast.lane.b32.xlu0 %v5307_v48, 320  ;;  %v4533_v48 = vpop.eup %4532  ;;  %4558 = vpow2.f32 %v1098_v9  ;;  %v1110_v21 = vmul.f32 1.442695, %v983_v36  ;;  %v5380_v47 = vrot.slane %v5060_v23, %v5029_v15  ;;  %v5387_v35 = vmul.f32 %v5374_v19, %v5184_v6 }
  0x8f   : > { %v4535_v59 = vpop.eup %4534  ;;  %1253 = vst.msk [vmem:[#allocation2 + $0x60] sm:$0xff] %vm1240_vm0, %v4533_v48  ;;  %v982_v48 = vmul.f32 %v775_v61, %v5216_v40  ;;  %4560 = vpow2.f32 %v1100_v44  ;;  %v529_v61 = vcombine.high %v521_v16, %v521_v16  ;;  %v530_v12 = vcombine.high %v528_v54, %v528_v54 }
  0x90   : > { %v4537_v29 = vpop.eup %4536  ;;  %1254 = vst.msk [vmem:[#allocation2 + $0x68] sm:$0xff] %vm1240_vm0, %v4535_v59  ;;  %4562 = vpow2.f32 %v1102_v20  ;;  %6717 = vst [vmem:[#allocation22_spill] sm:$0xff] %v5380_v47  ;;  %v537_v59 = vrot.slane %v521_v16, %v5182_v5  ;;  %v374_v3 = vmul.f32 1.442695, %v365_v10 }
  0x91   : > { %v4539_v24 = vpop.eup %4538  ;;  %1255 = vst.msk [vmem:[#allocation2 + $0x70] sm:$0xff] %vm1240_vm0, %v4537_v29  ;;  %v1108_v55 = vmul.f32 1.442695, %v982_v48  ;;  %4564 = vpow2.f32 %v1104_v56  ;;  %v551_v2 = vrot.slane %v529_v61, %v5182_v5  ;;  %v544_v48 = vrot.slane %v528_v54, %v5182_v5 }
  0x92   : > { %1905 = vbcast.lane.b32.xlu1 %v5330_v58, 328  ;;  %1901 = vbcast.lane.b32.xlu0 %v5330_v58, 320  ;;  %1256 = vst.msk [vmem:[#allocation2 + $0x78] sm:$0xff] %vm1240_vm0, %v4539_v24  ;;  %v4541_v51 = vpop.eup %4540  ;;  %4566 = vpow2.f32 %v1106_v52  ;;  %v559_v9 = vcombine.high %v537_v59, %v537_v59  ;;  %v779_v44 = vrot.slane %v537_v59, %v5029_v15 }
  0x93   : > { %1257 = vst.msk [vmem:[#allocation2 + $0x80] sm:$0xff] %vm1240_vm0, %v4541_v51  ;;  %v4543_v29 = vpop.eup %4542  ;;  %4568 = vpow2.f32 %v1108_v55  ;;  %v561_v8 = vcombine.high %v551_v2, %v551_v2  ;;  %v783_v16 = vrot.slane %v551_v2, %v5029_v15  ;;  %v558_v56 = vrot.slane %v530_v12, %v5182_v5 }
  0x94   : > { %v4545_v24 = vpop.eup %4544  ;;  %4570 = vpow2.f32 %v1110_v21  ;;  %1258 = vst.msk [vmem:[#allocation2 + $0x88] sm:$0xff] %vm1240_vm0, %v4543_v29  ;;  %v787_v6 = vrot.slane %v559_v9, %v5029_v15  ;;  %v984_v54 = vmul.f32 %v779_v44, %v5216_v40  ;;  %v985_v55 = vmul.f32 %v779_v44, %v5222_v49 }
  0x95   : > { %v4547_v36 = vpop.eup %4546  ;;  %1259 = vst.msk [vmem:[#allocation2 + $0x90] sm:$0xff] %vm1240_vm0, %v4545_v24  ;;  %v791_v52 = vrot.slane %v561_v8, %v5029_v15  ;;  %v986_v61 = vmul.f32 %v783_v16, %v5216_v40  ;;  %v987_v21 = vmul.f32 %v783_v16, %v5222_v49  ;;  %4572 = vpow2.f32 %v374_v3 }
  0x96   : > { %1917 = vbcast.lane.b32.xlu1 %v5337_v62, 328  ;;  %1913 = vbcast.lane.b32.xlu0 %v5337_v62, 320  ;;  %v4549_v20 = vpop.eup %4548  ;;  %1260 = vst.msk [vmem:[#allocation2 + $0x98] sm:$0xff] %vm1240_vm0, %v4547_v36  ;;  %v1356_v59 = vrot.slane %v5387_v35, %v5182_v5  ;;  %v560_v2 = vcombine.high %v544_v48, %v544_v48  ;;  %v1112_v8 = vmul.f32 1.442695, %v984_v54 }
  0x97   : > { %v4551_v10 = vpop.eup %4550  ;;  %1261 = vst.msk [vmem:[#allocation2 + $0xa0] sm:$0xff] %vm1240_vm0, %v4549_v20  ;;  %v795_v12 = vrot.slane %v544_v48, %v5029_v15  ;;  %v988_v29 = vmul.f32 %v787_v6, %v5216_v40  ;;  %v989_v3 = vmul.f32 %v787_v6, %v5222_v49  ;;  %v562_v44 = vcombine.high %v558_v56, %v558_v56 }
  0x98   : > { %v4553_v51 = vpop.eup %4552  ;;  %1262 = vst.msk [vmem:[#allocation2 + $0xa8] sm:$0xff] %vm1240_vm0, %v4551_v10  ;;  %v799_v16 = vrot.slane %v558_v56, %v5029_v15  ;;  %v990_v48 = vmul.f32 %v791_v52, %v5216_v40  ;;  %v991_v36 = vmul.f32 %v791_v52, %v5222_v49  ;;  %4574 = vpow2.f32 %v1112_v8 }
  0x99   : > { %v4555_v9 = vpop.eup %4554  ;;  %1263 = vst.msk [vmem:[#allocation2 + $0xb0] sm:$0xff] %vm1240_vm0, %v4553_v51  ;;  %v1114_v10 = vmul.f32 1.442695, %v985_v55  ;;  %v1116_v19 = vmul.f32 1.442695, %v986_v61  ;;  %v1364_v6 = vcombine.high %v1356_v59, %v1356_v59  ;;  %v803_v54 = vrot.slane %v560_v2, %v5029_v15 }
  0x9a   : > { %1929 = vbcast.lane.b32.xlu1 %v5367_v0, 328  ;;  %1925 = vbcast.lane.b32.xlu0 %v5367_v0, 320  ;;  %v4557_v24 = vpop.eup %4556  ;;  %1264 = vst.msk [vmem:[#allocation2 + $0xb8] sm:$0xff] %vm1240_vm0, %v4555_v9  ;;  %v1118_v51 = vmul.f32 1.442695, %v987_v21  ;;  %v992_v9 = vmul.f32 %v795_v12, %v5216_v40  ;;  %v993_v52 = vmul.f32 %v795_v12, %v5222_v49 }
  0x9b   : > { %v4559_v20 = vpop.eup %4558  ;;  %1265 = vst.msk [vmem:[#allocation2 + $0xc0] sm:$0xff] %vm1240_vm0, %v4557_v24  ;;  %v1120_v56 = vmul.f32 1.442695, %v988_v29  ;;  %4576 = vpow2.f32 %v1114_v10  ;;  %v1122_v55 = vmul.f32 1.442695, %v989_v3  ;;  %v807_v21 = vrot.slane %v562_v44, %v5029_v15 }
  0x9c   : > { %1266 = vst.msk [vmem:[#allocation2 + $0xc8] sm:$0xff] %vm1240_vm0, %v4559_v20  ;;  %v994_v2 = vmul.f32 %v799_v16, %v5216_v40  ;;  %4578 = vpow2.f32 %v1116_v19  ;;  %v1124_v29 = vmul.f32 1.442695, %v990_v48  ;;  %v5430_v24 = vrot.slane %v1356_v59, %v5182_v5 }
  0x9d   : > { %4580 = vpow2.f32 %v1118_v51  ;;  %v1126_v12 = vmul.f32 1.442695, %v991_v36  ;;  %v5435_v20 = vrot.slane %v1364_v6, %v5182_v5  ;;  %v1128_v19 = vmul.f32 1.442695, %v992_v9 }
  0x9e   : > { %1941 = vbcast.lane.b32.xlu1 %v5380_v47, 328  ;;  %1937 = vbcast.lane.b32.xlu0 %v5380_v47, 320  ;;  %4582 = vpow2.f32 %v1120_v56  ;;  %v997_v59 = vmul.f32 %v803_v54, %v5222_v49  ;;  %v998_v48 = vmul.f32 %v807_v21, %v5216_v40  ;;  %v1132_v36 = vmul.f32 1.442695, %v994_v2 }
  0x9f   : > { %4584 = vpow2.f32 %v1122_v55  ;;  %v999_v10 = vmul.f32 %v807_v21, %v5222_v49  ;;  %v2226_v9 = vrot.slane %v5435_v20, %v5029_v15  ;;  %v2222_v56 = vrot.slane %v5430_v24, %v5029_v15 }
  0xa0   : > { %4586 = vpow2.f32 %v1124_v29  ;;  %v360_v55 = vand.u32 2147483647, %v5080_v30  ;;  %v1394_v29 = vcombine.high %v5430_v24, %v5430_v24 }
  0xa1   : > { %4588 = vpow2.f32 %v1126_v12 }
  0xa2   : > { %1953 = vbcast.lane.b32.xlu1 %v5065_v25, 328  ;;  %1949 = vbcast.lane.b32.xlu0 %v5065_v25, 320  ;;  %v4561_v25 = vpop.eup %4560  ;;  %4590 = vpow2.f32 %v1128_v19  ;;  %v366_v24 = vsub.f32 0.0, %v360_v55  ;;  %v2230_v55 = vrot.slane %v1394_v29, %v5029_v15 }
  0xa3   : > { %v4563_v47 = vpop.eup %4562  ;;  %1267 = vst.msk [vmem:[#allocation2 + $0xd0] sm:$0xff] %vm1240_vm0, %v4561_v25  ;;  %v995_v25 = vmul.f32 %v799_v16, %v5222_v49  ;;  %v1130_v16 = vmul.f32 1.442695, %v993_v52  ;;  %v5454_v52 = vrot.slane %v5060_v23, %v5111_v39  ;;  %v1138_v49 = vmul.f32 1.442695, %v997_v59 }
  0xa4   : > { %v4565_v61 = vpop.eup %4564  ;;  %1268 = vst.msk [vmem:[#allocation2 + $0xd8] sm:$0xff] %vm1240_vm0, %v4563_v47  ;;  %v996_v47 = vmul.f32 %v803_v54, %v5216_v40 }
  0xa5   : > { %v4567_v8 = vpop.eup %4566  ;;  %1269 = vst.msk [vmem:[#allocation2 + $0xe0] sm:$0xff] %vm1240_vm0, %v4565_v61  ;;  %v1134_v51 = vmul.f32 1.442695, %v995_v25  ;;  %6718 = vst [vmem:[#allocation23_spill] sm:$0xff] %v5454_v52  ;;  %4592 = vpow2.f32 %v1130_v16  ;;  %v1140_v61 = vmul.f32 1.442695, %v998_v48 }
  0xa6   : > { %1965 = vbcast.lane.b32.xlu1 %v5069_v26, 328  ;;  %1961 = vbcast.lane.b32.xlu0 %v5069_v26, 320  ;;  %v4569_v3 = vpop.eup %4568  ;;  %1270 = vst.msk [vmem:[#allocation2 + $0xe8] sm:$0xff] %vm1240_vm0, %v4567_v8  ;;  %v1136_v54 = vmul.f32 1.442695, %v996_v47  ;;  %4594 = vpow2.f32 %v1132_v36  ;;  %v1349_v8 = vcombine.high %v5387_v35, %v5387_v35  ;;  %v1396_v36 = vcombine.high %v5435_v20, %v5435_v20 }
  0xa7   : > { %v4571_v44 = vpop.eup %4570  ;;  %1271 = vst.msk [vmem:[#allocation2 + $0xf0] sm:$0xff] %vm1240_vm0, %v4569_v3  ;;  %4596 = vpow2.f32 %v1134_v51  ;;  %v1142_v25 = vmul.f32 1.442695, %v999_v10  ;;  %v361_v51 = vand.u32 2147483647, %v5158_v57  ;;  %v5481_v20 = vrot.slane %v5060_v23, %v5133_v46 }
  0xa8   : > { %1272 = vst.msk [vmem:[#allocation2 + $0xf8] sm:$0xff] %vm1240_vm0, %v4571_v44  ;;  %v4573_v6 = vpop.eup %4572  ;;  %4598 = vpow2.f32 %v1136_v54  ;;  %v5465_v44 = vrot.slane %v5060_v23, %v5124_v43  ;;  %v1363_v10 = vrot.slane %v1349_v8, %v5182_v5  ;;  %v2234_v8 = vrot.slane %v1396_v36, %v5029_v15 }
  0xa9   : > { %v4575_v12 = vpop.eup %4574  ;;  %v383_v19 = vadd.f32 1.0, %v4573_v6  ;;  %4600 = vpow2.f32 %v1138_v49  ;;  %6720 = vst [vmem:[#allocation25_spill] sm:$0xff] %v5481_v20 }
  0xaa   : > { %1977 = vbcast.lane.b32.xlu1 %v5073_v27, 328  ;;  %1973 = vbcast.lane.b32.xlu0 %v5073_v27, 320  ;;  %6719 = vst [vmem:[#allocation24_spill] sm:$0xff] %v5465_v44  ;;  %1273 = vst.msk [vmem:[#allocation2 + $0x100] sm:$0xff] %vm1240_vm0, %v4575_v12  ;;  %v4577_v35 = vpop.eup %4576  ;;  %4602 = vpow2.f32 %v1140_v61 }
  0xab   : > { %v4579_v59 = vpop.eup %4578  ;;  %4604 = vpow2.f32 %v1142_v25  ;;  %1274 = vst.msk [vmem:[#allocation2 + $0x108] sm:$0xff] %vm1240_vm0, %v4577_v35  ;;  %v367_v25 = vsub.f32 0.0, %v361_v51  ;;  %v5497_v35 = vrot.slane %v5080_v30, %v5029_v15 }
  0xac   : > { %v4581_v6 = vpop.eup %4580  ;;  %1275 = vst.msk [vmem:[#allocation2 + $0x110] sm:$0xff] %vm1240_vm0, %v4579_v59  ;;  %4606 = vlog2.f32 %v383_v19  ;;  %v1365_v19 = vcombine.high %v1363_v10, %v1363_v10 }
  0xad   : > { %v4583_v61 = vpop.eup %4582  ;;  %1276 = vst.msk [vmem:[#allocation2 + $0x118] sm:$0xff] %vm1240_vm0, %v4581_v6  ;;  %6721 = vst [vmem:[#allocation26_spill] sm:$0xff] %v5497_v35  ;;  %v378_v51 = vmul.f32 1.442695, %v367_v25 }
  0xae   : > { %1989 = vbcast.lane.b32.xlu1 %v5077_v28, 328  ;;  %1985 = vbcast.lane.b32.xlu0 %v5077_v28, 320  ;;  %1277 = vst.msk [vmem:[#allocation2 + $0x120] sm:$0xff] %vm1240_vm0, %v4583_v61 }
  0xb0   : > { %v1662_v21 = vpop.permute.xlu1 %1661  ;;  %v1650_v2 = vpop.permute.xlu0 %1649 }
  0xb1   : > { %v2461_v3 = vmul.f32 %v2226_v9, %v1662_v21  ;;  %v2459_v47 = vmul.f32 %v2222_v56, %v1650_v2  ;;  %v376_v21 = vmul.f32 1.442695, %v366_v24  ;;  %v4585_v2 = vpop.eup %4584 }
  0xb2   : > { %2001 = vbcast.lane.b32.xlu1 %v5454_v52, 328  ;;  %1997 = vbcast.lane.b32.xlu0 %v5454_v52, 320  ;;  %1278 = vst.msk [vmem:[#allocation2 + $0x128] sm:$0xff] %vm1240_vm0, %v4585_v2 }
  0xb3   : > { %2557 = vst.msk [vmem:[#allocation3 + $0x10] sm:$0xff] %vm1240_vm0, %v2461_v3  ;;  %2555 = vst.msk [vmem:[#allocation3] sm:$0xff] %vm1240_vm0, %v2459_v47  ;;  %v5490_v47 = vrot.slane %v1363_v10, %v5182_v5  ;;  %4608 = vpow2.f32 %v376_v21 }
  0xb4   : > { %v1666_v16 = vpop.permute.xlu1 %1665  ;;  %v1654_v48 = vpop.permute.xlu0 %1653  ;;  %4610 = vpow2.f32 %v378_v51 }
  0xb5   : > { %v2462_v54 = vmul.f32 %v2226_v9, %v1666_v16  ;;  %v2460_v49 = vmul.f32 %v2222_v56, %v1654_v48  ;;  %v4587_v9 = vpop.eup %4586  ;;  %v5503_v16 = vld [vmem:[%s5371_s24 + $0x8] sm:$0xff] }
  0xb6   : > { %2013 = vbcast.lane.b32.xlu1 %v5465_v44, 328  ;;  %2009 = vbcast.lane.b32.xlu0 %v5465_v44, 320  ;;  %v4589_v23 = vpop.eup %4588  ;;  %1279 = vst.msk [vmem:[#allocation2 + $0x130] sm:$0xff] %vm1240_vm0, %v4587_v9  ;;  %6722 = vst [vmem:[#allocation27_spill] sm:$0xff] %v5503_v16  ;;  %v1338_v21 = vmul.f32 %v5503_v16, %v5269_v13 }
  0xb7   : > { %2558 = vst.msk [vmem:[#allocation3 + $0x18] sm:$0xff] %vm1240_vm0, %v2462_v54  ;;  %2556 = vst.msk [vmem:[#allocation3 + $0x8] sm:$0xff] %vm1240_vm0, %v2460_v49  ;;  %v4591_v24 = vpop.eup %4590  ;;  %v2238_v49 = vrot.slane %v5490_v47, %v5029_v15 }
  0xb8   : > { %v1678_v56 = vpop.permute.xlu1 %1677  ;;  %v1674_v29 = vpop.permute.xlu0 %1673  ;;  %1280 = vst.msk [vmem:[#allocation2 + $0x138] sm:$0xff] %vm1240_vm0, %v4589_v23  ;;  %1281 = vst.msk [vmem:[#allocation2 + $0x140] sm:$0xff] %vm1240_vm0, %v4591_v24 }
  0xb9   : > { %v2464_v12 = vmul.f32 %v2230_v55, %v1678_v56  ;;  %v2463_v3 = vmul.f32 %v2230_v55, %v1674_v29  ;;  %v4593_v59 = vpop.eup %4592  ;;  %v1393_v55 = vrot.slane %v1365_v19, %v5182_v5 }
  0xba   : > { %2025 = vbcast.lane.b32.xlu1 %v5481_v20, 328  ;;  %2021 = vbcast.lane.b32.xlu0 %v5481_v20, 320  ;;  %v4595_v48 = vpop.eup %4594  ;;  %1282 = vst.msk [vmem:[#allocation2 + $0x148] sm:$0xff] %vm1240_vm0, %v4593_v59  ;;  %v1405_v59 = vrot.slane %v1338_v21, %v5182_v5 }
  0xbb   : > { %2560 = vst.msk [vmem:[#allocation3 + $0x28] sm:$0xff] %vm1240_vm0, %v2464_v12  ;;  %2559 = vst.msk [vmem:[#allocation3 + $0x20] sm:$0xff] %vm1240_vm0, %v2463_v3  ;;  %v4597_v30 = vpop.eup %4596  ;;  %v2242_v12 = vrot.slane %v1393_v55, %v5029_v15  ;;  %v4712_v3 = vld [vmem:[%s5023_s11 + $0x18] sm:$0xff]  ;;  %v1397_v51 = vcombine.high %v1393_v55, %v1393_v55 }
  0xbc   : > { %v1690_v36 = vpop.permute.xlu1 %1689  ;;  %v1686_v10 = vpop.permute.xlu0 %1685  ;;  %1283 = vst.msk [vmem:[#allocation2 + $0x150] sm:$0xff] %vm1240_vm0, %v4595_v48  ;;  %1284 = vst.msk [vmem:[#allocation2 + $0x158] sm:$0xff] %vm1240_vm0, %v4597_v30  ;;  %v353_v19 = vmax.f32 %v4712_v3, 0.0  ;;  %v1413_v30 = vcombine.high %v1405_v59, %v1405_v59 }
  0xbd   : > { %v2466_v6 = vmul.f32 %v2234_v8, %v1690_v36  ;;  %v2465_v54 = vmul.f32 %v2234_v8, %v1686_v10  ;;  %v4599_v61 = vpop.eup %4598  ;;  %v1395_v8 = vcombine.high %v5490_v47, %v5490_v47  ;;  %v1398_v47 = vcombine.high %v1338_v21, %v1338_v21  ;;  %v5539_v21 = vld [vmem:[%s5023_s11 + $0x20] sm:$0xff] }
  0xbe   : > { %2037 = vbcast.lane.b32.xlu1 %v5497_v35, 328  ;;  %2033 = vbcast.lane.b32.xlu0 %v5497_v35, 320  ;;  %v4601_v2 = vpop.eup %4600  ;;  %1285 = vst.msk [vmem:[#allocation2 + $0x160] sm:$0xff] %vm1240_vm0, %v4599_v61  ;;  %v5543_v55 = vrot.slane %v5539_v21, %v5111_v39  ;;  %v5555_v3 = vrot.slane %v5539_v21, %v5124_v43 }
  0xbf   : > { %2562 = vst.msk [vmem:[#allocation3 + $0x38] sm:$0xff] %vm1240_vm0, %v2466_v6  ;;  %2561 = vst.msk [vmem:[#allocation3 + $0x30] sm:$0xff] %vm1240_vm0, %v2465_v54  ;;  %v4603_v9 = vpop.eup %4602 }
  0xc0   : > { %v1702_v56 = vpop.permute.xlu1 %1701  ;;  %v1698_v29 = vpop.permute.xlu0 %1697  ;;  %1286 = vst.msk [vmem:[#allocation2 + $0x168] sm:$0xff] %vm1240_vm0, %v4601_v2  ;;  %1287 = vst.msk [vmem:[#allocation2 + $0x170] sm:$0xff] %vm1240_vm0, %v4603_v9  ;;  %v1412_v9 = vrot.slane %v1398_v47, %v5182_v5 }
  0xc1   : > { %v4605_v13 = vpop.eup %4604  ;;  %v2468_v25 = vmul.f32 %v2238_v49, %v1702_v56  ;;  %v2467_v23 = vmul.f32 %v2238_v49, %v1698_v29  ;;  %v2246_v49 = vrot.slane %v1395_v8, %v5029_v15  ;;  %6723 = vst [vmem:[#allocation28_spill] sm:$0xff] %v5543_v55  ;;  %6724 = vst [vmem:[#allocation29_spill] sm:$0xff] %v5555_v3 }
  0xc2   : > { %v4607_v24 = vpop.eup %4606  ;;  %2049 = vbcast.lane.b32.xlu1 %v5087_v32, 328  ;;  %2045 = vbcast.lane.b32.xlu0 %v5087_v32, 320  ;;  %1288 = vst.msk [vmem:[#allocation2 + $0x178] sm:$0xff] %vm1240_vm0, %v4605_v13 }
  0xc3   : > { %2564 = vst.msk [vmem:[#allocation3 + $0x48] sm:$0xff] %vm1240_vm0, %v2468_v25  ;;  %2563 = vst.msk [vmem:[#allocation3 + $0x40] sm:$0xff] %vm1240_vm0, %v2467_v23  ;;  %v393_v48 = vmul.f32 0.6931472, %v4607_v24  ;;  %v4609_v2 = vpop.eup %4608  ;;  %v2250_v25 = vrot.slane %v1397_v51, %v5029_v15  ;;  %v1421_v23 = vrot.slane %v1405_v59, %v5182_v5  ;;  %v5566_v59 = vrot.slane %v5158_v57, %v5029_v15 }
  0xc4   : > { %v1714_v36 = vpop.permute.xlu1 %1713  ;;  %v1710_v10 = vpop.permute.xlu0 %1709  ;;  %v384_v51 = vadd.f32 1.0, %v4609_v2  ;;  %v1414_v57 = vcombine.high %v1412_v9, %v1412_v9 }
  0xc5   : > { %v2470_v6 = vmul.f32 %v2242_v12, %v1714_v36  ;;  %v2469_v54 = vmul.f32 %v2242_v12, %v1710_v10  ;;  %v5532_v61 = vadd.f32 %v393_v48, %v353_v19  ;;  %v1435_v12 = vrot.slane %v1413_v30, %v5182_v5  ;;  %v4611_v2 = vpop.eup %4610 }
  0xc6   : > { %2061 = vbcast.lane.b32.xlu1 %v5091_v33, 328  ;;  %2057 = vbcast.lane.b32.xlu0 %v5091_v33, 320  ;;  %v5562_v36 = vrot.slane %v5539_v21, %v5133_v46  ;;  %v1443_v30 = vcombine.high %v1421_v23, %v1421_v23  ;;  %4612 = vlog2.f32 %v384_v51 }
  0xc7   : > { %2566 = vst.msk [vmem:[#allocation3 + $0x58] sm:$0xff] %vm1240_vm0, %v2470_v6  ;;  %2565 = vst.msk [vmem:[#allocation3 + $0x50] sm:$0xff] %vm1240_vm0, %v2469_v54  ;;  %v563_v56 = vcombine.high %v5532_v61, %v5532_v61  ;;  %v570_v29 = vrot.slane %v5532_v61, %v5182_v5  ;;  %v5572_v6 = vrot.slane %v1412_v9, %v5182_v5 }
  0xc8   : > { %v1726_v8 = vpop.permute.xlu1 %1725  ;;  %v1722_v13 = vpop.permute.xlu0 %1721  ;;  %6725 = vst [vmem:[#allocation30_spill] sm:$0xff] %v5562_v36  ;;  %v1445_v44 = vcombine.high %v1435_v12, %v1435_v12  ;;  %v2262_v9 = vrot.slane %v1443_v30, %v5029_v15 }
  0xc9   : > { %v2472_v19 = vmul.f32 %v2246_v49, %v1726_v8  ;;  %v2471_v24 = vmul.f32 %v2246_v49, %v1722_v13  ;;  %v577_v47 = vrot.slane %v563_v56, %v5182_v5  ;;  %v578_v48 = vcombine.high %v570_v29, %v570_v29 }
  0xca   : > { %2073 = vbcast.lane.b32.xlu1 %v5102_v37, 328  ;;  %2069 = vbcast.lane.b32.xlu0 %v5102_v37, 320  ;;  %v586_v10 = vrot.slane %v570_v29, %v5182_v5  ;;  %v2254_v13 = vrot.slane %v1421_v23, %v5029_v15 }
  0xcb   : > { %2568 = vst.msk [vmem:[#allocation3 + $0x68] sm:$0xff] %vm1240_vm0, %v2472_v19  ;;  %2567 = vst.msk [vmem:[#allocation3 + $0x60] sm:$0xff] %vm1240_vm0, %v2471_v24  ;;  %v579_v54 = vcombine.high %v577_v47, %v577_v47  ;;  %v600_v49 = vrot.slane %v578_v48, %v5182_v5  ;;  %v2258_v24 = vrot.slane %v1435_v12, %v5029_v15 }
  0xcc   : > { %v1738_v56 = vpop.permute.xlu1 %1737  ;;  %v1734_v8 = vpop.permute.xlu0 %1733  ;;  %v608_v20 = vcombine.high %v586_v10, %v586_v10  ;;  %v811_v29 = vrot.slane %v586_v10, %v5029_v15  ;;  %v593_v48 = vrot.slane %v577_v47, %v5182_v5 }
  0xcd   : > { %v2474_v16 = vmul.f32 %v2250_v25, %v1738_v56  ;;  %v2473_v19 = vmul.f32 %v2250_v25, %v1734_v8  ;;  %v610_v52 = vcombine.high %v600_v49, %v600_v49  ;;  %v815_v28 = vrot.slane %v600_v49, %v5029_v15 }
  0xce   : > { %2085 = vbcast.lane.b32.xlu1 %v5115_v41, 328  ;;  %2081 = vbcast.lane.b32.xlu0 %v5115_v41, 320  ;;  %v5587_v25 = vrot.slane %v5572_v6, %v5029_v15  ;;  %v607_v23 = vrot.slane %v579_v54, %v5182_v5  ;;  %v819_v12 = vrot.slane %v608_v20, %v5029_v15  ;;  %v385_v56 = vadd.f32 1.0, %v4611_v2  ;;  %v5601_v41 = vld [vmem:[%s5371_s24 + $0x10] sm:$0xff] }
  0xcf   : > { %2570 = vst.msk [vmem:[#allocation3 + $0x78] sm:$0xff] %vm1240_vm0, %v2474_v16  ;;  %2569 = vst.msk [vmem:[#allocation3 + $0x70] sm:$0xff] %vm1240_vm0, %v2473_v19  ;;  %v5592_v49 = vrot.slane %v1414_v57, %v5182_v5  ;;  %v1000_v51 = vmul.f32 %v811_v29, %v5216_v40  ;;  %v5598_v19 = vrot.slane %v1445_v44, %v5029_v15  ;;  %v5609_v57 = vld [vmem:[%s6649_s2 + $0x8] sm:$0xff]  ;;  %v5615_v44 = vld [vmem:[%s6649_s2] sm:$0xff] }
  0xd0   : > { %v1750_v47 = vpop.permute.xlu1 %1749  ;;  %v1746_v10 = vpop.permute.xlu0 %1745  ;;  %6726 = vst [vmem:[#allocation31_spill] sm:$0xff] %v5601_v41  ;;  %v823_v20 = vrot.slane %v610_v52, %v5029_v15  ;;  %v609_v54 = vcombine.high %v593_v48, %v593_v48  ;;  %v1001_v40 = vmul.f32 %v5609_v57, %v811_v29  ;;  %v611_v2 = vcombine.high %v607_v23, %v607_v23 }
  0xd1   : > { %v2476_v30 = vmul.f32 %v2254_v13, %v1750_v47  ;;  %v2475_v8 = vmul.f32 %v2254_v13, %v1746_v10  ;;  %v1002_v13 = vmul.f32 %v5615_v44, %v815_v28  ;;  %v1144_v52 = vmul.f32 1.442695, %v1000_v51 }
  0xd2   : > { %2097 = vbcast.lane.b32.xlu1 %v5543_v55, 328  ;;  %2093 = vbcast.lane.b32.xlu0 %v5543_v55, 320  ;;  %v827_v47 = vrot.slane %v593_v48, %v5029_v15  ;;  %v1003_v10 = vmul.f32 %v5609_v57, %v815_v28  ;;  %v1004_v16 = vmul.f32 %v5615_v44, %v819_v12  ;;  %4614 = vlog2.f32 %v385_v56 }
  0xd3   : > { %2572 = vst.msk [vmem:[#allocation3 + $0x88] sm:$0xff] %vm1240_vm0, %v2476_v30  ;;  %2571 = vst.msk [vmem:[#allocation3 + $0x80] sm:$0xff] %vm1240_vm0, %v2475_v8  ;;  %v5625_v37 = vmul.f32 %v5601_v41, %v5346_v31  ;;  %v831_v35 = vrot.slane %v607_v23, %v5029_v15  ;;  %v1005_v51 = vmul.f32 %v5609_v57, %v819_v12  ;;  %4616 = vpow2.f32 %v1144_v52 }
  0xd4   : > { %v1762_v29 = vpop.permute.xlu1 %1761  ;;  %v1758_v55 = vpop.permute.xlu0 %1757  ;;  %v1006_v27 = vmul.f32 %v5615_v44, %v823_v20  ;;  %v835_v28 = vrot.slane %v609_v54, %v5029_v15  ;;  %v1007_v48 = vmul.f32 %v5609_v57, %v823_v20  ;;  %v1146_v31 = vmul.f32 1.442695, %v1001_v40 }
  0xd5   : > { %v2478_v30 = vmul.f32 %v2258_v24, %v1762_v29  ;;  %v2477_v8 = vmul.f32 %v2258_v24, %v1758_v55  ;;  %v1148_v41 = vmul.f32 1.442695, %v1002_v13  ;;  %v839_v23 = vrot.slane %v611_v2, %v5029_v15 }
  0xd6   : > { %2109 = vbcast.lane.b32.xlu1 %v5555_v3, 328  ;;  %2105 = vbcast.lane.b32.xlu0 %v5555_v3, 320  ;;  %v1008_v55 = vmul.f32 %v5615_v44, %v827_v47  ;;  %v1150_v24 = vmul.f32 1.442695, %v1003_v10  ;;  %v1152_v12 = vmul.f32 1.442695, %v1004_v16  ;;  %v1009_v29 = vmul.f32 %v5609_v57, %v827_v47  ;;  %v4613_v47 = vpop.eup %4612 }
  0xd7   : > { %2574 = vst.msk [vmem:[#allocation3 + $0x98] sm:$0xff] %vm1240_vm0, %v2478_v30  ;;  %2573 = vst.msk [vmem:[#allocation3 + $0x90] sm:$0xff] %vm1240_vm0, %v2477_v8  ;;  %v1010_v54 = vmul.f32 %v5615_v44, %v831_v35  ;;  %4618 = vpow2.f32 %v1146_v31  ;;  %v1154_v20 = vmul.f32 1.442695, %v1005_v51  ;;  %v1156_v30 = vmul.f32 1.442695, %v1006_v27 }
  0xd8   : > { %v1774_v56 = vpop.permute.xlu1 %1773  ;;  %v1770_v52 = vpop.permute.xlu0 %1769  ;;  %4620 = vpow2.f32 %v1148_v41  ;;  %v1454_v2 = vrot.slane %v5625_v37, %v5182_v5  ;;  %v1011_v16 = vmul.f32 %v5609_v57, %v831_v35  ;;  %v1158_v10 = vmul.f32 1.442695, %v1007_v48 }
  0xd9   : > { %v2480_v40 = vmul.f32 %v2262_v9, %v1774_v56  ;;  %v2479_v13 = vmul.f32 %v2262_v9, %v1770_v52  ;;  %4622 = vpow2.f32 %v1150_v24  ;;  %v1012_v9 = vmul.f32 %v5615_v44, %v835_v28 }
  0xda   : > { %2121 = vbcast.lane.b32.xlu1 %v5562_v36, 328  ;;  %2117 = vbcast.lane.b32.xlu0 %v5562_v36, 320  ;;  %4624 = vpow2.f32 %v1152_v12  ;;  %v1160_v27 = vmul.f32 1.442695, %v1008_v55  ;;  %v354_v41 = vmax.f32 %v5539_v21, 0.0  ;;  %v1013_v31 = vmul.f32 %v5609_v57, %v835_v28 }
  0xdb   : > { %2576 = vst.msk [vmem:[#allocation3 + $0xa8] sm:$0xff] %vm1240_vm0, %v2480_v40  ;;  %2575 = vst.msk [vmem:[#allocation3 + $0xa0] sm:$0xff] %vm1240_vm0, %v2479_v13  ;;  %v1014_v56 = vmul.f32 %v5615_v44, %v839_v23  ;;  %4626 = vpow2.f32 %v1154_v20  ;;  %v1162_v35 = vmul.f32 1.442695, %v1009_v29  ;;  %v1164_v52 = vmul.f32 1.442695, %v1010_v54 }
  0xdc   : > { %v1786_v51 = vpop.permute.xlu1 %1785  ;;  %v1782_v8 = vpop.permute.xlu0 %1781  ;;  %4628 = vpow2.f32 %v1156_v30  ;;  %v1015_v21 = vmul.f32 %v5609_v57, %v839_v23  ;;  %v1166_v55 = vmul.f32 1.442695, %v1011_v16  ;;  %v395_v12 = vmul.f32 0.6931472, %v4613_v47 }
  0xdd   : > { %v2482_v48 = vmul.f32 %v5598_v19, %v1786_v51  ;;  %v2481_v24 = vmul.f32 %v5598_v19, %v1782_v8  ;;  %4630 = vpow2.f32 %v1158_v10  ;;  %v2274_v28 = vrot.slane %v5592_v49, %v5029_v15 }
  0xde   : > { %2133 = vbcast.lane.b32.xlu1 %v5566_v59, 328  ;;  %2129 = vbcast.lane.b32.xlu0 %v5566_v59, 320  ;;  %v1446_v19 = vcombine.high %v5592_v49, %v5592_v49  ;;  %4632 = vpow2.f32 %v1160_v27  ;;  %v1168_v29 = vmul.f32 1.442695, %v1012_v9  ;;  %v1462_v40 = vcombine.high %v1454_v2, %v1454_v2 }
  0xdf   : > { %2578 = vst.msk [vmem:[#allocation3 + $0xb8] sm:$0xff] %vm1240_vm0, %v2482_v48  ;;  %2577 = vst.msk [vmem:[#allocation3 + $0xb0] sm:$0xff] %vm1240_vm0, %v2481_v24  ;;  %4634 = vpow2.f32 %v1162_v35  ;;  %v1170_v23 = vmul.f32 1.442695, %v1013_v31  ;;  %v5662_v13 = vadd.f32 %v395_v12, %v354_v41  ;;  %v5664_v30 = vpop.eup %4614  ;;  %v1172_v47 = vmul.f32 1.442695, %v1014_v56 }
  0xe0   : > { %v1798_v54 = vpop.permute.xlu1 %1797  ;;  %v1794_v20 = vpop.permute.xlu0 %1793  ;;  %4636 = vpow2.f32 %v1164_v52  ;;  %v1174_v49 = vmul.f32 1.442695, %v1015_v21  ;;  %v5679_v41 = vrot.slane %v1446_v19, %v5029_v15  ;;  %v1470_v35 = vrot.slane %v1454_v2, %v5182_v5  ;;  %v5694_v19 = vld [vmem:[%s5023_s11 + $0x28] sm:$0xff] }
  0xe1   : > { %v2484_v16 = vmul.f32 %v5587_v25, %v1798_v54  ;;  %v2483_v10 = vmul.f32 %v5587_v25, %v1794_v20  ;;  %v4617_v51 = vpop.eup %4616  ;;  %4638 = vpow2.f32 %v1166_v55  ;;  %v612_v9 = vcombine.high %v5662_v13, %v5662_v13 }
  0xe2   : > { %2145 = vbcast.lane.b32.xlu1 %v5162_v60, 328  ;;  %2141 = vbcast.lane.b32.xlu0 %v5162_v60, 320  ;;  %v6727_v25 = vcombine.high %v5572_v6, %v5572_v6  ;;  %4640 = vpow2.f32 %v1168_v29  ;;  %1289 = vst.msk [vmem:[#allocation2 + $0x180] sm:$0xff] %vm1240_vm0, %v4617_v51  ;;  %v619_v8 = vrot.slane %v5662_v13, %v5182_v5 }
  0xe3   : > { %2580 = vst.msk [vmem:[#allocation3 + $0xc8] sm:$0xff] %vm1240_vm0, %v2484_v16  ;;  %2579 = vst.msk [vmem:[#allocation3 + $0xc0] sm:$0xff] %vm1240_vm0, %v2483_v10  ;;  %v5686_v48 = vrot.slane %v1462_v40, %v5182_v5  ;;  %v1447_v6 = vcombine.high %v5625_v37, %v5625_v37  ;;  %4642 = vpow2.f32 %v1170_v23  ;;  %v626_v55 = vrot.slane %v612_v9, %v5182_v5 }
  0xe4   : > { %v2278_v27 = vrot.slane %v6727_v25, %v5029_v15  ;;  %v1810_v31 = vpop.permute.xlu1 %1809  ;;  %v1806_v56 = vpop.permute.xlu0 %1805  ;;  %4644 = vpow2.f32 %v1172_v47  ;;  %v5698_v2 = vrot.slane %v5694_v19, %v5111_v39  ;;  %v627_v37 = vcombine.high %v619_v8, %v619_v8 }
  0xe5   : > { %v4619_v24 = vpop.eup %4618  ;;  %v2486_v52 = vmul.f32 %v2274_v28, %v1810_v31  ;;  %v2485_v21 = vmul.f32 %v2274_v28, %v1806_v56  ;;  %4646 = vpow2.f32 %v1174_v49  ;;  %v635_v28 = vrot.slane %v619_v8, %v5182_v5 }
  0xe6   : > { %v4621_v12 = vpop.eup %4620  ;;  %2157 = vbcast.lane.b32.xlu1 %v5173_v1, 328  ;;  %2153 = vbcast.lane.b32.xlu0 %v5173_v1, 320  ;;  %1290 = vst.msk [vmem:[#allocation2 + $0x188] sm:$0xff] %vm1240_vm0, %v4619_v24  ;;  %v5706_v54 = vrot.slane %v5694_v19, %v5124_v43  ;;  %v1492_v20 = vcombine.high %v1470_v35, %v1470_v35 }
  0xe7   : > { %v4623_v29 = vpop.eup %4622  ;;  %2582 = vst.msk [vmem:[#allocation3 + $0xd8] sm:$0xff] %vm1240_vm0, %v2486_v52  ;;  %2581 = vst.msk [vmem:[#allocation3 + $0xd0] sm:$0xff] %vm1240_vm0, %v2485_v21  ;;  %v5710_v39 = vrot.slane %v5694_v19, %v5133_v46  ;;  %v628_v40 = vcombine.high %v626_v55, %v626_v55  ;;  %v5714_v47 = vrot.slane %v1447_v6, %v5182_v5 }
  0xe8   : > { %1291 = vst.msk [vmem:[#allocation2 + $0x190] sm:$0xff] %vm1240_vm0, %v4621_v12  ;;  %v4625_v23 = vpop.eup %4624  ;;  %v1822_v16 = vpop.permute.xlu1 %1821  ;;  %1292 = vst.msk [vmem:[#allocation2 + $0x198] sm:$0xff] %vm1240_vm0, %v4623_v29  ;;  %v649_v51 = vrot.slane %v627_v37, %v5182_v5  ;;  %v657_v43 = vcombine.high %v635_v28, %v635_v28  ;;  %v843_v49 = vrot.slane %v635_v28, %v5029_v15 }
  0xe9   : > { %v1818_v10 = vpop.permute.xlu0 %1817  ;;  %v4627_v9 = vpop.eup %4626  ;;  %v2488_v25 = vmul.f32 %v2278_v27, %v1822_v16  ;;  %v2286_v8 = vrot.slane %v1470_v35, %v5029_v15  ;;  %v5722_v31 = vrot.slane %v5686_v48, %v5029_v15  ;;  %1293 = vst.msk [vmem:[#allocation2 + $0x1a0] sm:$0xff] %vm1240_vm0, %v4625_v23  ;;  %v642_v6 = vrot.slane %v626_v55, %v5182_v5 }
  0xea   : > { %v2487_v46 = vmul.f32 %v2278_v27, %v1818_v10  ;;  %v4629_v56 = vpop.eup %4628  ;;  %2169 = vbcast.lane.b32.xlu1 %v5188_v7, 328  ;;  %2165 = vbcast.lane.b32.xlu0 %v5188_v7, 320  ;;  %1294 = vst.msk [vmem:[#allocation2 + $0x1a8] sm:$0xff] %vm1240_vm0, %v4627_v9  ;;  %v659_v24 = vcombine.high %v649_v51, %v649_v51  ;;  %v355_v16 = vmax.f32 %v5694_v19, 0.0 }
  0xeb   : > { %v847_v27 = vrot.slane %v649_v51, %v5029_v15  ;;  %v4631_v52 = vpop.eup %4630  ;;  %2584 = vst.msk [vmem:[#allocation3 + $0xe8] sm:$0xff] %vm1240_vm0, %v2488_v25  ;;  %v5733_v35 = vrot.slane %v1492_v20, %v5029_v15  ;;  %v1494_v21 = vcombine.high %v5686_v48, %v5686_v48  ;;  %1295 = vst.msk [vmem:[#allocation2 + $0x1b0] sm:$0xff] %vm1240_vm0, %v4629_v56  ;;  %v397_v48 = vmul.f32 0.6931472, %v5664_v30 }
  0xec   : > { %2583 = vst.msk [vmem:[#allocation3 + $0xe0] sm:$0xff] %vm1240_vm0, %v2487_v46  ;;  %v656_v12 = vrot.slane %v628_v40, %v5182_v5  ;;  %v851_v55 = vrot.slane %v657_v43, %v5029_v15  ;;  %v4633_v37 = vpop.eup %4632  ;;  %v1834_v28 = vpop.permute.xlu1 %1833  ;;  %v5742_v23 = vrot.slane %v5714_v47, %v5182_v5  ;;  %1296 = vst.msk [vmem:[#allocation2 + $0x1b8] sm:$0xff] %vm1240_vm0, %v4631_v52 }
  0xed   : > { %v1830_v29 = vpop.permute.xlu0 %1829  ;;  %v1016_v20 = vmul.f32 %v5615_v44, %v843_v49  ;;  %v4635_v10 = vpop.eup %4634  ;;  %v2490_v40 = vmul.f32 %v5679_v41, %v1834_v28  ;;  %1297 = vst.msk [vmem:[#allocation2 + $0x1c0] sm:$0xff] %vm1240_vm0, %v4633_v37  ;;  %v855_v9 = vrot.slane %v659_v24, %v5029_v15  ;;  %v658_v30 = vcombine.high %v642_v6, %v642_v6 }
  0xee   : > { %v2489_v51 = vmul.f32 %v5679_v41, %v1830_v29  ;;  %v4637_v25 = vpop.eup %4636  ;;  %2181 = vbcast.lane.b32.xlu1 %v5204_v14, 328  ;;  %2177 = vbcast.lane.b32.xlu0 %v5204_v14, 320  ;;  %1298 = vst.msk [vmem:[#allocation2 + $0x1c8] sm:$0xff] %vm1240_vm0, %v4635_v10  ;;  %v1017_v19 = vmul.f32 %v5609_v57, %v843_v49 }
  0xef   : > { %v1018_v46 = vmul.f32 %v5615_v44, %v847_v27  ;;  %v1176_v41 = vmul.f32 1.442695, %v1016_v20  ;;  %v4639_v56 = vpop.eup %4638  ;;  %2586 = vst.msk [vmem:[#allocation3 + $0xf8] sm:$0xff] %vm1240_vm0, %v2490_v40  ;;  %1299 = vst.msk [vmem:[#allocation2 + $0x1d0] sm:$0xff] %vm1240_vm0, %v4637_v25  ;;  %v660_v24 = vcombine.high %v656_v12, %v656_v12  ;;  %v859_v52 = vrot.slane %v642_v6, %v5029_v15 }
  0xf0   : > { %2585 = vst.msk [vmem:[#allocation3 + $0xf0] sm:$0xff] %vm1240_vm0, %v2489_v51  ;;  %v1019_v37 = vmul.f32 %v5609_v57, %v847_v27  ;;  %v1020_v28 = vmul.f32 %v5615_v44, %v851_v55  ;;  %v4641_v29 = vpop.eup %4640  ;;  %v1846_v10 = vpop.permute.xlu1 %1845  ;;  %v5766_v43 = vrot.slane %v1494_v21, %v5029_v15  ;;  %1300 = vst.msk [vmem:[#allocation2 + $0x1d8] sm:$0xff] %vm1240_vm0, %v4639_v56 }
  0xf1   : > { %v1842_v49 = vpop.permute.xlu0 %1841  ;;  %v863_v20 = vrot.slane %v656_v12, %v5029_v15  ;;  %v1021_v40 = vmul.f32 %v5609_v57, %v851_v55  ;;  %v5771_v51 = vadd.f32 %v397_v48, %v355_v16  ;;  %v4643_v25 = vpop.eup %4642  ;;  %v2492_v6 = vmul.f32 %v2286_v8, %v1846_v10  ;;  %1301 = vst.msk [vmem:[#allocation2 + $0x1e0] sm:$0xff] %vm1240_vm0, %v4641_v29 }
  0xf2   : > { %v2491_v36 = vmul.f32 %v2286_v8, %v1842_v49  ;;  %v1022_v27 = vmul.f32 %v5615_v44, %v855_v9  ;;  %4648 = vpow2.f32 %v1176_v41  ;;  %v4645_v3 = vpop.eup %4644  ;;  %2193 = vbcast.lane.b32.xlu1 %v5698_v2, 328  ;;  %2189 = vbcast.lane.b32.xlu0 %v5698_v2, 320  ;;  %1302 = vst.msk [vmem:[#allocation2 + $0x1e8] sm:$0xff] %vm1240_vm0, %v4643_v25  ;;  %v1178_v55 = vmul.f32 1.442695, %v1017_v19 }
  0xf3   : > { %v867_v21 = vrot.slane %v658_v30, %v5029_v15  ;;  %v1023_v12 = vmul.f32 %v5609_v57, %v855_v9  ;;  %v1180_v16 = vmul.f32 1.442695, %v1018_v46  ;;  %v4647_v48 = vpop.eup %4646  ;;  %2588 = vst.msk [vmem:[#allocation3 + $0x108] sm:$0xff] %vm1240_vm0, %v2492_v6  ;;  %1303 = vst.msk [vmem:[#allocation2 + $0x1f0] sm:$0xff] %vm1240_vm0, %v4645_v3  ;;  %v871_v8 = vrot.slane %v660_v24, %v5029_v15 }
  0xf4   : > { %2587 = vst.msk [vmem:[#allocation3 + $0x100] sm:$0xff] %vm1240_vm0, %v2491_v36  ;;  %v1024_v41 = vmul.f32 %v5615_v44, %v859_v52  ;;  %v1182_v56 = vmul.f32 1.442695, %v1019_v37  ;;  %v1184_v29 = vmul.f32 1.442695, %v1020_v28  ;;  %v1858_v10 = vpop.permute.xlu1 %1857  ;;  %1304 = vst.msk [vmem:[#allocation2 + $0x1f8] sm:$0xff] %vm1240_vm0, %v4647_v48  ;;  %v1025_v9 = vmul.f32 %v5609_v57, %v859_v52 }
  0xf5   : > { %v1854_v49 = vpop.permute.xlu0 %1853  ;;  %v1026_v30 = vmul.f32 %v5615_v44, %v863_v20  ;;  %4650 = vpow2.f32 %v1178_v55  ;;  %v1186_v19 = vmul.f32 1.442695, %v1021_v40  ;;  %v2494_v36 = vmul.f32 %v5722_v31, %v1858_v10 }
  0xf6   : > { %v2493_v3 = vmul.f32 %v5722_v31, %v1854_v49  ;;  %4652 = vpow2.f32 %v1180_v16  ;;  %v1188_v46 = vmul.f32 1.442695, %v1022_v27  ;;  %2205 = vbcast.lane.b32.xlu1 %v5706_v54, 328  ;;  %2201 = vbcast.lane.b32.xlu0 %v5706_v54, 320  ;;  %v1027_v24 = vmul.f32 %v5609_v57, %v863_v20  ;;  %v5801_v27 = vld [vmem:[%s5371_s24 + $0x18] sm:$0xff] }
  0xf7   : > { %4654 = vpow2.f32 %v1182_v56  ;;  %v1190_v37 = vmul.f32 1.442695, %v1023_v12  ;;  %v661_v52 = vcombine.high %v5771_v51, %v5771_v51  ;;  %2590 = vst.msk [vmem:[#allocation3 + $0x118] sm:$0xff] %vm1240_vm0, %v2494_v36  ;;  %v1028_v31 = vmul.f32 %v5615_v44, %v867_v21  ;;  %6728 = vst [vmem:[#allocation32_spill] sm:$0xff] %v5801_v27 }
  0xf8   : > { %2589 = vst.msk [vmem:[#allocation3 + $0x110] sm:$0xff] %vm1240_vm0, %v2493_v3  ;;  %4656 = vpow2.f32 %v1184_v29  ;;  %v1192_v28 = vmul.f32 1.442695, %v1024_v41  ;;  %v668_v40 = vrot.slane %v5771_v51, %v5182_v5  ;;  %v1870_v25 = vpop.permute.xlu1 %1869  ;;  %v1029_v20 = vmul.f32 %v5609_v57, %v867_v21 }
  0xf9   : > { %v1866_v6 = vpop.permute.xlu0 %1865  ;;  %v1030_v12 = vmul.f32 %v5615_v44, %v871_v8  ;;  %4658 = vpow2.f32 %v1186_v19  ;;  %v1194_v55 = vmul.f32 1.442695, %v1025_v9  ;;  %v2496_v16 = vmul.f32 %v5733_v35, %v1870_v25 }
  0xfa   : > { %v2495_v48 = vmul.f32 %v5733_v35, %v1866_v6  ;;  %4660 = vpow2.f32 %v1188_v46  ;;  %v1196_v56 = vmul.f32 1.442695, %v1026_v30  ;;  %2217 = vbcast.lane.b32.xlu1 %v5710_v39, 328  ;;  %2213 = vbcast.lane.b32.xlu0 %v5710_v39, 320  ;;  %v2302_v41 = vrot.slane %v5742_v23, %v5029_v15 }
  0xfb   : > { %v1031_v29 = vmul.f32 %v5609_v57, %v871_v8  ;;  %4662 = vpow2.f32 %v1190_v37  ;;  %v1198_v21 = vmul.f32 1.442695, %v1027_v24  ;;  %2592 = vst.msk [vmem:[#allocation3 + $0x128] sm:$0xff] %vm1240_vm0, %v2496_v16  ;;  %v6729_v35 = vcombine.high %v5714_v47, %v5714_v47 }
  0xfc   : > { %2591 = vst.msk [vmem:[#allocation3 + $0x120] sm:$0xff] %vm1240_vm0, %v2495_v48  ;;  %v5820_v49 = vmul.f32 %v5801_v27, %v5532_v61  ;;  %4664 = vpow2.f32 %v1192_v28  ;;  %v1200_v9 = vmul.f32 1.442695, %v1028_v31  ;;  %v1882_v30 = vpop.permute.xlu1 %1881  ;;  %v1202_v8 = vmul.f32 1.442695, %v1029_v20 }
  0xfd   : > { %v1491_v10 = vrot.slane %v6729_v35, %v5182_v5  ;;  %v1878_v19 = vpop.permute.xlu0 %1877  ;;  %4666 = vpow2.f32 %v1194_v55  ;;  %v675_v36 = vrot.slane %v661_v52, %v5182_v5  ;;  %v676_v3 = vcombine.high %v668_v40, %v668_v40 }
  0xfe   : > { %v2498_v46 = vmul.f32 %v5766_v43, %v1882_v30  ;;  %v2497_v24 = vmul.f32 %v5766_v43, %v1878_v19  ;;  %4668 = vpow2.f32 %v1196_v56  ;;  %v1204_v47 = vmul.f32 1.442695, %v1030_v12 }
  0xff   : > { %v4649_v37 = vpop.eup %4648  ;;  %4670 = vpow2.f32 %v1198_v21  ;;  %v1206_v25 = vmul.f32 1.442695, %v1031_v29  ;;  %v684_v61 = vrot.slane %v668_v40, %v5182_v5  ;;  %v2306_v31 = vrot.slane %v1491_v10, %v5029_v15 }
 0x100   : > { %2594 = vst.msk [vmem:[#allocation3 + $0x138] sm:$0xff] %vm1240_vm0, %v2498_v46  ;;  %2593 = vst.msk [vmem:[#allocation3 + $0x130] sm:$0xff] %vm1240_vm0, %v2497_v24  ;;  %v1493_v52 = vcombine.high %v5742_v23, %v5742_v23  ;;  %v1503_v28 = vrot.slane %v5820_v49, %v5182_v5  ;;  %4672 = vpow2.f32 %v1200_v9  ;;  %v1894_v43 = vpop.permute.xlu1 %1893  ;;  %v677_v20 = vcombine.high %v675_v36, %v675_v36 }
 0x101   : > { %1305 = vst.msk [vmem:[#allocation2 + $0x200] sm:$0xff] %vm1240_vm0, %v4649_v37  ;;  %v1890_v6 = vpop.permute.xlu0 %1889  ;;  %4674 = vpow2.f32 %v1202_v8  ;;  %v698_v40 = vrot.slane %v676_v3, %v5182_v5  ;;  %v706_v12 = vcombine.high %v684_v61, %v684_v61  ;;  %v2500_v16 = vmul.f32 %v2302_v41, %v1894_v43 }
 0x102   : > { %v4651_v55 = vpop.eup %4650  ;;  %v2499_v48 = vmul.f32 %v2302_v41, %v1890_v6  ;;  %v1495_v56 = vcombine.high %v1491_v10, %v1491_v10  ;;  %4676 = vpow2.f32 %v1204_v47  ;;  %v5839_v35 = vrot.slane %v1503_v28, %v5182_v5 }
 0x103   : > { %v4653_v29 = vpop.eup %4652  ;;  %4678 = vpow2.f32 %v1206_v25  ;;  %1306 = vst.msk [vmem:[#allocation2 + $0x208] sm:$0xff] %vm1240_vm0, %v4651_v55  ;;  %v708_v23 = vcombine.high %v698_v40, %v698_v40  ;;  %2596 = vst.msk [vmem:[#allocation3 + $0x148] sm:$0xff] %vm1240_vm0, %v2500_v16  ;;  %v691_v9 = vrot.slane %v675_v36, %v5182_v5  ;;  %v875_v41 = vrot.slane %v684_v61, %v5029_v15 }
 0x104   : > { %v4655_v21 = vpop.eup %4654  ;;  %2595 = vst.msk [vmem:[#allocation3 + $0x140] sm:$0xff] %vm1240_vm0, %v2499_v48  ;;  %1307 = vst.msk [vmem:[#allocation2 + $0x210] sm:$0xff] %vm1240_vm0, %v4653_v29  ;;  %v879_v10 = vrot.slane %v698_v40, %v5029_v15  ;;  %v1906_v19 = vpop.permute.xlu1 %1905  ;;  %v1511_v3 = vcombine.high %v1503_v28, %v1503_v28  ;;  %v5847_v46 = vrot.slane %v677_v20, %v5182_v5 }
 0x105   : > { %v4657_v30 = vpop.eup %4656  ;;  %v1902_v8 = vpop.permute.xlu0 %1901  ;;  %1308 = vst.msk [vmem:[#allocation2 + $0x218] sm:$0xff] %vm1240_vm0, %v4655_v21  ;;  %v883_v24 = vrot.slane %v706_v12, %v5029_v15  ;;  %v2502_v37 = vmul.f32 %v2306_v31, %v1906_v19  ;;  %v2310_v36 = vrot.slane %v1493_v52, %v5029_v15  ;;  %v2314_v61 = vrot.slane %v1495_v56, %v5029_v15 }
 0x106   : > { %v4659_v47 = vpop.eup %4658  ;;  %v2501_v25 = vmul.f32 %v2306_v31, %v1902_v8  ;;  %1309 = vst.msk [vmem:[#allocation2 + $0x220] sm:$0xff] %vm1240_vm0, %v4657_v30  ;;  %v887_v28 = vrot.slane %v708_v23, %v5029_v15  ;;  %v1032_v6 = vmul.f32 %v5615_v44, %v875_v41  ;;  %v1033_v20 = vmul.f32 %v5609_v57, %v875_v41 }
 0x107   : > { %v4661_v43 = vpop.eup %4660  ;;  %1310 = vst.msk [vmem:[#allocation2 + $0x228] sm:$0xff] %vm1240_vm0, %v4659_v47  ;;  %v1034_v40 = vmul.f32 %v5615_v44, %v879_v10  ;;  %2598 = vst.msk [vmem:[#allocation3 + $0x158] sm:$0xff] %vm1240_vm0, %v2502_v37  ;;  %v5862_v31 = vrot.slane %v5839_v35, %v5029_v15  ;;  %v707_v55 = vcombine.high %v691_v9, %v691_v9 }
 0x108   : > { %v4663_v12 = vpop.eup %4662  ;;  %2597 = vst.msk [vmem:[#allocation3 + $0x150] sm:$0xff] %vm1240_vm0, %v2501_v25  ;;  %1311 = vst.msk [vmem:[#allocation2 + $0x230] sm:$0xff] %vm1240_vm0, %v4661_v43  ;;  %v1035_v16 = vmul.f32 %v5609_v57, %v879_v10  ;;  %v1918_v56 = vpop.permute.xlu1 %1917  ;;  %v5869_v23 = vrot.slane %v1511_v3, %v5182_v5  ;;  %v709_v21 = vcombine.high %v5847_v46, %v5847_v46  ;;  %v1208_v43 = vmul.f32 1.442695, %v1032_v6 }
 0x109   : > { %v4665_v48 = vpop.eup %4664  ;;  %v1914_v29 = vpop.permute.xlu0 %1913  ;;  %1312 = vst.msk [vmem:[#allocation2 + $0x238] sm:$0xff] %vm1240_vm0, %v4663_v12  ;;  %v891_v41 = vrot.slane %v691_v9, %v5029_v15  ;;  %v1036_v30 = vmul.f32 %v5615_v44, %v883_v24  ;;  %v2504_v8 = vmul.f32 %v2310_v36, %v1918_v56  ;;  %v895_v10 = vrot.slane %v5847_v46, %v5029_v15 }
 0x10a   : > { %v4667_v19 = vpop.eup %4666  ;;  %v2503_v47 = vmul.f32 %v2310_v36, %v1914_v29  ;;  %1313 = vst.msk [vmem:[#allocation2 + $0x240] sm:$0xff] %vm1240_vm0, %v4665_v48  ;;  %v1037_v3 = vmul.f32 %v5609_v57, %v883_v24  ;;  %v1038_v25 = vmul.f32 %v5615_v44, %v887_v28  ;;  %v1210_v12 = vmul.f32 1.442695, %v1033_v20 }
 0x10b   : > { %v4669_v37 = vpop.eup %4668  ;;  %1314 = vst.msk [vmem:[#allocation2 + $0x248] sm:$0xff] %vm1240_vm0, %v4667_v19  ;;  %v1212_v9 = vmul.f32 1.442695, %v1034_v40  ;;  %2600 = vst.msk [vmem:[#allocation3 + $0x168] sm:$0xff] %vm1240_vm0, %v2504_v8  ;;  %v1541_v36 = vcombine.high %v5839_v35, %v5839_v35  ;;  %v899_v46 = vrot.slane %v707_v55, %v5029_v15  ;;  %v1039_v24 = vmul.f32 %v5609_v57, %v887_v28 }
 0x10c   : > { %v4671_v52 = vpop.eup %4670  ;;  %2599 = vst.msk [vmem:[#allocation3 + $0x160] sm:$0xff] %vm1240_vm0, %v2503_v47  ;;  %1315 = vst.msk [vmem:[#allocation2 + $0x250] sm:$0xff] %vm1240_vm0, %v4669_v37  ;;  %v1214_v48 = vmul.f32 1.442695, %v1035_v16  ;;  %v1930_v29 = vpop.permute.xlu1 %1929  ;;  %v1040_v20 = vmul.f32 %v5615_v44, %v891_v41  ;;  %v1041_v40 = vmul.f32 %v5609_v57, %v891_v41  ;;  %4680 = vpow2.f32 %v1208_v43 }
 0x10d   : > { %v4673_v56 = vpop.eup %4672  ;;  %v1926_v6 = vpop.permute.xlu0 %1925  ;;  %1316 = vst.msk [vmem:[#allocation2 + $0x258] sm:$0xff] %vm1240_vm0, %v4671_v52  ;;  %v1216_v19 = vmul.f32 1.442695, %v1036_v30  ;;  %v2506_v35 = vmul.f32 %v2314_v61, %v1930_v29  ;;  %4682 = vpow2.f32 %v1210_v12  ;;  %v1218_v55 = vmul.f32 1.442695, %v1037_v3 }
 0x10e   : > { %v4675_v8 = vpop.eup %4674  ;;  %v2505_v47 = vmul.f32 %v2314_v61, %v1926_v6  ;;  %1317 = vst.msk [vmem:[#allocation2 + $0x260] sm:$0xff] %vm1240_vm0, %v4673_v56  ;;  %v903_v16 = vrot.slane %v709_v21, %v5029_v15  ;;  %v1042_v52 = vmul.f32 %v5615_v44, %v895_v10  ;;  %4684 = vpow2.f32 %v1212_v9 }
 0x10f   : > { %v4677_v28 = vpop.eup %4676  ;;  %1318 = vst.msk [vmem:[#allocation2 + $0x268] sm:$0xff] %vm1240_vm0, %v4675_v8  ;;  %v1220_v37 = vmul.f32 1.442695, %v1038_v25  ;;  %2602 = vst.msk [vmem:[#allocation3 + $0x178] sm:$0xff] %vm1240_vm0, %v2506_v35  ;;  %v2322_v61 = vrot.slane %v5869_v23, %v5029_v15  ;;  %v1043_v41 = vmul.f32 %v5609_v57, %v895_v10  ;;  %4686 = vpow2.f32 %v1214_v48 }
 0x110   : > { %v4679_v27 = vpop.eup %4678  ;;  %2601 = vst.msk [vmem:[#allocation3 + $0x170] sm:$0xff] %vm1240_vm0, %v2505_v47  ;;  %1319 = vst.msk [vmem:[#allocation2 + $0x270] sm:$0xff] %vm1240_vm0, %v4677_v28  ;;  %v1222_v30 = vmul.f32 1.442695, %v1039_v24  ;;  %v1942_v3 = vpop.permute.xlu1 %1941  ;;  %v1044_v25 = vmul.f32 %v5615_v44, %v899_v46  ;;  %v1045_v43 = vmul.f32 %v5609_v57, %v899_v46  ;;  %4688 = vpow2.f32 %v1216_v19 }
 0x111   : > { %v1938_v21 = vpop.permute.xlu0 %1937  ;;  %1320 = vst.msk [vmem:[#allocation2 + $0x278] sm:$0xff] %vm1240_vm0, %v4679_v27  ;;  %v1224_v12 = vmul.f32 1.442695, %v1040_v20  ;;  %v2508_v9 = vmul.f32 %v5862_v31, %v1942_v3  ;;  %4690 = vpow2.f32 %v1218_v55  ;;  %v1226_v29 = vmul.f32 1.442695, %v1041_v40 }
 0x112   : > { %v2507_v56 = vmul.f32 %v5862_v31, %v1938_v21  ;;  %v1046_v10 = vmul.f32 %v5615_v44, %v903_v16  ;;  %4692 = vpow2.f32 %v1220_v37  ;;  %v1228_v24 = vmul.f32 1.442695, %v1042_v52 }
 0x113   : > { %2604 = vst.msk [vmem:[#allocation3 + $0x188] sm:$0xff] %vm1240_vm0, %v2508_v9  ;;  %v2326_v27 = vrot.slane %v1541_v36, %v5029_v15  ;;  %v1047_v46 = vmul.f32 %v5609_v57, %v903_v16  ;;  %4694 = vpow2.f32 %v1222_v30  ;;  %v1230_v48 = vmul.f32 1.442695, %v1043_v41 }
 0x114   : > { %2603 = vst.msk [vmem:[#allocation3 + $0x180] sm:$0xff] %vm1240_vm0, %v2507_v56  ;;  %v1954_v6 = vpop.permute.xlu1 %1953  ;;  %v1543_v31 = vcombine.high %v5869_v23, %v5869_v23  ;;  %v6730_v44 = vcombine.high %v5820_v49, %v5820_v49  ;;  %4696 = vpow2.f32 %v1224_v12  ;;  %v1232_v19 = vmul.f32 1.442695, %v1044_v25 }
 0x115   : > { %v1950_v20 = vpop.permute.xlu0 %1949  ;;  %v2510_v8 = vmul.f32 %v2322_v61, %v1954_v6  ;;  %4698 = vpow2.f32 %v1226_v29  ;;  %v1234_v36 = vmul.f32 1.442695, %v1045_v43  ;;  %v1236_v57 = vmul.f32 1.442695, %v1046_v10 }
 0x116   : > { %v1510_v40 = vrot.slane %v6730_v44, %v5182_v5  ;;  %v2509_v35 = vmul.f32 %v2322_v61, %v1950_v20  ;;  %4700 = vpow2.f32 %v1228_v24  ;;  %v1238_v47 = vmul.f32 1.442695, %v1047_v46  ;;  %v5931_v24 = vld [vmem:[%s5371_s24 + $0x20] sm:$0xff] }
 0x117   : > { %2606 = vst.msk [vmem:[#allocation3 + $0x198] sm:$0xff] %vm1240_vm0, %v2510_v8  ;;  %4702 = vpow2.f32 %v1230_v48  ;;  %v2330_v28 = vrot.slane %v1543_v31, %v5029_v15  ;;  %v1341_v8 = vmul.f32 %v5931_v24, %v5662_v13 }
 0x118   : > { %2605 = vst.msk [vmem:[#allocation3 + $0x190] sm:$0xff] %vm1240_vm0, %v2509_v35  ;;  %v1966_v23 = vpop.permute.xlu1 %1965  ;;  %v1526_v49 = vrot.slane %v1510_v40, %v5182_v5  ;;  %4704 = vpow2.f32 %v1232_v19  ;;  %v1512_v61 = vcombine.high %v1510_v40, %v1510_v40 }
 0x119   : > { %v1962_v55 = vpop.permute.xlu0 %1961  ;;  %v4681_v16 = vpop.eup %4680  ;;  %v2512_v52 = vmul.f32 %v2326_v27, %v1966_v23  ;;  %4706 = vpow2.f32 %v1234_v36 }
 0x11a   : > { %v2511_v37 = vmul.f32 %v2326_v27, %v1962_v55  ;;  %v4683_v41 = vpop.eup %4682  ;;  %4708 = vpow2.f32 %v1236_v57  ;;  %1321 = vst.msk [vmem:[#allocation2 + $0x280] sm:$0xff] %vm1240_vm0, %v4681_v16  ;;  %v2334_v56 = vrot.slane %v1526_v49, %v5029_v15  ;;  %v1540_v29 = vrot.slane %v1512_v61, %v5182_v5 }
 0x11b   : > { %v4685_v30 = vpop.eup %4684  ;;  %2608 = vst.msk [vmem:[#allocation3 + $0x1a8] sm:$0xff] %vm1240_vm0, %v2512_v52  ;;  %4710 = vpow2.f32 %v1238_v47  ;;  %1322 = vst.msk [vmem:[#allocation2 + $0x288] sm:$0xff] %vm1240_vm0, %v4683_v41  ;;  %v1542_v20 = vcombine.high %v1526_v49, %v1526_v49  ;;  %v1552_v52 = vrot.slane %v1341_v8, %v5182_v5 }
 0x11c   : > { %2607 = vst.msk [vmem:[#allocation3 + $0x1a0] sm:$0xff] %vm1240_vm0, %v2511_v37  ;;  %v4687_v3 = vpop.eup %4686  ;;  %v1978_v21 = vpop.permute.xlu1 %1977  ;;  %1323 = vst.msk [vmem:[#allocation2 + $0x290] sm:$0xff] %vm1240_vm0, %v4685_v30  ;;  %v2338_v19 = vrot.slane %v1540_v29, %v5029_v15  ;;  %v1544_v55 = vcombine.high %v1540_v29, %v1540_v29 }
 0x11d   : > { %v1974_v25 = vpop.permute.xlu0 %1973  ;;  %v4689_v43 = vpop.eup %4688  ;;  %v2514_v12 = vmul.f32 %v2330_v28, %v1978_v21  ;;  %1324 = vst.msk [vmem:[#allocation2 + $0x298] sm:$0xff] %vm1240_vm0, %v4687_v3  ;;  %v2342_v16 = vrot.slane %v1542_v20, %v5029_v15 }
 0x11e   : > { %v2513_v9 = vmul.f32 %v2330_v28, %v1974_v25  ;;  %v4691_v10 = vpop.eup %4690  ;;  %1325 = vst.msk [vmem:[#allocation2 + $0x2a0] sm:$0xff] %vm1240_vm0, %v4689_v43  ;;  %v2346_v21 = vrot.slane %v1544_v55, %v5029_v15 }
 0x11f   : > { %v4693_v27 = vpop.eup %4692  ;;  %2610 = vst.msk [vmem:[#allocation3 + $0x1b8] sm:$0xff] %vm1240_vm0, %v2514_v12  ;;  %1326 = vst.msk [vmem:[#allocation2 + $0x2a8] sm:$0xff] %vm1240_vm0, %v4691_v10  ;;  %v1568_v12 = vrot.slane %v1552_v52, %v5182_v5 }
 0x120   : > { %2609 = vst.msk [vmem:[#allocation3 + $0x1b0] sm:$0xff] %vm1240_vm0, %v2513_v9  ;;  %v4695_v46 = vpop.eup %4694  ;;  %v1990_v48 = vpop.permute.xlu1 %1989  ;;  %1327 = vst.msk [vmem:[#allocation2 + $0x2b0] sm:$0xff] %vm1240_vm0, %v4693_v27  ;;  %v1560_v9 = vcombine.high %v1552_v52, %v1552_v52 }
 0x121   : > { %v1986_v6 = vpop.permute.xlu0 %1985  ;;  %v4697_v31 = vpop.eup %4696  ;;  %v2516_v44 = vmul.f32 %v2334_v56, %v1990_v48  ;;  %1328 = vst.msk [vmem:[#allocation2 + $0x2b8] sm:$0xff] %vm1240_vm0, %v4695_v46  ;;  %v2350_v46 = vrot.slane %v1568_v12, %v5029_v15 }
 0x122   : > { %v2515_v40 = vmul.f32 %v2334_v56, %v1986_v6  ;;  %v4699_v35 = vpop.eup %4698  ;;  %1329 = vst.msk [vmem:[#allocation2 + $0x2c0] sm:$0xff] %vm1240_vm0, %v4697_v31  ;;  %v1582_v48 = vrot.slane %v1560_v9, %v5182_v5  ;;  %v1545_v31 = vcombine.high %v1341_v8, %v1341_v8  ;;  %v5978_v9 = vld [vmem:[%s5371_s24 + $0x28] sm:$0xff] }
 0x123   : > { %v4701_v36 = vpop.eup %4700  ;;  %2612 = vst.msk [vmem:[#allocation3 + $0x1c8] sm:$0xff] %vm1240_vm0, %v2516_v44  ;;  %1330 = vst.msk [vmem:[#allocation2 + $0x2c8] sm:$0xff] %vm1240_vm0, %v4699_v35  ;;  %v1590_v35 = vcombine.high %v1568_v12, %v1568_v12 }
 0x124   : > { %2611 = vst.msk [vmem:[#allocation3 + $0x1c0] sm:$0xff] %vm1240_vm0, %v2515_v40  ;;  %v4703_v57 = vpop.eup %4702  ;;  %v2002_v47 = vpop.permute.xlu1 %2001  ;;  %1331 = vst.msk [vmem:[#allocation2 + $0x2d0] sm:$0xff] %vm1240_vm0, %v4701_v36 }
 0x125   : > { %v1998_v23 = vpop.permute.xlu0 %1997  ;;  %v4705_v28 = vpop.eup %4704  ;;  %v2518_v13 = vmul.f32 %v2338_v19, %v2002_v47  ;;  %1332 = vst.msk [vmem:[#allocation2 + $0x2d8] sm:$0xff] %vm1240_vm0, %v4703_v57  ;;  %v1559_v47 = vrot.slane %v1545_v31, %v5182_v5 }
 0x126   : > { %v2517_v49 = vmul.f32 %v2338_v19, %v1998_v23  ;;  %v4707_v37 = vpop.eup %4706  ;;  %1333 = vst.msk [vmem:[#allocation2 + $0x2e0] sm:$0xff] %vm1240_vm0, %v4705_v28  ;;  %v2354_v19 = vrot.slane %v1582_v48, %v5029_v15  ;;  %v2358_v28 = vrot.slane %v1590_v35, %v5029_v15 }
 0x127   : > { %v4709_v61 = vpop.eup %4708  ;;  %2614 = vst.msk [vmem:[#allocation3 + $0x1d8] sm:$0xff] %vm1240_vm0, %v2518_v13  ;;  %1334 = vst.msk [vmem:[#allocation2 + $0x2e8] sm:$0xff] %vm1240_vm0, %v4707_v37  ;;  %v1592_v13 = vcombine.high %v1582_v48, %v1582_v48 }
 0x128   : > { %2613 = vst.msk [vmem:[#allocation3 + $0x1d0] sm:$0xff] %vm1240_vm0, %v2517_v49  ;;  %v4711_v41 = vpop.eup %4710  ;;  %v2014_v30 = vpop.permute.xlu1 %2013  ;;  %1335 = vst.msk [vmem:[#allocation2 + $0x2f0] sm:$0xff] %vm1240_vm0, %v4709_v61 }
 0x129   : > { %v2010_v3 = vpop.permute.xlu0 %2009  ;;  %v2520_v25 = vmul.f32 %v2342_v16, %v2014_v30  ;;  %1336 = vst.msk [vmem:[#allocation2 + $0x2f8] sm:$0xff] %vm1240_vm0, %v4711_v41  ;;  %v2362_v61 = vrot.slane %v1592_v13, %v5029_v15  ;;  %v1561_v41 = vcombine.high %v1559_v47, %v1559_v47 }
 0x12a   : > { %v2519_v43 = vmul.f32 %v2342_v16, %v2010_v3  ;;  %v1575_v16 = vrot.slane %v1559_v47, %v5182_v5 }
 0x12b   : > { %2616 = vst.msk [vmem:[#allocation3 + $0x1e8] sm:$0xff] %vm1240_vm0, %v2520_v25  ;;  %v1589_v12 = vrot.slane %v1561_v41, %v5182_v5 }
 0x12c   : > { %2615 = vst.msk [vmem:[#allocation3 + $0x1e0] sm:$0xff] %vm1240_vm0, %v2519_v43  ;;  %v2026_v56 = vpop.permute.xlu1 %2025  ;;  %v2366_v43 = vrot.slane %v1575_v16, %v5029_v15 }
 0x12d   : > { %v2022_v29 = vpop.permute.xlu0 %2021  ;;  %v2522_v10 = vmul.f32 %v2346_v21, %v2026_v56  ;;  %v2370_v48 = vrot.slane %v1589_v12, %v5029_v15 }
 0x12e   : > { %v2521_v27 = vmul.f32 %v2346_v21, %v2022_v29 }
 0x12f   : > { %2618 = vst.msk [vmem:[#allocation3 + $0x1f8] sm:$0xff] %vm1240_vm0, %v2522_v10  ;;  %v1591_v10 = vcombine.high %v1575_v16, %v1575_v16 }
 0x130   : > { %2617 = vst.msk [vmem:[#allocation3 + $0x1f0] sm:$0xff] %vm1240_vm0, %v2521_v27  ;;  %v2038_v6 = vpop.permute.xlu1 %2037 }
 0x131   : > { %v2034_v20 = vpop.permute.xlu0 %2033  ;;  %v2524_v44 = vmul.f32 %v2350_v46, %v2038_v6  ;;  %v1342_v6 = vmul.f32 %v5978_v9, %v5771_v51  ;;  %v2374_v35 = vrot.slane %v1591_v10, %v5029_v15 }
 0x132   : > { %v2523_v40 = vmul.f32 %v2350_v46, %v2034_v20 }
 0x133   : > { %2620 = vst.msk [vmem:[#allocation3 + $0x208] sm:$0xff] %vm1240_vm0, %v2524_v44  ;;  %v1593_v44 = vcombine.high %v1589_v12, %v1589_v12 }
 0x134   : > { %2619 = vst.msk [vmem:[#allocation3 + $0x200] sm:$0xff] %vm1240_vm0, %v2523_v40  ;;  %v2050_v36 = vpop.permute.xlu1 %2049 }
 0x135   : > { %v2046_v57 = vpop.permute.xlu0 %2045  ;;  %v2526_v23 = vmul.f32 %v2354_v19, %v2050_v36  ;;  %v1601_v36 = vrot.slane %v1342_v6, %v5182_v5  ;;  %v2378_v51 = vrot.slane %v1593_v44, %v5029_v15 }
 0x136   : > { %v2525_v55 = vmul.f32 %v2354_v19, %v2046_v57 }
 0x137   : > { %2622 = vst.msk [vmem:[#allocation3 + $0x218] sm:$0xff] %vm1240_vm0, %v2526_v23  ;;  %v1609_v13 = vcombine.high %v1601_v36, %v1601_v36 }
 0x138   : > { %2621 = vst.msk [vmem:[#allocation3 + $0x210] sm:$0xff] %vm1240_vm0, %v2525_v55  ;;  %v2062_v8 = vpop.permute.xlu1 %2061 }
 0x139   : > { %v2058_v49 = vpop.permute.xlu0 %2057  ;;  %v2528_v52 = vmul.f32 %v2358_v28, %v2062_v8 }
 0x13a   : > { %v2527_v37 = vmul.f32 %v2358_v28, %v2058_v49  ;;  %v1617_v28 = vrot.slane %v1601_v36, %v5182_v5 }
 0x13b   : > { %2624 = vst.msk [vmem:[#allocation3 + $0x228] sm:$0xff] %vm1240_vm0, %v2528_v52 }
 0x13c   : > { %2623 = vst.msk [vmem:[#allocation3 + $0x220] sm:$0xff] %vm1240_vm0, %v2527_v37  ;;  %v2074_v30 = vpop.permute.xlu1 %2073  ;;  %v2382_v37 = vrot.slane %v1617_v28, %v5029_v15  ;;  %v1639_v12 = vcombine.high %v1617_v28, %v1617_v28 }
 0x13d   : > { %v2070_v3 = vpop.permute.xlu0 %2069  ;;  %v2530_v21 = vmul.f32 %v2362_v61, %v2074_v30 }
 0x13e   : > { %v2529_v25 = vmul.f32 %v2362_v61, %v2070_v3  ;;  %v1631_v61 = vrot.slane %v1609_v13, %v5182_v5  ;;  %v1594_v3 = vcombine.high %v1342_v6, %v1342_v6 }
 0x13f   : > { %2626 = vst.msk [vmem:[#allocation3 + $0x238] sm:$0xff] %vm1240_vm0, %v2530_v21 }
 0x140   : > { %2625 = vst.msk [vmem:[#allocation3 + $0x230] sm:$0xff] %vm1240_vm0, %v2529_v25  ;;  %v2086_v56 = vpop.permute.xlu1 %2085  ;;  %v1608_v10 = vrot.slane %v1594_v3, %v5182_v5 }
 0x141   : > { %v2082_v29 = vpop.permute.xlu0 %2081  ;;  %v2532_v27 = vmul.f32 %v2366_v43, %v2086_v56 }
 0x142   : > { %v2531_v46 = vmul.f32 %v2366_v43, %v2082_v29  ;;  %v2386_v43 = vrot.slane %v1631_v61, %v5029_v15  ;;  %v1624_v44 = vrot.slane %v1608_v10, %v5182_v5  ;;  %v1610_v36 = vcombine.high %v1608_v10, %v1608_v10 }
 0x143   : > { %2628 = vst.msk [vmem:[#allocation3 + $0x248] sm:$0xff] %vm1240_vm0, %v2532_v27 }
 0x144   : > { %2627 = vst.msk [vmem:[#allocation3 + $0x240] sm:$0xff] %vm1240_vm0, %v2531_v46  ;;  %v2098_v20 = vpop.permute.xlu1 %2097  ;;  %v1638_v28 = vrot.slane %v1610_v36, %v5182_v5  ;;  %v6044_v36 = vmov 0.0  }
 0x145   : > { %v2094_v31 = vpop.permute.xlu0 %2093  ;;  %v2534_v40 = vmul.f32 %v2370_v48, %v2098_v20  ;;  %v1641_v20 = vcombine.high %v1631_v61, %v1631_v61 }
 0x146   : > { %v2533_v19 = vmul.f32 %v2370_v48, %v2094_v31  ;;  %v2390_v48 = vrot.slane %v1639_v12, %v5029_v15 }
 0x147   : > { %2630 = vst.msk [vmem:[#allocation3 + $0x258] sm:$0xff] %vm1240_vm0, %v2534_v40 }
 0x148   : > { %2629 = vst.msk [vmem:[#allocation3 + $0x250] sm:$0xff] %vm1240_vm0, %v2533_v19  ;;  %v2110_v57 = vpop.permute.xlu1 %2109 }
 0x149   : > { %v2106_v47 = vpop.permute.xlu0 %2105  ;;  %v2536_v23 = vmul.f32 %v2374_v35, %v2110_v57 }
 0x14a   : > { %v2535_v55 = vmul.f32 %v2374_v35, %v2106_v47  ;;  %v2394_v35 = vrot.slane %v1641_v20, %v5029_v15  ;;  %v6028_v20 = vmov 0.0  }
 0x14b   : > { %2632 = vst.msk [vmem:[#allocation3 + $0x268] sm:$0xff] %vm1240_vm0, %v2536_v23 }
 0x14c   : > { %2631 = vst.msk [vmem:[#allocation3 + $0x260] sm:$0xff] %vm1240_vm0, %v2535_v55  ;;  %v2122_v8 = vpop.permute.xlu1 %2121  ;;  %v2398_v55 = vrot.slane %v1624_v44, %v5029_v15 }
 0x14d   : > { %v2118_v49 = vpop.permute.xlu0 %2117  ;;  %v2538_v16 = vmul.f32 %v2378_v51, %v2122_v8 }
 0x14e   : > { %v2537_v52 = vmul.f32 %v2378_v51, %v2118_v49 }
 0x14f   : > { %2634 = vst.msk [vmem:[#allocation3 + $0x278] sm:$0xff] %vm1240_vm0, %v2538_v16 }
 0x150   : > { %2633 = vst.msk [vmem:[#allocation3 + $0x270] sm:$0xff] %vm1240_vm0, %v2537_v52  ;;  %v2134_v41 = vpop.permute.xlu1 %2133  ;;  %v2402_v52 = vrot.slane %v1638_v28, %v5029_v15 }
 0x151   : > { %v2130_v30 = vpop.permute.xlu0 %2129  ;;  %v2540_v21 = vmul.f32 %v2382_v37, %v2134_v41 }
 0x152   : > { %v2539_v25 = vmul.f32 %v2382_v37, %v2130_v30  ;;  %v1640_v37 = vcombine.high %v1624_v44, %v1624_v44  ;;  %v6036_v44 = vmov 0.0  }
 0x153   : > { %2636 = vst.msk [vmem:[#allocation3 + $0x288] sm:$0xff] %vm1240_vm0, %v2540_v21  ;;  %v1642_v21 = vcombine.high %v1638_v28, %v1638_v28  ;;  %v6056_v28 = vmov 0.0  }
 0x154   : > { %2635 = vst.msk [vmem:[#allocation3 + $0x280] sm:$0xff] %vm1240_vm0, %v2539_v25  ;;  %v2146_v56 = vpop.permute.xlu1 %2145  ;;  %v2406_v5 = vrot.slane %v1640_v37, %v5029_v15 }
 0x155   : > { %v2142_v29 = vpop.permute.xlu0 %2141  ;;  %v2542_v27 = vmul.f32 %v2386_v43, %v2146_v56 }
 0x156   : > { %v2541_v46 = vmul.f32 %v2386_v43, %v2142_v29  ;;  %v2410_v29 = vrot.slane %v1642_v21, %v5029_v15  ;;  %v6034_v15 = vmov 0.0  }
 0x157   : > { %2638 = vst.msk [vmem:[#allocation3 + $0x298] sm:$0xff] %vm1240_vm0, %v2542_v27 }
 0x158   : > { %2637 = vst.msk [vmem:[#allocation3 + $0x290] sm:$0xff] %vm1240_vm0, %v2541_v46  ;;  %v2158_v6 = vpop.permute.xlu1 %2157 }
 0x159   : > { %v2154_v31 = vpop.permute.xlu0 %2153  ;;  %v2544_v40 = vmul.f32 %v2390_v48, %v2158_v6  ;;  %v6030_v6 = vmov 0.0  }
 0x15a   : > { %v2543_v19 = vmul.f32 %v2390_v48, %v2154_v31  ;;  %v6032_v31 = vmov 0.0  }
 0x15b   : > { %2640 = vst.msk [vmem:[#allocation3 + $0x2a8] sm:$0xff] %vm1240_vm0, %v2544_v40  ;;  %v6038_v40 = vmov 0.0  }
 0x15c   : > { %2639 = vst.msk [vmem:[#allocation3 + $0x2a0] sm:$0xff] %vm1240_vm0, %v2543_v19  ;;  %v2170_v57 = vpop.permute.xlu1 %2169  ;;  %v6040_v19 = vmov 0.0  }
 0x15d   : > { %v2166_v47 = vpop.permute.xlu0 %2165  ;;  %v2546_v51 = vmul.f32 %v2394_v35, %v2170_v57  ;;  %v6046_v57 = vmov 0.0  }
 0x15e   : > { %v2545_v23 = vmul.f32 %v2394_v35, %v2166_v47  ;;  %v6042_v35 = vmov 0.0   ;;  %v6048_v47 = vmov 0.0  }
 0x15f   : > { %2642 = vst.msk [vmem:[#allocation3 + $0x2b8] sm:$0xff] %vm1240_vm0, %v2546_v51  ;;  %v6050_v51 = vmov 0.0  }
 0x160   : > { %2641 = vst.msk [vmem:[#allocation3 + $0x2b0] sm:$0xff] %vm1240_vm0, %v2545_v23  ;;  %v2182_v13 = vpop.permute.xlu1 %2181  ;;  %v6052_v23 = vmov 0.0  }
 0x161   : > { %v2178_v8 = vpop.permute.xlu0 %2177  ;;  %v2548_v49 = vmul.f32 %v2398_v55, %v2182_v13  ;;  %v6058_v13 = vmov 0.0  }
 0x162   : > { %v2547_v16 = vmul.f32 %v2398_v55, %v2178_v8  ;;  %v6054_v55 = vmov 0.0  }
 0x163   : > { %2644 = vst.msk [vmem:[#allocation3 + $0x2c8] sm:$0xff] %vm1240_vm0, %v2548_v49 }
 0x164   : > { %2643 = vst.msk [vmem:[#allocation3 + $0x2c0] sm:$0xff] %vm1240_vm0, %v2547_v16  ;;  %v2194_v61 = vpop.permute.xlu1 %2193 }
 0x165   : > { %v2190_v41 = vpop.permute.xlu0 %2189  ;;  %v2550_v30 = vmul.f32 %v2402_v52, %v2194_v61 }
 0x166   : > { %v2549_v3 = vmul.f32 %v2402_v52, %v2190_v41 }
 0x167   : > { %2646 = vst.msk [vmem:[#allocation3 + $0x2d8] sm:$0xff] %vm1240_vm0, %v2550_v30 }
 0x168   : > { %2645 = vst.msk [vmem:[#allocation3 + $0x2d0] sm:$0xff] %vm1240_vm0, %v2549_v3  ;;  %v2206_v25 = vpop.permute.xlu1 %2205 }
 0x169   : > { %v2202_v43 = vpop.permute.xlu0 %2201  ;;  %v2552_v12 = vmul.f32 %v2406_v5, %v2206_v25 }
 0x16a   : > { %v2551_v56 = vmul.f32 %v2406_v5, %v2202_v43 }
 0x16b   : > { %2648 = vst.msk [vmem:[#allocation3 + $0x2e8] sm:$0xff] %vm1240_vm0, %v2552_v12 }
 0x16c   : > { %2647 = vst.msk [vmem:[#allocation3 + $0x2e0] sm:$0xff] %vm1240_vm0, %v2551_v56  ;;  %v2218_v10 = vpop.permute.xlu1 %2217 }
 0x16d   : > { %v2214_v27 = vpop.permute.xlu0 %2213  ;;  %v2554_v46 = vmul.f32 %v2410_v29, %v2218_v10 }
 0x16e   : > { %v2553_v48 = vmul.f32 %v2410_v29, %v2214_v27 }
 0x16f   : > { %2650 = vst.msk [vmem:[#allocation3 + $0x2f8] sm:$0xff] %vm1240_vm0, %v2554_v46 }
 0x170   : > { %2649 = vst.msk [vmem:[#allocation3 + $0x2f0] sm:$0xff] %vm1240_vm0, %v2553_v48 }
 0x171 LB: >> { %s4292_s8 = sshll.u32 %s4908_s7, 7  ;;  %s2656_s7 = sadd.s32 1, %s4908_s7   ;;  %s4908_s7 = sphi %s6060_s7, %s2656_s7   ;;  %v4904_v13 = vphi %v6058_v13, %v6105_v13   ;;  %v4900_v28 = vphi %v6056_v28, %v6107_v28   ;;  %v4896_v55 = vphi %v6054_v55, %v6112_v55   ;;  %v4892_v23 = vphi %v6052_v23, %v6123_v23   ;;  %v4888_v51 = vphi %v6050_v51, %v6125_v51   ;;  %v4884_v47 = vphi %v6048_v47, %v6734_v47   ;;  %v4880_v57 = vphi %v6046_v57, %v2730_v57   ;;  %v4876_v36 = vphi %v6044_v36, %v2731_v36   ;;  %v4872_v35 = vphi %v6042_v35, %v6733_v35   ;;  %v4868_v19 = vphi %v6040_v19, %v2733_v19   ;;  %v4864_v40 = vphi %v6038_v40, %v2734_v40   ;;  %v4860_v44 = vphi %v6036_v44, %v6732_v44   ;;  %v4856_v15 = vphi %v6034_v15, %v2736_v15   ;;  %v4852_v31 = vphi %v6032_v31, %v2737_v31   ;;  %v4848_v6 = vphi %v6030_v6, %v2738_v6   ;;  %v4844_v20 = vphi %v6028_v20, %v2739_v20  }
 0x172   : >> { %s6092_s9 = scalar_lea.vmem [#allocation2], %s4292_s8  ;;  %s6095_s26 = scalar_lea.vmem [#allocation3], %s4292_s8 }
 0x173   : >> { %v2675_v8 = vld [vmem:[%s6092_s9] sm:$0xff]  ;;  %v2676_v16 = vld [vmem:[%s6092_s9 + $0x8] sm:$0xff]  ;;  %v2677_v41 = vld [vmem:[%s6092_s9 + $0x10] sm:$0xff]  ;;  %p6181_p12 = scmp.ge.s32.totalorder %s2656_s7, 6  }
 0x174   : >> { %v2691_v52 = vmul.f32 %v4904_v13, %v2675_v8  ;;  %v2692_v37 = vmul.f32 %v4900_v28, %v2676_v16  ;;  %v2693_v3 = vmul.f32 %v4896_v55, %v2677_v41  ;;  %v2678_v5 = vld [vmem:[%s6092_s9 + $0x18] sm:$0xff]  ;;  %v2679_v25 = vld [vmem:[%s6092_s9 + $0x20] sm:$0xff]  ;;  %v2680_v29 = vld [vmem:[%s6092_s9 + $0x28] sm:$0xff]  ;;  %2862 = vbcast.lane.b32.xlu1 (%p6181_p12), %v5036_v17, 336  ;;  %2854 = vbcast.lane.b32.xlu0 (%p6181_p12), %v5040_v18, 336  ;;  %vm3970_vm1 = vcmask (%p6181_p12), 1041409  }
 0x175   : >> { %v2694_v43 = vmul.f32 %v4892_v23, %v2678_v5  ;;  %v2695_v12 = vmul.f32 %v4888_v51, %v2679_v25  ;;  %v2696_v27 = vmul.f32 %v4884_v47, %v2680_v29  ;;  %v2681_v46 = vld [vmem:[%s6092_s9 + $0x30] sm:$0xff]  ;;  %v2682_v8 = vld [vmem:[%s6092_s9 + $0x38] sm:$0xff]  ;;  %vm3973_vm2 = vcmask (%p6181_p12), 1042434  }
 0x176   : >> { %v2698_v47 = vmul.f32 %v4876_v36, %v2682_v8  ;;  %v2685_v5 = vld [vmem:[%s6092_s9 + $0x50] sm:$0xff]  ;;  %vm3976_vm3 = vcmask (%p6181_p12), 1043459   ;;  %vm3979_vm4 = vcmask (%p6181_p12), 1044484   ;;  %vm3982_vm5 = vcmask (%p6181_p12), 1045509  }
 0x177   : >> { %v2708_v49 = vld [vmem:[%s6095_s26] sm:$0xff]  ;;  %v2709_v61 = vld [vmem:[%s6095_s26 + $0x8] sm:$0xff]  ;;  %v2710_v30 = vld [vmem:[%s6095_s26 + $0x10] sm:$0xff]  ;;  %v2701_v25 = vmul.f32 %v4864_v40, %v2685_v5  ;;  %vm3985_vm6 = vcmask (%p6181_p12), 1046534   ;;  %vm3988_vm7 = vcmask (%p6181_p12), 1047559  }
 0x178   : >> { %v2711_v21 = vld [vmem:[%s6095_s26 + $0x18] sm:$0xff]  ;;  %v6105_v13 = vadd.f32 %v2708_v49, %v2691_v52   ;;  %v6107_v28 = vadd.f32 %v2709_v61, %v2692_v37   ;;  %v2712_v56 = vld [vmem:[%s6095_s26 + $0x20] sm:$0xff]  ;;  %v2713_v10 = vld [vmem:[%s6095_s26 + $0x28] sm:$0xff]  ;;  %v6112_v55 = vadd.f32 %v2710_v30, %v2693_v3   ;;  %v2697_v49 = vmul.f32 %v4880_v57, %v2681_v46  ;;  %2866 = vbcast.lane.b32.xlu1 (%p6181_p12), %v5036_v17, 344 }
 0x179   : >> { %v2714_v48 = vld [vmem:[%s6095_s26 + $0x30] sm:$0xff]  ;;  %v6123_v23 = vadd.f32 %v2711_v21, %v2694_v43   ;;  %v6125_v51 = vadd.f32 %v2712_v56, %v2695_v12   ;;  %v2715_v16 = vld [vmem:[%s6095_s26 + $0x38] sm:$0xff]  ;;  %v2683_v52 = vld [vmem:[%s6092_s9 + $0x40] sm:$0xff]  ;;  %v2729_v61 = vadd.f32 %v2713_v10, %v2696_v27   ;;  %2858 = vbcast.lane.b32.xlu0 (%p6181_p12), %v5040_v18, 344 }
 0x17a   : >> { %2740 = vst.msk [vmem:[%s6095_s26] sm:$0xff] %vm1240_vm0, %v6105_v13  ;;  %2741 = vst.msk [vmem:[%s6095_s26 + $0x8] sm:$0xff] %vm1240_vm0, %v6107_v28  ;;  %v2716_v37 = vld [vmem:[%s6095_s26 + $0x40] sm:$0xff]  ;;  %v2699_v41 = vmul.f32 %v4872_v35, %v2683_v52  ;;  %v2684_v30 = vld [vmem:[%s6092_s9 + $0x48] sm:$0xff]  ;;  %v2730_v57 = vadd.f32 %v2714_v48, %v2697_v49   ;;  %v2731_v36 = vadd.f32 %v2715_v16, %v2698_v47  }
 0x17b   : >> { %2742 = vst.msk [vmem:[%s6095_s26 + $0x10] sm:$0xff] %vm1240_vm0, %v6112_v55  ;;  %v2717_v3 = vld [vmem:[%s6095_s26 + $0x48] sm:$0xff]  ;;  %2743 = vst.msk [vmem:[%s6095_s26 + $0x18] sm:$0xff] %vm1240_vm0, %v6123_v23  ;;  %v2700_v21 = vmul.f32 %v4868_v19, %v2684_v30  ;;  %v2718_v35 = vld [vmem:[%s6095_s26 + $0x50] sm:$0xff] }
 0x17c   : >> { %2744 = vst.msk [vmem:[%s6095_s26 + $0x20] sm:$0xff] %vm1240_vm0, %v6125_v51  ;;  %v2686_v43 = vld [vmem:[%s6092_s9 + $0x58] sm:$0xff]  ;;  %2745 = vst.msk [vmem:[%s6095_s26 + $0x28] sm:$0xff] %vm1240_vm0, %v2729_v61  ;;  %v2732_v56 = vadd.f32 %v2716_v37, %v2699_v41   ;;  %v2687_v10 = vld [vmem:[%s6092_s9 + $0x60] sm:$0xff]  ;;  %v2734_v40 = vadd.f32 %v2718_v35, %v2701_v25   ;;  %2874 = vbcast.lane.b32.xlu1 (%p6181_p12), %v5057_v22, 344 }
 0x17d   : >> { %v2719_v12 = vld [vmem:[%s6095_s26 + $0x58] sm:$0xff]  ;;  %v2702_v29 = vmul.f32 %v4860_v44, %v2686_v43  ;;  %v2720_v27 = vld [vmem:[%s6095_s26 + $0x60] sm:$0xff]  ;;  %v2688_v46 = vld [vmem:[%s6092_s9 + $0x68] sm:$0xff]  ;;  %2746 = vst.msk [vmem:[%s6095_s26 + $0x30] sm:$0xff] %vm1240_vm0, %v2730_v57  ;;  %v2733_v19 = vadd.f32 %v2717_v3, %v2700_v21   ;;  %v2703_v48 = vmul.f32 %v4856_v15, %v2687_v10  ;;  %2870 = vbcast.lane.b32.xlu0 (%p6181_p12), %v5057_v22, 336 }
 0x17e   : >> { %2747 = vst.msk [vmem:[%s6095_s26 + $0x38] sm:$0xff] %vm1240_vm0, %v2731_v36  ;;  %v2704_v8 = vmul.f32 %v4852_v31, %v2688_v46  ;;  %v2721_v44 = vld [vmem:[%s6095_s26 + $0x68] sm:$0xff]  ;;  %v2689_v49 = vld [vmem:[%s6092_s9 + $0x70] sm:$0xff]  ;;  %2748 = vst.msk [vmem:[%s6095_s26 + $0x40] sm:$0xff] %vm1240_vm0, %v2732_v56  ;;  %v6733_v35 = vmov %v2732_v56 }
 0x17f   : >> { %v2722_v47 = vld [vmem:[%s6095_s26 + $0x70] sm:$0xff]  ;;  %v2735_v16 = vadd.f32 %v2719_v12, %v2702_v29   ;;  %v2705_v52 = vmul.f32 %v4848_v6, %v2689_v49  ;;  %v2690_v37 = vld [vmem:[%s6092_s9 + $0x78] sm:$0xff]  ;;  %2749 = vst.msk [vmem:[%s6095_s26 + $0x48] sm:$0xff] %vm1240_vm0, %v2733_v19  ;;  %2750 = vst.msk [vmem:[%s6095_s26 + $0x50] sm:$0xff] %vm1240_vm0, %v2734_v40  ;;  %v2736_v15 = vadd.f32 %v2720_v27, %v2703_v48  }
 0x180   : >> { %v2723_v41 = vld [vmem:[%s6095_s26 + $0x78] sm:$0xff]  ;;  %v2737_v31 = vadd.f32 %v2721_v44, %v2704_v8   ;;  %v2706_v30 = vmul.f32 %v4844_v20, %v2690_v37  ;;  %2655 = sbr.rel (!%p6181_p12) target bundleno = 369 (0x171), region = 202  ;;  %2882 = vbcast.lane.b32.xlu1 (%p6181_p12), %v5097_v34, 344  ;;  %v6735_v17 = vld [vmem:[#allocation12_spill] sm:$0xff] (%p6181_p12)  ;;  %v6736_v18 = vld [vmem:[#allocation13_spill] sm:$0xff] (%p6181_p12) }
 0x181   : >> { %2751 = vst.msk [vmem:[%s6095_s26 + $0x58] sm:$0xff] %vm1240_vm0, %v2735_v16  ;;  %v2738_v6 = vadd.f32 %v2722_v47, %v2705_v52   ;;  %2752 = vst.msk [vmem:[%s6095_s26 + $0x60] sm:$0xff] %vm1240_vm0, %v2736_v15  ;;  %v6732_v44 = vmov %v2735_v16  ;;  %v6734_v47 = vmov %v2729_v61  ;;  %2878 = vbcast.lane.b32.xlu0 (%p6181_p12), %v5097_v34, 336  ;;  %v6737_v22 = vld [vmem:[#allocation14_spill] sm:$0xff] (%p6181_p12)  ;;  %v6738_v34 = vld [vmem:[#allocation15_spill] sm:$0xff] (%p6181_p12) }
 0x182   : >> { %2753 = vst.msk [vmem:[%s6095_s26 + $0x68] sm:$0xff] %vm1240_vm0, %v2737_v31  ;;  %v2739_v20 = vadd.f32 %v2723_v41, %v2706_v30   ;;  %v6746_v25 = vld [vmem:[#allocation8_spill] sm:$0xff] (%p6181_p12)  ;;  %v6747_v49 = vld [vmem:[#allocation26_spill] sm:$0xff] (%p6181_p12)  ;;  %v6303_v30 = vld [vmem:[%s6650_s3] ss:$0 sm:$0xff] (%p6181_p12) }
 0x183   : >> { %2754 = vst.msk [vmem:[%s6095_s26 + $0x70] sm:$0xff] %vm1240_vm0, %v2738_v6 }
 0x184   : >> { %2755 = vst.msk [vmem:[%s6095_s26 + $0x78] sm:$0xff] %vm1240_vm0, %v2739_v20  ;;  %2890 = vbcast.lane.b32.xlu1 (%p6181_p12), %v5108_v38, 344 }
 0x185   : > { %2886 = vbcast.lane.b32.xlu0 %v5108_v38, 336  ;;  %v6739_v38 = vld [vmem:[#allocation16_spill] sm:$0xff]  ;;  %s4302_s14 = smul.u32 (%p4988_p6), 48, %s4828_s18 }
 0x187   : > { %s4080_s24 = sadd.s32 (%p4988_p6), %s4824_s17, %s4302_s14 }
 0x188   : > { %2898 = vbcast.lane.b32.xlu1 %v5121_v42, 344  ;;  %s4294_s25 = sshll.u32 (%p4988_p6), %s4080_s24, 3 }
 0x189   : > { %2894 = vbcast.lane.b32.xlu0 %v5121_v42, 336  ;;  %v6740_v42 = vld [vmem:[#allocation17_spill] sm:$0xff]  ;;  %s4082_s29 = scalar_lea.vmem (%p4988_p6), %s6651_s4, %s4294_s25 }
 0x18b   : > { %v2759_v20 = vld [vmem:[#allocation3 + $0x18] sm:$0xff]  ;;  %v2757_v6 = vld [vmem:[#allocation3 + $0x8] sm:$0xff]  ;;  %v2762_v35 = vld [vmem:[#allocation3 + $0x30] sm:$0xff] }
 0x18c   : > { %2906 = vbcast.lane.b32.xlu1 %v5130_v45, 344  ;;  %v2765_v47 = vld [vmem:[#allocation3 + $0x48] sm:$0xff]  ;;  %v2764_v16 = vld [vmem:[#allocation3 + $0x40] sm:$0xff] }
 0x18d   : > { %2902 = vbcast.lane.b32.xlu0 %v5130_v45, 336  ;;  %v6741_v45 = vld [vmem:[#allocation18_spill] sm:$0xff] }
 0x190   : > { %2914 = vbcast.lane.b32.xlu1 %v5143_v50, 344 }
 0x191   : > { %2910 = vbcast.lane.b32.xlu0 %v5143_v50, 336  ;;  %v6742_v50 = vld [vmem:[#allocation19_spill] sm:$0xff] }
 0x194   : > { %2922 = vbcast.lane.b32.xlu1 %v5149_v53, 344 }
 0x195   : > { %2918 = vbcast.lane.b32.xlu0 %v5149_v53, 336  ;;  %v6743_v53 = vld [vmem:[#allocation20_spill] sm:$0xff] }
 0x198   : > { %2930 = vbcast.lane.b32.xlu1 %v6735_v17, 344 }
 0x199   : > { %2926 = vbcast.lane.b32.xlu0 %v6735_v17, 336 }
 0x19c   : > { %2938 = vbcast.lane.b32.xlu1 %v6736_v18, 344 }
 0x19d   : > { %2934 = vbcast.lane.b32.xlu0 %v6736_v18, 336 }
 0x1a0   : > { %2946 = vbcast.lane.b32.xlu1 %v6737_v22, 344 }
 0x1a1   : > { %2942 = vbcast.lane.b32.xlu0 %v6737_v22, 336 }
 0x1a4   : > { %2954 = vbcast.lane.b32.xlu1 %v6738_v34, 344 }
 0x1a5   : > { %2950 = vbcast.lane.b32.xlu0 %v6738_v34, 336 }
 0x1a8   : > { %2962 = vbcast.lane.b32.xlu1 %v6739_v38, 344 }
 0x1a9   : > { %2958 = vbcast.lane.b32.xlu0 %v6739_v38, 336 }
 0x1ac   : > { %2970 = vbcast.lane.b32.xlu1 %v6740_v42, 344 }
 0x1ad   : > { %2966 = vbcast.lane.b32.xlu0 %v6740_v42, 336 }
 0x1b0   : > { %2978 = vbcast.lane.b32.xlu1 %v5241_v11, 344 }
 0x1b1   : > { %2974 = vbcast.lane.b32.xlu0 %v5241_v11, 336  ;;  %v6744_v11 = vld [vmem:[#allocation22_spill] sm:$0xff] }
 0x1b4   : > { %2986 = vbcast.lane.b32.xlu1 %v5260_v63, 344 }
 0x1b5   : > { %2982 = vbcast.lane.b32.xlu0 %v5260_v63, 336  ;;  %v6745_v63 = vld [vmem:[#allocation7_spill] sm:$0xff] }
 0x1b8   : > { %2994 = vbcast.lane.b32.xlu1 %v5265_v4, 344 }
 0x1b9   : > { %2990 = vbcast.lane.b32.xlu0 %v5265_v4, 336 }
 0x1bc   : > { %3002 = vbcast.lane.b32.xlu1 %v6741_v45, 344 }
 0x1bd   : > { %2998 = vbcast.lane.b32.xlu0 %v6741_v45, 336 }
 0x1c0   : > { %3010 = vbcast.lane.b32.xlu1 %v6742_v50, 344 }
 0x1c1   : > { %3006 = vbcast.lane.b32.xlu0 %v6742_v50, 336 }
 0x1c4   : > { %3018 = vbcast.lane.b32.xlu1 %v6743_v53, 344 }
 0x1c5   : > { %3014 = vbcast.lane.b32.xlu0 %v6743_v53, 336 }
 0x1c8   : > { %3026 = vbcast.lane.b32.xlu1 %v5330_v58, 344 }
 0x1c9   : > { %3022 = vbcast.lane.b32.xlu0 %v5330_v58, 336  ;;  %v2758_v58 = vld [vmem:[#allocation3 + $0x10] sm:$0xff] }
 0x1cc   : > { %3034 = vbcast.lane.b32.xlu1 %v5337_v62, 344 }
 0x1cd   : > { %3030 = vbcast.lane.b32.xlu0 %v5337_v62, 336 }
 0x1d0   : > { %3042 = vbcast.lane.b32.xlu1 %v5367_v0, 344 }
 0x1d1   : > { %3038 = vbcast.lane.b32.xlu0 %v5367_v0, 336  ;;  %v2756_v0 = vld [vmem:[#allocation3] sm:$0xff] }
 0x1d4   : > { %3050 = vbcast.lane.b32.xlu1 %v6744_v11, 344 }
 0x1d5   : > { %3046 = vbcast.lane.b32.xlu0 %v6744_v11, 336  ;;  %v6748_v11 = vld [vmem:[#allocation10_spill] sm:$0xff] }
 0x1d8   : > { %3058 = vbcast.lane.b32.xlu1 %v6745_v63, 344 }
 0x1d9   : > { %3054 = vbcast.lane.b32.xlu0 %v6745_v63, 336  ;;  %v2767_v63 = vld [vmem:[#allocation3 + $0x58] sm:$0xff] }
 0x1dc   : > { %3118 = vbcast.lane.b32.xlu1 %v5087_v32, 336 }
 0x1dd   : > { %3062 = vbcast.lane.b32.xlu0 %v5069_v26, 336 }
 0x1e0   : > { %3182 = vbcast.lane.b32.xlu1 %v5162_v60, 336 }
 0x1e1   : > { %3122 = vbcast.lane.b32.xlu0 %v5087_v32, 344 }
 0x1e4   : > { %3066 = vbcast.lane.b32.xlu1 %v5069_v26, 344  ;;  %v2761_v26 = vld [vmem:[#allocation3 + $0x28] sm:$0xff] }
 0x1e5   : > { %3186 = vbcast.lane.b32.xlu0 %v5162_v60, 344  ;;  %v2760_v60 = vld [vmem:[#allocation3 + $0x20] sm:$0xff] }
 0x1e6   : > { %v2863_v4 = vpop.permute.xlu1 %2862  ;;  %v2855_v62 = vpop.permute.xlu0 %2854 }
 0x1e7   : > { %v3238_v31 = vmul.f32 %v2863_v4, %v2758_v58  ;;  %v3236_v19 = vmul.f32 %v2855_v62, %v2756_v0  ;;  %v2766_v4 = vld [vmem:[#allocation3 + $0x50] sm:$0xff] }
 0x1e8   : > { %3130 = vbcast.lane.b32.xlu1 %v5091_v33, 344  ;;  %v6749_v58 = vld [vmem:[#allocation21_spill] sm:$0xff] }
 0x1e9   : > { %3126 = vbcast.lane.b32.xlu0 %v5091_v33, 336  ;;  %v3341_v57 = vsel %vm1240_vm0, %v3238_v31, 0.0  ;;  %v3332_v13 = vsel %vm1240_vm0, %v3236_v19, 0.0  ;;  %v6309_v62 = vmul.f32 %v6303_v30, %v6749_v58 }
 0x1ea   : > { %v2867_v15 = vpop.permute.xlu1 %2866 }
 0x1eb   : > { %v2859_v40 = vpop.permute.xlu0 %2858  ;;  %v3239_v36 = vmul.f32 %v2867_v15, %v2759_v20 }
 0x1ec   : > { %v3237_v32 = vmul.f32 %v2859_v40, %v2757_v6  ;;  %3194 = vbcast.lane.b32.xlu1 %v5173_v1, 344 }
 0x1ed   : > { %3190 = vbcast.lane.b32.xlu0 %v5173_v1, 336  ;;  %v3342_v51 = vsel %vm1240_vm0, %v3239_v36, 0.0  ;;  %v2763_v1 = vld [vmem:[#allocation3 + $0x38] sm:$0xff] }
 0x1ee   : > { %v3333_v33 = vsel %vm1240_vm0, %v3237_v32, 0.0  ;;  %v3343_v23 = vadd.f32 %v3342_v51, %v3341_v57  ;;  %v2875_v55 = vpop.permute.xlu1 %2874  ;;  %v2769_v51 = vld [vmem:[#allocation3 + $0x68] sm:$0xff] }
 0x1ef   : > { %v2871_v28 = vpop.permute.xlu0 %2870  ;;  %v3241_v61 = vmul.f32 %v2875_v55, %v2761_v26  ;;  %v3334_v21 = vadd.f32 %v3333_v33, %v3332_v13  ;;  %v2768_v33 = vld [vmem:[#allocation3 + $0x60] sm:$0xff] }
 0x1f0   : > { %v3240_v3 = vmul.f32 %v2871_v28, %v2760_v60  ;;  %v3344_v5 = vrot.slane %v3343_v23, 4  ;;  %3074 = vbcast.lane.b32.xlu1 %v6746_v25, 344 }
 0x1f1   : > { %3070 = vbcast.lane.b32.xlu0 %v6746_v25, 336  ;;  %v3351_v43 = vsel %vm1240_vm0, %v3241_v61, 0.0  ;;  %v3335_v8 = vrot.slane %v3334_v21, 4 }
 0x1f2   : > { %v3350_v12 = vsel %vm1240_vm0, %v3240_v3, 0.0  ;;  %v3345_v56 = vadd.f32 %v3344_v5, %v3343_v23  ;;  %v2883_v10 = vpop.permute.xlu1 %2882  ;;  %v3783_v23 = vrot.slane %v6309_v62, 1  ;;  %v3784_v3 = vrot.slane %v6309_v62, 2 }
 0x1f3   : > { %v3352_v29 = vadd.f32 %v3351_v43, %v3350_v12  ;;  %v2879_v27 = vpop.permute.xlu0 %2878  ;;  %v3243_v46 = vmul.f32 %v2883_v10, %v2763_v1  ;;  %v3336_v45 = vadd.f32 %v3335_v8, %v3334_v21 }
 0x1f4   : > { %v3242_v48 = vmul.f32 %v2879_v27, %v2762_v35  ;;  %3114 = vbcast.lane.b32.xlu1 %v6747_v49, 344  ;;  %v3346_v41 = vrot.slane %v3345_v56, 2  ;;  %v2771_v27 = vld [vmem:[#allocation3 + $0x78] sm:$0xff] }
 0x1f5   : > { %v3353_v44 = vrot.slane %v3352_v29, 4  ;;  %3110 = vbcast.lane.b32.xlu0 %v6747_v49, 336  ;;  %v3360_v52 = vsel %vm1240_vm0, %v3243_v46, 0.0  ;;  %v3337_v60 = vrot.slane %v3336_v45, 2  ;;  %v2770_v46 = vld [vmem:[#allocation3 + $0x70] sm:$0xff] }
 0x1f6   : > { %v3359_v37 = vsel %vm1240_vm0, %v3242_v48, 0.0  ;;  %v2891_v22 = vpop.permute.xlu1 %2890  ;;  %v3347_v6 = vadd.f32 %v3346_v41, %v3345_v56 }
 0x1f7   : > { %v3354_v17 = vadd.f32 %v3353_v44, %v3352_v29  ;;  %v3361_v18 = vadd.f32 %v3360_v52, %v3359_v37  ;;  %v2887_v34 = vpop.permute.xlu0 %2886  ;;  %v3245_v38 = vmul.f32 %v2891_v22, %v2765_v47  ;;  %v3338_v56 = vadd.f32 %v3337_v60, %v3336_v45 }
 0x1f8   : > { %v3244_v42 = vmul.f32 %v2887_v34, %v2764_v16  ;;  %3138 = vbcast.lane.b32.xlu1 %v6748_v11, 344  ;;  %v3348_v61 = vrot.slane %v3347_v6, 1  ;;  %v3785_v29 = vrot.slane %v6309_v62, 3  ;;  %v3786_v16 = vrot.slane %v6309_v62, 4 }
 0x1f9   : > { %v3355_v50 = vrot.slane %v3354_v17, 2  ;;  %v3362_v53 = vrot.slane %v3361_v18, 4  ;;  %3134 = vbcast.lane.b32.xlu0 %v6748_v11, 336  ;;  %v3369_v0 = vsel %vm1240_vm0, %v3245_v38, 0.0  ;;  %v2772_v11 = vld [vmem:[#allocation3 + $0x80] sm:$0xff] }
 0x1fa   : > { %v3368_v20 = vsel %vm1240_vm0, %v3244_v42, 0.0  ;;  %v2899_v15 = vpop.permute.xlu1 %2898  ;;  %v3349_v47 = vadd.f32 %v3348_v61, %v3347_v6  ;;  %v3339_v42 = vrot.slane %v3338_v56, 1  ;;  %v3787_v6 = vrot.slane %v6309_v62, 5  ;;  %v2774_v61 = vld [vmem:[#allocation3 + $0x90] sm:$0xff] }
 0x1fb   : > { %v3363_v31 = vadd.f32 %v3362_v53, %v3361_v18  ;;  %v2895_v40 = vpop.permute.xlu0 %2894  ;;  %v3356_v19 = vadd.f32 %v3355_v50, %v3354_v17  ;;  %v3370_v36 = vadd.f32 %v3369_v0, %v3368_v20  ;;  %v3247_v32 = vmul.f32 %v2899_v15, %v2767_v63  ;;  %v6750_v53 = vld [vmem:[#allocation9_spill] sm:$0xff] }
 0x1fc   : > { %v3246_v26 = vmul.f32 %v2895_v40, %v2766_v4  ;;  %3178 = vbcast.lane.b32.xlu1 %v5566_v59, 344 }
 0x1fd   : > { %v3364_v57 = vrot.slane %v3363_v31, 2  ;;  %3174 = vbcast.lane.b32.xlu0 %v5566_v59, 336  ;;  %v3371_v55 = vrot.slane %v3370_v36, 4  ;;  %v3378_v28 = vsel %vm1240_vm0, %v3247_v32, 0.0  ;;  %v3357_v35 = vrot.slane %v3356_v19, 1 }
 0x1fe   : > { %v3377_v13 = vsel %vm1240_vm0, %v3246_v26, 0.0  ;;  %v2907_v25 = vpop.permute.xlu1 %2906 }
 0x1ff   : > { %v3365_v5 = vadd.f32 %v3364_v57, %v3363_v31  ;;  %v3379_v21 = vadd.f32 %v3378_v28, %v3377_v13  ;;  %v2903_v1 = vpop.permute.xlu0 %2902  ;;  %v3372_v43 = vadd.f32 %v3371_v55, %v3370_v36  ;;  %v3249_v12 = vmul.f32 %v2907_v25, %v2769_v51  ;;  %v2775_v57 = vld [vmem:[#allocation3 + $0x98] sm:$0xff]  ;;  %v6751_v13 = vld [vmem:[#allocation11_spill] sm:$0xff] }
 0x200   : > { %v3248_v59 = vmul.f32 %v2903_v1, %v2768_v33  ;;  %3202 = vbcast.lane.b32.xlu1 %v5188_v7, 344  ;;  %v3358_v18 = vadd.f32 %v3357_v35, %v3356_v19  ;;  %v3874_v36 = vadd.f32 %v3783_v23, %v3349_v47  ;;  %v3788_v25 = vrot.slane %v6309_v62, 6  ;;  %v2776_v47 = vld [vmem:[#allocation3 + $0xa0] sm:$0xff] }
 0x201   : > { %v3380_v10 = vrot.slane %v3379_v21, 4  ;;  %3198 = vbcast.lane.b32.xlu0 %v5188_v7, 336  ;;  %v3366_v48 = vrot.slane %v3365_v5, 1  ;;  %v3373_v8 = vrot.slane %v3372_v43, 2  ;;  %v3387_v44 = vsel %vm1240_vm0, %v3249_v12, 0.0  ;;  %v2773_v7 = vld [vmem:[#allocation3 + $0x88] sm:$0xff] }
 0x202   : > { %v3386_v49 = vsel %vm1240_vm0, %v3248_v59, 0.0  ;;  %v2915_v41 = vpop.permute.xlu1 %2914  ;;  %v3875_v32 = vadd.f32 %v3784_v3, %v3358_v18 }
 0x203   : > { %v3381_v52 = vadd.f32 %v3380_v10, %v3379_v21  ;;  %v3388_v37 = vadd.f32 %v3387_v44, %v3386_v49  ;;  %v2911_v17 = vpop.permute.xlu0 %2910  ;;  %v3374_v22 = vadd.f32 %v3373_v8, %v3372_v43  ;;  %v3251_v34 = vmul.f32 %v2915_v41, %v2771_v27 }
 0x204   : > { %v3250_v38 = vmul.f32 %v2911_v17, %v2770_v46  ;;  %3082 = vbcast.lane.b32.xlu1 %v6750_v53, 344  ;;  %v3367_v63 = vadd.f32 %v3366_v48, %v3365_v5  ;;  %v3340_v5 = vadd.f32 %v3339_v42, %v3338_v56  ;;  %v3969_v10 = vrot.slane %v3874_v36, 7  ;;  %v2777_v56 = vld [vmem:[#allocation3 + $0xa8] sm:$0xff] }
 0x205   : > { %v3382_v45 = vrot.slane %v3381_v52, 2  ;;  %v3389_v50 = vrot.slane %v3388_v37, 4  ;;  %3078 = vbcast.lane.b32.xlu0 %v6750_v53, 336  ;;  %v3375_v4 = vrot.slane %v3374_v22, 1  ;;  %v3396_v58 = vsel %vm1240_vm0, %v3251_v34, 0.0 }
 0x206   : > { %v3395_v0 = vsel %vm1240_vm0, %v3250_v38, 0.0  ;;  %v2923_v40 = vpop.permute.xlu1 %2922  ;;  %v3876_v21 = vadd.f32 %v3785_v29, %v3367_v63  ;;  %v3789_v27 = vrot.slane %v6309_v62, 7  ;;  %v3972_v29 = vrot.slane %v3875_v32, 6 }
 0x207   : > { %v3383_v20 = vadd.f32 %v3382_v45, %v3381_v52  ;;  %v3390_v31 = vadd.f32 %v3389_v50, %v3388_v37  ;;  %v3397_v15 = vadd.f32 %v3396_v58, %v3395_v0  ;;  %v2919_v19 = vpop.permute.xlu0 %2918  ;;  %v3253_v26 = vmul.f32 %v2923_v40, %v2773_v7  ;;  %v2779_v58 = vld [vmem:[#allocation3 + $0xb8] sm:$0xff]  ;;  %v2778_v0 = vld [vmem:[#allocation3 + $0xb0] sm:$0xff] }
 0x208   : > { %v3252_v60 = vmul.f32 %v2919_v19, %v2772_v11  ;;  %v3376_v51 = vadd.f32 %v3375_v4, %v3374_v22  ;;  %3146 = vbcast.lane.b32.xlu1 %v6751_v13, 344  ;;  %v3873_v52 = vadd.f32 %v6309_v62, %v3340_v5  ;;  %v3975_v18 = vrot.slane %v3876_v21, 5  ;;  %v6752_v4 = vld [vmem:[#allocation23_spill] sm:$0xff]  ;;  %v6753_v5 = vld [vmem:[#allocation28_spill] sm:$0xff] }
 0x209   : > { %v3384_v33 = vrot.slane %v3383_v20, 1  ;;  %v3391_v55 = vrot.slane %v3390_v31, 2  ;;  %v3398_v28 = vrot.slane %v3397_v15, 4  ;;  %3142 = vbcast.lane.b32.xlu0 %v6751_v13, 336  ;;  %v3405_v23 = vsel %vm1240_vm0, %v3253_v26, 0.0  ;;  %v2781_v21 = vld [vmem:[#allocation3 + $0xc8] sm:$0xff] }
 0x20a   : > { %v3404_v43 = vsel %vm1240_vm0, %v3252_v60, 0.0  ;;  %v2931_v12 = vpop.permute.xlu1 %2930  ;;  %v3877_v8 = vadd.f32 %v3786_v16, %v3376_v51  ;;  %v3971_v42 = vsel %vm3970_vm1, %v3969_v10, %v3873_v52  ;;  %v2782_v52 = vld [vmem:[#allocation3 + $0xd0] sm:$0xff] }
 0x20b   : > { %v3385_v3 = vadd.f32 %v3384_v33, %v3383_v20  ;;  %v3392_v1 = vadd.f32 %v3391_v55, %v3390_v31  ;;  %v3399_v35 = vadd.f32 %v3398_v28, %v3397_v15  ;;  %v2927_v59 = vpop.permute.xlu0 %2926  ;;  %v3255_v46 = vmul.f32 %v2931_v12, %v2775_v57 }
 0x20c   : > { %v3254_v48 = vmul.f32 %v2927_v59, %v2774_v61  ;;  %3210 = vbcast.lane.b32.xlu1 %v5204_v14, 344  ;;  %v3406_v37 = vadd.f32 %v3405_v23, %v3404_v43  ;;  %v3978_v11 = vrot.slane %v3877_v8, 4 }
 0x20d   : > { %v3393_v44 = vrot.slane %v3392_v1, 1  ;;  %v3400_v49 = vrot.slane %v3399_v35, 2  ;;  %3206 = vbcast.lane.b32.xlu0 %v5204_v14, 336  ;;  %v3414_v41 = vsel %vm1240_vm0, %v3255_v46, 0.0  ;;  %v3878_v22 = vadd.f32 %v3787_v6, %v3385_v3 }
 0x20e   : > { %v3413_v17 = vsel %vm1240_vm0, %v3254_v48, 0.0  ;;  %v2939_v16 = vpop.permute.xlu1 %2938  ;;  %v3974_v14 = vsel %vm3973_vm2, %v3972_v29, %v3971_v42  ;;  %v3407_v20 = vrot.slane %v3406_v37, 4 }
 0x20f   : > { %v3394_v34 = vadd.f32 %v3393_v44, %v3392_v1  ;;  %v3401_v38 = vadd.f32 %v3400_v49, %v3399_v35  ;;  %v2935_v7 = vpop.permute.xlu0 %2934  ;;  %v3415_v45 = vadd.f32 %v3414_v41, %v3413_v17  ;;  %v3257_v50 = vmul.f32 %v2939_v16, %v2777_v56 }
 0x210   : > { %v3256_v53 = vmul.f32 %v2935_v7, %v2776_v47  ;;  %3090 = vbcast.lane.b32.xlu1 %v6752_v4, 344  ;;  %v3977_v40 = vsel %vm3976_vm3, %v3975_v18, %v3974_v14  ;;  %v3981_v19 = vrot.slane %v3878_v22, 3  ;;  %v3408_v23 = vadd.f32 %v3407_v20, %v3406_v37  ;;  %v2783_v47 = vld [vmem:[#allocation3 + $0xd8] sm:$0xff]  ;;  %v2785_v14 = vld [vmem:[#allocation3 + $0xe8] sm:$0xff] }
 0x211   : > { %v3879_v62 = vadd.f32 %v3788_v25, %v3394_v34  ;;  %v3402_v63 = vrot.slane %v3401_v38, 1  ;;  %3086 = vbcast.lane.b32.xlu0 %v6752_v4, 336  ;;  %v3416_v6 = vrot.slane %v3415_v45, 4  ;;  %v3423_v31 = vsel %vm1240_vm0, %v3257_v50, 0.0  ;;  %v2780_v25 = vld [vmem:[#allocation3 + $0xc0] sm:$0xff] }
 0x212   : > { %v3422_v15 = vsel %vm1240_vm0, %v3256_v53, 0.0  ;;  %v2947_v26 = vpop.permute.xlu1 %2946  ;;  %v3980_v28 = vsel %vm3979_vm4, %v3978_v11, %v3977_v40  ;;  %v3409_v17 = vrot.slane %v3408_v23, 2  ;;  %v2784_v11 = vld [vmem:[#allocation3 + $0xe0] sm:$0xff] }
 0x213   : > { %v3403_v36 = vadd.f32 %v3402_v63, %v3401_v38  ;;  %v3424_v32 = vadd.f32 %v3423_v31, %v3422_v15  ;;  %v2943_v60 = vpop.permute.xlu0 %2942  ;;  %v3984_v57 = vrot.slane %v3879_v62, 2  ;;  %v3417_v51 = vadd.f32 %v3416_v6, %v3415_v45  ;;  %v6755_v62 = vld [vmem:[#allocation27_spill] sm:$0xff] }
 0x214   : > { %v3259_v33 = vmul.f32 %v2947_v26, %v2779_v58  ;;  %v3258_v55 = vmul.f32 %v2943_v60, %v2778_v0  ;;  %3154 = vbcast.lane.b32.xlu1 %v6753_v5, 344  ;;  %v3983_v43 = vsel %vm3982_vm5, %v3981_v19, %v3980_v28  ;;  %v6366_v63 = vmul.f32 %v6303_v30, %v6755_v62  ;;  %v2786_v28 = vld [vmem:[#allocation3 + $0xf0] sm:$0xff] }
 0x215   : > { %v3880_v13 = vadd.f32 %v3789_v27, %v3403_v36  ;;  %v3425_v61 = vrot.slane %v3424_v32, 4  ;;  %3150 = vbcast.lane.b32.xlu0 %v6753_v5, 336  ;;  %v3418_v3 = vrot.slane %v3417_v51, 2  ;;  %v3986_v48 = vsel %vm3985_vm6, %v3984_v57, %v3983_v43 }
 0x216   : > { %v3432_v1 = vsel %vm1240_vm0, %v3259_v33, 0.0  ;;  %v3431_v35 = vsel %vm1240_vm0, %v3258_v55, 0.0  ;;  %v2955_v27 = vpop.permute.xlu1 %2954  ;;  %v3410_v0 = vadd.f32 %v3409_v17, %v3408_v23  ;;  %v3790_v36 = vrot.slane %v6366_v63, 1  ;;  %v6756_v33 = vld [vmem:[#allocation29_spill] sm:$0xff]  ;;  %v2787_v55 = vld [vmem:[#allocation3 + $0xf8] sm:$0xff]  ;;  %v2789_v17 = vld [vmem:[#allocation3 + $0x108] sm:$0xff] }
 0x217   : > { %v3987_v12 = vrot.slane %v3880_v13, 1  ;;  %v3426_v59 = vadd.f32 %v3425_v61, %v3424_v32  ;;  %v3433_v10 = vadd.f32 %v3432_v1, %v3431_v35  ;;  %v2951_v46 = vpop.permute.xlu0 %2950  ;;  %v3419_v56 = vadd.f32 %v3418_v3, %v3417_v51 }
 0x218   : > { %v3261_v29 = vmul.f32 %v2955_v27, %v2781_v21  ;;  %v3260_v8 = vmul.f32 %v2951_v46, %v2780_v25  ;;  %3218 = vbcast.lane.b32.xlu1 %v5698_v2, 344  ;;  %v3411_v5 = vrot.slane %v3410_v0, 1  ;;  %v3795_v62 = vrot.slane %v6366_v63, 6 }
 0x219   : > { %v3989_v44 = vsel %vm3988_vm7, %v3987_v12, %v3986_v48  ;;  %v3434_v49 = vrot.slane %v3433_v10, 4  ;;  %3214 = vbcast.lane.b32.xlu0 %v5698_v2, 336  ;;  %v3427_v18 = vrot.slane %v3426_v59, 2  ;;  %v3420_v7 = vrot.slane %v3419_v56, 1  ;;  %v6754_v2 = vld [vmem:[#allocation24_spill] sm:$0xff] }
 0x21a   : > { %4066 = vst.msk [vmem:[%s6026_s6] sm:$0xff] %vm1240_vm0, %v3989_v44  ;;  %v3441_v37 = vsel %vm1240_vm0, %v3261_v29, 0.0  ;;  %v3440_v41 = vsel %vm1240_vm0, %v3260_v8, 0.0  ;;  %v2963_v38 = vpop.permute.xlu1 %2962 }
 0x21b   : > { %v3435_v22 = vadd.f32 %v3434_v49, %v3433_v10  ;;  %v3442_v34 = vadd.f32 %v3441_v37, %v3440_v41  ;;  %v2959_v16 = vpop.permute.xlu0 %2958  ;;  %v3263_v42 = vmul.f32 %v2963_v38, %v2783_v47  ;;  %v3428_v20 = vadd.f32 %v3427_v18, %v3426_v59 }
 0x21c   : > { %v3262_v45 = vmul.f32 %v2959_v16, %v2782_v52  ;;  %3098 = vbcast.lane.b32.xlu1 %v6754_v2, 344  ;;  %v3421_v19 = vadd.f32 %v3420_v7, %v3419_v56  ;;  %v3791_v10 = vrot.slane %v6366_v63, 2  ;;  %v3792_v56 = vrot.slane %v6366_v63, 3  ;;  %v2788_v16 = vld [vmem:[#allocation3 + $0x100] sm:$0xff] }
 0x21d   : > { %v3436_v50 = vrot.slane %v3435_v22, 2  ;;  %v3443_v53 = vrot.slane %v3442_v34, 4  ;;  %3094 = vbcast.lane.b32.xlu0 %v6754_v2, 336  ;;  %v3450_v4 = vsel %vm1240_vm0, %v3263_v42, 0.0  ;;  %v3429_v21 = vrot.slane %v3428_v20, 1  ;;  %v2791_v2 = vld [vmem:[#allocation3 + $0x118] sm:$0xff] }
 0x21e   : > { %v3449_v58 = vsel %vm1240_vm0, %v3262_v45, 0.0  ;;  %v2971_v15 = vpop.permute.xlu1 %2970  ;;  %v3882_v35 = vadd.f32 %v3790_v36, %v3421_v19  ;;  %v3412_v49 = vadd.f32 %v3411_v5, %v3410_v0  ;;  %v3793_v47 = vrot.slane %v6366_v63, 4 }
 0x21f   : > { %v3444_v6 = vadd.f32 %v3443_v53, %v3442_v34  ;;  %v3451_v31 = vadd.f32 %v3450_v4, %v3449_v58  ;;  %v2967_v40 = vpop.permute.xlu0 %2966  ;;  %v3265_v32 = vmul.f32 %v2971_v15, %v2785_v14  ;;  %v3437_v60 = vadd.f32 %v3436_v50, %v3435_v22  ;;  %v6757_v53 = vld [vmem:[#allocation25_spill] sm:$0xff] }
 0x220   : > { %v3264_v26 = vmul.f32 %v2967_v40, %v2784_v11  ;;  %3162 = vbcast.lane.b32.xlu1 %v6756_v33, 344  ;;  %v3990_v22 = vrot.slane %v3882_v35, 7  ;;  %v3430_v34 = vadd.f32 %v3429_v21, %v3428_v20  ;;  %v3794_v38 = vrot.slane %v6366_v63, 5  ;;  %v2790_v14 = vld [vmem:[#allocation3 + $0x110] sm:$0xff] }
 0x221   : > { %v3445_v57 = vrot.slane %v3444_v6, 2  ;;  %v3452_v51 = vrot.slane %v3451_v31, 4  ;;  %3158 = vbcast.lane.b32.xlu0 %v6756_v33, 336  ;;  %v3459_v13 = vsel %vm1240_vm0, %v3265_v32, 0.0  ;;  %v3438_v27 = vrot.slane %v3437_v60, 1 }
 0x222   : > { %v3458_v61 = vsel %vm1240_vm0, %v3264_v26, 0.0  ;;  %v2979_v3 = vpop.permute.xlu1 %2978  ;;  %v3796_v4 = vrot.slane %v6366_v63, 7  ;;  %v3881_v0 = vadd.f32 %v6366_v63, %v3412_v49  ;;  %v3883_v19 = vadd.f32 %v3791_v10, %v3430_v34  ;;  %v2792_v63 = vld [vmem:[#allocation3 + $0x120] sm:$0xff] }
 0x223   : > { %v3446_v25 = vadd.f32 %v3445_v57, %v3444_v6  ;;  %v3453_v23 = vadd.f32 %v3452_v51, %v3451_v31  ;;  %v2975_v1 = vpop.permute.xlu0 %2974  ;;  %v3460_v43 = vadd.f32 %v3459_v13, %v3458_v61  ;;  %v3267_v12 = vmul.f32 %v2979_v3, %v2787_v55  ;;  %v6758_v55 = vld [vmem:[#allocation30_spill] sm:$0xff] }
 0x224   : > { %v3266_v59 = vmul.f32 %v2975_v1, %v2786_v28  ;;  %3226 = vbcast.lane.b32.xlu1 %v5706_v54, 344  ;;  %v3439_v7 = vadd.f32 %v3438_v27, %v3437_v60  ;;  %v3991_v60 = vsel %vm3970_vm1, %v3990_v22, %v3881_v0  ;;  %v2793_v28 = vld [vmem:[#allocation3 + $0x128] sm:$0xff] }
 0x225   : > { %v3447_v46 = vrot.slane %v3446_v25, 1  ;;  %v3454_v48 = vrot.slane %v3453_v23, 2  ;;  %3222 = vbcast.lane.b32.xlu0 %v5706_v54, 336  ;;  %v3461_v29 = vrot.slane %v3460_v43, 4  ;;  %v3468_v8 = vsel %vm1240_vm0, %v3267_v12, 0.0 }
 0x226   : > { %v3467_v44 = vsel %vm1240_vm0, %v3266_v59, 0.0  ;;  %v2987_v41 = vpop.permute.xlu1 %2986  ;;  %v3884_v57 = vadd.f32 %v3792_v56, %v3439_v7  ;;  %v3992_v12 = vrot.slane %v3883_v19, 6 }
 0x227   : > { %v3455_v52 = vadd.f32 %v3454_v48, %v3453_v23  ;;  %v3469_v37 = vadd.f32 %v3468_v8, %v3467_v44  ;;  %v2983_v18 = vpop.permute.xlu0 %2982  ;;  %v3462_v54 = vadd.f32 %v3461_v29, %v3460_v43  ;;  %v3448_v42 = vadd.f32 %v3447_v46, %v3446_v25  ;;  %v2795_v46 = vld [vmem:[#allocation3 + $0x138] sm:$0xff]  ;;  %v2794_v48 = vld [vmem:[#allocation3 + $0x130] sm:$0xff] }
 0x228   : > { %3106 = vbcast.lane.b32.xlu1 %v6757_v53, 344  ;;  %v3269_v58 = vmul.f32 %v2987_v41, %v2789_v17  ;;  %v3268_v31 = vmul.f32 %v2983_v18, %v2788_v16  ;;  %v3994_v56 = vrot.slane %v3884_v57, 5  ;;  %v2798_v57 = vld [vmem:[#allocation3 + $0x150] sm:$0xff] }
 0x229   : > { %v3456_v45 = vrot.slane %v3455_v52, 1  ;;  %v3470_v50 = vrot.slane %v3469_v37, 4  ;;  %3102 = vbcast.lane.b32.xlu0 %v6757_v53, 336  ;;  %v3463_v11 = vrot.slane %v3462_v54, 2  ;;  %v3885_v51 = vadd.f32 %v3793_v47, %v3448_v42  ;;  %v2797_v53 = vld [vmem:[#allocation3 + $0x148] sm:$0xff] }
 0x22a   : > { %v2995_v15 = vpop.permute.xlu1 %2994  ;;  %v3477_v61 = vsel %vm1240_vm0, %v3269_v58, 0.0  ;;  %v3476_v3 = vsel %vm1240_vm0, %v3268_v31, 0.0 }
 0x22b   : > { %v3457_v20 = vadd.f32 %v3456_v45, %v3455_v52  ;;  %v3471_v6 = vadd.f32 %v3470_v50, %v3469_v37  ;;  %v2991_v40 = vpop.permute.xlu0 %2990  ;;  %v3464_v36 = vadd.f32 %v3463_v11, %v3462_v54  ;;  %v3271_v32 = vmul.f32 %v2995_v15, %v2791_v2  ;;  %v2796_v2 = vld [vmem:[#allocation3 + $0x140] sm:$0xff] }
 0x22c   : > { %v3270_v26 = vmul.f32 %v2991_v40, %v2790_v14  ;;  %3170 = vbcast.lane.b32.xlu1 %v6758_v55, 344  ;;  %v3996_v29 = vrot.slane %v3885_v51, 4  ;;  %v3478_v47 = vadd.f32 %v3477_v61, %v3476_v3  ;;  %v3993_v54 = vsel %vm3973_vm2, %v3992_v12, %v3991_v60  ;;  %v2799_v60 = vld [vmem:[#allocation3 + $0x158] sm:$0xff] }
 0x22d   : > { %v3472_v33 = vrot.slane %v3471_v6, 2  ;;  %3166 = vbcast.lane.b32.xlu0 %v6758_v55, 336  ;;  %v3465_v13 = vrot.slane %v3464_v36, 1  ;;  %v3486_v5 = vsel %vm1240_vm0, %v3271_v32, 0.0  ;;  %v3886_v25 = vadd.f32 %v3794_v38, %v3457_v20 }
 0x22e   : > { %v3485_v21 = vsel %vm1240_vm0, %v3270_v26, 0.0  ;;  %v3003_v35 = vpop.permute.xlu1 %3002  ;;  %v3995_v45 = vsel %vm3976_vm3, %v3994_v56, %v3993_v54  ;;  %v3479_v11 = vrot.slane %v3478_v47, 4  ;;  %v2802_v54 = vld [vmem:[#allocation3 + $0x170] sm:$0xff] }
 0x22f   : > { %v3473_v23 = vadd.f32 %v3472_v33, %v3471_v6  ;;  %v3487_v1 = vadd.f32 %v3486_v5, %v3485_v21  ;;  %v2999_v43 = vpop.permute.xlu0 %2998  ;;  %v3466_v59 = vadd.f32 %v3465_v13, %v3464_v36  ;;  %v3273_v10 = vmul.f32 %v3003_v35, %v2793_v28  ;;  %v2801_v35 = vld [vmem:[#allocation3 + $0x168] sm:$0xff] }
 0x230   : > { %v3272_v27 = vmul.f32 %v2999_v43, %v2792_v63  ;;  %3234 = vbcast.lane.b32.xlu1 %v5710_v39, 344  ;;  %v3998_v41 = vrot.slane %v3886_v25, 3  ;;  %v3997_v14 = vsel %vm3979_vm4, %v3996_v29, %v3995_v45  ;;  %v3480_v51 = vadd.f32 %v3479_v11, %v3478_v47  ;;  %v2800_v43 = vld [vmem:[#allocation3 + $0x160] sm:$0xff] }
 0x231   : > { %v3474_v8 = vrot.slane %v3473_v23, 1  ;;  %v3488_v44 = vrot.slane %v3487_v1, 4  ;;  %3230 = vbcast.lane.b32.xlu0 %v5710_v39, 336  ;;  %v3887_v49 = vadd.f32 %v3795_v62, %v3466_v59  ;;  %v3495_v52 = vsel %vm1240_vm0, %v3273_v10, 0.0 }
 0x232   : > { %v3494_v37 = vsel %vm1240_vm0, %v3272_v27, 0.0  ;;  %v3011_v34 = vpop.permute.xlu1 %3010  ;;  %v3999_v0 = vsel %vm3982_vm5, %v3998_v41, %v3997_v14  ;;  %v3481_v12 = vrot.slane %v3480_v51, 2 }
 0x233   : > { %v3475_v17 = vadd.f32 %v3474_v8, %v3473_v23  ;;  %v3489_v18 = vadd.f32 %v3488_v44, %v3487_v1  ;;  %v3496_v22 = vadd.f32 %v3495_v52, %v3494_v37  ;;  %v3007_v38 = vpop.permute.xlu0 %3006  ;;  %v4000_v16 = vrot.slane %v3887_v49, 2 }
 0x234   : > { %v3275_v7 = vmul.f32 %v3011_v34, %v2795_v46  ;;  %v3274_v42 = vmul.f32 %v3007_v38, %v2794_v48  ;;  %v6759_v46 = vld [vmem:[#allocation31_spill] sm:$0xff]  ;;  %v2803_v38 = vld [vmem:[#allocation3 + $0x178] sm:$0xff] }
 0x235   : > { %v3888_v39 = vadd.f32 %v3796_v4, %v3475_v17  ;;  %v3497_v50 = vrot.slane %v3496_v22, 4  ;;  %v3490_v6 = vrot.slane %v3489_v18, 2  ;;  %v4001_v4 = vsel %vm3985_vm6, %v4000_v16, %v3999_v0 }
 0x236   : > { %v3504_v62 = vsel %vm1240_vm0, %v3275_v7, 0.0  ;;  %v3503_v58 = vsel %vm1240_vm0, %v3274_v42, 0.0  ;;  %v3019_v15 = vpop.permute.xlu1 %3018  ;;  %v6415_v48 = vmul.f32 %v6303_v30, %v6759_v46  ;;  %v3482_v16 = vadd.f32 %v3481_v12, %v3480_v51 }
 0x237   : > { %v4002_v20 = vrot.slane %v3888_v39, 1  ;;  %v3498_v31 = vadd.f32 %v3497_v50, %v3496_v22  ;;  %v3015_v40 = vpop.permute.xlu0 %3014  ;;  %v3505_v19 = vadd.f32 %v3504_v62, %v3503_v58  ;;  %v3277_v36 = vmul.f32 %v3019_v15, %v2797_v53 }
 0x238   : > { %v3276_v32 = vmul.f32 %v3015_v40, %v2796_v2  ;;  %v3491_v21 = vadd.f32 %v3490_v6, %v3489_v18  ;;  %v3797_v17 = vrot.slane %v6415_v48, 1  ;;  %v3798_v18 = vrot.slane %v6415_v48, 2 }
 0x239   : > { %v4003_v26 = vsel %vm3988_vm7, %v4002_v20, %v4001_v4  ;;  %v3506_v33 = vrot.slane %v3505_v19, 4  ;;  %v3513_v55 = vsel %vm1240_vm0, %v3277_v36, 0.0  ;;  %v3499_v63 = vrot.slane %v3498_v31, 2  ;;  %v2805_v4 = vld [vmem:[#allocation3 + $0x188] sm:$0xff] }
 0x23a   : > { %4067 = vst.msk [vmem:[%s6026_s6 + $0x8] sm:$0xff] %vm1240_vm0, %v4003_v26  ;;  %v3512_v28 = vsel %vm1240_vm0, %v3276_v32, 0.0  ;;  %v3027_v61 = vpop.permute.xlu1 %3026  ;;  %v3492_v47 = vrot.slane %v3491_v21, 1  ;;  %v3799_v7 = vrot.slane %v6415_v48, 3  ;;  %v3483_v36 = vrot.slane %v3482_v16, 1 }
 0x23b   : > { %v3514_v13 = vadd.f32 %v3513_v55, %v3512_v28  ;;  %v3023_v5 = vpop.permute.xlu0 %3022  ;;  %v3507_v25 = vadd.f32 %v3506_v33, %v3505_v19  ;;  %v3279_v23 = vmul.f32 %v3027_v61, %v2799_v60  ;;  %v3500_v56 = vadd.f32 %v3499_v63, %v3498_v31  ;;  %v2804_v19 = vld [vmem:[#allocation3 + $0x180] sm:$0xff] }
 0x23c   : > { %v3278_v3 = vmul.f32 %v3023_v5, %v2798_v57  ;;  %v3493_v62 = vadd.f32 %v3492_v47, %v3491_v21  ;;  %v3800_v31 = vrot.slane %v6415_v48, 4  ;;  %v3801_v32 = vrot.slane %v6415_v48, 5 }
 0x23d   : > { %v3515_v1 = vrot.slane %v3514_v13, 4  ;;  %v3508_v59 = vrot.slane %v3507_v25, 2  ;;  %v3522_v10 = vsel %vm1240_vm0, %v3279_v23, 0.0  ;;  %v3501_v39 = vrot.slane %v3500_v56, 1 }
 0x23e   : > { %v3521_v27 = vsel %vm1240_vm0, %v3278_v3, 0.0  ;;  %v3035_v44 = vpop.permute.xlu1 %3034  ;;  %v3484_v12 = vadd.f32 %v3483_v36, %v3482_v16 }
 0x23f   : > { %v3516_v29 = vadd.f32 %v3515_v1, %v3514_v13  ;;  %v3523_v8 = vadd.f32 %v3522_v10, %v3521_v27  ;;  %v3031_v49 = vpop.permute.xlu0 %3030  ;;  %v3509_v52 = vadd.f32 %v3508_v59, %v3507_v25  ;;  %v3281_v37 = vmul.f32 %v3035_v44, %v2801_v35  ;;  %v2807_v35 = vld [vmem:[#allocation3 + $0x198] sm:$0xff] }
 0x240   : > { %v3280_v41 = vmul.f32 %v3031_v49, %v2800_v43  ;;  %v3502_v57 = vadd.f32 %v3501_v39, %v3500_v56  ;;  %v3890_v13 = vadd.f32 %v3797_v17, %v3493_v62  ;;  %v2806_v43 = vld [vmem:[#allocation3 + $0x190] sm:$0xff]  ;;  %v3802_v59 = vrot.slane %v6415_v48, 6 }
 0x241   : > { %v3517_v22 = vrot.slane %v3516_v29, 2  ;;  %v3524_v34 = vrot.slane %v3523_v8, 4  ;;  %v3531_v42 = vsel %vm1240_vm0, %v3281_v37, 0.0  ;;  %v3510_v58 = vrot.slane %v3509_v52, 1 }
 0x242   : > { %v3530_v45 = vsel %vm1240_vm0, %v3280_v41, 0.0  ;;  %v3043_v14 = vpop.permute.xlu1 %3042  ;;  %v3891_v46 = vadd.f32 %v3798_v18, %v3502_v57  ;;  %v4004_v17 = vrot.slane %v3890_v13, 7 }
 0x243   : > { %v3518_v50 = vadd.f32 %v3517_v22, %v3516_v29  ;;  %v3525_v53 = vadd.f32 %v3524_v34, %v3523_v8  ;;  %v3532_v2 = vadd.f32 %v3531_v42, %v3530_v45  ;;  %v3039_v11 = vpop.permute.xlu0 %3038  ;;  %v3283_v0 = vmul.f32 %v3043_v14, %v2803_v38  ;;  %v2822_v14 = vld [vmem:[#allocation3 + $0x210] sm:$0xff] }
 0x244   : > { %v3282_v20 = vmul.f32 %v3039_v11, %v2802_v54  ;;  %v3511_v61 = vadd.f32 %v3510_v58, %v3509_v52  ;;  %v4006_v18 = vrot.slane %v3891_v46, 6  ;;  %v3889_v11 = vadd.f32 %v6415_v48, %v3484_v12 }
 0x245   : > { %v3519_v6 = vrot.slane %v3518_v50, 1  ;;  %v3526_v15 = vrot.slane %v3525_v53, 2  ;;  %v3533_v40 = vrot.slane %v3532_v2, 4  ;;  %v3540_v26 = vsel %vm1240_vm0, %v3283_v0, 0.0 }
 0x246   : > { %v3539_v60 = vsel %vm1240_vm0, %v3282_v20, 0.0  ;;  %v3051_v28 = vpop.permute.xlu1 %3050  ;;  %v3892_v47 = vadd.f32 %v3799_v7, %v3511_v61  ;;  %v3803_v58 = vrot.slane %v6415_v48, 7 }
 0x247   : > { %v3527_v51 = vadd.f32 %v3526_v15, %v3525_v53  ;;  %v3534_v33 = vadd.f32 %v3533_v40, %v3532_v2  ;;  %v3541_v55 = vadd.f32 %v3540_v26, %v3539_v60  ;;  %v3047_v63 = vpop.permute.xlu0 %3046  ;;  %v3285_v5 = vmul.f32 %v3051_v28, %v2805_v4  ;;  %v2823_v40 = vld [vmem:[#allocation3 + $0x218] sm:$0xff]  ;;  %v2808_v26 = vld [vmem:[#allocation3 + $0x1a0] sm:$0xff]  ;;  %v2838_v28 = vld [vmem:[#allocation3 + $0x290] sm:$0xff] }
 0x248   : > { %v3284_v21 = vmul.f32 %v3047_v63, %v2804_v19  ;;  %v3520_v25 = vadd.f32 %v3519_v6, %v3518_v50  ;;  %v4008_v62 = vrot.slane %v3892_v47, 5  ;;  %v4005_v4 = vsel %vm3970_vm1, %v4004_v17, %v3889_v11 }
 0x249   : > { %v3528_v23 = vrot.slane %v3527_v51, 1  ;;  %v3535_v3 = vrot.slane %v3534_v33, 2  ;;  %v3542_v1 = vrot.slane %v3541_v55, 4  ;;  %v3549_v10 = vsel %vm1240_vm0, %v3285_v5, 0.0 }
 0x24a   : > { %v3548_v27 = vsel %vm1240_vm0, %v3284_v21, 0.0  ;;  %v3059_v44 = vpop.permute.xlu1 %3058  ;;  %v3893_v22 = vadd.f32 %v3800_v31, %v3520_v25  ;;  %v4007_v60 = vsel %vm3973_vm2, %v4006_v18, %v4005_v4 }
 0x24b   : > { %v3529_v56 = vadd.f32 %v3528_v23, %v3527_v51  ;;  %v3536_v29 = vadd.f32 %v3535_v3, %v3534_v33  ;;  %v3543_v8 = vadd.f32 %v3542_v1, %v3541_v55  ;;  %v3055_v49 = vpop.permute.xlu0 %3054  ;;  %v3550_v52 = vadd.f32 %v3549_v10, %v3548_v27  ;;  %v6760_v51 = vld [vmem:[#allocation32_spill] sm:$0xff] }
 0x24c   : > { %v3287_v37 = vmul.f32 %v3059_v44, %v2807_v35  ;;  %v3286_v41 = vmul.f32 %v3055_v49, %v2806_v43  ;;  %v4010_v20 = vrot.slane %v3893_v22, 4  ;;  %v6437_v33 = vmul.f32 %v6303_v30, %v6760_v51  ;;  %v2809_v35 = vld [vmem:[#allocation3 + $0x1a8] sm:$0xff]  ;;  %v2839_v43 = vld [vmem:[#allocation3 + $0x298] sm:$0xff] }
 0x24d   : > { %v3537_v34 = vrot.slane %v3536_v29, 1  ;;  %v3544_v38 = vrot.slane %v3543_v8, 2  ;;  %v3894_v54 = vadd.f32 %v3801_v32, %v3529_v56  ;;  %v3551_v16 = vrot.slane %v3550_v52, 4  ;;  %v2825_v22 = vld [vmem:[#allocation3 + $0x228] sm:$0xff] }
 0x24e   : > { %v3558_v42 = vsel %vm1240_vm0, %v3287_v37, 0.0  ;;  %v3557_v45 = vsel %vm1240_vm0, %v3286_v41, 0.0  ;;  %v3119_v2 = vpop.permute.xlu1 %3118  ;;  %v4009_v13 = vsel %vm3976_vm3, %v4008_v62, %v4007_v60  ;;  %v3804_v17 = vrot.slane %v6437_v33, 1 }
 0x24f   : > { %v3538_v39 = vadd.f32 %v3537_v34, %v3536_v29  ;;  %v3545_v50 = vadd.f32 %v3544_v38, %v3543_v8  ;;  %v3559_v53 = vadd.f32 %v3558_v42, %v3557_v45  ;;  %v3063_v7 = vpop.permute.xlu0 %3062  ;;  %v3552_v0 = vadd.f32 %v3551_v16, %v3550_v52  ;;  %v2824_v34 = vld [vmem:[#allocation3 + $0x220] sm:$0xff] }
 0x250   : > { %v4012_v19 = vrot.slane %v3894_v54, 3  ;;  %v3302_v32 = vmul.f32 %v3119_v2, %v2822_v14  ;;  %v4011_v25 = vsel %vm3979_vm4, %v4010_v20, %v4009_v13  ;;  %v3288_v1 = vmul.f32 %v3063_v7, %v2808_v26 }
 0x251   : > { %v3895_v6 = vadd.f32 %v3802_v59, %v3538_v39  ;;  %v3546_v31 = vrot.slane %v3545_v50, 1  ;;  %v3560_v15 = vrot.slane %v3559_v53, 4  ;;  %v3553_v36 = vrot.slane %v3552_v0, 2 }
 0x252   : > { %v3183_v55 = vpop.permute.xlu1 %3182  ;;  %v4013_v12 = vsel %vm3982_vm5, %v4012_v19, %v4011_v25  ;;  %v3629_v30 = vsel %vm1240_vm0, %v3302_v32, 0.0  ;;  %v3566_v38 = vsel %vm1240_vm0, %v3288_v1, 0.0  ;;  %v2821_v25 = vld [vmem:[#allocation3 + $0x208] sm:$0xff] }
 0x253   : > { %v3547_v57 = vadd.f32 %v3546_v31, %v3545_v50  ;;  %v3561_v48 = vadd.f32 %v3560_v15, %v3559_v53  ;;  %v3123_v63 = vpop.permute.xlu0 %3122  ;;  %v4014_v61 = vrot.slane %v3895_v6, 2  ;;  %v3554_v5 = vadd.f32 %v3553_v36, %v3552_v0 }
 0x254   : > { %v3303_v21 = vmul.f32 %v3123_v63, %v2823_v40  ;;  %v3318_v59 = vmul.f32 %v3183_v55, %v2838_v28  ;;  %v2810_v28 = vld [vmem:[#allocation3 + $0x1b0] sm:$0xff] }
 0x255   : > { %v3896_v23 = vadd.f32 %v3803_v58, %v3547_v57  ;;  %v3562_v3 = vrot.slane %v3561_v48, 2  ;;  %v3555_v46 = vrot.slane %v3554_v5, 1  ;;  %v4015_v49 = vsel %vm3985_vm6, %v4014_v61, %v4013_v12  ;;  %v2811_v57 = vld [vmem:[#allocation3 + $0x1b8] sm:$0xff] }
 0x256   : > { %v3630_v10 = vsel %vm1240_vm0, %v3303_v21, 0.0  ;;  %v3067_v8 = vpop.permute.xlu1 %3066  ;;  %v3701_v54 = vsel %vm1240_vm0, %v3318_v59, 0.0 }
 0x257   : > { %v4016_v27 = vrot.slane %v3896_v23, 1  ;;  %v3563_v56 = vadd.f32 %v3562_v3, %v3561_v48  ;;  %v3631_v29 = vadd.f32 %v3630_v10, %v3629_v30  ;;  %v3187_v44 = vpop.permute.xlu0 %3186  ;;  %v3289_v47 = vmul.f32 %v3067_v8, %v2809_v35  ;;  %v2820_v23 = vld [vmem:[#allocation3 + $0x200] sm:$0xff] }
 0x258   : > { %v3319_v52 = vmul.f32 %v3187_v44, %v2839_v43  ;;  %v3556_v45 = vadd.f32 %v3555_v46, %v3554_v5  ;;  %v3805_v5 = vrot.slane %v6437_v33, 2  ;;  %v2841_v46 = vld [vmem:[#allocation3 + $0x2a8] sm:$0xff] }
 0x259   : > { %v4017_v37 = vsel %vm3988_vm7, %v4016_v27, %v4015_v49  ;;  %v3564_v41 = vrot.slane %v3563_v56, 1  ;;  %v3567_v16 = vsel %vm1240_vm0, %v3289_v47, 0.0  ;;  %v3632_v62 = vrot.slane %v3631_v29, 4 }
 0x25a   : > { %4068 = vst.msk [vmem:[%s6026_s6 + $0x10] sm:$0xff] %vm1240_vm0, %v4017_v37  ;;  %v3702_v42 = vsel %vm1240_vm0, %v3319_v52, 0.0  ;;  %v3568_v39 = vadd.f32 %v3567_v16, %v3566_v38  ;;  %v3131_v53 = vpop.permute.xlu1 %3130  ;;  %v3897_v6 = vadd.f32 %v6437_v33, %v3556_v45  ;;  %v4717_v38 = vld [vmem:[%s6650_s3] ss:$0 sm:$0xff] }
 0x25b   : > { %v3565_v18 = vadd.f32 %v3564_v41, %v3563_v56  ;;  %v6453_v50 = vadd.f32 %v3702_v42, %v3701_v54  ;;  %v3127_v2 = vpop.permute.xlu0 %3126  ;;  %v3305_v14 = vmul.f32 %v3131_v53, %v2825_v22  ;;  %v3633_v32 = vadd.f32 %v3632_v62, %v3631_v29  ;;  %v2840_v56 = vld [vmem:[#allocation3 + $0x2a0] sm:$0xff] }
 0x25c   : > { %v3304_v7 = vmul.f32 %v3127_v2, %v2824_v34  ;;  %v3569_v58 = vrot.slane %v3568_v39, 4  ;;  %v2826_v34 = vld [vmem:[#allocation3 + $0x230] sm:$0xff]  ;;  %v6468_v54 = vmul.f32 %v4717_v38, %v5931_v24 }
 0x25d   : > { %v3898_v11 = vadd.f32 %v3804_v17, %v3565_v18  ;;  %v3639_v0 = vsel %vm1240_vm0, %v3305_v14, 0.0  ;;  %v3634_v13 = vrot.slane %v3633_v32, 2  ;;  %v2827_v17 = vld [vmem:[#allocation3 + $0x238] sm:$0xff] }
 0x25e   : > { %v3638_v20 = vsel %vm1240_vm0, %v3304_v7, 0.0  ;;  %v3570_v15 = vadd.f32 %v3569_v58, %v3568_v39  ;;  %v3195_v40 = vpop.permute.xlu1 %3194 }
 0x25f   : > { %v4018_v31 = vrot.slane %v3898_v11, 7  ;;  %v3191_v4 = vpop.permute.xlu0 %3190  ;;  %v3640_v19 = vadd.f32 %v3639_v0, %v3638_v20  ;;  %v3635_v10 = vadd.f32 %v3634_v13, %v3633_v32  ;;  %v3321_v16 = vmul.f32 %v3195_v40, %v2841_v46 }
 0x260   : > { %v3571_v26 = vrot.slane %v3570_v15, 2  ;;  %v3320_v42 = vmul.f32 %v3191_v4, %v2840_v56  ;;  %v3704_v11 = vrot.slane %v6453_v50, 4  ;;  %v2837_v4 = vld [vmem:[#allocation3 + $0x288] sm:$0xff]  ;;  %v3812_v32 = vrot.slane %v6468_v54, 2 }
 0x261   : > { %v4019_v36 = vsel %vm3970_vm1, %v4018_v31, %v3897_v6  ;;  %v3641_v60 = vrot.slane %v3640_v19, 4  ;;  %v3636_v45 = vrot.slane %v3635_v10, 1  ;;  %v3711_v20 = vsel %vm1240_vm0, %v3321_v16, 0.0 }
 0x262   : > { %v3572_v51 = vadd.f32 %v3571_v26, %v3570_v15  ;;  %v3075_v48 = vpop.permute.xlu1 %3074  ;;  %v3710_v24 = vsel %vm1240_vm0, %v3320_v42, 0.0  ;;  %v3811_v31 = vrot.slane %v6468_v54, 1  ;;  %v2813_v42 = vld [vmem:[#allocation3 + $0x1c8] sm:$0xff] }
 0x263   : > { %v3071_v55 = vpop.permute.xlu0 %3070  ;;  %v3642_v63 = vadd.f32 %v3641_v60, %v3640_v19  ;;  %v3291_v21 = vmul.f32 %v3075_v48, %v2811_v57  ;;  %v3637_v6 = vadd.f32 %v3636_v45, %v3635_v10  ;;  %v2836_v19 = vld [vmem:[#allocation3 + $0x280] sm:$0xff]  ;;  %v3705_v57 = vadd.f32 %v3704_v11, %v6453_v50 }
 0x264   : > { %v3573_v61 = vrot.slane %v3572_v51, 1  ;;  %v3290_v1 = vmul.f32 %v3071_v55, %v2810_v28  ;;  %v2812_v45 = vld [vmem:[#allocation3 + $0x1c0] sm:$0xff] }
 0x265   : > { %v3643_v3 = vrot.slane %v3642_v63, 2  ;;  %v3576_v29 = vsel %vm1240_vm0, %v3291_v21, 0.0 }
 0x266   : > { %v3574_v35 = vadd.f32 %v3573_v61, %v3572_v51  ;;  %v3115_v43 = vpop.permute.xlu1 %3114  ;;  %v3575_v44 = vsel %vm1240_vm0, %v3290_v1, 0.0  ;;  %v3712_v51 = vadd.f32 %v3711_v20, %v3710_v24  ;;  %v3906_v61 = vadd.f32 %v3811_v31, %v3637_v6 }
 0x267   : > { %v3111_v12 = vpop.permute.xlu0 %3110  ;;  %v3301_v30 = vmul.f32 %v3115_v43, %v2821_v25  ;;  %v3644_v8 = vadd.f32 %v3643_v3, %v3642_v63  ;;  %v3577_v39 = vadd.f32 %v3576_v29, %v3575_v44  ;;  %v3706_v3 = vrot.slane %v3705_v57, 2 }
 0x268   : > { %v3300_v59 = vmul.f32 %v3111_v12, %v2820_v23  ;;  %v3899_v27 = vadd.f32 %v3805_v5, %v3574_v35  ;;  %v3713_v1 = vrot.slane %v3712_v51, 4  ;;  %v4032_v10 = vrot.slane %v3906_v61, 7  ;;  %v2828_v61 = vld [vmem:[#allocation3 + $0x240] sm:$0xff] }
 0x269   : > { %v3621_v49 = vsel %vm1240_vm0, %v3301_v30, 0.0  ;;  %v3645_v2 = vrot.slane %v3644_v8, 1  ;;  %v3578_v15 = vrot.slane %v3577_v39, 4  ;;  %v6482_v30 = vmul.f32 %v4717_v38, %v5978_v9 }
 0x26a   : > { %v3620_v47 = vsel %vm1240_vm0, %v3300_v59, 0.0  ;;  %v4020_v52 = vrot.slane %v3899_v27, 6  ;;  %v3139_v41 = vpop.permute.xlu1 %3138  ;;  %v3714_v44 = vadd.f32 %v3713_v1, %v3712_v51  ;;  %v3807_v31 = vrot.slane %v6437_v33, 4  ;;  %v2829_v51 = vld [vmem:[#allocation3 + $0x248] sm:$0xff] }
 0x26b   : > { %v3622_v37 = vadd.f32 %v3621_v49, %v3620_v47  ;;  %v3135_v22 = vpop.permute.xlu0 %3134  ;;  %v3307_v14 = vmul.f32 %v3139_v41, %v2827_v17  ;;  %v3579_v5 = vadd.f32 %v3578_v15, %v3577_v39  ;;  %v3806_v39 = vrot.slane %v6437_v33, 3 }
 0x26c   : > { %v6471_v18 = vsel %vm3973_vm2, %v4020_v52, %v4019_v36  ;;  %v3306_v7 = vmul.f32 %v3135_v22, %v2826_v34  ;;  %v3646_v36 = vadd.f32 %v3645_v2, %v3644_v8  ;;  %v3707_v8 = vadd.f32 %v3706_v3, %v3705_v57  ;;  %v2843_v52 = vld [vmem:[#allocation3 + $0x2b8] sm:$0xff] }
 0x26d   : > { %v3623_v53 = vrot.slane %v3622_v37, 4  ;;  %v3648_v26 = vsel %vm1240_vm0, %v3307_v14, 0.0  ;;  %v3580_v27 = vrot.slane %v3579_v5, 2  ;;  %v3818_v22 = vrot.slane %v6482_v30, 1 }
 0x26e   : > { %v3179_v58 = vpop.permute.xlu1 %3178  ;;  %v3647_v60 = vsel %vm1240_vm0, %v3306_v7, 0.0  ;;  %v3907_v23 = vadd.f32 %v3812_v32, %v3646_v36  ;;  %v3819_v34 = vrot.slane %v6482_v30, 2  ;;  %v3708_v7 = vrot.slane %v3707_v8, 1  ;;  %v2815_v36 = vld [vmem:[#allocation3 + $0x1d8] sm:$0xff]  ;;  %v2814_v32 = vld [vmem:[#allocation3 + $0x1d0] sm:$0xff] }
 0x26f   : > { %v3624_v62 = vadd.f32 %v3623_v53, %v3622_v37  ;;  %v3175_v0 = vpop.permute.xlu0 %3174  ;;  %v3317_v63 = vmul.f32 %v3179_v58, %v2837_v4  ;;  %v3649_v25 = vadd.f32 %v3648_v26, %v3647_v60  ;;  %v2842_v37 = vld [vmem:[#allocation3 + $0x2b0] sm:$0xff]  ;;  %v3581_v38 = vadd.f32 %v3580_v27, %v3579_v5 }
 0x270   : > { %v3316_v13 = vmul.f32 %v3175_v0, %v2836_v19  ;;  %v4034_v29 = vrot.slane %v3907_v23, 6  ;;  %v3813_v53 = vrot.slane %v6468_v54, 3  ;;  %v3715_v11 = vrot.slane %v3714_v44, 2  ;;  %v2830_v27 = vld [vmem:[#allocation3 + $0x250] sm:$0xff] }
 0x271   : > { %v3625_v40 = vrot.slane %v3624_v62, 2  ;;  %v3693_v50 = vsel %vm1240_vm0, %v3317_v63, 0.0  ;;  %v3650_v56 = vrot.slane %v3649_v25, 4  ;;  %v3820_v58 = vrot.slane %v6482_v30, 3 }
 0x272   : > { %v3203_v55 = vpop.permute.xlu1 %3202  ;;  %v3692_v59 = vsel %vm1240_vm0, %v3316_v13, 0.0  ;;  %v3814_v15 = vrot.slane %v6468_v54, 4  ;;  %v3821_v19 = vrot.slane %v6482_v30, 4  ;;  %v3808_v26 = vrot.slane %v6437_v33, 5 }
 0x273   : > { %v3626_v48 = vadd.f32 %v3625_v40, %v3624_v62  ;;  %v3199_v28 = vpop.permute.xlu0 %3198  ;;  %v3694_v47 = vadd.f32 %v3693_v50, %v3692_v59  ;;  %v3651_v16 = vadd.f32 %v3650_v56, %v3649_v25  ;;  %v3323_v2 = vmul.f32 %v3203_v55, %v2843_v52  ;;  %v2844_v52 = vld [vmem:[#allocation3 + $0x2c0] sm:$0xff] }
 0x274   : > { %v3322_v14 = vmul.f32 %v3199_v28, %v2842_v37  ;;  %v3582_v40 = vrot.slane %v3581_v38, 1  ;;  %v3822_v55 = vrot.slane %v6482_v30, 5  ;;  %v3709_v28 = vadd.f32 %v3708_v7, %v3707_v8 }
 0x275   : > { %v3627_v21 = vrot.slane %v3626_v48, 1  ;;  %v3695_v62 = vrot.slane %v3694_v47, 4  ;;  %v3652_v4 = vrot.slane %v3651_v16, 2  ;;  %v3720_v60 = vsel %vm1240_vm0, %v3323_v2, 0.0 }
 0x276   : > { %v3083_v43 = vpop.permute.xlu1 %3082  ;;  %v3719_v57 = vsel %vm1240_vm0, %v3322_v14, 0.0  ;;  %v3716_v63 = vadd.f32 %v3715_v11, %v3714_v44  ;;  %v3809_v25 = vrot.slane %v6437_v33, 6  ;;  %v3816_v56 = vrot.slane %v6468_v54, 6 }
 0x277   : > { %v3628_v35 = vadd.f32 %v3627_v21, %v3626_v48  ;;  %v3079_v12 = vpop.permute.xlu0 %3078  ;;  %v3293_v24 = vmul.f32 %v3083_v43, %v2813_v42  ;;  %v3815_v48 = vrot.slane %v6468_v54, 5  ;;  %v3696_v13 = vadd.f32 %v3695_v62, %v3694_v47  ;;  %v2845_v47 = vld [vmem:[#allocation3 + $0x2c8] sm:$0xff] }
 0x278   : > { %v3292_v6 = vmul.f32 %v3079_v12, %v2812_v45  ;;  %v3583_v43 = vadd.f32 %v3582_v40, %v3581_v38  ;;  %v3653_v12 = vadd.f32 %v3652_v4, %v3651_v16  ;;  %v3721_v50 = vadd.f32 %v3720_v60, %v3719_v57 }
 0x279   : > { %v3905_v46 = vadd.f32 %v6468_v54, %v3628_v35  ;;  %v3585_v23 = vsel %vm1240_vm0, %v3293_v24, 0.0  ;;  %v3810_v8 = vrot.slane %v6437_v33, 7  ;;  %v3697_v44 = vrot.slane %v3696_v13, 2  ;;  %v2847_v24 = vld [vmem:[#allocation3 + $0x2d8] sm:$0xff] }
 0x27a   : > { %v3147_v41 = vpop.permute.xlu1 %3146  ;;  %v3584_v3 = vsel %vm1240_vm0, %v3292_v6, 0.0  ;;  %v3717_v45 = vrot.slane %v3716_v63, 1  ;;  %v3900_v14 = vadd.f32 %v3806_v39, %v3583_v43  ;;  %v3654_v7 = vrot.slane %v3653_v12, 1  ;;  %v2846_v6 = vld [vmem:[#allocation3 + $0x2d0] sm:$0xff] }
 0x27b   : > { %v4033_v49 = vsel %vm3970_vm1, %v4032_v10, %v3905_v46  ;;  %v3143_v9 = vpop.permute.xlu0 %3142  ;;  %v3309_v59 = vmul.f32 %v3147_v41, %v2829_v51  ;;  %v2831_v10 = vld [vmem:[#allocation3 + $0x258] sm:$0xff]  ;;  %v6512_v41 = vadd.f32 %v3818_v22, %v3709_v28  ;;  %v3722_v11 = vrot.slane %v3721_v50, 4 }
 0x27c   : > { %v6489_v17 = vsel %vm3973_vm2, %v4034_v29, %v4033_v49  ;;  %v3308_v46 = vmul.f32 %v3143_v9, %v2828_v61  ;;  %v3823_v29 = vrot.slane %v6482_v30, 6  ;;  %v3586_v49 = vadd.f32 %v3585_v23, %v3584_v3 }
 0x27d   : > { %v3657_v62 = vsel %vm1240_vm0, %v3309_v59, 0.0  ;;  %v3698_v60 = vadd.f32 %v3697_v44, %v3696_v13  ;;  %v3824_v23 = vrot.slane %v6482_v30, 7  ;;  %v4046_v3 = vrot.slane %v6512_v41, 7  ;;  %v2816_v13 = vld [vmem:[#allocation3 + $0x1e0] sm:$0xff] }
 0x27e   : > { %v3211_v0 = vpop.permute.xlu1 %3210  ;;  %v3656_v40 = vsel %vm1240_vm0, %v3308_v46, 0.0  ;;  %v3587_v57 = vrot.slane %v3586_v49, 4  ;;  %v4022_v46 = vrot.slane %v3900_v14, 5 }
 0x27f   : > { %v3207_v20 = vpop.permute.xlu0 %3206  ;;  %v3325_v4 = vmul.f32 %v3211_v0, %v2845_v47  ;;  %v3655_v0 = vadd.f32 %v3654_v7, %v3653_v12  ;;  %v3699_v44 = vrot.slane %v3698_v60, 1  ;;  %v3723_v47 = vadd.f32 %v3722_v11, %v3721_v50  ;;  %v2833_v50 = vld [vmem:[#allocation3 + $0x268] sm:$0xff] }
 0x281   : > { %v3729_v43 = vsel %vm1240_vm0, %v3325_v4, 0.0 }
 0x282   : > { %v3091_v5 = vpop.permute.xlu1 %3090 }
 0x283   : > { %v3087_v21 = vpop.permute.xlu0 %3086  ;;  %v3295_v1 = vmul.f32 %v3091_v5, %v2815_v36  ;;  %v3324_v36 = vmul.f32 %v3207_v20, %v2844_v52  ;;  %v3658_v20 = vadd.f32 %v3657_v62, %v3656_v40  ;;  %v3588_v52 = vadd.f32 %v3587_v57, %v3586_v49  ;;  %v2832_v49 = vld [vmem:[#allocation3 + $0x260] sm:$0xff] }
 0x284   : > { %v3294_v35 = vmul.f32 %v3087_v21, %v2814_v32  ;;  %v3817_v21 = vrot.slane %v6468_v54, 7  ;;  %v3700_v57 = vadd.f32 %v3699_v44, %v3698_v60 }
 0x285   : > { %v3594_v37 = vsel %vm1240_vm0, %v3295_v1, 0.0  ;;  %v3718_v1 = vadd.f32 %v3717_v45, %v3716_v63  ;;  %v3728_v59 = vsel %vm1240_vm0, %v3324_v36, 0.0 }
 0x286   : > { %v3593_v38 = vsel %vm1240_vm0, %v3294_v35, 0.0  ;;  %v3155_v16 = vpop.permute.xlu1 %3154  ;;  %v2817_v35 = vld [vmem:[#allocation3 + $0x1e8] sm:$0xff]  ;;  %v3730_v14 = vadd.f32 %v3729_v43, %v3728_v59 }
 0x287   : > { %v3151_v42 = vpop.permute.xlu0 %3150  ;;  %v3311_v9 = vmul.f32 %v3155_v16, %v2831_v10  ;;  %v3595_v32 = vadd.f32 %v3594_v37, %v3593_v38  ;;  %v6527_v45 = vadd.f32 %v3819_v34, %v3718_v1  ;;  %v3724_v34 = vrot.slane %v3723_v47, 2  ;;  %v2849_v1 = vld [vmem:[#allocation3 + $0x2e8] sm:$0xff] }
 0x288   : > { %v3310_v2 = vmul.f32 %v3151_v42, %v2830_v27 }
 0x289   : > { %v3666_v22 = vsel %vm1240_vm0, %v3311_v9, 0.0  ;;  %v3596_v10 = vrot.slane %v3595_v32, 4  ;;  %v6531_v9 = vadd.f32 %v3813_v53, %v3655_v0  ;;  %v2848_v0 = vld [vmem:[#allocation3 + $0x2e0] sm:$0xff]  ;;  %v6542_v59 = vadd.f32 %v3724_v34, %v3723_v47 }
 0x28a   : > { %v3665_v51 = vsel %vm1240_vm0, %v3310_v2, 0.0  ;;  %v3219_v28 = vpop.permute.xlu1 %3218  ;;  %v3659_v2 = vrot.slane %v3658_v20, 4 }
 0x28b   : > { %v3215_v61 = vpop.permute.xlu0 %3214  ;;  %v3327_v39 = vmul.f32 %v3219_v28, %v2847_v24  ;;  %v3667_v27 = vadd.f32 %v3666_v22, %v3665_v51  ;;  %v3597_v7 = vadd.f32 %v3596_v10, %v3595_v32  ;;  %v3589_v22 = vrot.slane %v3588_v52, 2 }
 0x28c   : > { %v3326_v5 = vmul.f32 %v3215_v61, %v2846_v6  ;;  %v6537_v6 = vsel %vm3976_vm3, %v4022_v46, %v6471_v18  ;;  %v4036_v32 = vrot.slane %v6531_v9, 5  ;;  %v3660_v61 = vadd.f32 %v3659_v2, %v3658_v20 }
 0x28d   : > { %v3738_v16 = vsel %vm1240_vm0, %v3327_v39, 0.0  ;;  %v3668_v11 = vrot.slane %v3667_v27, 4  ;;  %v3731_v39 = vrot.slane %v3730_v14, 4  ;;  %v3590_v20 = vadd.f32 %v3589_v22, %v3588_v52 }
 0x28e   : > { %v3099_v37 = vpop.permute.xlu1 %3098  ;;  %v3737_v63 = vsel %vm1240_vm0, %v3326_v5, 0.0  ;;  %v3726_v22 = vrot.slane %v6542_v59, 1 }
 0x28f   : > { %v3095_v38 = vpop.permute.xlu0 %3094  ;;  %v3297_v12 = vmul.f32 %v3099_v37, %v2817_v35  ;;  %v3739_v40 = vadd.f32 %v3738_v16, %v3737_v63  ;;  %v3598_v35 = vrot.slane %v3597_v7, 2 }
 0x290   : > { %v3296_v42 = vmul.f32 %v3095_v38, %v2816_v13  ;;  %v3669_v13 = vadd.f32 %v3668_v11, %v3667_v27  ;;  %v3913_v38 = vadd.f32 %v6482_v30, %v3700_v57  ;;  %v4121_v30 = vld [vmem:[%s6026_s6] sm:$0xff] (%p4988_p6) }
 0x291   : > { %v3603_v62 = vsel %vm1240_vm0, %v3297_v12, 0.0  ;;  %v3740_v10 = vrot.slane %v3739_v40, 4  ;;  %v3661_v12 = vrot.slane %v3660_v61, 2  ;;  %v3599_v11 = vadd.f32 %v3598_v35, %v3597_v7  ;;  %v2834_v35 = vld [vmem:[#allocation3 + $0x270] sm:$0xff]  ;;  %4122 = vst [vmem:[%s4082_s29] sm:$0xff] (%p4988_p6), %v4121_v30 }
 0x292   : > { %v3602_v24 = vsel %vm1240_vm0, %v3296_v42, 0.0  ;;  %v3163_v36 = vpop.permute.xlu1 %3162  ;;  %v3732_v42 = vadd.f32 %v3731_v39, %v3730_v14 }
 0x293   : > { %v3604_v4 = vadd.f32 %v3603_v62, %v3602_v24  ;;  %v3159_v53 = vpop.permute.xlu0 %3158  ;;  %v3313_v51 = vmul.f32 %v3163_v36, %v2833_v50  ;;  %v2819_v50 = vld [vmem:[#allocation3 + $0x1f8] sm:$0xff]  ;;  %v3670_v62 = vrot.slane %v3669_v13, 2  ;;  %v3741_v34 = vadd.f32 %v3740_v10, %v3739_v40 }
 0x294   : > { %v3312_v28 = vmul.f32 %v3159_v53, %v2832_v49  ;;  %v2818_v49 = vld [vmem:[#allocation3 + $0x1f0] sm:$0xff]  ;;  %v3662_v39 = vadd.f32 %v3661_v12, %v3660_v61  ;;  %v6553_v61 = vsel %vm3970_vm1, %v4046_v3, %v3913_v38 }
 0x295   : > { %v3605_v5 = vrot.slane %v3604_v4, 4  ;;  %v3675_v18 = vsel %vm1240_vm0, %v3313_v51, 0.0  ;;  %v3591_v51 = vrot.slane %v3590_v20, 1 }
 0x296   : > { %v3674_v43 = vsel %vm1240_vm0, %v3312_v28, 0.0  ;;  %v3227_v44 = vpop.permute.xlu1 %3226 }
 0x297   : > { %v3606_v60 = vadd.f32 %v3605_v5, %v3604_v4  ;;  %v3676_v46 = vadd.f32 %v3675_v18, %v3674_v43  ;;  %v3223_v37 = vpop.permute.xlu0 %3222  ;;  %v3329_v16 = vmul.f32 %v3227_v44, %v2849_v1  ;;  %v3733_v5 = vrot.slane %v3732_v42, 2 }
 0x298   : > { %v3328_v63 = vmul.f32 %v3223_v37, %v2848_v0  ;;  %v2835_v0 = vld [vmem:[#allocation3 + $0x278] sm:$0xff]  ;;  %v3600_v18 = vrot.slane %v3599_v11, 1  ;;  %v3671_v43 = vadd.f32 %v3670_v62, %v3669_v13  ;;  %v3592_v12 = vadd.f32 %v3591_v51, %v3590_v20 }
 0x299   : > { %v3607_v2 = vrot.slane %v3606_v60, 2  ;;  %v3677_v27 = vrot.slane %v3676_v46, 4  ;;  %v3747_v47 = vsel %vm1240_vm0, %v3329_v16, 0.0 }
 0x29a   : > { %v3746_v24 = vsel %vm1240_vm0, %v3328_v63, 0.0  ;;  %v3107_v57 = vpop.permute.xlu1 %3106 }
 0x29b   : > { %v3608_v4 = vadd.f32 %v3607_v2, %v3606_v60  ;;  %v3678_v36 = vadd.f32 %v3677_v27, %v3676_v46  ;;  %v3748_v53 = vadd.f32 %v3747_v47, %v3746_v24  ;;  %v3103_v52 = vpop.permute.xlu0 %3102  ;;  %v3299_v14 = vmul.f32 %v3107_v57, %v2819_v50  ;;  %v2851_v47 = vld [vmem:[#allocation3 + $0x2f8] sm:$0xff]  ;;  %v2850_v24 = vld [vmem:[#allocation3 + $0x2f0] sm:$0xff] }
 0x29c   : > { %v3298_v28 = vmul.f32 %v3103_v52, %v2818_v49  ;;  %v3742_v60 = vrot.slane %v3741_v34, 2  ;;  %v3663_v50 = vrot.slane %v3662_v39, 1  ;;  %v3734_v57 = vadd.f32 %v3733_v5, %v3732_v42 }
 0x29d   : > { %v3679_v1 = vrot.slane %v3678_v36, 2  ;;  %v3749_v7 = vrot.slane %v3748_v53, 4  ;;  %v3612_v40 = vsel %vm1240_vm0, %v3299_v14, 0.0  ;;  %v3609_v46 = vrot.slane %v3608_v4, 1 }
 0x29e   : > { %v3611_v10 = vsel %vm1240_vm0, %v3298_v28, 0.0  ;;  %v3171_v16 = vpop.permute.xlu1 %3170  ;;  %v3601_v52 = vadd.f32 %v3600_v18, %v3599_v11  ;;  %v3672_v28 = vrot.slane %v3671_v43, 1  ;;  %v3743_v41 = vadd.f32 %v3742_v60, %v3741_v34 }
 0x29f   : > { %v3750_v44 = vadd.f32 %v3749_v7, %v3748_v53  ;;  %v3613_v37 = vadd.f32 %v3612_v40, %v3611_v10  ;;  %v3167_v63 = vpop.permute.xlu0 %3166  ;;  %v3315_v2 = vmul.f32 %v3171_v16, %v2835_v0  ;;  %v3680_v13 = vadd.f32 %v3679_v1, %v3678_v36 }
 0x2a0   : > { %v3314_v27 = vmul.f32 %v3167_v63, %v2834_v35  ;;  %v3610_v7 = vadd.f32 %v3609_v46, %v3608_v4  ;;  %v3901_v1 = vadd.f32 %v3807_v31, %v3592_v12  ;;  %v3664_v40 = vadd.f32 %v3663_v50, %v3662_v39 }
 0x2a1   : > { %v3751_v49 = vrot.slane %v3750_v44, 2  ;;  %v3614_v62 = vrot.slane %v3613_v37, 4  ;;  %v3684_v53 = vsel %vm1240_vm0, %v3315_v2, 0.0  ;;  %v3681_v42 = vrot.slane %v3680_v13, 1 }
 0x2a2   : > { %v3683_v14 = vsel %vm1240_vm0, %v3314_v27, 0.0  ;;  %v3235_v38 = vpop.permute.xlu1 %3234  ;;  %v3735_v5 = vrot.slane %v3734_v57, 1  ;;  %v3902_v4 = vadd.f32 %v3808_v26, %v3601_v52  ;;  %v3744_v60 = vrot.slane %v3743_v41, 1 }
 0x2a3   : > { %v3615_v3 = vadd.f32 %v3614_v62, %v3613_v37  ;;  %v3231_v20 = vpop.permute.xlu0 %3230  ;;  %v3752_v51 = vadd.f32 %v3751_v49, %v3750_v44  ;;  %v3685_v0 = vadd.f32 %v3684_v53, %v3683_v14  ;;  %v3331_v35 = vmul.f32 %v3235_v38, %v2851_v47 }
 0x2a4   : > { %v3330_v36 = vmul.f32 %v3231_v20, %v2850_v24  ;;  %v3673_v37 = vadd.f32 %v3672_v28, %v3671_v43  ;;  %v3903_v16 = vadd.f32 %v3809_v25, %v3610_v7  ;;  %v3727_v63 = vadd.f32 %v3726_v22, %v6542_v59 }
 0x2a5   : > { %v3616_v11 = vrot.slane %v3615_v3, 2  ;;  %v3686_v18 = vrot.slane %v3685_v0, 4  ;;  %v3756_v10 = vsel %vm1240_vm0, %v3331_v35, 0.0  ;;  %v3753_v31 = vrot.slane %v3752_v51, 1 }
 0x2a6   : > { %v3755_v34 = vsel %vm1240_vm0, %v3330_v36, 0.0  ;;  %v3682_v12 = vadd.f32 %v3681_v42, %v3680_v13  ;;  %v4024_v50 = vrot.slane %v3901_v1, 4  ;;  %v3909_v49 = vadd.f32 %v3814_v15, %v3664_v40 }
 0x2a7   : > { %v3617_v46 = vadd.f32 %v3616_v11, %v3615_v3  ;;  %v3757_v44 = vadd.f32 %v3756_v10, %v3755_v34  ;;  %v3687_v39 = vadd.f32 %v3686_v18, %v3685_v0  ;;  %v3736_v62 = vadd.f32 %v3735_v5, %v3734_v57 }
 0x2a8   : > { %v4026_v47 = vrot.slane %v3902_v4, 3  ;;  %v3745_v24 = vadd.f32 %v3744_v60, %v3743_v41  ;;  %v3910_v25 = vadd.f32 %v3815_v48, %v3673_v37  ;;  %v4028_v53 = vrot.slane %v3903_v16, 2 }
 0x2a9   : > { %v3618_v2 = vrot.slane %v3617_v46, 1  ;;  %v3758_v27 = vrot.slane %v3757_v44, 4  ;;  %v3688_v26 = vrot.slane %v3687_v39, 2  ;;  %v3754_v14 = vadd.f32 %v3753_v31, %v3752_v51 }
 0x2aa   : > { %v3916_v59 = vadd.f32 %v3820_v58, %v3727_v63  ;;  %v3911_v22 = vadd.f32 %v3816_v56, %v3682_v12  ;;  %v4025_v57 = vsel %vm3979_vm4, %v4024_v50, %v6537_v6  ;;  %v4038_v41 = vrot.slane %v3909_v49, 4 }
 0x2ab   : > { %v3619_v52 = vadd.f32 %v3618_v2, %v3617_v46  ;;  %v3759_v43 = vadd.f32 %v3758_v27, %v3757_v44  ;;  %v3689_v28 = vadd.f32 %v3688_v26, %v3687_v39  ;;  %v3917_v48 = vadd.f32 %v3821_v19, %v3736_v62  ;;  %v4125_v46 = vld [vmem:[%s6026_s6 + $0x10] sm:$0xff] (%p4988_p6) }
 0x2ac   : > { %v4027_v3 = vsel %vm3982_vm5, %v4026_v47, %v4025_v57  ;;  %v3918_v58 = vadd.f32 %v3822_v55, %v3745_v24  ;;  %v4040_v20 = vrot.slane %v3910_v25, 3  ;;  %v4050_v51 = vrot.slane %v3916_v59, 5  ;;  %4126 = vst [vmem:[%s4082_s29 + $0x80] sm:$0xff] (%p4988_p6), %v4125_v46 }
 0x2ad   : > { %v3904_v15 = vadd.f32 %v3810_v8, %v3619_v52  ;;  %v3760_v13 = vrot.slane %v3759_v43, 2  ;;  %v3690_v7 = vrot.slane %v3689_v28, 1  ;;  %v4029_v33 = vsel %vm3985_vm6, %v4028_v53, %v4027_v3 }
 0x2ae   : > { %v3919_v8 = vadd.f32 %v3823_v29, %v3754_v14  ;;  %v4042_v0 = vrot.slane %v3911_v22, 2  ;;  %v4048_v36 = vrot.slane %v6527_v45, 6  ;;  %v4037_v55 = vsel %vm3976_vm3, %v4036_v32, %v6489_v17 }
 0x2af   : > { %v4030_v38 = vrot.slane %v3904_v15, 1  ;;  %v3761_v56 = vadd.f32 %v3760_v13, %v3759_v43  ;;  %v3691_v6 = vadd.f32 %v3690_v7, %v3689_v28  ;;  %v4052_v1 = vrot.slane %v3917_v48, 4 }
 0x2b0   : > { %v4039_v40 = vsel %vm3979_vm4, %v4038_v41, %v4037_v55  ;;  %v4054_v42 = vrot.slane %v3918_v58, 3  ;;  %v4049_v45 = vsel %vm3973_vm2, %v4048_v36, %v6553_v61  ;;  %v4056_v9 = vrot.slane %v3919_v8, 2 }
 0x2b1   : > { %v4031_v19 = vsel %vm3988_vm7, %v4030_v38, %v4029_v33  ;;  %v3762_v35 = vrot.slane %v3761_v56, 1  ;;  %v3912_v29 = vadd.f32 %v3817_v21, %v3691_v6  ;;  %v4041_v5 = vsel %vm3982_vm5, %v4040_v20, %v4039_v40 }
 0x2b2   : > { %4069 = vst.msk [vmem:[%s6026_s6 + $0x18] sm:$0xff] %vm1240_vm0, %v4031_v19  ;;  %v4051_v17 = vsel %vm3976_vm3, %v4050_v51, %v4049_v45  ;;  %v4043_v32 = vsel %vm3985_vm6, %v4042_v0, %v4041_v5 }
 0x2b3   : > { %v3763_v11 = vadd.f32 %v3762_v35, %v3761_v56  ;;  %v4044_v18 = vrot.slane %v3912_v29, 1  ;;  %v4053_v21 = vsel %vm3979_vm4, %v4052_v1, %v4051_v17 }
 0x2b4   : > { %v4055_v34 = vsel %vm3982_vm5, %v4054_v42, %v4053_v21 }
 0x2b5   : > { %v3920_v54 = vadd.f32 %v3824_v23, %v3763_v11  ;;  %v4045_v10 = vsel %vm3988_vm7, %v4044_v18, %v4043_v32  ;;  %v4057_v4 = vsel %vm3985_vm6, %v4056_v9, %v4055_v34  ;;  %v4123_v23 = vld [vmem:[%s6026_s6 + $0x8] sm:$0xff] (%p4988_p6) }
 0x2b6   : > { %4070 = vst.msk [vmem:[%s6026_s6 + $0x20] sm:$0xff] %vm1240_vm0, %v4045_v10  ;;  %4078 = sbr.rel (!%p4988_p6) target bundleno = 707 (0x2c3), region = 123  ;;  %4124 = vst [vmem:[%s4082_s29 + $0x40] sm:$0xff] (%p4988_p6), %v4123_v23 }
 0x2b7   : > { %v4058_v61 = vrot.slane %v3920_v54, 1 }
 0x2b9   : > { %v4059_v60 = vsel %vm3988_vm7, %v4058_v61, %v4057_v4  ;;  %v4127_v44 = vld [vmem:[%s6026_s6 + $0x18] sm:$0xff] (%p4988_p6) }
 0x2ba   : > { %4071 = vst.msk [vmem:[%s6026_s6 + $0x28] sm:$0xff] %vm1240_vm0, %v4059_v60  ;;  %4128 = vst [vmem:[%s4082_s29 + $0xc0] sm:$0xff] (%p4988_p6), %v4127_v44 }
 0x2bd   : > { %v4129_v37 = vld [vmem:[%s6026_s6 + $0x20] sm:$0xff] }
 0x2be   : > { %4130 = vst [vmem:[%s4082_s29 + $0x100] sm:$0xff] %v4129_v37 }
 0x2c1   : > { %v4131_v16 = vld [vmem:[%s6026_s6 + $0x28] sm:$0xff] }
 0x2c2   : > { %4132 = vst [vmem:[%s4082_s29 + $0x140] sm:$0xff] %v4131_v16 }
 0x2c3 PF: > { %s14_s21 = sadd.s32 1, %s4840_s21   ;;  %s6761_s15 = smov %s4820_s16 }
 0x2c4   : > { %p11_p13 = scmp.ge.s32.totalorder %s14_s21, 18   ;;  %s6762_s16 = smov %s4996_s5 }
 0x2c5   : > { %s6763_s17 = smov %s4832_s19  ;;  %s6764_s18 = smov %s4836_s20 }
 0x2c6   : > { %s6765_s19 = smov %s6768_s22  ;;  %s6766_s20 = smov %s6772_s23 }
 0x2c7   :  { %13 = sbr.rel (!%p11_p13) target bundleno = 4 (0x4), region = 213 }

</bundles_post_ra>
